<compile_context>
chip_gen: v7x
topology: tpu7x:2x2x1
jax: 0.10.0
libtpu: 0.0.40
codegen_flags: <defaults>
</compile_context>

<pallas_src>
import jax
import jax.numpy as jnp
from jax.experimental import pallas as pl
from jax.experimental.pallas import tpu as pltpu

# ---- static geometry (input is CIFAR 3x32x32, required by fc1 = Linear(16*5*5, 120)) ----
PITCH = 32                 # lane pitch of one image row (constant through all stages)
LX = 1152                  # padded input lanes: 32*32 pixels + 128 zero pad for shifts
L1 = 28 * PITCH            # conv1 output lanes: 28 rows * 32 pitch = 896
LM1 = L1 - 33              # pooled-1 carrier lanes = 863
L2 = 596                   # conv2 accumulator lanes (covers last anchor 64*9 + 2*9 = 594)
LN2 = L2 - 66              # pooled-2 carrier lanes = 530


# --------------------------------- fused Pallas kernel ---------------------------------- #

def _simplenet_kernel(x_ref, w1_ref, b1_ref, w2_ref, b2_ref, sel_ref,
                      wf1_ref, bf1_ref, wf2_ref, bf2_ref, wf3_ref, bf3_ref,
                      out_ref):
    f32 = jnp.float32
    x = x_ref[...]                                              # (3, LX), q = 32*y + x

    # ---------------- conv1 (3->6, 5x5) + bias + relu (kn2row) ----------------
    y1 = jnp.dot(w1_ref[...], x, preferred_element_type=f32)    # (150, LX)
    acc1 = jnp.zeros((6, L1), f32)
    for ki in range(5):
        for kj in range(5):
            blk = (ki * 5 + kj) * 6
            off = ki * PITCH + kj
            acc1 = acc1 + y1[blk:blk + 6, off:off + L1]
    acc1 = jnp.maximum(acc1 + b1_ref[...], 0.0)                 # valid at x < 28

    # ---------------- maxpool1 2x2 ----------------
    m1 = jnp.maximum(acc1[:, :L1 - 32], acc1[:, 32:L1])         # rows y / y+1
    m2 = jnp.maximum(m1[:, :L1 - 33], m1[:, 1:L1 - 32])         # cols x / x+1   (6, 863)
    # pooled1[c, v, u] sits at lane 64*v + 2*u of m2.

    # ---------------- conv2 (6->16, 5x5) + bias + relu (kn2row, stretched grid) -------
    y2 = jnp.dot(w2_ref[...], m2, preferred_element_type=f32)   # (400, 863)
    acc2 = jnp.zeros((16, L2), f32)
    for ki in range(5):
        for kj in range(5):
            blk = (ki * 5 + kj) * 16
            off = 64 * ki + 2 * kj
            acc2 = acc2 + y2[blk:blk + 16, off:off + L2]
    acc2 = jnp.maximum(acc2 + b2_ref[...], 0.0)                 # anchors 64*y2 + 2*x2

    # ---------------- maxpool2 2x2 ----------------
    n1 = jnp.maximum(acc2[:, :L2 - 64], acc2[:, 64:L2])
    n2 = jnp.maximum(n1[:, :L2 - 66], n1[:, 2:L2 - 64])         # (16, 530)
    # pooled2[c, v, u] sits at lane 128*v + 4*u of n2.

    # -------- flatten (torch view(-1, 400)) via constant 0/1 selection matmul --------
    flat_c = jnp.dot(n2, sel_ref[...], preferred_element_type=f32)   # (16, 25)

    # -------- fc1 + relu: contraction over (c, 25) as 16 row-block matmuls --------
    wf1 = wf1_ref[...]
    h = bf1_ref[...]                                            # (1, 128)
    for c in range(16):
        h = h + jnp.dot(flat_c[c:c + 1, :], wf1[25 * c:25 * c + 25, :],
                        preferred_element_type=f32)
    h = jnp.maximum(h, 0.0)

    # ---------------- fc2 + relu, fc3 ----------------
    h = jnp.maximum(jnp.dot(h, wf2_ref[...], preferred_element_type=f32)
                    + bf2_ref[...], 0.0)
    out_ref[...] = (jnp.dot(h, wf3_ref[...], preferred_element_type=f32)
                    + bf3_ref[...])


# ------------------------------------- wrapper ------------------------------------------ #

def simplenet_forward(x_nchw, params):
    B = x_nchw.shape[0]
    x_flat = x_nchw.reshape(B, 3, 32 * 32)                      # free row-major view
    x_pad = jnp.pad(x_flat, ((0, 0), (0, 0), (0, LX - 32 * 32)))

    weights = (params["w1m"], params["b1c"], params["w2m"], params["b2c"],
               params["sel"], params["wf1"], params["bf1"], params["wf2"],
               params["bf2"], params["wf3"], params["bf3"])
    w_specs = [pl.BlockSpec(w.shape, lambda b: (0, 0)) for w in weights]

    out = pl.pallas_call(
        _simplenet_kernel,
        out_shape=jax.ShapeDtypeStruct((B, 1, 10), jnp.float32),
        grid=(B,),
        in_specs=[pl.BlockSpec((None, 3, LX), lambda b: (b, 0, 0))] + w_specs,
        out_specs=pl.BlockSpec((None, 1, 10), lambda b: (b, 0, 0)),
        compiler_params=pltpu.CompilerParams(
            dimension_semantics=("parallel",)),
    )(x_pad, *weights)
    return out.reshape(B, 10)


# --------------------------------- parameter setup -------------------------------------- #

def init_params(key):
    """Deterministic synthetic parameters matching the nn.Module (torch-style uniform)."""
    ks = jax.random.split(key, 10)

    def u(k, shape, fan_in):
        bound = 1.0 / jnp.sqrt(jnp.float32(fan_in))
        return jax.random.uniform(k, shape, jnp.float32, -bound, bound)

    w1 = u(ks[0], (6, 3, 5, 5), 3 * 25)      # conv1.weight
    b1 = u(ks[1], (6,), 3 * 25)              # conv1.bias
    w2 = u(ks[2], (16, 6, 5, 5), 6 * 25)     # conv2.weight
    b2 = u(ks[3], (16,), 6 * 25)             # conv2.bias
    fw1 = u(ks[4], (120, 400), 400)          # fc1.weight
    fb1 = u(ks[5], (120,), 400)
    fw2 = u(ks[6], (84, 120), 120)           # fc2.weight
    fb2 = u(ks[7], (84,), 120)
    fw3 = u(ks[8], (10, 84), 84)             # fc3.weight
    fb3 = u(ks[9], (10,), 84)

    # TODO(synk): B1..B5 nn.Parameters exist in the torch module but are unused in forward().

    # kn2row conv weights: rows ordered (ki, kj, oc), column = input channel.
    w1m = jnp.transpose(w1, (2, 3, 0, 1)).reshape(150, 3)
    w2m = jnp.transpose(w2, (2, 3, 0, 1)).reshape(400, 6)

    # Selection matrix folding the torch flatten: picks lane 128*v + 4*u -> column 5*v + u.
    vv, uu = jnp.meshgrid(jnp.arange(5), jnp.arange(5), indexing="ij")
    rows = (128 * vv + 4 * uu).reshape(-1)
    cols = (5 * vv + uu).reshape(-1)
    sel = jnp.zeros((LN2, 25), jnp.float32).at[rows, cols].set(1.0)

    # MLP weights stored transposed, output dims zero-padded to 128 lanes.
    wf1 = jnp.zeros((400, 128), jnp.float32).at[:, :120].set(fw1.T)
    bf1 = jnp.zeros((1, 128), jnp.float32).at[0, :120].set(fb1)
    wf2 = jnp.zeros((128, 128), jnp.float32).at[:120, :84].set(fw2.T)
    bf2 = jnp.zeros((1, 128), jnp.float32).at[0, :84].set(fb2)
    wf3 = jnp.zeros((128, 10), jnp.float32).at[:84, :].set(fw3.T)
    bf3 = fb3.reshape(1, 10)

    params = {
        "w1m": w1m, "b1c": b1.reshape(6, 1),
        "w2m": w2m, "b2c": b2.reshape(16, 1),
        "sel": sel,
        "wf1": wf1, "bf1": bf1, "wf2": wf2, "bf2": bf2, "wf3": wf3, "bf3": bf3,
    }
    raw = (w1, b1, w2, b2, fw1, fb1, fw2, fb2, fw3, fb3)
    return params, raw


# ------------------------------- pure-JAX reference (no Pallas) ------------------------- #

def _reference_forward(x, raw):
    w1, b1, w2, b2, fw1, fb1, fw2, fb2, fw3, fb3 = raw
    hp = jax.lax.Precision.HIGHEST

    def conv(z, w, b):
        y = jax.lax.conv_general_dilated(z, w, (1, 1), "VALID",
                                         dimension_numbers=("NCHW", "OIHW", "NCHW"),
                                         precision=hp)
        return y + b[None, :, None, None]

    def pool(z):
        return jax.lax.reduce_window(z, -jnp.inf, jax.lax.max,
                                     (1, 1, 2, 2), (1, 1, 2, 2), "VALID")

    y = pool(jax.nn.relu(conv(x, w1, b1)))
    y = pool(jax.nn.relu(conv(y, w2, b2)))
    y = y.reshape(y.shape[0], -1)
    y = jax.nn.relu(jnp.dot(y, fw1.T, precision=hp) + fb1)
    y = jax.nn.relu(jnp.dot(y, fw2.T, precision=hp) + fb2)
    return jnp.dot(y, fw3.T, precision=hp) + fb3


if __name__ == "__main__":
    key = jax.random.PRNGKey(0)
    kx, kp = jax.random.split(key)
    # CIFAR-shaped input (3x32x32 is required by fc1 = Linear(16*5*5, 120)); batch=2.
    x = jax.random.normal(kx, (2, 3, 32, 32), jnp.float32)
    params, raw = init_params(kp)

    out = jax.jit(simplenet_forward)(x, params)
    out = jax.block_until_ready(out)
    assert out.shape == (2, 10) and out.dtype == jnp.float32

    ref = _reference_forward(x, raw)
    assert bool(jnp.allclose(out, ref, rtol=5e-2, atol=5e-2)), (
        "max abs diff vs reference: %f" % float(jnp.max(jnp.abs(out - ref))))

    print("KERNEL_OK")
</pallas_src>

<mosaic_0001>
module attributes {stable_mosaic.version = 11 : i64} {
  func.func @_simplenet_kernel(%arg0: i32, %arg1: memref<1x3x1152xf32, #tpu.memory_space<vmem>>, %arg2: memref<150x3xf32, #tpu.memory_space<vmem>>, %arg3: memref<6x1xf32, #tpu.memory_space<vmem>>, %arg4: memref<400x6xf32, #tpu.memory_space<vmem>>, %arg5: memref<16x1xf32, #tpu.memory_space<vmem>>, %arg6: memref<530x25xf32, #tpu.memory_space<vmem>>, %arg7: memref<400x128xf32, #tpu.memory_space<vmem>>, %arg8: memref<1x128xf32, #tpu.memory_space<vmem>>, %arg9: memref<128x128xf32, #tpu.memory_space<vmem>>, %arg10: memref<1x128xf32, #tpu.memory_space<vmem>>, %arg11: memref<128x10xf32, #tpu.memory_space<vmem>>, %arg12: memref<1x10xf32, #tpu.memory_space<vmem>>, %arg13: memref<1x1x10xf32, #tpu.memory_space<vmem>>) attributes {dimension_semantics = [#tpu.dimension_semantics<parallel>], iteration_bounds = array<i64: 2>, scalar_prefetch = 0 : i64, scratch_operands = 0 : i64, tpu.core_type = #tpu.core_type<tc>, window_params = [{transform_indices = @transform_0, window_bounds = array<i64: 1, 3, 1152>}, {pipeline_mode = #tpu.pipeline_mode<synchronous>, transform_indices = @transform_1, window_bounds = array<i64: 150, 3>}, {pipeline_mode = #tpu.pipeline_mode<synchronous>, transform_indices = @transform_2, window_bounds = array<i64: 6, 1>}, {pipeline_mode = #tpu.pipeline_mode<synchronous>, transform_indices = @transform_3, window_bounds = array<i64: 400, 6>}, {pipeline_mode = #tpu.pipeline_mode<synchronous>, transform_indices = @transform_4, window_bounds = array<i64: 16, 1>}, {pipeline_mode = #tpu.pipeline_mode<synchronous>, transform_indices = @transform_5, window_bounds = array<i64: 530, 25>}, {pipeline_mode = #tpu.pipeline_mode<synchronous>, transform_indices = @transform_6, window_bounds = array<i64: 400, 128>}, {pipeline_mode = #tpu.pipeline_mode<synchronous>, transform_indices = @transform_7, window_bounds = array<i64: 1, 128>}, {pipeline_mode = #tpu.pipeline_mode<synchronous>, transform_indices = @transform_8, window_bounds = array<i64: 128, 128>}, {pipeline_mode = #tpu.pipeline_mode<synchronous>, transform_indices = @transform_9, window_bounds = array<i64: 1, 128>}, {pipeline_mode = #tpu.pipeline_mode<synchronous>, transform_indices = @transform_10, window_bounds = array<i64: 128, 10>}, {pipeline_mode = #tpu.pipeline_mode<synchronous>, transform_indices = @transform_11, window_bounds = array<i64: 1, 10>}, {transform_indices = @transform_12, window_bounds = array<i64: 1, 1, 10>}]} {
    %c0 = arith.constant 0 : index
    %c0_0 = arith.constant 0 : index
    %c0_1 = arith.constant 0 : index
    %0 = vector.load %arg1[%c0, %c0_0, %c0_1] : memref<1x3x1152xf32, #tpu.memory_space<vmem>>, vector<1x3x1152xf32>
    %1 = vector.shape_cast %0 : vector<1x3x1152xf32> to vector<3x1152xf32>
    %c0_2 = arith.constant 0 : index
    %c0_3 = arith.constant 0 : index
    %2 = vector.load %arg2[%c0_2, %c0_3] : memref<150x3xf32, #tpu.memory_space<vmem>>, vector<150x3xf32>
    %cst = arith.constant dense<0.000000e+00> : vector<150x1152xf32>
    %3 = tpu.matmul %2, %1, %cst {dimension_numbers = #tpu.dot_dimension_numbers<[1], [0], [0], [1], [0, 0, 1, 1], [], []>} : vector<150x3xf32>, vector<3x1152xf32>, vector<150x1152xf32> -> vector<150x1152xf32>
    %cst_4 = arith.constant 0.000000e+00 : f32
    %4 = vector.broadcast %cst_4 : f32 to vector<6x896xf32>
    %5 = vector.extract_strided_slice %3 {offsets = [0, 0], sizes = [6, 896], strides = [1, 1]} : vector<150x1152xf32> to vector<6x896xf32>
    %6 = arith.addf %4, %5 : vector<6x896xf32>
    %7 = vector.extract_strided_slice %3 {offsets = [6, 1], sizes = [6, 896], strides = [1, 1]} : vector<150x1152xf32> to vector<6x896xf32>
    %8 = arith.addf %6, %7 : vector<6x896xf32>
    %9 = vector.extract_strided_slice %3 {offsets = [12, 2], sizes = [6, 896], strides = [1, 1]} : vector<150x1152xf32> to vector<6x896xf32>
    %10 = arith.addf %8, %9 : vector<6x896xf32>
    %11 = vector.extract_strided_slice %3 {offsets = [18, 3], sizes = [6, 896], strides = [1, 1]} : vector<150x1152xf32> to vector<6x896xf32>
    %12 = arith.addf %10, %11 : vector<6x896xf32>
    %13 = vector.extract_strided_slice %3 {offsets = [24, 4], sizes = [6, 896], strides = [1, 1]} : vector<150x1152xf32> to vector<6x896xf32>
    %14 = arith.addf %12, %13 : vector<6x896xf32>
    %15 = vector.extract_strided_slice %3 {offsets = [30, 32], sizes = [6, 896], strides = [1, 1]} : vector<150x1152xf32> to vector<6x896xf32>
    %16 = arith.addf %14, %15 : vector<6x896xf32>
    %17 = vector.extract_strided_slice %3 {offsets = [36, 33], sizes = [6, 896], strides = [1, 1]} : vector<150x1152xf32> to vector<6x896xf32>
    %18 = arith.addf %16, %17 : vector<6x896xf32>
    %19 = vector.extract_strided_slice %3 {offsets = [42, 34], sizes = [6, 896], strides = [1, 1]} : vector<150x1152xf32> to vector<6x896xf32>
    %20 = arith.addf %18, %19 : vector<6x896xf32>
    %21 = vector.extract_strided_slice %3 {offsets = [48, 35], sizes = [6, 896], strides = [1, 1]} : vector<150x1152xf32> to vector<6x896xf32>
    %22 = arith.addf %20, %21 : vector<6x896xf32>
    %23 = vector.extract_strided_slice %3 {offsets = [54, 36], sizes = [6, 896], strides = [1, 1]} : vector<150x1152xf32> to vector<6x896xf32>
    %24 = arith.addf %22, %23 : vector<6x896xf32>
    %25 = vector.extract_strided_slice %3 {offsets = [60, 64], sizes = [6, 896], strides = [1, 1]} : vector<150x1152xf32> to vector<6x896xf32>
    %26 = arith.addf %24, %25 : vector<6x896xf32>
    %27 = vector.extract_strided_slice %3 {offsets = [66, 65], sizes = [6, 896], strides = [1, 1]} : vector<150x1152xf32> to vector<6x896xf32>
    %28 = arith.addf %26, %27 : vector<6x896xf32>
    %29 = vector.extract_strided_slice %3 {offsets = [72, 66], sizes = [6, 896], strides = [1, 1]} : vector<150x1152xf32> to vector<6x896xf32>
    %30 = arith.addf %28, %29 : vector<6x896xf32>
    %31 = vector.extract_strided_slice %3 {offsets = [78, 67], sizes = [6, 896], strides = [1, 1]} : vector<150x1152xf32> to vector<6x896xf32>
    %32 = arith.addf %30, %31 : vector<6x896xf32>
    %33 = vector.extract_strided_slice %3 {offsets = [84, 68], sizes = [6, 896], strides = [1, 1]} : vector<150x1152xf32> to vector<6x896xf32>
    %34 = arith.addf %32, %33 : vector<6x896xf32>
    %35 = vector.extract_strided_slice %3 {offsets = [90, 96], sizes = [6, 896], strides = [1, 1]} : vector<150x1152xf32> to vector<6x896xf32>
    %36 = arith.addf %34, %35 : vector<6x896xf32>
    %37 = vector.extract_strided_slice %3 {offsets = [96, 97], sizes = [6, 896], strides = [1, 1]} : vector<150x1152xf32> to vector<6x896xf32>
    %38 = arith.addf %36, %37 : vector<6x896xf32>
    %39 = vector.extract_strided_slice %3 {offsets = [102, 98], sizes = [6, 896], strides = [1, 1]} : vector<150x1152xf32> to vector<6x896xf32>
    %40 = arith.addf %38, %39 : vector<6x896xf32>
    %41 = vector.extract_strided_slice %3 {offsets = [108, 99], sizes = [6, 896], strides = [1, 1]} : vector<150x1152xf32> to vector<6x896xf32>
    %42 = arith.addf %40, %41 : vector<6x896xf32>
    %43 = vector.extract_strided_slice %3 {offsets = [114, 100], sizes = [6, 896], strides = [1, 1]} : vector<150x1152xf32> to vector<6x896xf32>
    %44 = arith.addf %42, %43 : vector<6x896xf32>
    %45 = vector.extract_strided_slice %3 {offsets = [120, 128], sizes = [6, 896], strides = [1, 1]} : vector<150x1152xf32> to vector<6x896xf32>
    %46 = arith.addf %44, %45 : vector<6x896xf32>
    %47 = vector.extract_strided_slice %3 {offsets = [126, 129], sizes = [6, 896], strides = [1, 1]} : vector<150x1152xf32> to vector<6x896xf32>
    %48 = arith.addf %46, %47 : vector<6x896xf32>
    %49 = vector.extract_strided_slice %3 {offsets = [132, 130], sizes = [6, 896], strides = [1, 1]} : vector<150x1152xf32> to vector<6x896xf32>
    %50 = arith.addf %48, %49 : vector<6x896xf32>
    %51 = vector.extract_strided_slice %3 {offsets = [138, 131], sizes = [6, 896], strides = [1, 1]} : vector<150x1152xf32> to vector<6x896xf32>
    %52 = arith.addf %50, %51 : vector<6x896xf32>
    %53 = vector.extract_strided_slice %3 {offsets = [144, 132], sizes = [6, 896], strides = [1, 1]} : vector<150x1152xf32> to vector<6x896xf32>
    %54 = arith.addf %52, %53 : vector<6x896xf32>
    %c0_5 = arith.constant 0 : index
    %c0_6 = arith.constant 0 : index
    %55 = vector.load %arg3[%c0_5, %c0_6] : memref<6x1xf32, #tpu.memory_space<vmem>>, vector<6x1xf32>
    %56 = vector.broadcast %55 : vector<6x1xf32> to vector<6x896xf32>
    %57 = arith.addf %54, %56 : vector<6x896xf32>
    %cst_7 = arith.constant 0.000000e+00 : f32
    %58 = vector.broadcast %cst_7 : f32 to vector<6x896xf32>
    %59 = arith.maximumf %57, %58 : vector<6x896xf32>
    %60 = vector.extract_strided_slice %59 {offsets = [0, 0], sizes = [6, 864], strides = [1, 1]} : vector<6x896xf32> to vector<6x864xf32>
    %61 = vector.extract_strided_slice %59 {offsets = [0, 32], sizes = [6, 864], strides = [1, 1]} : vector<6x896xf32> to vector<6x864xf32>
    %62 = arith.maximumf %60, %61 : vector<6x864xf32>
    %63 = vector.extract_strided_slice %62 {offsets = [0, 0], sizes = [6, 863], strides = [1, 1]} : vector<6x864xf32> to vector<6x863xf32>
    %64 = vector.extract_strided_slice %62 {offsets = [0, 1], sizes = [6, 863], strides = [1, 1]} : vector<6x864xf32> to vector<6x863xf32>
    %65 = arith.maximumf %63, %64 : vector<6x863xf32>
    %c0_8 = arith.constant 0 : index
    %c0_9 = arith.constant 0 : index
    %66 = vector.load %arg4[%c0_8, %c0_9] : memref<400x6xf32, #tpu.memory_space<vmem>>, vector<400x6xf32>
    %cst_10 = arith.constant dense<0.000000e+00> : vector<400x863xf32>
    %67 = tpu.matmul %66, %65, %cst_10 {dimension_numbers = #tpu.dot_dimension_numbers<[1], [0], [0], [1], [0, 0, 1, 1], [], []>} : vector<400x6xf32>, vector<6x863xf32>, vector<400x863xf32> -> vector<400x863xf32>
    %cst_11 = arith.constant 0.000000e+00 : f32
    %68 = vector.broadcast %cst_11 : f32 to vector<16x596xf32>
    %69 = vector.extract_strided_slice %67 {offsets = [0, 0], sizes = [16, 596], strides = [1, 1]} : vector<400x863xf32> to vector<16x596xf32>
    %70 = arith.addf %68, %69 : vector<16x596xf32>
    %71 = vector.extract_strided_slice %67 {offsets = [16, 2], sizes = [16, 596], strides = [1, 1]} : vector<400x863xf32> to vector<16x596xf32>
    %72 = arith.addf %70, %71 : vector<16x596xf32>
    %73 = vector.extract_strided_slice %67 {offsets = [32, 4], sizes = [16, 596], strides = [1, 1]} : vector<400x863xf32> to vector<16x596xf32>
    %74 = arith.addf %72, %73 : vector<16x596xf32>
    %75 = vector.extract_strided_slice %67 {offsets = [48, 6], sizes = [16, 596], strides = [1, 1]} : vector<400x863xf32> to vector<16x596xf32>
    %76 = arith.addf %74, %75 : vector<16x596xf32>
    %77 = vector.extract_strided_slice %67 {offsets = [64, 8], sizes = [16, 596], strides = [1, 1]} : vector<400x863xf32> to vector<16x596xf32>
    %78 = arith.addf %76, %77 : vector<16x596xf32>
    %79 = vector.extract_strided_slice %67 {offsets = [80, 64], sizes = [16, 596], strides = [1, 1]} : vector<400x863xf32> to vector<16x596xf32>
    %80 = arith.addf %78, %79 : vector<16x596xf32>
    %81 = vector.extract_strided_slice %67 {offsets = [96, 66], sizes = [16, 596], strides = [1, 1]} : vector<400x863xf32> to vector<16x596xf32>
    %82 = arith.addf %80, %81 : vector<16x596xf32>
    %83 = vector.extract_strided_slice %67 {offsets = [112, 68], sizes = [16, 596], strides = [1, 1]} : vector<400x863xf32> to vector<16x596xf32>
    %84 = arith.addf %82, %83 : vector<16x596xf32>
    %85 = vector.extract_strided_slice %67 {offsets = [128, 70], sizes = [16, 596], strides = [1, 1]} : vector<400x863xf32> to vector<16x596xf32>
    %86 = arith.addf %84, %85 : vector<16x596xf32>
    %87 = vector.extract_strided_slice %67 {offsets = [144, 72], sizes = [16, 596], strides = [1, 1]} : vector<400x863xf32> to vector<16x596xf32>
    %88 = arith.addf %86, %87 : vector<16x596xf32>
    %89 = vector.extract_strided_slice %67 {offsets = [160, 128], sizes = [16, 596], strides = [1, 1]} : vector<400x863xf32> to vector<16x596xf32>
    %90 = arith.addf %88, %89 : vector<16x596xf32>
    %91 = vector.extract_strided_slice %67 {offsets = [176, 130], sizes = [16, 596], strides = [1, 1]} : vector<400x863xf32> to vector<16x596xf32>
    %92 = arith.addf %90, %91 : vector<16x596xf32>
    %93 = vector.extract_strided_slice %67 {offsets = [192, 132], sizes = [16, 596], strides = [1, 1]} : vector<400x863xf32> to vector<16x596xf32>
    %94 = arith.addf %92, %93 : vector<16x596xf32>
    %95 = vector.extract_strided_slice %67 {offsets = [208, 134], sizes = [16, 596], strides = [1, 1]} : vector<400x863xf32> to vector<16x596xf32>
    %96 = arith.addf %94, %95 : vector<16x596xf32>
    %97 = vector.extract_strided_slice %67 {offsets = [224, 136], sizes = [16, 596], strides = [1, 1]} : vector<400x863xf32> to vector<16x596xf32>
    %98 = arith.addf %96, %97 : vector<16x596xf32>
    %99 = vector.extract_strided_slice %67 {offsets = [240, 192], sizes = [16, 596], strides = [1, 1]} : vector<400x863xf32> to vector<16x596xf32>
    %100 = arith.addf %98, %99 : vector<16x596xf32>
    %101 = vector.extract_strided_slice %67 {offsets = [256, 194], sizes = [16, 596], strides = [1, 1]} : vector<400x863xf32> to vector<16x596xf32>
    %102 = arith.addf %100, %101 : vector<16x596xf32>
    %103 = vector.extract_strided_slice %67 {offsets = [272, 196], sizes = [16, 596], strides = [1, 1]} : vector<400x863xf32> to vector<16x596xf32>
    %104 = arith.addf %102, %103 : vector<16x596xf32>
    %105 = vector.extract_strided_slice %67 {offsets = [288, 198], sizes = [16, 596], strides = [1, 1]} : vector<400x863xf32> to vector<16x596xf32>
    %106 = arith.addf %104, %105 : vector<16x596xf32>
    %107 = vector.extract_strided_slice %67 {offsets = [304, 200], sizes = [16, 596], strides = [1, 1]} : vector<400x863xf32> to vector<16x596xf32>
    %108 = arith.addf %106, %107 : vector<16x596xf32>
    %109 = vector.extract_strided_slice %67 {offsets = [320, 256], sizes = [16, 596], strides = [1, 1]} : vector<400x863xf32> to vector<16x596xf32>
    %110 = arith.addf %108, %109 : vector<16x596xf32>
    %111 = vector.extract_strided_slice %67 {offsets = [336, 258], sizes = [16, 596], strides = [1, 1]} : vector<400x863xf32> to vector<16x596xf32>
    %112 = arith.addf %110, %111 : vector<16x596xf32>
    %113 = vector.extract_strided_slice %67 {offsets = [352, 260], sizes = [16, 596], strides = [1, 1]} : vector<400x863xf32> to vector<16x596xf32>
    %114 = arith.addf %112, %113 : vector<16x596xf32>
    %115 = vector.extract_strided_slice %67 {offsets = [368, 262], sizes = [16, 596], strides = [1, 1]} : vector<400x863xf32> to vector<16x596xf32>
    %116 = arith.addf %114, %115 : vector<16x596xf32>
    %117 = vector.extract_strided_slice %67 {offsets = [384, 264], sizes = [16, 596], strides = [1, 1]} : vector<400x863xf32> to vector<16x596xf32>
    %118 = arith.addf %116, %117 : vector<16x596xf32>
    %c0_12 = arith.constant 0 : index
    %c0_13 = arith.constant 0 : index
    %119 = vector.load %arg5[%c0_12, %c0_13] : memref<16x1xf32, #tpu.memory_space<vmem>>, vector<16x1xf32>
    %120 = vector.broadcast %119 : vector<16x1xf32> to vector<16x596xf32>
    %121 = arith.addf %118, %120 : vector<16x596xf32>
    %cst_14 = arith.constant 0.000000e+00 : f32
    %122 = vector.broadcast %cst_14 : f32 to vector<16x596xf32>
    %123 = arith.maximumf %121, %122 : vector<16x596xf32>
    %124 = vector.extract_strided_slice %123 {offsets = [0, 0], sizes = [16, 532], strides = [1, 1]} : vector<16x596xf32> to vector<16x532xf32>
    %125 = vector.extract_strided_slice %123 {offsets = [0, 64], sizes = [16, 532], strides = [1, 1]} : vector<16x596xf32> to vector<16x532xf32>
    %126 = arith.maximumf %124, %125 : vector<16x532xf32>
    %127 = vector.extract_strided_slice %126 {offsets = [0, 0], sizes = [16, 530], strides = [1, 1]} : vector<16x532xf32> to vector<16x530xf32>
    %128 = vector.extract_strided_slice %126 {offsets = [0, 2], sizes = [16, 530], strides = [1, 1]} : vector<16x532xf32> to vector<16x530xf32>
    %129 = arith.maximumf %127, %128 : vector<16x530xf32>
    %c0_15 = arith.constant 0 : index
    %c0_16 = arith.constant 0 : index
    %130 = vector.load %arg6[%c0_15, %c0_16] : memref<530x25xf32, #tpu.memory_space<vmem>>, vector<530x25xf32>
    %cst_17 = arith.constant dense<0.000000e+00> : vector<16x25xf32>
    %131 = tpu.matmul %129, %130, %cst_17 {dimension_numbers = #tpu.dot_dimension_numbers<[1], [0], [0], [1], [0, 0, 1, 1], [], []>} : vector<16x530xf32>, vector<530x25xf32>, vector<16x25xf32> -> vector<16x25xf32>
    %c0_18 = arith.constant 0 : index
    %c0_19 = arith.constant 0 : index
    %132 = vector.load %arg7[%c0_18, %c0_19] : memref<400x128xf32, #tpu.memory_space<vmem>>, vector<400x128xf32>
    %c0_20 = arith.constant 0 : index
    %c0_21 = arith.constant 0 : index
    %133 = vector.load %arg8[%c0_20, %c0_21] : memref<1x128xf32, #tpu.memory_space<vmem>>, vector<1x128xf32>
    %134 = vector.extract_strided_slice %131 {offsets = [0, 0], sizes = [1, 25], strides = [1, 1]} : vector<16x25xf32> to vector<1x25xf32>
    %135 = vector.extract_strided_slice %132 {offsets = [0, 0], sizes = [25, 128], strides = [1, 1]} : vector<400x128xf32> to vector<25x128xf32>
    %cst_22 = arith.constant dense<0.000000e+00> : vector<1x128xf32>
    %136 = tpu.matmul %134, %135, %cst_22 {dimension_numbers = #tpu.dot_dimension_numbers<[1], [0], [0], [1], [0, 0, 1, 1], [], []>} : vector<1x25xf32>, vector<25x128xf32>, vector<1x128xf32> -> vector<1x128xf32>
    %137 = arith.addf %133, %136 : vector<1x128xf32>
    %138 = vector.extract_strided_slice %131 {offsets = [1, 0], sizes = [1, 25], strides = [1, 1]} : vector<16x25xf32> to vector<1x25xf32>
    %139 = vector.extract_strided_slice %132 {offsets = [25, 0], sizes = [25, 128], strides = [1, 1]} : vector<400x128xf32> to vector<25x128xf32>
    %cst_23 = arith.constant dense<0.000000e+00> : vector<1x128xf32>
    %140 = tpu.matmul %138, %139, %cst_23 {dimension_numbers = #tpu.dot_dimension_numbers<[1], [0], [0], [1], [0, 0, 1, 1], [], []>} : vector<1x25xf32>, vector<25x128xf32>, vector<1x128xf32> -> vector<1x128xf32>
    %141 = arith.addf %137, %140 : vector<1x128xf32>
    %142 = vector.extract_strided_slice %131 {offsets = [2, 0], sizes = [1, 25], strides = [1, 1]} : vector<16x25xf32> to vector<1x25xf32>
    %143 = vector.extract_strided_slice %132 {offsets = [50, 0], sizes = [25, 128], strides = [1, 1]} : vector<400x128xf32> to vector<25x128xf32>
    %cst_24 = arith.constant dense<0.000000e+00> : vector<1x128xf32>
    %144 = tpu.matmul %142, %143, %cst_24 {dimension_numbers = #tpu.dot_dimension_numbers<[1], [0], [0], [1], [0, 0, 1, 1], [], []>} : vector<1x25xf32>, vector<25x128xf32>, vector<1x128xf32> -> vector<1x128xf32>
    %145 = arith.addf %141, %144 : vector<1x128xf32>
    %146 = vector.extract_strided_slice %131 {offsets = [3, 0], sizes = [1, 25], strides = [1, 1]} : vector<16x25xf32> to vector<1x25xf32>
    %147 = vector.extract_strided_slice %132 {offsets = [75, 0], sizes = [25, 128], strides = [1, 1]} : vector<400x128xf32> to vector<25x128xf32>
    %cst_25 = arith.constant dense<0.000000e+00> : vector<1x128xf32>
    %148 = tpu.matmul %146, %147, %cst_25 {dimension_numbers = #tpu.dot_dimension_numbers<[1], [0], [0], [1], [0, 0, 1, 1], [], []>} : vector<1x25xf32>, vector<25x128xf32>, vector<1x128xf32> -> vector<1x128xf32>
    %149 = arith.addf %145, %148 : vector<1x128xf32>
    %150 = vector.extract_strided_slice %131 {offsets = [4, 0], sizes = [1, 25], strides = [1, 1]} : vector<16x25xf32> to vector<1x25xf32>
    %151 = vector.extract_strided_slice %132 {offsets = [100, 0], sizes = [25, 128], strides = [1, 1]} : vector<400x128xf32> to vector<25x128xf32>
    %cst_26 = arith.constant dense<0.000000e+00> : vector<1x128xf32>
    %152 = tpu.matmul %150, %151, %cst_26 {dimension_numbers = #tpu.dot_dimension_numbers<[1], [0], [0], [1], [0, 0, 1, 1], [], []>} : vector<1x25xf32>, vector<25x128xf32>, vector<1x128xf32> -> vector<1x128xf32>
    %153 = arith.addf %149, %152 : vector<1x128xf32>
    %154 = vector.extract_strided_slice %131 {offsets = [5, 0], sizes = [1, 25], strides = [1, 1]} : vector<16x25xf32> to vector<1x25xf32>
    %155 = vector.extract_strided_slice %132 {offsets = [125, 0], sizes = [25, 128], strides = [1, 1]} : vector<400x128xf32> to vector<25x128xf32>
    %cst_27 = arith.constant dense<0.000000e+00> : vector<1x128xf32>
    %156 = tpu.matmul %154, %155, %cst_27 {dimension_numbers = #tpu.dot_dimension_numbers<[1], [0], [0], [1], [0, 0, 1, 1], [], []>} : vector<1x25xf32>, vector<25x128xf32>, vector<1x128xf32> -> vector<1x128xf32>
    %157 = arith.addf %153, %156 : vector<1x128xf32>
    %158 = vector.extract_strided_slice %131 {offsets = [6, 0], sizes = [1, 25], strides = [1, 1]} : vector<16x25xf32> to vector<1x25xf32>
    %159 = vector.extract_strided_slice %132 {offsets = [150, 0], sizes = [25, 128], strides = [1, 1]} : vector<400x128xf32> to vector<25x128xf32>
    %cst_28 = arith.constant dense<0.000000e+00> : vector<1x128xf32>
    %160 = tpu.matmul %158, %159, %cst_28 {dimension_numbers = #tpu.dot_dimension_numbers<[1], [0], [0], [1], [0, 0, 1, 1], [], []>} : vector<1x25xf32>, vector<25x128xf32>, vector<1x128xf32> -> vector<1x128xf32>
    %161 = arith.addf %157, %160 : vector<1x128xf32>
    %162 = vector.extract_strided_slice %131 {offsets = [7, 0], sizes = [1, 25], strides = [1, 1]} : vector<16x25xf32> to vector<1x25xf32>
    %163 = vector.extract_strided_slice %132 {offsets = [175, 0], sizes = [25, 128], strides = [1, 1]} : vector<400x128xf32> to vector<25x128xf32>
    %cst_29 = arith.constant dense<0.000000e+00> : vector<1x128xf32>
    %164 = tpu.matmul %162, %163, %cst_29 {dimension_numbers = #tpu.dot_dimension_numbers<[1], [0], [0], [1], [0, 0, 1, 1], [], []>} : vector<1x25xf32>, vector<25x128xf32>, vector<1x128xf32> -> vector<1x128xf32>
    %165 = arith.addf %161, %164 : vector<1x128xf32>
    %166 = vector.extract_strided_slice %131 {offsets = [8, 0], sizes = [1, 25], strides = [1, 1]} : vector<16x25xf32> to vector<1x25xf32>
    %167 = vector.extract_strided_slice %132 {offsets = [200, 0], sizes = [25, 128], strides = [1, 1]} : vector<400x128xf32> to vector<25x128xf32>
    %cst_30 = arith.constant dense<0.000000e+00> : vector<1x128xf32>
    %168 = tpu.matmul %166, %167, %cst_30 {dimension_numbers = #tpu.dot_dimension_numbers<[1], [0], [0], [1], [0, 0, 1, 1], [], []>} : vector<1x25xf32>, vector<25x128xf32>, vector<1x128xf32> -> vector<1x128xf32>
    %169 = arith.addf %165, %168 : vector<1x128xf32>
    %170 = vector.extract_strided_slice %131 {offsets = [9, 0], sizes = [1, 25], strides = [1, 1]} : vector<16x25xf32> to vector<1x25xf32>
    %171 = vector.extract_strided_slice %132 {offsets = [225, 0], sizes = [25, 128], strides = [1, 1]} : vector<400x128xf32> to vector<25x128xf32>
    %cst_31 = arith.constant dense<0.000000e+00> : vector<1x128xf32>
    %172 = tpu.matmul %170, %171, %cst_31 {dimension_numbers = #tpu.dot_dimension_numbers<[1], [0], [0], [1], [0, 0, 1, 1], [], []>} : vector<1x25xf32>, vector<25x128xf32>, vector<1x128xf32> -> vector<1x128xf32>
    %173 = arith.addf %169, %172 : vector<1x128xf32>
    %174 = vector.extract_strided_slice %131 {offsets = [10, 0], sizes = [1, 25], strides = [1, 1]} : vector<16x25xf32> to vector<1x25xf32>
    %175 = vector.extract_strided_slice %132 {offsets = [250, 0], sizes = [25, 128], strides = [1, 1]} : vector<400x128xf32> to vector<25x128xf32>
    %cst_32 = arith.constant dense<0.000000e+00> : vector<1x128xf32>
    %176 = tpu.matmul %174, %175, %cst_32 {dimension_numbers = #tpu.dot_dimension_numbers<[1], [0], [0], [1], [0, 0, 1, 1], [], []>} : vector<1x25xf32>, vector<25x128xf32>, vector<1x128xf32> -> vector<1x128xf32>
    %177 = arith.addf %173, %176 : vector<1x128xf32>
    %178 = vector.extract_strided_slice %131 {offsets = [11, 0], sizes = [1, 25], strides = [1, 1]} : vector<16x25xf32> to vector<1x25xf32>
    %179 = vector.extract_strided_slice %132 {offsets = [275, 0], sizes = [25, 128], strides = [1, 1]} : vector<400x128xf32> to vector<25x128xf32>
    %cst_33 = arith.constant dense<0.000000e+00> : vector<1x128xf32>
    %180 = tpu.matmul %178, %179, %cst_33 {dimension_numbers = #tpu.dot_dimension_numbers<[1], [0], [0], [1], [0, 0, 1, 1], [], []>} : vector<1x25xf32>, vector<25x128xf32>, vector<1x128xf32> -> vector<1x128xf32>
    %181 = arith.addf %177, %180 : vector<1x128xf32>
    %182 = vector.extract_strided_slice %131 {offsets = [12, 0], sizes = [1, 25], strides = [1, 1]} : vector<16x25xf32> to vector<1x25xf32>
    %183 = vector.extract_strided_slice %132 {offsets = [300, 0], sizes = [25, 128], strides = [1, 1]} : vector<400x128xf32> to vector<25x128xf32>
    %cst_34 = arith.constant dense<0.000000e+00> : vector<1x128xf32>
    %184 = tpu.matmul %182, %183, %cst_34 {dimension_numbers = #tpu.dot_dimension_numbers<[1], [0], [0], [1], [0, 0, 1, 1], [], []>} : vector<1x25xf32>, vector<25x128xf32>, vector<1x128xf32> -> vector<1x128xf32>
    %185 = arith.addf %181, %184 : vector<1x128xf32>
    %186 = vector.extract_strided_slice %131 {offsets = [13, 0], sizes = [1, 25], strides = [1, 1]} : vector<16x25xf32> to vector<1x25xf32>
    %187 = vector.extract_strided_slice %132 {offsets = [325, 0], sizes = [25, 128], strides = [1, 1]} : vector<400x128xf32> to vector<25x128xf32>
    %cst_35 = arith.constant dense<0.000000e+00> : vector<1x128xf32>
    %188 = tpu.matmul %186, %187, %cst_35 {dimension_numbers = #tpu.dot_dimension_numbers<[1], [0], [0], [1], [0, 0, 1, 1], [], []>} : vector<1x25xf32>, vector<25x128xf32>, vector<1x128xf32> -> vector<1x128xf32>
    %189 = arith.addf %185, %188 : vector<1x128xf32>
    %190 = vector.extract_strided_slice %131 {offsets = [14, 0], sizes = [1, 25], strides = [1, 1]} : vector<16x25xf32> to vector<1x25xf32>
    %191 = vector.extract_strided_slice %132 {offsets = [350, 0], sizes = [25, 128], strides = [1, 1]} : vector<400x128xf32> to vector<25x128xf32>
    %cst_36 = arith.constant dense<0.000000e+00> : vector<1x128xf32>
    %192 = tpu.matmul %190, %191, %cst_36 {dimension_numbers = #tpu.dot_dimension_numbers<[1], [0], [0], [1], [0, 0, 1, 1], [], []>} : vector<1x25xf32>, vector<25x128xf32>, vector<1x128xf32> -> vector<1x128xf32>
    %193 = arith.addf %189, %192 : vector<1x128xf32>
    %194 = vector.extract_strided_slice %131 {offsets = [15, 0], sizes = [1, 25], strides = [1, 1]} : vector<16x25xf32> to vector<1x25xf32>
    %195 = vector.extract_strided_slice %132 {offsets = [375, 0], sizes = [25, 128], strides = [1, 1]} : vector<400x128xf32> to vector<25x128xf32>
    %cst_37 = arith.constant dense<0.000000e+00> : vector<1x128xf32>
    %196 = tpu.matmul %194, %195, %cst_37 {dimension_numbers = #tpu.dot_dimension_numbers<[1], [0], [0], [1], [0, 0, 1, 1], [], []>} : vector<1x25xf32>, vector<25x128xf32>, vector<1x128xf32> -> vector<1x128xf32>
    %197 = arith.addf %193, %196 : vector<1x128xf32>
    %cst_38 = arith.constant 0.000000e+00 : f32
    %198 = vector.broadcast %cst_38 : f32 to vector<1x128xf32>
    %199 = arith.maximumf %197, %198 : vector<1x128xf32>
    %c0_39 = arith.constant 0 : index
    %c0_40 = arith.constant 0 : index
    %200 = vector.load %arg9[%c0_39, %c0_40] : memref<128x128xf32, #tpu.memory_space<vmem>>, vector<128x128xf32>
    %cst_41 = arith.constant dense<0.000000e+00> : vector<1x128xf32>
    %201 = tpu.matmul %199, %200, %cst_41 {dimension_numbers = #tpu.dot_dimension_numbers<[1], [0], [0], [1], [0, 0, 1, 1], [], []>} : vector<1x128xf32>, vector<128x128xf32>, vector<1x128xf32> -> vector<1x128xf32>
    %c0_42 = arith.constant 0 : index
    %c0_43 = arith.constant 0 : index
    %202 = vector.load %arg10[%c0_42, %c0_43] : memref<1x128xf32, #tpu.memory_space<vmem>>, vector<1x128xf32>
    %203 = arith.addf %201, %202 : vector<1x128xf32>
    %cst_44 = arith.constant 0.000000e+00 : f32
    %204 = vector.broadcast %cst_44 : f32 to vector<1x128xf32>
    %205 = arith.maximumf %203, %204 : vector<1x128xf32>
    %c0_45 = arith.constant 0 : index
    %c0_46 = arith.constant 0 : index
    %206 = vector.load %arg11[%c0_45, %c0_46] : memref<128x10xf32, #tpu.memory_space<vmem>>, vector<128x10xf32>
    %cst_47 = arith.constant dense<0.000000e+00> : vector<1x10xf32>
    %207 = tpu.matmul %205, %206, %cst_47 {dimension_numbers = #tpu.dot_dimension_numbers<[1], [0], [0], [1], [0, 0, 1, 1], [], []>} : vector<1x128xf32>, vector<128x10xf32>, vector<1x10xf32> -> vector<1x10xf32>
    %c0_48 = arith.constant 0 : index
    %c0_49 = arith.constant 0 : index
    %208 = vector.load %arg12[%c0_48, %c0_49] : memref<1x10xf32, #tpu.memory_space<vmem>>, vector<1x10xf32>
    %209 = arith.addf %207, %208 : vector<1x10xf32>
    %c0_50 = arith.constant 0 : index
    %c0_51 = arith.constant 0 : index
    %c0_52 = arith.constant 0 : index
    %210 = vector.load %arg13[%c0_50, %c0_51, %c0_52] : memref<1x1x10xf32, #tpu.memory_space<vmem>>, vector<1x1x10xf32>
    %211 = vector.shape_cast %210 : vector<1x1x10xf32> to vector<1x10xf32>
    %212 = vector.shape_cast %209 : vector<1x10xf32> to vector<1x1x10xf32>
    tpu.vector_store %arg13[%c0_50, %c0_51, %c0_52], %212 {strides = array<i32>} : memref<1x1x10xf32, #tpu.memory_space<vmem>>, vector<1x1x10xf32>,
    return
  }
  func.func @transform_0(%arg0: i32) -> (i32, i32, i32) {
    %c0_i32 = arith.constant 0 : i32
    %c0_i32_0 = arith.constant 0 : i32
    %c0_i32_1 = arith.constant 0 : i32
    return %arg0, %c0_i32, %c0_i32_0 : i32, i32, i32
  }
  func.func @transform_1(%arg0: i32) -> (i32, i32) {
    %c0_i32 = arith.constant 0 : i32
    %c0_i32_0 = arith.constant 0 : i32
    %c0_i32_1 = arith.constant 0 : i32
    return %c0_i32, %c0_i32_0 : i32, i32
  }
  func.func @transform_2(%arg0: i32) -> (i32, i32) {
    %c0_i32 = arith.constant 0 : i32
    %c0_i32_0 = arith.constant 0 : i32
    %c0_i32_1 = arith.constant 0 : i32
    return %c0_i32, %c0_i32_0 : i32, i32
  }
  func.func @transform_3(%arg0: i32) -> (i32, i32) {
    %c0_i32 = arith.constant 0 : i32
    %c0_i32_0 = arith.constant 0 : i32
    %c0_i32_1 = arith.constant 0 : i32
    return %c0_i32, %c0_i32_0 : i32, i32
  }
  func.func @transform_4(%arg0: i32) -> (i32, i32) {
    %c0_i32 = arith.constant 0 : i32
    %c0_i32_0 = arith.constant 0 : i32
    %c0_i32_1 = arith.constant 0 : i32
    return %c0_i32, %c0_i32_0 : i32, i32
  }
  func.func @transform_5(%arg0: i32) -> (i32, i32) {
    %c0_i32 = arith.constant 0 : i32
    %c0_i32_0 = arith.constant 0 : i32
    %c0_i32_1 = arith.constant 0 : i32
    return %c0_i32, %c0_i32_0 : i32, i32
  }
  func.func @transform_6(%arg0: i32) -> (i32, i32) {
    %c0_i32 = arith.constant 0 : i32
    %c0_i32_0 = arith.constant 0 : i32
    %c0_i32_1 = arith.constant 0 : i32
    return %c0_i32, %c0_i32_0 : i32, i32
  }
  func.func @transform_7(%arg0: i32) -> (i32, i32) {
    %c0_i32 = arith.constant 0 : i32
    %c0_i32_0 = arith.constant 0 : i32
    %c0_i32_1 = arith.constant 0 : i32
    return %c0_i32, %c0_i32_0 : i32, i32
  }
  func.func @transform_8(%arg0: i32) -> (i32, i32) {
    %c0_i32 = arith.constant 0 : i32
    %c0_i32_0 = arith.constant 0 : i32
    %c0_i32_1 = arith.constant 0 : i32
    return %c0_i32, %c0_i32_0 : i32, i32
  }
  func.func @transform_9(%arg0: i32) -> (i32, i32) {
    %c0_i32 = arith.constant 0 : i32
    %c0_i32_0 = arith.constant 0 : i32
    %c0_i32_1 = arith.constant 0 : i32
    return %c0_i32, %c0_i32_0 : i32, i32
  }
  func.func @transform_10(%arg0: i32) -> (i32, i32) {
    %c0_i32 = arith.constant 0 : i32
    %c0_i32_0 = arith.constant 0 : i32
    %c0_i32_1 = arith.constant 0 : i32
    return %c0_i32, %c0_i32_0 : i32, i32
  }
  func.func @transform_11(%arg0: i32) -> (i32, i32) {
    %c0_i32 = arith.constant 0 : i32
    %c0_i32_0 = arith.constant 0 : i32
    %c0_i32_1 = arith.constant 0 : i32
    return %c0_i32, %c0_i32_0 : i32, i32
  }
  func.func @transform_12(%arg0: i32) -> (i32, i32, i32) {
    %c0_i32 = arith.constant 0 : i32
    %c0_i32_0 = arith.constant 0 : i32
    %c0_i32_1 = arith.constant 0 : i32
    return %arg0, %c0_i32, %c0_i32_0 : i32, i32, i32
  }
}

</mosaic_0001>

<bundles_post_ra>
// kernel: simplenet_forward.1
= control target key start
LH: loop header
LB: loop body
LE: loop exit
PB: predicated region body
PF: predicated region fallthrough
CT: control target
= control target key end

     0   :  { %s15208_s0 = inlined_call_operand.vmem [shape: f32[2,3,1152], index: 0, kind: input, shape index: {}]   ;;  %s15209_s1 = inlined_call_operand.vmem [shape: f32[150,3], index: 1, kind: input, shape index: {}]   ;;  %s15210_s2 = inlined_call_operand.vmem [shape: f32[6,1], index: 2, kind: input, shape index: {}]   ;;  %s15211_s3 = inlined_call_operand.vmem [shape: f32[400,6], index: 3, kind: input, shape index: {}]   ;;  %s15212_s4 = inlined_call_operand.vmem [shape: f32[16,1], index: 4, kind: input, shape index: {}]   ;;  %s15213_s5 = inlined_call_operand.vmem [shape: f32[530,25], index: 5, kind: input, shape index: {}]   ;;  %s15214_s6 = inlined_call_operand.vmem [shape: f32[400,128], index: 6, kind: input, shape index: {}]   ;;  %s15215_s7 = inlined_call_operand.vmem [shape: f32[1,128], index: 7, kind: input, shape index: {}]   ;;  %s15216_s8 = inlined_call_operand.vmem [shape: f32[128,128], index: 8, kind: input, shape index: {}]   ;;  %s15217_s9 = inlined_call_operand.vmem [shape: f32[1,128], index: 9, kind: input, shape index: {}]   ;;  %s15218_s10 = inlined_call_operand.vmem [shape: f32[128,10], index: 10, kind: input, shape index: {}]   ;;  %s15219_s11 = inlined_call_operand.vmem [shape: f32[1,10], index: 11, kind: input, shape index: {}]   ;;  %s15220_s12 = inlined_call_operand.hbm [shape: f32[2,1,10], index: 12, kind: output, shape index: {}]  }
   0x1   :  { %15392 = sst [smem:[#allocation95_spill]] %s15208_s0 }
   0x2   :  { %15393 = sst [smem:[#allocation96_spill]] %s15210_s2 }
   0x3   :  { %15394 = sst [smem:[#allocation97_spill]] %s15217_s9 }
   0x4   :  { %15395 = sst [smem:[#allocation98_spill]] %s15219_s11 }
   0x5   :  { %15396 = sst [smem:[#allocation99_spill]] %s15220_s12 }
   0x6   :  { %17 = vsyncpa [#allocation3], 0 }
   0x7   :  { %19 = vsyncpa [#allocation3 + $0x1], 0  ;;  %s9522_s21 = smov 0   ;;  %s9524_s22 = smov 0  }
   0x8   :  { %s9526_s23 = smov 0   ;;  %s9528_s24 = smov 0  }
   0x9 LB: > { %15397 = sst [smem:[#allocation5_spill]] %s9414_s21  ;;  %s9543_s25 = sadd.s32 4294967295, %s9426_s24   ;;  %s9426_s24 = sphi %s9528_s24, %s16048_s24   ;;  %s9422_s23 = sphi %s9526_s23, %s16050_s23   ;;  %s9418_s22 = sphi %s9524_s22, %s16052_s22   ;;  %s9414_s21 = sphi %s9522_s21, %s16051_s21  }
   0xa   : > { %15398 = sst [smem:[#allocation6_spill]] %s9422_s23  ;;  %s7948_s26 = sadd.s32 4294967294, %s9426_s24  }
   0xb   : > { %15399 = sst [smem:[#allocation7_spill]] %s9426_s24  ;;  %s9547_s27 = sadd.s32 1, %s9426_s24  }
   0xc   : > { %15400 = sst [smem:[#allocation8_spill]] %s9547_s27  ;;  %s289_s28 = sadd.s32 1, %s9422_s23 }
   0xd   : > { %s286_s29 = ssub.s32 %s9426_s24, %s9547_s27  ;;  %p299_p0 = scmp.ne.s32.totalorder %s9422_s23, %s9418_s22 }
   0xe   : > { %p287_p1 = scmp.eq.s32.totalorder %s286_s29, 0  ;;  %p300_p2 = scmp.eq.s32.totalorder %s9543_s25, 1 }
   0xf   : > { %p305_p3 = scmp.ne.s32.totalorder %s9418_s22, %s9414_s21  ;;  %p306_p4 = scmp.eq.s32.totalorder %s7948_s26, 1 }
  0x10   : > { %s9558_s30 = scalar_select %p287_p1, %s9422_s23, %s289_s28  }
  0x11   : > { %p9560_p5 = por %p300_p2, %p299_p0  ;;  %p9564_p6 = por %p306_p4, %p305_p3 }
  0x12   : > { %15401 = sst [smem:[#allocation9_spill]] %s9558_s30  ;;  %p7951_p7 = scmp.ge.s32.totalorder %s9426_s24, 1 }
  0x13   : > { %s15402_s13 = scalar_select %p9560_p5, 1, 0 }
  0x14   : > { %s15404_s14 = scalar_select %p9564_p6, 1, 0 }
  0x15   : > { %15403 = sst [smem:[#allocation10_spill]] %s15402_s13  ;;  %p365_p8 = scmp.lt.s32.totalorder %s9426_s24, 3 }
  0x16   : > { %15405 = sst [smem:[#allocation11_spill]] %s15404_s14 }
  0x17   : > { %p366_p9 = pnand %p7951_p7, %p365_p8 }
  0x19   : > { %369 = sbr.rel (%p366_p9) target bundleno = 3044 (0xbe4), region = 68 }
  0x20   : > { %p406_p10 = scmp.lt.s32.totalorder %s9543_s25, 1  ;;  %v15231_v0 = vmov 0.0   ;;  %v9429_v1 = vmov 0   ;;  %s15406_s0 = sld [smem:[#allocation95_spill]]  ;;  %vm15309_vm0 = vcmask 1042432   ;;  %v9588_v7 = vld [vmem:[%s15209_s1] sm:$0xff] }
  0x21   : > { %585 = vmatprep.mubr.f32.mxu0 %v15231_v0  ;;  %663 = vmatprep.mubr.f32.mxu1 %v15231_v0  ;;  %s15407_s2 = sld [smem:[#allocation96_spill]]  ;;  %vm444_vm1 = vcmask 23552   ;;  %v9593_v8 = vld [vmem:[%s15209_s1 + $0x68] sm:$0xff]  ;;  %v9614_v13 = vld [vmem:[%s15209_s1 + $0x70] sm:$0xff]  ;;  %v9634_v16 = vld [vmem:[%s15209_s1 + $0x78] sm:$0xff]  ;;  %vm15326_vm2 = vcmask 1043456  }
  0x22   : > { %s407_s15 = scalar_select %p406_p10, %s9543_s25, 1  ;;  %9288 = vset.pattern.permute.xlu0 %v9429_v1  ;;  %v9609_v12 = vld [vmem:[%s15209_s1 + $0x8] sm:$0xff]  ;;  %v9628_v15 = vld [vmem:[%s15209_s1 + $0x10] sm:$0xff]  ;;  %v9646_v17 = vld [vmem:[%s15209_s1 + $0x18] sm:$0xff]  ;;  %vm15327_vm3 = vcmask 1041408   ;;  %vm15310_vm4 = vmmov 0  }
  0x23   : > { %v9652_v18 = vld [vmem:[%s15209_s1 + $0x80] sm:$0xff]  ;;  %v9668_v20 = vld [vmem:[%s15209_s1 + $0x88] sm:$0xff]  ;;  %v9684_v22 = vld [vmem:[%s15209_s1 + $0x90] sm:$0x3f]  ;;  %s15221_s20 = smov 28   ;;  %s15223_s26 = smov 29  }
  0x24   : > { %s9220_s16 = smul.u32 36, %s407_s15  ;;  %v9662_v19 = vld [vmem:[%s15209_s1 + $0x20] sm:$0xff]  ;;  %v9678_v21 = vld [vmem:[%s15209_s1 + $0x28] sm:$0xff]  ;;  %v9694_v23 = vld [vmem:[%s15209_s1 + $0x30] sm:$0xff]  ;;  %s15227_s28 = smov 127   ;;  %vm1442_vm5 = vcmask 1039360  }
  0x25   : > { %v9705_v24 = vld [vmem:[%s15209_s1 + $0x38] sm:$0xff]  ;;  %v9717_v25 = vld [vmem:[%s15209_s1 + $0x40] sm:$0xff]  ;;  %v9728_v26 = vld [vmem:[%s15209_s1 + $0x48] sm:$0xff]  ;;  %s15245_s29 = smov 126   ;;  %s15240_s15 = smov 125   ;;  %vm1513_vm6 = vcmask 1031168  }
  0x26   : > { %s9577_s19 = scalar_lea.vmem %s15406_s0, %s9220_s16  ;;  %v9739_v27 = vld [vmem:[%s15209_s1 + $0x50] sm:$0xff]  ;;  %v9750_v28 = vld [vmem:[%s15209_s1 + $0x58] sm:$0xff]  ;;  %v9761_v29 = vld [vmem:[%s15209_s1 + $0x60] sm:$0xff]  ;;  %s15260_s16 = smov 124   ;;  %vm1559_vm7 = vcmask 1022976   ;;  %vm1605_vm8 = vcmask 1014784  }
  0x27   : > { %v2752_v2 = vld [vmem:[%s15407_s2] sm:$0x3f]  ;;  %v412_v4 = vld [vmem:[%s9577_s19 + $0x8] sm:$0x77]  ;;  %v413_v5 = vld [vmem:[%s9577_s19 + $0x10] sm:$0x77] }
  0x28   : > { %v411_v3 = vld [vmem:[%s9577_s19] sm:$0x77]  ;;  %2755 = vperm.xlu0 %9288, %v2752_v2   ;;  %v441_v9 = vcombine.high %v412_v4, %v412_v4  ;;  %v442_v10 = vcombine.high %v413_v5, %v413_v5  ;;  %v414_v11 = vld [vmem:[%s9577_s19 + $0x18] sm:$0x77]  ;;  %s15253_s17 = smov 96   ;;  %s15267_s18 = smov 94  }
  0x29   : > { %v440_v6 = vcombine.high %v411_v3, %v411_v3  ;;  %v443_v14 = vcombine.high %v414_v11, %v414_v11  ;;  %s15479_s0 = smov 60   ;;  %s15483_s2 = smov 32   ;;  %vm1675_vm9 = vcmask 785408   ;;  %vm1745_vm10 = vcmask 777216  }
  0x2a   : > { %s15485_s30 = smov 31   ;;  %s15486_s23 = smov 96   ;;  %vm1791_vm11 = vcmask 769024   ;;  %vm1837_vm12 = vcmask 760832   ;;  %vm15329_vm13 = vcmask 752640   ;;  %vm15328_vm14 = vcmask 523264  }
  0x2b   : > { %7953 = vmatprep.subr.msk.mxu0 %vm15309_vm0, %v440_v6  ;;  %9187 = vmatprep.subr.msk.mxu1 %vm15309_vm0, %v440_v6  ;;  %s15488_s27 = smov 93   ;;  %s15490_s14 = smov 30   ;;  %vm15315_vm15 = vcmask 515072  }
  0x2c   : > { %7954 = vmatpush1.msk.msra.mxu0 %vm15309_vm0, %v411_v3  ;;  %9188 = vmatpush1.msk.msra.mxu1 %vm15309_vm0, %v411_v3  ;;  %s15491_s21 = smov 94   ;;  %s15497_s24 = smov 64  }
  0x2d   : > { %7955 = vmatmul.mubr.msk.f32.vlgmr.msra.gmra.mrb[0].mxu0 %vm444_vm1, %v9588_v7  ;;  %7968 = vmatmul.mubr.msk.f32.vlgmr.msra.gmra.mrb[0].mxu1 %vm444_vm1, %v9593_v8  ;;  %s15500_s13 = smov 62   ;;  %s15504_s9 = smov 63  }
  0x2e   : > { %591 = vmatprep.mubr.f32.mxu0 %v15231_v0  ;;  %669 = vmatprep.mubr.f32.mxu1 %v15231_v0  ;;  %s16042_s12 = sld [smem:[#allocation98_spill]] }
  0x2f   : > { %7974 = vmatprep.subr.msk.mxu1 %vm15309_vm0, %v441_v9  ;;  %7995 = vmatprep.subr.msk.mxu0 %vm15309_vm0, %v442_v10 }
  0x30   : > { %7975 = vmatpush1.msk.msra.mxu1 %vm15309_vm0, %v412_v4  ;;  %7996 = vmatpush1.msk.msra.mxu0 %vm15309_vm0, %v413_v5 }
  0x31   : > { %7956 = vmatmul.mubr.msk.f32.gmra.mrb[2].mxu0 %vm444_vm1, %v9609_v12  ;;  %7969 = vmatmul.mubr.msk.f32.gmra.mrb[2].mxu1 %vm444_vm1, %v9614_v13 }
  0x32   : > { %597 = vmatprep.mubr.f32.mxu0 %v15231_v0  ;;  %675 = vmatprep.mubr.f32.mxu1 %v15231_v0 }
  0x33   : > { %8016 = vmatprep.subr.msk.mxu1 %vm15309_vm0, %v443_v14  ;;  %8568 = vmatprep.subr.mxu0 %v15231_v0 }
  0x35   : > { %7957 = vmatmul.mubr.msk.f32.gmra.mrb[4].mxu0 %vm444_vm1, %v9628_v15  ;;  %7970 = vmatmul.mubr.msk.f32.gmra.mrb[4].mxu1 %vm444_vm1, %v9634_v16 }
  0x36   : > { %603 = vmatprep.mubr.f32.mxu0 %v15231_v0  ;;  %680 = vmatprep.mubr.f32.mxu1 %v15231_v0 }
  0x39   : > { %7958 = vmatmul.mubr.msk.f32.gmra.mrb[6].mxu0 %vm444_vm1, %v9646_v17  ;;  %7971 = vmatmul.mubr.msk.f32.gmra.mrb[6].mxu1 %vm444_vm1, %v9652_v18 }
  0x3a   : > { %609 = vmatprep.mubr.f32.mxu0 %v15231_v0  ;;  %685 = vmatprep.mubr.f32.mxu1 %v15231_v0 }
  0x3d   : > { %7959 = vmatmul.mubr.msk.f32.gmra.mrb[8].mxu0 %vm444_vm1, %v9662_v19  ;;  %7972 = vmatmul.mubr.msk.f32.gmra.mrb[8].mxu1 %vm444_vm1, %v9668_v20 }
  0x3e   : > { %615 = vmatprep.mubr.f32.mxu0 %v15231_v0  ;;  %690 = vmatprep.mubr.f32.mxu1 %v15231_v0 }
  0x41   : > { %7960 = vmatmul.mubr.msk.f32.gmra.mrb[10].mxu0 %vm444_vm1, %v9678_v21  ;;  %7973 = vmatmul.mubr.msk.f32.gmra.mrb[10].mxu1 %vm444_vm1, %v9684_v22 }
  0x42   : > { %621 = vmatprep.mubr.f32.mxu0 %v15231_v0  ;;  %760 = vmatprep.mubr.f32.mxu1 %v15231_v0 }
  0x45   : > { %7961 = vmatmul.mubr.msk.f32.gmra.mrb[12].mxu0 %vm444_vm1, %v9694_v23  ;;  %7976 = vmatmul.mubr.msk.f32.vlgmr.msra.gmra.mrb[12].mxu1 %vm444_vm1, %v9588_v7 }
  0x46   : > { %627 = vmatprep.mubr.f32.mxu0 %v15231_v0  ;;  %766 = vmatprep.mubr.f32.mxu1 %v15231_v0 }
  0x47   : > { %8017 = vmatpush1.msk.msra.mxu1 %vm15309_vm0, %v414_v11 }
  0x49   : > { %7962 = vmatmul.mubr.msk.f32.gmra.mrb[14].mxu0 %vm444_vm1, %v9705_v24  ;;  %7977 = vmatmul.mubr.msk.f32.gmra.mrb[14].mxu1 %vm444_vm1, %v9609_v12 }
  0x4a   : > { %633 = vmatprep.mubr.f32.mxu0 %v15231_v0  ;;  %772 = vmatprep.mubr.f32.mxu1 %v15231_v0 }
  0x4d   : > { %7963 = vmatmul.mubr.msk.f32.gmra.mrb[16].mxu0 %vm444_vm1, %v9717_v25  ;;  %7978 = vmatmul.mubr.msk.f32.gmra.mrb[16].mxu1 %vm444_vm1, %v9628_v15 }
  0x4e   : > { %639 = vmatprep.mubr.f32.mxu0 %v15231_v0  ;;  %778 = vmatprep.mubr.f32.mxu1 %v15231_v0 }
  0x51   : > { %7964 = vmatmul.mubr.msk.f32.gmra.mrb[18].mxu0 %vm444_vm1, %v9728_v26  ;;  %7979 = vmatmul.mubr.msk.f32.gmra.mrb[18].mxu1 %vm444_vm1, %v9646_v17 }
  0x52   : > { %645 = vmatprep.mubr.f32.mxu0 %v15231_v0  ;;  %784 = vmatprep.mubr.f32.mxu1 %v15231_v0 }
  0x55   : > { %7965 = vmatmul.mubr.msk.f32.gmra.mrb[20].mxu0 %vm444_vm1, %v9739_v27  ;;  %7980 = vmatmul.mubr.msk.f32.gmra.mrb[20].mxu1 %vm444_vm1, %v9662_v19 }
  0x56   : > { %651 = vmatprep.mubr.f32.mxu0 %v15231_v0  ;;  %790 = vmatprep.mubr.f32.mxu1 %v15231_v0 }
  0x59   : > { %7966 = vmatmul.mubr.msk.f32.gmra.mrb[22].mxu0 %vm444_vm1, %v9750_v28  ;;  %7981 = vmatmul.mubr.msk.f32.gmra.mrb[22].mxu1 %vm444_vm1, %v9678_v21 }
  0x5a   : > { %657 = vmatprep.mubr.f32.mxu0 %v15231_v0  ;;  %796 = vmatprep.mubr.f32.mxu1 %v15231_v0 }
  0x5d   : > { %7967 = vmatmul.mubr.msk.f32.gmra.mrb[24].mxu0 %vm444_vm1, %v9761_v29  ;;  %7982 = vmatmul.mubr.msk.f32.gmra.mrb[24].mxu1 %vm444_vm1, %v9694_v23 }
  0x5e   : > { %802 = vmatprep.mubr.f32.mxu1 %v15231_v0  ;;  %939 = vmatprep.mubr.f32.mxu0 %v15231_v0 }
  0x61   : > { %7983 = vmatmul.mubr.msk.f32.gmra.mrb[26].mxu1 %vm444_vm1, %v9705_v24  ;;  %7997 = vmatmul.mubr.msk.f32.vlgmr.msra.gmra.mrb[26].mxu0 %vm444_vm1, %v9588_v7 }
  0x62   : > { %808 = vmatprep.mubr.f32.mxu1 %v15231_v0  ;;  %945 = vmatprep.mubr.f32.mxu0 %v15231_v0 }
  0x65   : > { %7984 = vmatmul.mubr.msk.f32.gmra.mrb[28].mxu1 %vm444_vm1, %v9717_v25  ;;  %7998 = vmatmul.mubr.msk.f32.gmra.mrb[28].mxu0 %vm444_vm1, %v9609_v12 }
  0x66   : > { %951 = vmatprep.mubr.f32.mxu0 %v15231_v0  ;;  %814 = vmatprep.mubr.f32.mxu1 %v15231_v0 }
  0x69   : > { %7999 = vmatmul.mubr.msk.f32.gmra.mrb[30].mxu0 %vm444_vm1, %v9628_v15  ;;  %7985 = vmatmul.mubr.msk.f32.gmra.mrb[30].mxu1 %vm444_vm1, %v9728_v26 }
  0x6a   : > { %820 = vmatprep.mubr.f32.mxu1 %v15231_v0  ;;  %957 = vmatprep.mubr.f32.mxu0 %v15231_v0 }
  0x6d   : > { %7986 = vmatmul.mubr.msk.f32.gmra.mrb[32].mxu1 %vm444_vm1, %v9739_v27  ;;  %8000 = vmatmul.mubr.msk.f32.gmra.mrb[32].mxu0 %vm444_vm1, %v9646_v17 }
  0x6e   : > { %826 = vmatprep.mubr.f32.mxu1 %v15231_v0  ;;  %963 = vmatprep.mubr.f32.mxu0 %v15231_v0 }
  0x71   : > { %7987 = vmatmul.mubr.msk.f32.gmra.mrb[34].mxu1 %vm444_vm1, %v9750_v28  ;;  %8001 = vmatmul.mubr.msk.f32.gmra.mrb[34].mxu0 %vm444_vm1, %v9662_v19 }
  0x72   : > { %969 = vmatprep.mubr.f32.mxu0 %v15231_v0  ;;  %832 = vmatprep.mubr.f32.mxu1 %v15231_v0 }
  0x75   : > { %8002 = vmatmul.mubr.msk.f32.gmra.mrb[36].mxu0 %vm444_vm1, %v9678_v21  ;;  %7988 = vmatmul.mubr.msk.f32.gmra.mrb[36].mxu1 %vm444_vm1, %v9761_v29 }
  0x76   : > { %838 = vmatprep.mubr.f32.mxu1 %v15231_v0  ;;  %975 = vmatprep.mubr.f32.mxu0 %v15231_v0 }
  0x79   : > { %7989 = vmatmul.mubr.msk.f32.gmra.mrb[38].mxu1 %vm444_vm1, %v9593_v8  ;;  %8003 = vmatmul.mubr.msk.f32.gmra.mrb[38].mxu0 %vm444_vm1, %v9694_v23 }
  0x7a   : > { %844 = vmatprep.mubr.f32.mxu1 %v15231_v0  ;;  %981 = vmatprep.mubr.f32.mxu0 %v15231_v0 }
  0x7d   : > { %7990 = vmatmul.mubr.msk.f32.gmra.mrb[40].mxu1 %vm444_vm1, %v9614_v13  ;;  %8004 = vmatmul.mubr.msk.f32.gmra.mrb[40].mxu0 %vm444_vm1, %v9705_v24 }
  0x7e   : > { %987 = vmatprep.mubr.f32.mxu0 %v15231_v0  ;;  %850 = vmatprep.mubr.f32.mxu1 %v15231_v0 }
  0x81   : > { %8005 = vmatmul.mubr.msk.f32.gmra.mrb[42].mxu0 %vm444_vm1, %v9717_v25  ;;  %7991 = vmatmul.mubr.msk.f32.gmra.mrb[42].mxu1 %vm444_vm1, %v9634_v16 }
  0x82   : > { %856 = vmatprep.mubr.f32.mxu1 %v15231_v0  ;;  %993 = vmatprep.mubr.f32.mxu0 %v15231_v0 }
  0x85   : > { %7992 = vmatmul.mubr.msk.f32.gmra.mrb[44].mxu1 %vm444_vm1, %v9652_v18  ;;  %8006 = vmatmul.mubr.msk.f32.gmra.mrb[44].mxu0 %vm444_vm1, %v9728_v26 }
  0x86   : > { %862 = vmatprep.mubr.f32.mxu1 %v15231_v0  ;;  %999 = vmatprep.mubr.f32.mxu0 %v15231_v0 }
  0x89   : > { %7993 = vmatmul.mubr.msk.f32.gmra.mrb[46].mxu1 %vm444_vm1, %v9668_v20  ;;  %8007 = vmatmul.mubr.msk.f32.gmra.mrb[46].mxu0 %vm444_vm1, %v9739_v27 }
  0x8a   : > { %1005 = vmatprep.mubr.f32.mxu0 %v15231_v0  ;;  %868 = vmatprep.mubr.f32.mxu1 %v15231_v0 }
  0x8d   : > { %8008 = vmatmul.mubr.msk.f32.gmra.mrb[48].mxu0 %vm444_vm1, %v9750_v28  ;;  %7994 = vmatmul.mubr.msk.f32.gmra.mrb[48].mxu1 %vm444_vm1, %v9684_v22 }
  0x8e   : > { %1011 = vmatprep.mubr.f32.mxu0 %v15231_v0  ;;  %1118 = vmatprep.mubr.f32.mxu1 %v15231_v0 }
  0x91   : > { %8009 = vmatmul.mubr.msk.f32.gmra.mrb[50].mxu0 %vm444_vm1, %v9761_v29  ;;  %8018 = vmatmul.mubr.msk.f32.vlgmr.msra.gmra.mrb[50].mxu1 %vm444_vm1, %v9588_v7 }
  0x92   : > { %1017 = vmatprep.mubr.f32.mxu0 %v15231_v0  ;;  %1124 = vmatprep.mubr.f32.mxu1 %v15231_v0 }
  0x95   : > { %8010 = vmatmul.mubr.msk.f32.gmra.mrb[52].mxu0 %vm444_vm1, %v9593_v8  ;;  %8019 = vmatmul.mubr.msk.f32.gmra.mrb[52].mxu1 %vm444_vm1, %v9609_v12 }
  0x96   : > { %1023 = vmatprep.mubr.f32.mxu0 %v15231_v0  ;;  %1130 = vmatprep.mubr.f32.mxu1 %v15231_v0 }
  0x99   : > { %8011 = vmatmul.mubr.msk.f32.gmra.mrb[54].mxu0 %vm444_vm1, %v9614_v13  ;;  %8020 = vmatmul.mubr.msk.f32.gmra.mrb[54].mxu1 %vm444_vm1, %v9628_v15 }
  0x9a   : > { %1029 = vmatprep.mubr.f32.mxu0 %v15231_v0  ;;  %1136 = vmatprep.mubr.f32.mxu1 %v15231_v0 }
  0x9d   : > { %8012 = vmatmul.mubr.msk.f32.gmra.mrb[56].mxu0 %vm444_vm1, %v9634_v16  ;;  %8021 = vmatmul.mubr.msk.f32.gmra.mrb[56].mxu1 %vm444_vm1, %v9646_v17 }
  0x9e   : > { %1035 = vmatprep.mubr.f32.mxu0 %v15231_v0  ;;  %1142 = vmatprep.mubr.f32.mxu1 %v15231_v0 }
  0xa1   : > { %8013 = vmatmul.mubr.msk.f32.gmra.mrb[58].mxu0 %vm444_vm1, %v9652_v18  ;;  %8022 = vmatmul.mubr.msk.f32.gmra.mrb[58].mxu1 %vm444_vm1, %v9662_v19 }
  0xa2   : > { %1041 = vmatprep.mubr.f32.mxu0 %v15231_v0  ;;  %1148 = vmatprep.mubr.f32.mxu1 %v15231_v0 }
  0xa5   : > { %8014 = vmatmul.mubr.msk.f32.gmra.mrb[60].mxu0 %vm444_vm1, %v9668_v20  ;;  %8023 = vmatmul.mubr.msk.f32.gmra.mrb[60].mxu1 %vm444_vm1, %v9678_v21 }
  0xa6   : > { %1047 = vmatprep.mubr.f32.mxu0 %v15231_v0  ;;  %1154 = vmatprep.mubr.f32.mxu1 %v15231_v0 }
  0xa9   : > { %8015 = vmatmul.mubr.msk.f32.gmra.mrb[62].mxu0 %vm444_vm1, %v9684_v22  ;;  %8024 = vmatmul.mubr.msk.f32.gmra.mrb[62].mxu1 %vm444_vm1, %v9694_v23 }
  0xaa   : > { %1160 = vmatprep.mubr.f32.mxu1 %v15231_v0 }
  0xad   : > { %8025 = vmatmul.mubr.msk.f32.gmra.mrb[64].mxu1 %vm444_vm1, %v9705_v24 }
  0xae   : > { %1166 = vmatprep.mubr.f32.mxu1 %v15231_v0 }
  0xb1   : > { %8026 = vmatmul.mubr.msk.f32.gmra.mrb[66].mxu1 %vm444_vm1, %v9717_v25 }
  0xb2   : > { %1172 = vmatprep.mubr.f32.mxu1 %v15231_v0 }
  0xb5   : > { %8027 = vmatmul.mubr.msk.f32.gmra.mrb[68].mxu1 %vm444_vm1, %v9728_v26 }
  0xb6   : > { %1178 = vmatprep.mubr.f32.mxu1 %v15231_v0 }
  0xb9   : > { %8028 = vmatmul.mubr.msk.f32.gmra.mrb[70].mxu1 %vm444_vm1, %v9739_v27 }
  0xba   : > { %1184 = vmatprep.mubr.f32.mxu1 %v15231_v0 }
  0xbd   : > { %8029 = vmatmul.mubr.msk.f32.gmra.mrb[72].mxu1 %vm444_vm1, %v9750_v28 }
  0xbe   : > { %1190 = vmatprep.mubr.f32.mxu1 %v15231_v0 }
  0xc1   : > { %8030 = vmatmul.mubr.msk.f32.gmra.mrb[74].mxu1 %vm444_vm1, %v9761_v29 }
  0xc2   : > { %1196 = vmatprep.mubr.f32.mxu1 %v15231_v0 }
  0xc5   : > { %8031 = vmatmul.mubr.msk.f32.gmra.mrb[76].mxu1 %vm444_vm1, %v9593_v8 }
  0xc6   : > { %1202 = vmatprep.mubr.f32.mxu1 %v15231_v0 }
  0xc9   : > { %8032 = vmatmul.mubr.msk.f32.gmra.mrb[78].mxu1 %vm444_vm1, %v9614_v13 }
  0xca   : > { %1208 = vmatprep.mubr.f32.mxu1 %v15231_v0 }
  0xcd   : > { %8033 = vmatmul.mubr.msk.f32.gmra.mrb[80].mxu1 %vm444_vm1, %v9634_v16 }
  0xce   : > { %1214 = vmatprep.mubr.f32.mxu1 %v15231_v0 }
  0xd1   : > { %8034 = vmatmul.mubr.msk.f32.gmra.mrb[82].mxu1 %vm444_vm1, %v9652_v18 }
  0xd2   : > { %1220 = vmatprep.mubr.f32.mxu1 %v15231_v0 }
  0xd5   : > { %8035 = vmatmul.mubr.msk.f32.gmra.mrb[84].mxu1 %vm444_vm1, %v9668_v20 }
  0xd6   : > { %1226 = vmatprep.mubr.f32.mxu1 %v15231_v0 }
  0xd9   : > { %8036 = vmatmul.mubr.msk.f32.gmra.mrb[86].mxu1 %vm444_vm1, %v9684_v22 }
  0xda   : > { %3141 = vmatprep.mubr.f32.mxu1 %v15231_v0 }
 0x100   : > { %v9919_v30 = vpop.f32.mrb[0].mxu1  ;;  %v9921_v31 = vpop.f32.mrb[0].mxu0 }
 0x101   : > { %15408 = vst [vmem:[#allocation12_spill] sm:$0xff] %v9921_v31  ;;  %v9923_v32 = vpop.f32.mrb[1].mxu1  ;;  %v9925_v33 = vpop.f32.mrb[1].mxu0  ;;  %v1402_v34 = vrot.slane %v9921_v31, 6  ;;  %v2401_v41 = vrot.slane %v9919_v30, 4 }
 0x102   : > { %15409 = vst [vmem:[#allocation13_spill] sm:$0xff] %v9925_v33  ;;  %v1405_v35 = vrot.slane %v9925_v33, 6  ;;  %v2404_v44 = vrot.slane %v9923_v32, 4 }
 0x104   : > { %v593_v36 = vpop.f32.mrb[2].mxu0  ;;  %v671_v37 = vpop.f32.mrb[2].mxu1 }
 0x105   : > { %v595_v38 = vpop.f32.mrb[3].mxu0  ;;  %v673_v39 = vpop.f32.mrb[3].mxu1  ;;  %v2463_v40 = vrot.slane %v671_v37, 2  ;;  %v2402_v42 = vrot.slane %v671_v37, 4  ;;  %v1403_v43 = vrot.slane %v593_v36, 6  ;;  %v1473_v49 = vrot.slane %v593_v36, 4 }
 0x106   : > { %v2405_v45 = vrot.slane %v673_v39, 4  ;;  %v1406_v46 = vrot.slane %v595_v38, 6  ;;  %v1476_v54 = vrot.slane %v595_v38, 4  ;;  %v2464_v1 = vrot.slane %v673_v39, 2 }
 0x107   : > { %2471 = vrot.lane.b32.xlu0 %v2463_v40, %s15221_s20  ;;  %v2403_v47 = vsel %vm15326_vm2, %v2401_v41, %v2402_v42  ;;  %v1404_v48 = vsel %vm15327_vm3, %v1402_v34, %v1403_v43 }
 0x108   : > { %2425 = vrot.lane.b32.xlu1 %v2403_v47, %s15223_s26  ;;  %v599_v50 = vpop.f32.mrb[4].mxu0  ;;  %v2406_v51 = vsel %vm15326_vm2, %v2404_v44, %v2405_v45  ;;  %v1407_v52 = vsel %vm15327_vm3, %v1405_v35, %v1406_v46  ;;  %v677_v53 = vpop.f32.mrb[4].mxu1 }
 0x109   : > { %v1474_v55 = vrot.slane %v599_v50, 4  ;;  %v601_v56 = vpop.f32.mrb[5].mxu0  ;;  %v9937_v57 = vpop.f32.mrb[5].mxu1  ;;  %v1535_v23 = vrot.slane %v599_v50, 2 }
 0x10a   : > { %15410 = vst [vmem:[#allocation14_spill] sm:$0xff] %v9937_v57  ;;  %v1477_v58 = vrot.slane %v601_v56, 4  ;;  %v2532_v62 = vrot.slane %v9937_v57, 6  ;;  %v1536_v36 = vrot.slane %v601_v56, 2 }
 0x10b   : > { %1426 = vrot.lane.b32.xlu0 %v1404_v48, %s15227_s28  ;;  %v1475_v59 = vsel %vm15326_vm2, %v1473_v49, %v1474_v55 }
 0x10c   : > { %2427 = vrot.lane.b32.xlu1 %v2406_v51, %s15223_s26  ;;  %v1478_v60 = vsel %vm15326_vm2, %v1476_v54, %v1477_v58  ;;  %v605_v61 = vpop.f32.mrb[6].mxu0  ;;  %v682_v63 = vpop.f32.mrb[6].mxu1  ;;  %s15277_s26 = smov 93  }
 0x10d   : > { %v607_v2 = vpop.f32.mrb[7].mxu0  ;;  %v683_v3 = vpop.f32.mrb[7].mxu1  ;;  %v1635_v5 = vrot.slane %v605_v61, 6 }
 0x10e   : > { %v2533_v4 = vrot.slane %v683_v3, 6  ;;  %v1638_v6 = vrot.slane %v607_v2, 6  ;;  %v2601_v8 = vrot.slane %v683_v3, 4 }
 0x10f   : > { %2473 = vrot.lane.b32.xlu0 %v2464_v1, %s15221_s20  ;;  %s15225_s20 = smov 95  }
 0x110   : > { %1497 = vrot.lane.b32.xlu1 %v1475_v59, %s15245_s29  ;;  %v611_v7 = vpop.f32.mrb[8].mxu0  ;;  %v687_v9 = vpop.f32.mrb[8].mxu1  ;;  %v2534_v10 = vsel %vm15327_vm3, %v2532_v62, %v2533_v4 }
 0x111   : > { %v1636_v11 = vrot.slane %v611_v7, 6  ;;  %v613_v12 = vpop.f32.mrb[9].mxu0  ;;  %v9947_v13 = vpop.f32.mrb[9].mxu1  ;;  %v1705_v16 = vrot.slane %v611_v7, 4 }
 0x112   : > { %v1639_v14 = vrot.slane %v613_v12, 6  ;;  %v2602_v15 = vrot.slane %v9947_v13, 4  ;;  %v1708_v18 = vrot.slane %v613_v12, 4  ;;  %v2662_v49 = vrot.slane %v9947_v13, 2 }
 0x113   : > { %1428 = vrot.lane.b32.xlu0 %v1407_v52, %s15227_s28  ;;  %v1637_v17 = vsel %vm15327_vm3, %v1635_v5, %v1636_v11 }
 0x114   : > { %1499 = vrot.lane.b32.xlu1 %v1478_v60, %s15245_s29  ;;  %v9953_v19 = vpop.f32.mrb[10].mxu0  ;;  %v1640_v20 = vsel %vm15327_vm3, %v1638_v6, %v1639_v14  ;;  %v692_v21 = vpop.f32.mrb[10].mxu1  ;;  %v9957_v22 = vsel %vm15326_vm2, %v2601_v8, %v2602_v15 }
 0x115   : > { %v1706_v24 = vrot.slane %v9953_v19, 4  ;;  %v9960_v25 = vpop.f32.mrb[11].mxu0  ;;  %v693_v26 = vpop.f32.mrb[11].mxu1  ;;  %v1767_v14 = vrot.slane %v9953_v19, 2 }
 0x116   : > { %v1709_v27 = vrot.slane %v9960_v25, 4 }
 0x117   : > { %1543 = vrot.lane.b32.xlu0 %v1535_v23, %s15240_s15  ;;  %v9965_v28 = vsel %vm15326_vm2, %v1705_v16, %v1706_v24 }
 0x118   : > { %1589 = vrot.lane.b32.xlu1 %v605_v61, %s15260_s16  ;;  %v9968_v29 = vpop.f32.mrb[12].mxu0  ;;  %v9970_v34 = vpop.f32.mrb[12].mxu1  ;;  %v9973_v35 = vsel %vm15326_vm2, %v1708_v18, %v1709_v27 }
 0x119   : > { %15411 = vst [vmem:[#allocation15_spill] sm:$0xff] %v9970_v34  ;;  %v9975_v37 = vpop.f32.mrb[13].mxu0  ;;  %v9977_v38 = vpop.f32.mrb[13].mxu1  ;;  %v1867_v39 = vrot.slane %v9968_v29, 6  ;;  %v1408_v40 = vrot.slane %v9970_v34, 6 }
 0x11a   : > { %15412 = vst [vmem:[#allocation16_spill] sm:$0xff] %v9977_v38  ;;  %v1870_v41 = vrot.slane %v9975_v37, 6  ;;  %v1411_v43 = vrot.slane %v9977_v38, 6 }
 0x11b   : > { %1545 = vrot.lane.b32.xlu0 %v1536_v36, %s15240_s15 }
 0x11c   : > { %1591 = vrot.lane.b32.xlu1 %v607_v2, %s15260_s16  ;;  %v629_v42 = vpop.f32.mrb[14].mxu0  ;;  %v768_v44 = vpop.f32.mrb[14].mxu1 }
 0x11d   : > { %v1868_v45 = vrot.slane %v629_v42, 6  ;;  %v631_v46 = vpop.f32.mrb[15].mxu0  ;;  %v1409_v47 = vrot.slane %v768_v44, 6  ;;  %v770_v48 = vpop.f32.mrb[15].mxu1  ;;  %v1937_v52 = vrot.slane %v629_v42, 4  ;;  %v1479_v53 = vrot.slane %v768_v44, 4 }
 0x11e   : > { %v1871_v50 = vrot.slane %v631_v46, 6  ;;  %v1412_v51 = vrot.slane %v770_v48, 6  ;;  %v1940_v56 = vrot.slane %v631_v46, 4  ;;  %v1482_v59 = vrot.slane %v770_v48, 4 }
 0x11f   : > { %1659 = vrot.lane.b32.xlu0 %v1637_v17, %s15253_s17  ;;  %v9988_v54 = vsel %vm15327_vm3, %v1408_v40, %v1409_v47  ;;  %v9991_v55 = vsel %vm15327_vm3, %v1867_v39, %v1868_v45  ;;  %v1768_v48 = vrot.slane %v9960_v25, 2 }
 0x120   : > { %2556 = vrot.lane.b32.xlu1 %v2534_v10, %s15227_s28  ;;  %v9994_v58 = vpop.f32.mrb[16].mxu0  ;;  %v9996_v60 = vpop.f32.mrb[16].mxu1  ;;  %v9999_v61 = vsel %vm15327_vm3, %v1870_v41, %v1871_v50  ;;  %v10002_v62 = vsel %vm15327_vm3, %v1411_v43, %v1412_v51 }
 0x121   : > { %v1938_v63 = vrot.slane %v9994_v58, 4  ;;  %v10005_v1 = vpop.f32.mrb[17].mxu0  ;;  %v1480_v2 = vrot.slane %v9996_v60, 4  ;;  %v10008_v3 = vpop.f32.mrb[17].mxu1 }
 0x122   : > { %v1941_v4 = vrot.slane %v10005_v1, 4  ;;  %v1483_v5 = vrot.slane %v10008_v3, 4 }
 0x123   : > { %1661 = vrot.lane.b32.xlu0 %v1640_v20, %s15253_s17  ;;  %v10014_v6 = vsel %vm15326_vm2, %v1479_v53, %v1480_v2  ;;  %v10017_v7 = vsel %vm15326_vm2, %v1937_v52, %v1938_v63 }
 0x124   : > { %2670 = vrot.lane.b32.xlu1 %v2662_v49, %s15240_s15  ;;  %v10020_v8 = vpop.f32.mrb[18].mxu0  ;;  %v10023_v9 = vsel %vm15326_vm2, %v1482_v59, %v1483_v5  ;;  %v10026_v10 = vsel %vm15326_vm2, %v1940_v56, %v1941_v4  ;;  %v10028_v11 = vpop.f32.mrb[18].mxu1  ;;  %v2332_v5 = vrot.slane %v9919_v30, 6 }
 0x125   : > { %v10030_v12 = vpop.f32.mrb[19].mxu0  ;;  %v10032_v13 = vpop.f32.mrb[19].mxu1  ;;  %v2099_v15 = vrot.slane %v10020_v8, 6  ;;  %v1641_v16 = vrot.slane %v10028_v11, 6 }
 0x126   : > { %v2102_v17 = vrot.slane %v10030_v12, 6  ;;  %v1644_v20 = vrot.slane %v10032_v13, 6 }
 0x127   : > { %2715 = vrot.lane.b32.xlu0 %v693_v26, %s15260_s16 }
 0x128   : > { %2625 = vrot.lane.b32.xlu1 %v9957_v22, %s15245_s29  ;;  %v647_v18 = vpop.f32.mrb[20].mxu0  ;;  %v786_v21 = vpop.f32.mrb[20].mxu1 }
 0x129   : > { %v2100_v23 = vrot.slane %v647_v18, 6  ;;  %v649_v24 = vpop.f32.mrb[21].mxu0  ;;  %v1642_v27 = vrot.slane %v786_v21, 6  ;;  %v788_v36 = vpop.f32.mrb[21].mxu1  ;;  %v2169_v26 = vrot.slane %v647_v18, 4  ;;  %v1711_v40 = vrot.slane %v786_v21, 4 }
 0x12a   : > { %v2103_v19 = vrot.slane %v649_v24, 6  ;;  %v1645_v39 = vrot.slane %v788_v36, 6  ;;  %v2172_v42 = vrot.slane %v649_v24, 4  ;;  %v1714_v44 = vrot.slane %v788_v36, 4 }
 0x12b   : > { %1775 = vrot.lane.b32.xlu0 %v1767_v14, %s15267_s18  ;;  %v10044_v41 = vsel %vm15327_vm3, %v2099_v15, %v2100_v23  ;;  %v10047_v22 = vsel %vm15327_vm3, %v1641_v16, %v1642_v27 }
 0x12c   : > { %1729 = vrot.lane.b32.xlu1 %v9965_v28, %s15225_s20  ;;  %v10051_v43 = vpop.f32.mrb[22].mxu0  ;;  %v10053_v45 = vpop.f32.mrb[22].mxu1  ;;  %v10056_v46 = vsel %vm15327_vm3, %v1644_v20, %v1645_v39  ;;  %v10059_v47 = vsel %vm15327_vm3, %v2102_v17, %v2103_v19 }
 0x12d   : > { %v2170_v49 = vrot.slane %v10051_v43, 4  ;;  %v10063_v50 = vpop.f32.mrb[23].mxu0  ;;  %v1712_v28 = vrot.slane %v10053_v45, 4  ;;  %v10066_v51 = vpop.f32.mrb[23].mxu1 }
 0x12e   : > { %v2173_v52 = vrot.slane %v10063_v50, 4  ;;  %v1715_v53 = vrot.slane %v10066_v51, 4 }
 0x12f   : > { %1777 = vrot.lane.b32.xlu0 %v1768_v48, %s15267_s18  ;;  %v10072_v56 = vsel %vm15326_vm2, %v1711_v40, %v1712_v28  ;;  %v10075_v59 = vsel %vm15326_vm2, %v2169_v26, %v2170_v49 }
 0x130   : > { %1731 = vrot.lane.b32.xlu1 %v9973_v35, %s15225_s20  ;;  %v10079_v25 = vpop.f32.mrb[24].mxu0  ;;  %v10082_v63 = vsel %vm15326_vm2, %v1714_v44, %v1715_v53  ;;  %v10085_v2 = vsel %vm15326_vm2, %v2172_v42, %v2173_v52  ;;  %v10087_v4 = vpop.f32.mrb[24].mxu1  ;;  %v2335_v35 = vrot.slane %v9923_v32, 6  ;;  %s15229_s20 = smov 92  }
 0x131   : > { %v2331_v14 = vrot.slane %v10079_v25, 6  ;;  %v10091_v15 = vpop.f32.mrb[25].mxu0  ;;  %v10093_v16 = vpop.f32.mrb[25].mxu1  ;;  %v1873_v18 = vrot.slane %v10087_v4, 6 }
 0x132   : > { %v2334_v17 = vrot.slane %v10091_v15, 6  ;;  %v1876_v30 = vrot.slane %v10093_v16, 6 }
 0x133   : > { %1430 = vrot.lane.b32.xlu0 %v9988_v54, %s15227_s28  ;;  %v10101_v20 = vsel %vm15327_vm3, %v2331_v14, %v2332_v5 }
 0x134   : > { %1821 = vrot.lane.b32.xlu1 %v9968_v29, %s15277_s26  ;;  %v804_v21 = vpop.f32.mrb[26].mxu1  ;;  %v10107_v23 = vsel %vm15327_vm3, %v2334_v17, %v2335_v35  ;;  %v10109_v32 = vpop.f32.mrb[26].mxu0 }
 0x135   : > { %15413 = vst [vmem:[#allocation17_spill] sm:$0xff] %v10109_v32  ;;  %v1874_v24 = vrot.slane %v804_v21, 6  ;;  %v806_v27 = vpop.f32.mrb[27].mxu1  ;;  %v10111_v54 = vpop.f32.mrb[27].mxu0  ;;  %v1943_v19 = vrot.slane %v804_v21, 4  ;;  %v1414_v29 = vrot.slane %v10109_v32, 6 }
 0x136   : > { %15414 = vst [vmem:[#allocation18_spill] sm:$0xff] %v10111_v54  ;;  %v1877_v36 = vrot.slane %v806_v27, 6  ;;  %v1946_v26 = vrot.slane %v806_v27, 4  ;;  %v1417_v42 = vrot.slane %v10111_v54, 6 }
 0x137   : > { %1891 = vrot.lane.b32.xlu0 %v9991_v55, %s15229_s20  ;;  %v10117_v39 = vsel %vm15327_vm3, %v1873_v18, %v1874_v24  ;;  %v1537_v18 = vrot.slane %v9996_v60, 2 }
 0x138   : > { %1823 = vrot.lane.b32.xlu1 %v9975_v37, %s15277_s26  ;;  %v10121_v40 = vpop.f32.mrb[28].mxu1  ;;  %v10125_v44 = vsel %vm15327_vm3, %v1876_v30, %v1877_v36  ;;  %v947_v48 = vpop.f32.mrb[28].mxu0  ;;  %v1999_v37 = vrot.slane %v9994_v58, 2 }
 0x139   : > { %v1944_v55 = vrot.slane %v10121_v40, 4  ;;  %v10128_v49 = vpop.f32.mrb[29].mxu1  ;;  %v1415_v28 = vrot.slane %v947_v48, 6  ;;  %v949_v52 = vpop.f32.mrb[29].mxu0  ;;  %v1485_v14 = vrot.slane %v947_v48, 4 }
 0x13a   : > { %v1947_v53 = vrot.slane %v10128_v49, 4  ;;  %v1418_v5 = vrot.slane %v949_v52, 6  ;;  %v1488_v30 = vrot.slane %v949_v52, 4 }
 0x13b   : > { %1893 = vrot.lane.b32.xlu0 %v9999_v61, %s15229_s20  ;;  %v10135_v35 = vsel %vm15326_vm2, %v1943_v19, %v1944_v55  ;;  %v10138_v17 = vsel %vm15327_vm3, %v1414_v29, %v1415_v28  ;;  %s15283_s20 = smov 64  }
 0x13c   : > { %1432 = vrot.lane.b32.xlu1 %v10002_v62, %s15227_s28  ;;  %v10143_v21 = vpop.f32.mrb[30].mxu0  ;;  %v10145_v24 = vpop.f32.mrb[30].mxu1  ;;  %v10148_v58 = vsel %vm15326_vm2, %v1946_v26, %v1947_v53  ;;  %v10151_v61 = vsel %vm15327_vm3, %v1417_v42, %v1418_v5  ;;  %s15280_s28 = smov 63  }
 0x13d   : > { %v1486_v27 = vrot.slane %v10143_v21, 4  ;;  %v10154_v36 = vpop.f32.mrb[31].mxu0  ;;  %v10156_v19 = vpop.f32.mrb[31].mxu1  ;;  %v2105_v60 = vrot.slane %v10145_v24, 6 }
 0x13e   : > { %15415 = vst [vmem:[#allocation19_spill] sm:$0xff] %v10154_v36  ;;  %v1489_v62 = vrot.slane %v10154_v36, 4  ;;  %v2108_v26 = vrot.slane %v10156_v19, 6 }
 0x13f   : > { %2007 = vrot.lane.b32.xlu0 %v1999_v37, %s15280_s28  ;;  %v10162_v29 = vsel %vm15326_vm2, %v1485_v14, %v1486_v27 }
 0x140   : > { %1547 = vrot.lane.b32.xlu1 %v1537_v18, %s15240_s15  ;;  %v822_v42 = vpop.f32.mrb[32].mxu1  ;;  %v10166_v48 = vpop.f32.mrb[32].mxu0  ;;  %v10169_v55 = vsel %vm15326_vm2, %v1488_v30, %v1489_v62 }
 0x141   : > { %15416 = vst [vmem:[#allocation20_spill] sm:$0xff] %v10169_v55  ;;  %v2106_v28 = vrot.slane %v822_v42, 6  ;;  %v824_v52 = vpop.f32.mrb[33].mxu1  ;;  %v10171_v53 = vpop.f32.mrb[33].mxu0  ;;  %v2175_v37 = vrot.slane %v822_v42, 4  ;;  %v1647_v14 = vrot.slane %v10166_v48, 6 }
 0x142   : > { %15417 = vst [vmem:[#allocation21_spill] sm:$0xff] %v10171_v53  ;;  %v2109_v5 = vrot.slane %v824_v52, 6  ;;  %v2178_v30 = vrot.slane %v824_v52, 4  ;;  %v1650_v27 = vrot.slane %v10171_v53, 6 }
 0x143   : > { %1501 = vrot.lane.b32.xlu0 %v10014_v6, %s15245_s29  ;;  %v10177_v18 = vsel %vm15327_vm3, %v2105_v60, %v2106_v28  ;;  %v1538_v6 = vrot.slane %v10008_v3, 2 }
 0x144   : > { %1961 = vrot.lane.b32.xlu1 %v10017_v7, %s15283_s20  ;;  %v10182_v62 = vpop.f32.mrb[34].mxu1  ;;  %v965_v0 = vpop.f32.mrb[34].mxu0  ;;  %v10185_v32 = vsel %vm15327_vm3, %v2108_v26, %v2109_v5 }
 0x145   : > { %v2176_v42 = vrot.slane %v10182_v62, 4  ;;  %v1648_v54 = vrot.slane %v965_v0, 6  ;;  %v10189_v60 = vpop.f32.mrb[35].mxu1  ;;  %v967_v28 = vpop.f32.mrb[35].mxu0  ;;  %v1717_v52 = vrot.slane %v965_v0, 4  ;;  %v2000_v0 = vrot.slane %v10005_v1, 2 }
 0x146   : > { %v2179_v38 = vrot.slane %v10189_v60, 4  ;;  %v1651_v7 = vrot.slane %v967_v28, 6  ;;  %v1720_v3 = vrot.slane %v967_v28, 4 }
 0x147   : > { %1549 = vrot.lane.b32.xlu0 %v1538_v6, %s15240_s15  ;;  %v10194_v34 = vsel %vm15326_vm2, %v2175_v37, %v2176_v42  ;;  %v10197_v26 = vsel %vm15327_vm3, %v1647_v14, %v1648_v54  ;;  %s15291_s15 = smov 62  }
 0x148   : > { %1503 = vrot.lane.b32.xlu1 %v10023_v9, %s15245_s29  ;;  %v10201_v5 = vpop.f32.mrb[36].mxu0  ;;  %v10203_v53 = vpop.f32.mrb[36].mxu1  ;;  %v10206_v36 = vsel %vm15326_vm2, %v2178_v30, %v2179_v38  ;;  %v10209_v6 = vsel %vm15327_vm3, %v1650_v27, %v1651_v7  ;;  %s15258_s29 = smov 61  }
 0x149   : > { %15418 = vst [vmem:[#allocation22_spill] sm:$0xff] %v10209_v6  ;;  %v1718_v37 = vrot.slane %v10201_v5, 4  ;;  %v10213_v54 = vpop.f32.mrb[37].mxu0  ;;  %v10215_v14 = vpop.f32.mrb[37].mxu1  ;;  %v2337_v42 = vrot.slane %v10203_v53, 6 }
 0x14a   : > { %15419 = vst [vmem:[#allocation23_spill] sm:$0xff] %v10213_v54  ;;  %v1721_v9 = vrot.slane %v10213_v54, 4  ;;  %v2340_v1 = vrot.slane %v10215_v14, 6 }
 0x14b   : > { %2009 = vrot.lane.b32.xlu0 %v2000_v0, %s15280_s28  ;;  %v10221_v38 = vsel %vm15326_vm2, %v1717_v52, %v1718_v37 }
 0x14c   : > { %1963 = vrot.lane.b32.xlu1 %v10026_v10, %s15283_s20  ;;  %v840_v30 = vpop.f32.mrb[38].mxu1  ;;  %v10226_v27 = vpop.f32.mrb[38].mxu0  ;;  %v10229_v28 = vsel %vm15326_vm2, %v1720_v3, %v1721_v9 }
 0x14d   : > { %15420 = vst [vmem:[#allocation24_spill] sm:$0xff] %v10229_v28  ;;  %v2338_v7 = vrot.slane %v840_v30, 6  ;;  %v842_v54 = vpop.f32.mrb[39].mxu1  ;;  %v10231_v6 = vpop.f32.mrb[39].mxu0  ;;  %v2407_v52 = vrot.slane %v840_v30, 4  ;;  %v1879_v37 = vrot.slane %v10226_v27, 6 }
 0x14e   : > { %15421 = vst [vmem:[#allocation25_spill] sm:$0xff] %v10231_v6  ;;  %v2341_v0 = vrot.slane %v842_v54, 6  ;;  %v2410_v3 = vrot.slane %v842_v54, 4  ;;  %v1882_v9 = vrot.slane %v10231_v6, 6 }
 0x14f   : > { %1593 = vrot.lane.b32.xlu0 %v10028_v11, %s15260_s16  ;;  %v10237_v10 = vsel %vm15327_vm3, %v2337_v42, %v2338_v7 }
 0x150   : > { %15422 = vst [vmem:[#allocation26_spill] sm:$0xff] %v10237_v10  ;;  %2053 = vrot.lane.b32.xlu1 %v10020_v8, %s15291_s15  ;;  %v10242_v28 = vpop.f32.mrb[40].mxu1  ;;  %v983_v33 = vpop.f32.mrb[40].mxu0  ;;  %v10245_v57 = vsel %vm15327_vm3, %v2340_v1, %v2341_v0 }
 0x151   : > { %15423 = vst [vmem:[#allocation27_spill] sm:$0xff] %v10242_v28  ;;  %v2408_v11 = vrot.slane %v10242_v28, 4  ;;  %v1880_v30 = vrot.slane %v983_v33, 6  ;;  %v10248_v55 = vpop.f32.mrb[41].mxu1  ;;  %v985_v42 = vpop.f32.mrb[41].mxu0  ;;  %v1949_v8 = vrot.slane %v983_v33, 4 }
 0x152   : > { %v2411_v7 = vrot.slane %v10248_v55, 4  ;;  %v1883_v31 = vrot.slane %v985_v42, 6  ;;  %v1952_v0 = vrot.slane %v985_v42, 4 }
 0x153   : > { %2123 = vrot.lane.b32.xlu0 %v10044_v41, %s15258_s29  ;;  %v10254_v54 = vsel %vm15326_vm2, %v2407_v52, %v2408_v11  ;;  %v10257_v1 = vsel %vm15327_vm3, %v1879_v37, %v1880_v30 }
 0x154   : > { %1595 = vrot.lane.b32.xlu1 %v10032_v13, %s15260_s16  ;;  %v10261_v6 = vpop.f32.mrb[42].mxu0  ;;  %v10263_v10 = vpop.f32.mrb[42].mxu1  ;;  %v10266_v28 = vsel %vm15326_vm2, %v2410_v3, %v2411_v7  ;;  %v10269_v41 = vsel %vm15327_vm3, %v1882_v9, %v1883_v31  ;;  %s15289_s16 = smov 60  }
 0x155   : > { %15424 = vst [vmem:[#allocation28_spill] sm:$0xff] %v10261_v6  ;;  %15425 = vst [vmem:[#allocation29_spill] sm:$0xff] %v10263_v10  ;;  %v1950_v33 = vrot.slane %v10261_v6, 4  ;;  %v10272_v52 = vpop.f32.mrb[43].mxu0  ;;  %v10274_v37 = vpop.f32.mrb[43].mxu1  ;;  %v2535_v3 = vrot.slane %v10263_v10, 6 }
 0x156   : > { %15426 = vst [vmem:[#allocation30_spill] sm:$0xff] %v10266_v28  ;;  %15427 = vst [vmem:[#allocation31_spill] sm:$0xff] %v10269_v41  ;;  %v1953_v11 = vrot.slane %v10272_v52, 4  ;;  %v2538_v31 = vrot.slane %v10274_v37, 6 }
 0x157   : > { %15428 = vst [vmem:[#allocation32_spill] sm:$0xff] %v10272_v52  ;;  %15429 = vst [vmem:[#allocation33_spill] sm:$0xff] %v10274_v37  ;;  %1665 = vrot.lane.b32.xlu0 %v10056_v46, %s15253_s17  ;;  %v10280_v13 = vsel %vm15326_vm2, %v1949_v8, %v1950_v33  ;;  %v2231_v8 = vrot.slane %v10051_v43, 2 }
 0x158   : > { %2055 = vrot.lane.b32.xlu1 %v10030_v12, %s15291_s15  ;;  %v858_v9 = vpop.f32.mrb[44].mxu1  ;;  %v10286_v30 = vpop.f32.mrb[44].mxu0  ;;  %v10289_v42 = vsel %vm15326_vm2, %v1952_v0, %v1953_v11  ;;  %v1769_v0 = vrot.slane %v10053_v45, 2 }
 0x159   : > { %15430 = vst [vmem:[#allocation34_spill] sm:$0xff] %v10289_v42  ;;  %v2536_v7 = vrot.slane %v858_v9, 6  ;;  %v860_v52 = vpop.f32.mrb[45].mxu1  ;;  %v10291_v41 = vpop.f32.mrb[45].mxu0  ;;  %v2604_v33 = vrot.slane %v858_v9, 4  ;;  %v2111_v12 = vrot.slane %v10286_v30, 6 }
 0x15a   : > { %15431 = vst [vmem:[#allocation35_spill] sm:$0xff] %v10291_v41  ;;  %v2539_v46 = vrot.slane %v860_v52, 6  ;;  %v2607_v11 = vrot.slane %v860_v52, 4  ;;  %v2114_v10 = vrot.slane %v10291_v41, 6 }
 0x15b   : > { %2125 = vrot.lane.b32.xlu0 %v10059_v47, %s15258_s29  ;;  %v10298_v37 = vsel %vm15327_vm3, %v2535_v3, %v2536_v7  ;;  %s15440_s29 = smov 95  }
 0x15c   : > { %15432 = vst [vmem:[#allocation36_spill] sm:$0xff] %v10298_v37  ;;  %1663 = vrot.lane.b32.xlu1 %v10047_v22, %s15253_s17  ;;  %v10304_v42 = vpop.f32.mrb[46].mxu1  ;;  %v1001_v43 = vpop.f32.mrb[46].mxu0  ;;  %v10307_v6 = vsel %vm15327_vm3, %v2538_v31, %v2539_v46  ;;  %s15269_s17 = smov 32  }
 0x15d   : > { %15433 = vst [vmem:[#allocation37_spill] sm:$0xff] %v10304_v42  ;;  %v2605_v47 = vrot.slane %v10304_v42, 4  ;;  %v2112_v9 = vrot.slane %v1001_v43, 6  ;;  %v10310_v28 = vpop.f32.mrb[47].mxu1  ;;  %v1003_v3 = vpop.f32.mrb[47].mxu0  ;;  %v2181_v45 = vrot.slane %v1001_v43, 4 }
 0x15e   : > { %15434 = vst [vmem:[#allocation38_spill] sm:$0xff] %v10310_v28  ;;  %v2608_v7 = vrot.slane %v10310_v28, 4  ;;  %v2115_v22 = vrot.slane %v1003_v3, 6  ;;  %v2184_v31 = vrot.slane %v1003_v3, 4 }
 0x15f   : > { %2239 = vrot.lane.b32.xlu0 %v2231_v8, %s15269_s17  ;;  %v10315_v52 = vsel %vm15326_vm2, %v2604_v33, %v2605_v47  ;;  %v10318_v41 = vsel %vm15327_vm3, %v2111_v12, %v2112_v9  ;;  %v1770_v9 = vrot.slane %v10066_v51, 2 }
 0x160   : > { %1779 = vrot.lane.b32.xlu1 %v1769_v0, %s15267_s18  ;;  %v10321_v46 = vpop.f32.mrb[48].mxu0  ;;  %v10323_v37 = vpop.f32.mrb[48].mxu1  ;;  %v10326_v42 = vsel %vm15326_vm2, %v2607_v11, %v2608_v7  ;;  %v10329_v28 = vsel %vm15327_vm3, %v2114_v10, %v2115_v22 }
 0x161   : > { %15435 = vst [vmem:[#allocation39_spill] sm:$0xff] %v10321_v46  ;;  %15436 = vst [vmem:[#allocation40_spill] sm:$0xff] %v10326_v42  ;;  %v2182_v8 = vrot.slane %v10321_v46, 4  ;;  %v10332_v33 = vpop.f32.mrb[49].mxu0  ;;  %v10334_v43 = vpop.f32.mrb[49].mxu1 }
 0x162   : > { %15437 = vst [vmem:[#allocation41_spill] sm:$0xff] %v10329_v28  ;;  %15438 = vst [vmem:[#allocation42_spill] sm:$0xff] %v10332_v33  ;;  %v2185_v12 = vrot.slane %v10332_v33, 4 }
 0x163   : > { %15439 = vst [vmem:[#allocation43_spill] sm:$0xff] %v10334_v43  ;;  %1733 = vrot.lane.b32.xlu0 %v10072_v56, %s15440_s29  ;;  %v10340_v0 = vsel %vm15326_vm2, %v2181_v45, %v2182_v8 }
 0x164   : > { %15441 = vst [vmem:[#allocation44_spill] sm:$0xff] %v10340_v0  ;;  %2193 = vrot.lane.b32.xlu1 %v10075_v59, %s15289_s16  ;;  %v10344_v10 = vpop.f32.mrb[50].mxu0  ;;  %v10346_v11 = vpop.f32.mrb[50].mxu1  ;;  %v10349_v47 = vsel %vm15326_vm2, %v2184_v31, %v2185_v12  ;;  %v2232_v12 = vrot.slane %v10063_v50, 2 }
 0x165   : > { %15442 = vst [vmem:[#allocation45_spill] sm:$0xff] %v10344_v10  ;;  %15443 = vst [vmem:[#allocation46_spill] sm:$0xff] %v10346_v11  ;;  %v10352_v3 = vpop.f32.mrb[51].mxu0  ;;  %v1122_v7 = vpop.f32.mrb[51].mxu1  ;;  %v2343_v56 = vrot.slane %v10344_v10, 6  ;;  %v1420_v22 = vrot.slane %v10346_v11, 6 }
 0x166   : > { %15444 = vst [vmem:[#allocation47_spill] sm:$0xff] %v10349_v47  ;;  %15445 = vst [vmem:[#allocation48_spill] sm:$0xff] %v10352_v3  ;;  %v2346_v59 = vrot.slane %v10352_v3, 6  ;;  %v1423_v8 = vrot.slane %v1122_v7, 6 }
 0x167   : > { %1781 = vrot.lane.b32.xlu0 %v1770_v9, %s15267_s18  ;;  %s15285_s18 = smov 31  }
 0x168   : > { %1735 = vrot.lane.b32.xlu1 %v10082_v63, %s15440_s29  ;;  %v1019_v45 = vpop.f32.mrb[52].mxu0  ;;  %v1126_v31 = vpop.f32.mrb[52].mxu1 }
 0x169   : > { %v2344_v51 = vrot.slane %v1019_v45, 6  ;;  %v1021_v33 = vpop.f32.mrb[53].mxu0  ;;  %v1421_v47 = vrot.slane %v1126_v31, 6  ;;  %v1128_v28 = vpop.f32.mrb[53].mxu1  ;;  %v2413_v43 = vrot.slane %v1019_v45, 4  ;;  %v1491_v11 = vrot.slane %v1126_v31, 4 }
 0x16a   : > { %v2347_v46 = vrot.slane %v1021_v33, 6  ;;  %v1424_v9 = vrot.slane %v1128_v28, 6  ;;  %v2416_v50 = vrot.slane %v1021_v33, 4  ;;  %v1494_v3 = vrot.slane %v1128_v28, 4 }
 0x16b   : > { %2241 = vrot.lane.b32.xlu0 %v2232_v12, %s15269_s17  ;;  %v10363_v10 = vsel %vm15327_vm3, %v1420_v22, %v1421_v47  ;;  %v10366_v63 = vsel %vm15327_vm3, %v2343_v56, %v2344_v51  ;;  %s15274_s17 = smov 30  }
 0x16c   : > { %2195 = vrot.lane.b32.xlu1 %v10085_v2, %s15289_s16  ;;  %v10370_v7 = vpop.f32.mrb[54].mxu0  ;;  %v10372_v42 = vpop.f32.mrb[54].mxu1  ;;  %v10375_v0 = vsel %vm15327_vm3, %v2346_v59, %v2347_v46  ;;  %v10378_v45 = vsel %vm15327_vm3, %v1423_v8, %v1424_v9  ;;  %s15473_s16 = smov 61  }
 0x16d   : > { %15446 = vst [vmem:[#allocation49_spill] sm:$0xff] %v10375_v0  ;;  %15447 = vst [vmem:[#allocation50_spill] sm:$0xff] %v10378_v45  ;;  %v2414_v47 = vrot.slane %v10370_v7, 4  ;;  %v10381_v22 = vpop.f32.mrb[55].mxu0  ;;  %v1492_v56 = vrot.slane %v10372_v42, 4  ;;  %v10384_v31 = vpop.f32.mrb[55].mxu1 }
 0x16e   : > { %15448 = vst [vmem:[#allocation51_spill] sm:$0xff] %v10381_v22  ;;  %15449 = vst [vmem:[#allocation52_spill] sm:$0xff] %v10384_v31  ;;  %v2417_v2 = vrot.slane %v10381_v22, 4  ;;  %v1495_v28 = vrot.slane %v10384_v31, 4 }
 0x16f   : > { %1825 = vrot.lane.b32.xlu0 %v10087_v4, %s15277_s26  ;;  %v10391_v46 = vsel %vm15326_vm2, %v2413_v43, %v2414_v47  ;;  %v10394_v33 = vsel %vm15326_vm2, %v1491_v11, %v1492_v56  ;;  %v10410_v4 = vpop.permute.xlu0 %2755 }
 0x170   : > { %2285 = vrot.lane.b32.xlu1 %v10079_v25, %s15285_s18  ;;  %v10398_v59 = vpop.f32.mrb[56].mxu0  ;;  %v10401_v8 = vsel %vm15326_vm2, %v2416_v50, %v2417_v2  ;;  %v10404_v12 = vsel %vm15326_vm2, %v1494_v3, %v1495_v28  ;;  %15454 = vst [vmem:[#allocation57_spill] sm:$0xff] %v10410_v4  ;;  %v10416_v3 = vpop.f32.mrb[56].mxu1  ;;  %v415_v4 = vld [vmem:[%s9577_s19 + $0x20] sm:$0x7]  ;;  %s15495_s19 = smov 28  }
 0x171   : > { %15450 = vst [vmem:[#allocation53_spill] sm:$0xff] %v10398_v59  ;;  %15451 = vst [vmem:[#allocation54_spill] sm:$0xff] %v10401_v8  ;;  %v10406_v51 = vpop.f32.mrb[57].mxu0  ;;  %v2541_v43 = vrot.slane %v10398_v59, 6  ;;  %v1653_v56 = vrot.slane %v10416_v3, 6  ;;  %v10419_v2 = vpop.f32.mrb[57].mxu1  ;;  %8569 = vmatpush3.msk.msra.mxu0 %vm15309_vm0, %v415_v4 }
 0x172   : > { %15452 = vst [vmem:[#allocation55_spill] sm:$0xff] %v10404_v12  ;;  %15453 = vst [vmem:[#allocation56_spill] sm:$0xff] %v10406_v51  ;;  %v2544_v25 = vrot.slane %v10406_v51, 6  ;;  %vm15314_vm0 = vcmask 498688  }
 0x173   : > { %2355 = vrot.lane.b32.xlu0 %v10101_v20, %s15274_s17  ;;  %15455 = vst [vmem:[#allocation58_spill] sm:$0xff] %v10416_v3  ;;  %15456 = vst [vmem:[#allocation59_spill] sm:$0xff] %v10419_v2 }
 0x174   : > { %1827 = vrot.lane.b32.xlu1 %v10093_v16, %s15277_s26  ;;  %v1037_v11 = vpop.f32.mrb[58].mxu0  ;;  %v1144_v16 = vpop.f32.mrb[58].mxu1  ;;  %s15464_s26 = smov 127  }
 0x175   : > { %v2542_v9 = vrot.slane %v1037_v11, 6  ;;  %v1039_v50 = vpop.f32.mrb[59].mxu0  ;;  %v2610_v20 = vrot.slane %v1037_v11, 4  ;;  %v1654_v12 = vrot.slane %v1144_v16, 6  ;;  %v10441_v0 = vpop.f32.mrb[59].mxu1 }
 0x176   : > { %v2545_v47 = vrot.slane %v1039_v50, 6  ;;  %v2613_v51 = vrot.slane %v1039_v50, 4 }
 0x177   : > { %2357 = vrot.lane.b32.xlu0 %v10107_v23, %s15274_s17  ;;  %v10424_v28 = vsel %vm15327_vm3, %v2541_v43, %v2542_v9  ;;  %v1723_v9 = vrot.slane %v1144_v16, 4  ;;  %s15459_s17 = smov 92  }
 0x178   : > { %2287 = vrot.lane.b32.xlu1 %v10091_v15, %s15285_s18  ;;  %v10428_v31 = vpop.f32.mrb[60].mxu0  ;;  %v10431_v45 = vsel %vm15327_vm3, %v2544_v25, %v2545_v47  ;;  %v10444_v15 = vsel %vm15327_vm3, %v1653_v56, %v1654_v12  ;;  %v10451_v50 = vpop.f32.mrb[60].mxu1  ;;  %v2001_v47 = vrot.slane %v10121_v40, 2  ;;  %v2002_v40 = vrot.slane %v10128_v49, 2  ;;  %s15470_s18 = smov 124  }
 0x179   : > { %v10433_v22 = vpop.permute.xlu0 %2471  ;;  %v2611_v8 = vrot.slane %v10428_v31, 4  ;;  %v10436_v23 = vpop.f32.mrb[61].mxu0  ;;  %15458 = vst [vmem:[#allocation61_spill] sm:$0xff] %v10444_v15  ;;  %15460 = vst [vmem:[#allocation62_spill] sm:$0xff] %v10451_v50  ;;  %v1724_v12 = vrot.slane %v10451_v50, 4  ;;  %v9328_v15 = vld [vmem:[%s15209_s1] sm:$0xff] }
 0x17a   : > { %15457 = vst [vmem:[#allocation60_spill] sm:$0xff] %v10433_v22  ;;  %v10438_v11 = vpop.permute.xlu1 %2425  ;;  %v2614_v43 = vrot.slane %v10436_v23, 4  ;;  %v1539_v22 = vrot.slane %v10143_v21, 2  ;;  %v9330_v21 = vld [vmem:[%s15209_s1 + $0x10] sm:$0xff] }
 0x17b   : > { %1897 = vrot.lane.b32.xlu0 %v10125_v44, %s15459_s17  ;;  %v10449_v25 = vsel %vm15326_vm2, %v2610_v20, %v2611_v8  ;;  %v10469_v20 = vsel %vm15326_vm2, %v1723_v9, %v1724_v12 }
 0x17c   : > { %1895 = vrot.lane.b32.xlu1 %v10117_v39, %s15459_s17  ;;  %v10456_v59 = vpop.f32.mrb[62].mxu0  ;;  %v10459_v16 = vsel %vm15326_vm2, %v2613_v51, %v2614_v43  ;;  %15462 = vst [vmem:[#allocation64_spill] sm:$0xff] %v10469_v20  ;;  %v10482_v43 = vpop.f32.mrb[61].mxu1 }
 0x17d   : > { %v10462_v56 = vpop.permute.xlu0 %1426  ;;  %v10464_v44 = vpop.f32.mrb[63].mxu0  ;;  %15465 = vst [vmem:[#allocation66_spill] sm:$0xff] %v10482_v43 }
 0x17e   : > { %15461 = vst [vmem:[#allocation63_spill] sm:$0xff] %v10464_v44  ;;  %v10466_v8 = vpop.permute.xlu1 %2427  ;;  %v10486_v12 = vpop.f32.mrb[62].mxu1 }
 0x17f   : > { %1965 = vrot.lane.b32.xlu0 %v10135_v35, %s15283_s20  ;;  %v10494_v49 = vpop.f32.mrb[63].mxu1 }
 0x180   : > { %2011 = vrot.lane.b32.xlu1 %v2001_v47, %s15280_s28  ;;  %15466 = vst [vmem:[#allocation67_spill] sm:$0xff] %v10494_v49 }
 0x181   : > { %v10474_v39 = vpop.permute.xlu0 %2473 }
 0x182   : > { %15463 = vst [vmem:[#allocation65_spill] sm:$0xff] %v10474_v39  ;;  %v10477_v51 = vpop.permute.xlu1 %1497 }
 0x183   : > { %2013 = vrot.lane.b32.xlu0 %v2002_v40, %s15280_s28  ;;  %s15467_s28 = smov 126  }
 0x184   : > { %1434 = vrot.lane.b32.xlu1 %v10138_v17, %s15464_s26  ;;  %v10500_v17 = vpop.f32.mrb[64].mxu1 }
 0x185   : > { %v10484_v9 = vpop.permute.xlu0 %1428  ;;  %v10506_v20 = vpop.f32.mrb[65].mxu1  ;;  %v1955_v4 = vrot.slane %v10500_v17, 4 }
 0x186   : > { %v10488_v35 = vpop.permute.xlu1 %1499 }
 0x187   : > { %2057 = vrot.lane.b32.xlu0 %v10145_v24, %s15291_s15  ;;  %v15468_v24 = vmov 0.0  }
 0x188   : > { %1967 = vrot.lane.b32.xlu1 %v10148_v58, %s15283_s20  ;;  %8570 = vmatprep.mubr.msk.f32.mxu0 %vm15310_vm4, %v15468_v24  ;;  %v10512_v58 = vpop.f32.mrb[66].mxu1  ;;  %s15492_s20 = smov 29  }
 0x189   : > { %v10496_v47 = vpop.permute.xlu0 %1543  ;;  %15469 = vst [vmem:[#allocation68_spill] sm:$0xff] %v10512_v58  ;;  %8571 = vmatmul.mubr.msk.f32.vlgmr.msra.gmra.mrb[64].mxu0 %vm444_vm1, %v9328_v15  ;;  %v9329_v15 = vld [vmem:[%s15209_s1 + $0x8] sm:$0xff] }
 0x18a   : > { %v10498_v40 = vpop.permute.xlu1 %1589  ;;  %8573 = vmatprep.mubr.msk.f32.mxu0 %vm15310_vm4, %v15468_v24 }
 0x18b   : > { %1505 = vrot.lane.b32.xlu0 %v10162_v29, %s15467_s28 }
 0x18c   : > { %1436 = vrot.lane.b32.xlu1 %v10151_v61, %s15464_s26  ;;  %v1956_v61 = vrot.slane %v10512_v58, 4 }
 0x18d   : > { %v10514_v50 = vpop.permute.xlu0 %1545  ;;  %8574 = vmatmul.mubr.msk.f32.gmra.mrb[66].mxu0 %vm444_vm1, %v9329_v15 }
 0x18e   : > { %v10520_v29 = vpop.permute.xlu1 %1591  ;;  %8576 = vmatprep.mubr.msk.f32.mxu0 %vm15310_vm4, %v15468_v24 }
 0x18f   : > { %1597 = vrot.lane.b32.xlu0 %v10166_v48, %s15470_s18  ;;  %v10542_v48 = vsel %vm15326_vm2, %v1955_v4, %v1956_v61 }
 0x190   : > { %2059 = vrot.lane.b32.xlu1 %v10156_v19, %s15291_s15  ;;  %15472 = vst [vmem:[#allocation70_spill] sm:$0xff] %v10542_v48  ;;  %s15474_s15 = smov 125   ;;  %v10547_v19 = vpop.f32.mrb[67].mxu1 }
 0x191   : > { %v10530_v3 = vpop.permute.xlu0 %1659  ;;  %15475 = vst [vmem:[#allocation71_spill] sm:$0xff] %v10547_v19  ;;  %8577 = vmatmul.mubr.msk.f32.gmra.mrb[68].mxu0 %vm444_vm1, %v9330_v21  ;;  %v10555_v15 = vpop.f32.mrb[68].mxu1  ;;  %v2233_v21 = vrot.slane %v10182_v62, 2 }
 0x192   : > { %v10537_v58 = vpop.permute.xlu1 %2556  ;;  %15476 = vst [vmem:[#allocation72_spill] sm:$0xff] %v10555_v15  ;;  %v2117_v4 = vrot.slane %v10555_v15, 6  ;;  %v10560_v61 = vpop.f32.mrb[69].mxu1  ;;  %8579 = vmatprep.mubr.msk.f32.mxu0 %vm15310_vm4, %v15468_v24  ;;  %v9331_v15 = vld [vmem:[%s15209_s1 + $0x18] sm:$0xff] }
 0x193   : > { %15471 = vst [vmem:[#allocation69_spill] sm:$0xff] %v10537_v58  ;;  %2129 = vrot.lane.b32.xlu0 %v10185_v32, %s15473_s16  ;;  %15478 = vst [vmem:[#allocation74_spill] sm:$0xff] %v10560_v61  ;;  %v2234_v32 = vrot.slane %v10189_v60, 2 }
 0x194   : > { %1551 = vrot.lane.b32.xlu1 %v1539_v22, %s15474_s15  ;;  %v1180_v22 = vpop.f32.mrb[70].mxu1 }
 0x195   : > { %v10549_v39 = vpop.permute.xlu0 %1661  ;;  %v2118_v48 = vrot.slane %v1180_v22, 6  ;;  %8580 = vmatmul.mubr.msk.f32.gmra.mrb[70].mxu0 %vm444_vm1, %v9331_v15  ;;  %v9332_v15 = vld [vmem:[%s15209_s1 + $0x20] sm:$0xff] }
 0x196   : > { %v10557_v58 = vpop.permute.xlu1 %2670  ;;  %8582 = vmatprep.mubr.msk.f32.mxu0 %vm15310_vm4, %v15468_v24 }
 0x197   : > { %15477 = vst [vmem:[#allocation73_spill] sm:$0xff] %v10557_v58  ;;  %2197 = vrot.lane.b32.xlu0 %v10194_v34, %s15479_s0  ;;  %v10581_v34 = vsel %vm15327_vm3, %v2117_v4, %v2118_v48  ;;  %v2187_v48 = vrot.slane %v1180_v22, 4 }
 0x198   : > { %2127 = vrot.lane.b32.xlu1 %v10177_v18, %s15473_s16  ;;  %15482 = vst [vmem:[#allocation77_spill] sm:$0xff] %v10581_v34  ;;  %v10584_v18 = vpop.f32.mrb[71].mxu1 }
 0x199   : > { %v10570_v58 = vpop.permute.xlu0 %2715  ;;  %v10587_v62 = vpop.f32.mrb[72].mxu1  ;;  %8583 = vmatmul.mubr.msk.f32.gmra.mrb[72].mxu0 %vm444_vm1, %v9332_v15 }
 0x19a   : > { %15480 = vst [vmem:[#allocation75_spill] sm:$0xff] %v10570_v58  ;;  %v10576_v44 = vpop.permute.xlu1 %2625  ;;  %15484 = vst [vmem:[#allocation78_spill] sm:$0xff] %v10587_v62  ;;  %v2188_v4 = vrot.slane %v10587_v62, 4  ;;  %8585 = vmatprep.mubr.msk.f32.mxu0 %vm15310_vm4, %v15468_v24 }
 0x19b   : > { %15481 = vst [vmem:[#allocation76_spill] sm:$0xff] %v10576_v44  ;;  %2245 = vrot.lane.b32.xlu0 %v2234_v32, %s15483_s2 }
 0x19c   : > { %2243 = vrot.lane.b32.xlu1 %v2233_v21, %s15483_s2  ;;  %v9333_v21 = vld [vmem:[%s15209_s1 + $0x28] sm:$0xff]  ;;  %v10615_v15 = vsel %vm15326_vm2, %v2187_v48, %v2188_v4  ;;  %v1771_v4 = vrot.slane %v10201_v5, 2  ;;  %v2466_v5 = vrot.slane %v10248_v55, 2 }
 0x19d   : > { %v10589_v60 = vpop.permute.xlu0 %1775  ;;  %8586 = vmatmul.mubr.msk.f32.gmra.mrb[74].mxu0 %vm444_vm1, %v9333_v21  ;;  %15487 = vst [vmem:[#allocation79_spill] sm:$0xff] %v10615_v15  ;;  %v9334_v21 = vld [vmem:[%s15209_s1 + $0x30] sm:$0xff]  ;;  %v9337_v15 = vld [vmem:[%s15209_s1 + $0x48] sm:$0xff] }
 0x19e   : > { %v10595_v58 = vpop.permute.xlu1 %1729  ;;  %8588 = vmatprep.mubr.msk.f32.mxu0 %vm15310_vm4, %v15468_v24 }
 0x19f   : > { %2289 = vrot.lane.b32.xlu0 %v10203_v53, %s15485_s30  ;;  %v1885_v53 = vrot.slane %v10486_v12, 6 }
 0x1a0   : > { %1667 = vrot.lane.b32.xlu1 %v10197_v26, %s15486_s23  ;;  %v1886_v26 = vrot.slane %v10500_v17, 6  ;;  %v9335_v17 = vld [vmem:[%s15209_s1 + $0x38] sm:$0xff] }
 0x1a1   : > { %v10604_v32 = vpop.permute.xlu0 %1777  ;;  %8589 = vmatmul.mubr.msk.f32.gmra.mrb[76].mxu0 %vm444_vm1, %v9334_v21 }
 0x1a2   : > { %v10610_v22 = vpop.permute.xlu1 %1731  ;;  %8591 = vmatprep.mubr.msk.f32.mxu0 %vm15310_vm4, %v15468_v24 }
 0x1a3   : > { %1737 = vrot.lane.b32.xlu0 %v10221_v38, %s15440_s29  ;;  %v10636_v38 = vsel %vm15327_vm3, %v1885_v53, %v1886_v26 }
 0x1a4   : > { %2199 = vrot.lane.b32.xlu1 %v10206_v36, %s15479_s0  ;;  %15489 = vst [vmem:[#allocation80_spill] sm:$0xff] %v10636_v38  ;;  %v1656_v38 = vrot.slane %v10419_v2, 6  ;;  %v9338_v2 = vld [vmem:[%s15209_s1 + $0x50] sm:$0xff] }
 0x1a5   : > { %v10623_v44 = vpop.permute.xlu0 %1430  ;;  %8592 = vmatmul.mubr.msk.f32.gmra.mrb[78].mxu0 %vm444_vm1, %v9335_v17  ;;  %v15494_v17 = vld [vmem:[#allocation26_spill] sm:$0xff] }
 0x1a6   : > { %v10629_v48 = vpop.permute.xlu1 %1821  ;;  %8594 = vmatprep.mubr.msk.f32.mxu0 %vm15310_vm4, %v15468_v24 }
 0x1a7   : > { %1829 = vrot.lane.b32.xlu0 %v10226_v27, %s15488_s27  ;;  %v9336_v27 = vld [vmem:[%s15209_s1 + $0x40] sm:$0xff] }
 0x1a8   : > { %2291 = vrot.lane.b32.xlu1 %v10215_v14, %s15485_s30 }
 0x1a9   : > { %v10640_v36 = vpop.permute.xlu0 %1891  ;;  %8595 = vmatmul.mubr.msk.f32.gmra.mrb[80].mxu0 %vm444_vm1, %v9336_v27  ;;  %v1657_v27 = vrot.slane %v10441_v0, 6 }
 0x1aa   : > { %v10647_v21 = vpop.permute.xlu1 %1823  ;;  %8597 = vmatprep.mubr.msk.f32.mxu0 %vm15310_vm4, %v15468_v24 }
 0x1ab   : > { %2361 = vrot.lane.b32.xlu0 %v10245_v57, %s15490_s14  ;;  %v15493_v57 = vld [vmem:[#allocation27_spill] sm:$0xff] }
 0x1ac   : > { %1783 = vrot.lane.b32.xlu1 %v1771_v4, %s15491_s21  ;;  %v2465_v26 = vrot.slane %v15493_v57, 2  ;;  %v1726_v57 = vrot.slane %v10441_v0, 4 }
 0x1ad   : > { %v10654_v14 = vpop.permute.xlu0 %1893  ;;  %8598 = vmatmul.mubr.msk.f32.gmra.mrb[82].mxu0 %vm444_vm1, %v9337_v15  ;;  %v10693_v15 = vsel %vm15327_vm3, %v1656_v38, %v1657_v27  ;;  %v9340_v27 = vld [vmem:[%s15209_s1 + $0x60] sm:$0xff] }
 0x1ae   : > { %v10660_v53 = vpop.permute.xlu1 %1432  ;;  %8600 = vmatprep.mubr.msk.f32.mxu0 %vm15310_vm4, %v15468_v24  ;;  %15496 = vst [vmem:[#allocation27_spill] sm:$0xff] %v10693_v15 }
 0x1af   : > { %2429 = vrot.lane.b32.xlu0 %v10254_v54, %s15492_s20 }
 0x1b0   : > { %2359 = vrot.lane.b32.xlu1 %v15494_v17, %s15490_s14  ;;  %v1727_v17 = vrot.slane %v10482_v43, 4 }
 0x1b1   : > { %v10670_v4 = vpop.permute.xlu0 %2007  ;;  %8601 = vmatmul.mubr.msk.f32.gmra.mrb[84].mxu0 %vm444_vm1, %v9338_v2  ;;  %v9339_v2 = vld [vmem:[%s15209_s1 + $0x58] sm:$0xff] }
 0x1b2   : > { %v10678_v55 = vpop.permute.xlu1 %1547  ;;  %8603 = vmatprep.mubr.msk.f32.mxu0 %vm15310_vm4, %v15468_v24  ;;  %v10710_v38 = vsel %vm15326_vm2, %v1726_v57, %v1727_v17  ;;  %v15502_v57 = vld [vmem:[#allocation28_spill] sm:$0xff] }
 0x1b3   : > { %2477 = vrot.lane.b32.xlu0 %v2466_v5, %s15495_s19  ;;  %15499 = vst [vmem:[#allocation81_spill] sm:$0xff] %v10710_v38  ;;  %v2003_v17 = vrot.slane %v15502_v57, 2  ;;  %v9341_v57 = vld [vmem:[%s15209_s1 + $0x68] sm:$0xff] }
 0x1b4   : > { %2475 = vrot.lane.b32.xlu1 %v2465_v26, %s15495_s19 }
 0x1b5   : > { %v10684_v54 = vpop.permute.xlu0 %1501  ;;  %8604 = vmatmul.mubr.msk.f32.gmra.mrb[86].mxu0 %vm444_vm1, %v9339_v2 }
 0x1b6   : > { %v10695_v62 = vpop.permute.xlu1 %1961  ;;  %8606 = vmatprep.mubr.msk.f32.mxu0 %vm15310_vm4, %v15468_v24 }
 0x1b7   : > { %1969 = vrot.lane.b32.xlu0 %v10280_v13, %s15497_s24  ;;  %v1443_v13 = vsel %vm1442_vm5, %v10462_v56, %v10484_v9 }
 0x1b8   : > { %1899 = vrot.lane.b32.xlu1 %v10257_v1, %s15459_s17  ;;  %v15501_v1 = vld [vmem:[#allocation30_spill] sm:$0xff] }
 0x1b9   : > { %v10703_v0 = vpop.permute.xlu0 %1549  ;;  %8607 = vmatmul.mubr.msk.f32.gmra.mrb[88].mxu0 %vm444_vm1, %v9340_v27 }
 0x1ba   : > { %15498 = vst [vmem:[#allocation26_spill] sm:$0xff] %v10703_v0  ;;  %v10712_v5 = vpop.permute.xlu1 %1503  ;;  %8609 = vmatprep.mubr.msk.f32.mxu0 %vm15310_vm4, %v15468_v24  ;;  %v9342_v0 = vld [vmem:[%s15209_s1 + $0x70] sm:$0xff] }
 0x1bb   : > { %2061 = vrot.lane.b32.xlu0 %v10286_v30, %s15500_s13  ;;  %v15503_v30 = vld [vmem:[#allocation12_spill] sm:$0xff] }
 0x1bc   : > { %2431 = vrot.lane.b32.xlu1 %v15501_v1, %s15492_s20  ;;  %v1457_v56 = vadd.f32 %v1443_v13, %v15503_v30  ;;  %v1514_v1 = vsel %vm1513_vm6, %v10477_v51, %v10488_v35  ;;  %v1889_v13 = vrot.slane %v10506_v20, 6  ;;  %v1560_v51 = vsel %vm1559_vm7, %v10496_v47, %v10514_v50 }
 0x1bd   : > { %v10723_v26 = vpop.permute.xlu0 %2009  ;;  %8610 = vmatmul.mubr.msk.f32.gmra.mrb[90].mxu0 %vm444_vm1, %v9341_v57  ;;  %v15506_v57 = vld [vmem:[#allocation37_spill] sm:$0xff] }
 0x1be   : > { %v10730_v2 = vpop.permute.xlu1 %1963  ;;  %8612 = vmatprep.mubr.msk.f32.mxu0 %vm15310_vm4, %v15468_v24  ;;  %v1528_v15 = vadd.f32 %v1514_v1, %v1457_v56  ;;  %v2663_v38 = vrot.slane %v15506_v57, 2  ;;  %v1959_v56 = vrot.slane %v10547_v19, 4  ;;  %v1606_v1 = vsel %vm1605_vm8, %v10498_v40, %v10520_v29 }
 0x1bf   : > { %2560 = vrot.lane.b32.xlu0 %v10307_v6, %s15464_s26  ;;  %v1888_v6 = vrot.slane %v10494_v49, 6  ;;  %v15507_v49 = vld [vmem:[#allocation36_spill] sm:$0xff] }
 0x1c0   : > { %2015 = vrot.lane.b32.xlu1 %v2003_v17, %s15504_s9  ;;  %v15505_v17 = vld [vmem:[#allocation38_spill] sm:$0xff]  ;;  %v1574_v47 = vadd.f32 %v1560_v51, %v1528_v15 }
 0x1c1   : > { %v10741_v27 = vpop.permute.xlu0 %1593  ;;  %v2664_v30 = vrot.slane %v15505_v17, 2  ;;  %8613 = vmatmul.mubr.msk.f32.gmra.mrb[92].mxu0 %vm444_vm1, %v9342_v0  ;;  %v9343_v0 = vld [vmem:[%s15209_s1 + $0x78] sm:$0xff] }
 0x1c2   : > { %v10747_v43 = vpop.permute.xlu1 %2053  ;;  %8615 = vmatprep.mubr.msk.f32.mxu0 %vm15310_vm4, %v15468_v24 }
 0x1c3   : > { %2627 = vrot.lane.b32.xlu0 %v10315_v52, %s15467_s28  ;;  %v1958_v52 = vrot.slane %v10506_v20, 4  ;;  %v1676_v20 = vsel %vm1675_vm9, %v10530_v3, %v10549_v39  ;;  %v1746_v3 = vsel %vm1745_vm10, %v10595_v58, %v10610_v22  ;;  %v1792_v58 = vsel %vm1791_vm11, %v10589_v60, %v10604_v32  ;;  %v15512_v60 = vld [vmem:[#allocation45_spill] sm:$0xff] }
 0x1c4   : > { %2558 = vrot.lane.b32.xlu1 %v15507_v49, %s15464_s26  ;;  %v10775_v49 = vsel %vm15327_vm3, %v1888_v6, %v1889_v13  ;;  %v1620_v6 = vadd.f32 %v1606_v1, %v1574_v47  ;;  %v2120_v1 = vrot.slane %v10560_v61, 6 }
 0x1c5   : > { %v10762_v34 = vpop.permute.xlu0 %2123  ;;  %15508 = vst [vmem:[#allocation30_spill] sm:$0xff] %v10775_v49  ;;  %8616 = vmatmul.mubr.msk.f32.gmra.mrb[94].mxu0 %vm444_vm1, %v9343_v0  ;;  %v10796_v40 = vsel %vm15326_vm2, %v1958_v52, %v1959_v56  ;;  %v1838_v52 = vsel %vm1837_vm12, %v10629_v48, %v10647_v21  ;;  %v9345_v0 = vld [vmem:[%s15209_s1 + $0x88] sm:$0xff] }
 0x1c6   : > { %v10768_v17 = vpop.permute.xlu1 %1595  ;;  %8618 = vmatprep.mubr.msk.f32.mxu0 %vm15310_vm4, %v15468_v24  ;;  %15509 = vst [vmem:[#allocation28_spill] sm:$0xff] %v10796_v40 }
 0x1c7   : > { %2674 = vrot.lane.b32.xlu0 %v2664_v30, %s15474_s15  ;;  %v9344_v30 = vld [vmem:[%s15209_s1 + $0x80] sm:$0xff] }
 0x1c8   : > { %2672 = vrot.lane.b32.xlu1 %v2663_v38, %s15474_s15  ;;  %v1690_v38 = vadd.f32 %v1676_v20, %v1620_v6  ;;  %v2121_v20 = vrot.slane %v10584_v18, 6 }
 0x1c9   : > { %v10785_v15 = vpop.permute.xlu0 %1665  ;;  %8619 = vmatmul.mubr.msk.f32.gmra.mrb[96].mxu0 %vm444_vm1, %v9344_v30  ;;  %v1908_v30 = vsel %vm15329_vm13, %v10640_v36, %v10654_v14 }
 0x1ca   : > { %v10791_v13 = vpop.permute.xlu1 %2055  ;;  %v1760_v57 = vadd.f32 %v1746_v3, %v1690_v38  ;;  %8621 = vmatprep.mubr.msk.f32.mxu0 %vm15310_vm4, %v15468_v24  ;;  %v15513_v38 = vld [vmem:[#allocation43_spill] sm:$0xff] }
 0x1cb   : > { %2717 = vrot.lane.b32.xlu0 %v10323_v37, %s15470_s18  ;;  %v15510_v37 = vld [vmem:[#allocation44_spill] sm:$0xff] }
 0x1cc   : > { %2131 = vrot.lane.b32.xlu1 %v10318_v41, %s15473_s16  ;;  %v15511_v41 = vld [vmem:[#allocation40_spill] sm:$0xff]  ;;  %v1806_v6 = vadd.f32 %v1792_v58, %v1760_v57  ;;  %v2190_v57 = vrot.slane %v10584_v18, 4  ;;  %v10852_v58 = vsel %vm15327_vm3, %v2120_v1, %v2121_v20  ;;  %v1978_v18 = vsel %vm15328_vm14, %v10695_v62, %v10730_v2 }
 0x1cd   : > { %v10805_v51 = vpop.permute.xlu0 %2125  ;;  %8622 = vmatmul.mubr.msk.f32.gmra.mrb[98].mxu0 %vm444_vm1, %v9345_v0  ;;  %15514 = vst [vmem:[#allocation12_spill] sm:$0xff] %v10852_v58  ;;  %v15530_v58 = vld [vmem:[#allocation19_spill] sm:$0xff] }
 0x1ce   : > { %v10811_v47 = vpop.permute.xlu1 %1663  ;;  %8624 = vmatprep.mubr.msk.f32.mxu0 %vm15310_vm4, %v15468_v24  ;;  %v1852_v48 = vadd.f32 %v1838_v52, %v1806_v6  ;;  %v15515_v52 = vld [vmem:[#allocation39_spill] sm:$0xff]  ;;  %vm15313_vm4 = vcmask 490496  }
 0x1cf   : > { %2201 = vrot.lane.b32.xlu0 %v15510_v37, %s15479_s0  ;;  %v2235_v0 = vrot.slane %v15515_v52, 2 }
 0x1d0   : > { %2629 = vrot.lane.b32.xlu1 %v15511_v41, %s15467_s28  ;;  %v9346_v41 = vld [vmem:[%s15209_s1 + $0x90] sm:$0x3f] }
 0x1d1   : > { %v10825_v56 = vpop.permute.xlu0 %2239  ;;  %8625 = vmatmul.mubr.msk.f32.gmra.mrb[100].mxu0 %vm444_vm1, %v9346_v41  ;;  %vm15312_vm1 = vcmask 506880  }
 0x1d2   : > { %v10833_v3 = vpop.permute.xlu1 %1779  ;;  %3466 = vmatprep.mubr.f32.mxu0 %v15468_v24  ;;  %v2070_v62 = vsel %vm15312_vm1, %v10747_v43, %v10791_v13  ;;  %vm2255_vm1 = vcmask 261120  }
 0x1d3   : > { %2293 = vrot.lane.b32.xlu0 %v15512_v60, %s15485_s30  ;;  %v10855_v60 = vpop.f32.mrb[73].mxu1 }
 0x1d4   : > { %2719 = vrot.lane.b32.xlu1 %v15513_v38, %s15470_s18  ;;  %15516 = vst [vmem:[#allocation38_spill] sm:$0xff] %v10855_v60  ;;  %v2191_v36 = vrot.slane %v10855_v60, 4  ;;  %v1922_v38 = vadd.f32 %v1908_v30, %v1852_v48 }
 0x1d5   : > { %v10844_v37 = vpop.permute.xlu0 %1733 }
 0x1d6   : > { %v2194_v6 = vpop.permute.xlu1 %2193  ;;  %v10868_v20 = vsel %vm15326_vm2, %v2190_v57, %v2191_v36  ;;  %v1992_v41 = vadd.f32 %v1978_v18, %v1922_v38  ;;  %v2467_v57 = vrot.slane %v10370_v7, 2  ;;  %v2666_v7 = vrot.slane %v10436_v23, 2 }
 0x1d7   : > { %1438 = vrot.lane.b32.xlu0 %v10363_v10, %s15464_s26  ;;  %15517 = vst [vmem:[#allocation37_spill] sm:$0xff] %v10868_v20  ;;  %v2024_v10 = vsel %vm15315_vm15, %v10670_v4, %v10723_v26  ;;  %v2665_v36 = vrot.slane %v10428_v31, 2  ;;  %vm2441_vm15 = vcmask 236544   ;;  %v1540_v20 = vrot.slane %v15530_v58, 2 }
 0x1d8   : > { %2247 = vrot.lane.b32.xlu1 %v2235_v0, %s15483_s2  ;;  %v2038_v30 = vadd.f32 %v2024_v10, %v1992_v41  ;;  %v10905_v10 = vpop.f32.mrb[74].mxu1 }
 0x1d9   : > { %v10865_v1 = vpop.permute.xlu0 %1781  ;;  %v2349_v23 = vrot.slane %v10905_v10, 6 }
 0x1da   : > { %v10870_v52 = vpop.permute.xlu1 %1735 }
 0x1db   : > { %2433 = vrot.lane.b32.xlu0 %v10391_v46, %s15492_s20  ;;  %v2140_v46 = vsel %vm15314_vm0, %v10762_v34, %v10805_v51  ;;  %vm2371_vm0 = vcmask 244736  }
 0x1dc   : > { %2363 = vrot.lane.b32.xlu1 %v10366_v63, %s15490_s14  ;;  %v2084_v63 = vadd.f32 %v2070_v62, %v2038_v30 }
 0x1dd   : > { %v10882_v48 = vpop.permute.xlu0 %2241 }
 0x1de   : > { %v10885_v0 = vpop.permute.xlu1 %2195 }
 0x1df   : > { %2564 = vrot.lane.b32.xlu0 %v10431_v45, %s15464_s26  ;;  %v2210_v18 = vsel %vm15313_vm4, %v2194_v6, %v10885_v0  ;;  %v2154_v45 = vadd.f32 %v2140_v46, %v2084_v63  ;;  %v10908_v6 = vpop.f32.mrb[75].mxu1  ;;  %vm15318_vm4 = vcmask 252928  }
 0x1e0   : > { %2479 = vrot.lane.b32.xlu1 %v2467_v57, %s15495_s19  ;;  %15518 = vst [vmem:[#allocation36_spill] sm:$0xff] %v10908_v6  ;;  %v2352_v31 = vrot.slane %v10908_v6, 6 }
 0x1e1   : > { %v10893_v43 = vpop.permute.xlu0 %1825  ;;  %v2224_v34 = vadd.f32 %v2210_v18, %v2154_v45 }
 0x1e2   : > { %v2286_v4 = vpop.permute.xlu1 %2285 }
 0x1e3   : > { %2631 = vrot.lane.b32.xlu0 %v10449_v25, %s15467_s28  ;;  %v1198_v25 = vpop.f32.mrb[76].mxu1 }
 0x1e4   : > { %2562 = vrot.lane.b32.xlu1 %v10424_v28, %s15464_s26  ;;  %v2256_v28 = vsel %vm2255_vm1, %v10825_v56, %v10882_v48  ;;  %v2350_v30 = vrot.slane %v1198_v25, 6  ;;  %v1200_v57 = vpop.f32.mrb[77].mxu1  ;;  %v2419_v56 = vrot.slane %v1198_v25, 4 }
 0x1e5   : > { %v2356_v38 = vpop.permute.xlu0 %2355  ;;  %v2270_v63 = vadd.f32 %v2256_v28, %v2224_v34  ;;  %v2353_v18 = vrot.slane %v1200_v57, 6  ;;  %v2422_v6 = vrot.slane %v1200_v57, 4  ;;  %v15521_v57 = vld [vmem:[#allocation63_spill] sm:$0xff] }
 0x1e6   : > { %v10903_v41 = vpop.permute.xlu1 %1827  ;;  %v10929_v24 = vsel %vm15327_vm3, %v2349_v23, %v2350_v30  ;;  %v1541_v30 = vrot.slane %v10372_v42, 2 }
 0x1e7   : > { %2678 = vrot.lane.b32.xlu0 %v2666_v7, %s15474_s15  ;;  %v10932_v34 = vsel %vm15327_vm3, %v2352_v31, %v2353_v18  ;;  %v2442_v31 = vsel %vm2441_vm15, %v10438_v11, %v10466_v8 }
 0x1e8   : > { %2676 = vrot.lane.b32.xlu1 %v2665_v36, %s15474_s15  ;;  %v10926_v36 = vpop.f32.mrb[78].mxu1  ;;  %15519 = vst [vmem:[#allocation44_spill] sm:$0xff] %v10932_v34 }
 0x1e9   : > { %v10916_v62 = vpop.permute.xlu0 %2357 }
 0x1ea   : > { %v10918_v46 = vpop.permute.xlu1 %2287  ;;  %v2372_v28 = vsel %vm2371_vm0, %v2356_v38, %v10916_v62 }
 0x1eb   : > { %v2302_v7 = vsel %vm15318_vm4, %v2286_v4, %v10918_v46  ;;  %2721 = vrot.lane.b32.xlu0 %v10456_v59, %s15470_s18  ;;  %v2420_v59 = vrot.slane %v10926_v36, 4  ;;  %vm2487_vm4 = vcmask 228352  }
 0x1ec   : > { %v2316_v45 = vadd.f32 %v2302_v7, %v2270_v63  ;;  %2633 = vrot.lane.b32.xlu1 %v10459_v16, %s15467_s28  ;;  %v10939_v63 = vpop.f32.mrb[79].mxu1  ;;  %v15522_v7 = vld [vmem:[#allocation65_spill] sm:$0xff] }
 0x1ed   : > { %v10936_v4 = vpop.permute.xlu0 %1897  ;;  %15520 = vst [vmem:[#allocation40_spill] sm:$0xff] %v10939_v63  ;;  %v2423_v23 = vrot.slane %v10939_v63, 4  ;;  %v10953_v18 = vsel %vm15326_vm2, %v2419_v56, %v2420_v59  ;;  %v10960_v34 = vpop.f32.mrb[80].mxu1  ;;  %v1515_v59 = vsel %vm1513_vm6, %v10488_v35, %v10684_v54 }
 0x1ee   : > { %v2386_v16 = vadd.f32 %v2372_v28, %v2316_v45  ;;  %v10941_v25 = vpop.permute.xlu1 %1895  ;;  %v15523_v45 = vld [vmem:[#allocation60_spill] sm:$0xff]  ;;  %15524 = vst [vmem:[#allocation45_spill] sm:$0xff] %v10960_v34  ;;  %v10971_v56 = vpop.f32.mrb[81].mxu1 }
 0x1ef   : > { %1509 = vrot.lane.b32.xlu0 %v10394_v33, %s15467_s28  ;;  %v2488_v28 = vsel %vm2487_vm4, %v15523_v45, %v15522_v7  ;;  %v10963_v42 = vsel %vm15326_vm2, %v2422_v6, %v2423_v23  ;;  %v1444_v33 = vsel %vm1442_vm5, %v10484_v9, %v10623_v44  ;;  %15526 = vst [vmem:[#allocation39_spill] sm:$0xff] %v10971_v56  ;;  %v15528_v6 = vld [vmem:[#allocation14_spill] sm:$0xff]  ;;  %v2550_v9 = vrot.slane %v10971_v56, 6  ;;  %v1216_v45 = vpop.f32.mrb[82].mxu1 }
 0x1f0   : > { %v2456_v38 = vadd.f32 %v2442_v31, %v2386_v16  ;;  %2723 = vrot.lane.b32.xlu1 %v15521_v57, %s15470_s18  ;;  %15525 = vst [vmem:[#allocation43_spill] sm:$0xff] %v10963_v42  ;;  %v15527_v31 = vld [vmem:[#allocation20_spill] sm:$0xff]  ;;  %v2547_v57 = vrot.slane %v10960_v34, 6  ;;  %v2548_v42 = vrot.slane %v1216_v45, 6  ;;  %v1218_v60 = vpop.f32.mrb[83].mxu1 }
 0x1f1   : > { %v10958_v63 = vpop.permute.xlu0 %1965  ;;  %v2551_v61 = vrot.slane %v1218_v60, 6  ;;  %v2619_v56 = vrot.slane %v1218_v60, 4  ;;  %v10992_v19 = vpop.f32.mrb[84].mxu1  ;;  %v1561_v60 = vsel %vm1559_vm7, %v10514_v50, %v10678_v55  ;;  %v1677_v50 = vsel %vm1675_vm9, %v10549_v39, %v10811_v47 }
 0x1f2   : > { %v10968_v11 = vpop.permute.xlu1 %2011  ;;  %v2502_v16 = vadd.f32 %v2488_v28, %v2456_v38  ;;  %v15529_v38 = vld [vmem:[#allocation13_spill] sm:$0xff]  ;;  %v2617_v49 = vrot.slane %v10992_v19, 4  ;;  %v1445_v39 = vsel %vm1442_vm5, %v10623_v44, %v10660_v53  ;;  %v1793_v44 = vsel %vm1791_vm11, %v10604_v32, %v10833_v3 }
 0x1f3   : > { %1555 = vrot.lane.b32.xlu0 %v1541_v30, %s15474_s15  ;;  %v1458_v28 = vadd.f32 %v1444_v33, %v15529_v38  ;;  %v10995_v33 = vsel %vm15327_vm3, %v2550_v9, %v2551_v61  ;;  %v10998_v38 = vsel %vm15327_vm3, %v2547_v57, %v2548_v42  ;;  %v1607_v61 = vsel %vm1605_vm8, %v10520_v29, %v10741_v27  ;;  %v15532_v42 = vld [vmem:[#allocation61_spill] sm:$0xff] }
 0x1f4   : > { %1507 = vrot.lane.b32.xlu1 %v15527_v31, %s15467_s28  ;;  %v10979_v23 = vadd.f32 %v2502_v16, %v15528_v6  ;;  %v15531_v16 = vld [vmem:[#allocation58_spill] sm:$0xff]  ;;  %v2616_v6 = vrot.slane %v1216_v45, 4  ;;  %v15533_v9 = vld [vmem:[#allocation21_spill] sm:$0xff]  ;;  %vm15547_vm3 = vcmask 506880  }
 0x1f5   : > { %v10984_v30 = vpop.permute.xlu0 %2013  ;;  %v1529_v31 = vadd.f32 %v1515_v59, %v1458_v28  ;;  %v11003_v59 = vpop.f32.mrb[85].mxu1 }
 0x1f6   : > { %v10987_v35 = vpop.permute.xlu1 %1434  ;;  %v11069_v32 = vpop.f32.mrb[86].mxu1 }
 0x1f7   : > { %1601 = vrot.lane.b32.xlu0 %v15531_v16, %s15470_s18  ;;  %v1575_v57 = vadd.f32 %v1561_v60, %v1529_v31  ;;  %v11022_v16 = vsel %vm15326_vm2, %v2616_v6, %v2617_v49  ;;  %v1747_v31 = vsel %vm1745_vm10, %v10610_v22, %v10844_v37  ;;  %v15535_v60 = vld [vmem:[#allocation62_spill] sm:$0xff]  ;;  %v1516_v22 = vsel %vm1513_vm6, %v10684_v54, %v10712_v5 }
 0x1f8   : > { %1553 = vrot.lane.b32.xlu1 %v1540_v20, %s15474_s15  ;;  %v2620_v20 = vrot.slane %v11003_v59, 4  ;;  %v15537_v6 = vld [vmem:[#allocation22_spill] sm:$0xff] }
 0x1f9   : > { %v11000_v58 = vpop.permute.xlu0 %2057  ;;  %v1621_v29 = vadd.f32 %v1607_v61, %v1575_v57 }
 0x1fa   : > { %v11005_v28 = vpop.permute.xlu1 %1967  ;;  %v11019_v45 = vsel %vm15326_vm2, %v2619_v56, %v2620_v20  ;;  %v15536_v56 = vld [vmem:[#allocation64_spill] sm:$0xff]  ;;  %vm15545_vm2 = vcmask 515072  }
 0x1fb   : > { %1671 = vrot.lane.b32.xlu0 %v15532_v42, %s15486_s23  ;;  %v1773_v42 = vrot.slane %v15535_v60, 2  ;;  %v1691_v49 = vadd.f32 %v1677_v50, %v1621_v29  ;;  %v15539_v29 = vld [vmem:[#allocation24_spill] sm:$0xff] }
 0x1fc   : > { %1599 = vrot.lane.b32.xlu1 %v15533_v9, %s15470_s18  ;;  %v15538_v9 = vld [vmem:[#allocation15_spill] sm:$0xff] }
 0x1fd   : > { %v11027_v40 = vpop.permute.xlu0 %1505  ;;  %v1761_v61 = vadd.f32 %v1747_v31, %v1691_v49  ;;  %v1459_v50 = vadd.f32 %v1445_v39, %v15538_v9  ;;  %v1839_v31 = vsel %vm1837_vm12, %v10647_v21, %v10893_v43  ;;  %v1909_v39 = vsel %vm15329_vm13, %v10654_v14, %v10941_v25  ;;  %v11072_v21 = vpop.f32.mrb[87].mxu1 }
 0x1fe   : > { %v11029_v34 = vpop.permute.xlu1 %1436 }
 0x1ff   : > { %15534 = vst [vmem:[#allocation63_spill] sm:$0xff] %v11029_v34  ;;  %1741 = vrot.lane.b32.xlu0 %v15536_v56, %s15440_s29  ;;  %v15540_v56 = vld [vmem:[#allocation23_spill] sm:$0xff]  ;;  %v1530_v54 = vadd.f32 %v1516_v22, %v1459_v50  ;;  %v1608_v22 = vsel %vm1605_vm8, %v10741_v27, %v10768_v17  ;;  %v15544_v27 = vld [vmem:[#allocation25_spill] sm:$0xff] }
 0x200   : > { %1669 = vrot.lane.b32.xlu1 %v15537_v6, %s15486_s23  ;;  %v1772_v49 = vrot.slane %v15540_v56, 2  ;;  %v1807_v6 = vadd.f32 %v1793_v44, %v1761_v61 }
 0x201   : > { %v11042_v20 = vpop.permute.xlu0 %1597 }
 0x202   : > { %v11044_v57 = vpop.permute.xlu1 %2059  ;;  %v1853_v9 = vadd.f32 %v1839_v31, %v1807_v6  ;;  %v1979_v31 = vsel %vm15328_vm14, %v10730_v2, %v10958_v63  ;;  %v2025_v2 = vsel %vm15545_vm2, %v10723_v26, %v10968_v11  ;;  %v1794_v26 = vsel %vm1791_vm11, %v10833_v3, %v10865_v1 }
 0x203   : > { %1787 = vrot.lane.b32.xlu0 %v1773_v42, %s15491_s21  ;;  %vm15549_vm2 = vcmask 498688  }
 0x204   : > { %1739 = vrot.lane.b32.xlu1 %v15539_v29, %s15440_s29  ;;  %v15541_v29 = vld [vmem:[#allocation26_spill] sm:$0xff]  ;;  %v1923_v44 = vadd.f32 %v1909_v39, %v1853_v9 }
 0x205   : > { %v11059_v60 = vpop.permute.xlu0 %2129  ;;  %v1562_v61 = vsel %vm1559_vm7, %v10678_v55, %v15541_v29  ;;  %v15543_v55 = vld [vmem:[#allocation68_spill] sm:$0xff] }
 0x206   : > { %v11062_v42 = vpop.permute.xlu1 %1551  ;;  %v1576_v14 = vadd.f32 %v1562_v61, %v1530_v54  ;;  %v2005_v6 = vrot.slane %v15543_v55, 2  ;;  %v1748_v54 = vsel %vm1745_vm10, %v10844_v37, %v10870_v52  ;;  %v1993_v9 = vadd.f32 %v1979_v31, %v1923_v44 }
 0x207   : > { %1833 = vrot.lane.b32.xlu0 %v10486_v12, %s15488_s27  ;;  %v1678_v12 = vsel %vm1675_vm9, %v10811_v47, %v10785_v15  ;;  %v2071_v37 = vsel %vm15547_vm3, %v10791_v13, %v11000_v58  ;;  %v1840_v55 = vsel %vm1837_vm12, %v10893_v43, %v10903_v41  ;;  %v15550_v13 = vld [vmem:[#allocation70_spill] sm:$0xff]  ;;  %v15551_v43 = vld [vmem:[#allocation72_spill] sm:$0xff]  ;;  %vm15553_vm3 = vcmask 490496  }
 0x208   : > { %1785 = vrot.lane.b32.xlu1 %v1772_v49, %s15491_s21  ;;  %v15542_v49 = vld [vmem:[#allocation31_spill] sm:$0xff]  ;;  %v1622_v34 = vadd.f32 %v1608_v22, %v1576_v14  ;;  %v15546_v14 = vld [vmem:[#allocation34_spill] sm:$0xff] }
 0x209   : > { %v2198_v50 = vpop.permute.xlu0 %2197 }
 0x20a   : > { %v2128_v56 = vpop.permute.xlu1 %2127  ;;  %v1692_v47 = vadd.f32 %v1678_v12, %v1622_v34  ;;  %v15548_v34 = vld [vmem:[#allocation32_spill] sm:$0xff]  ;;  %v2039_v12 = vadd.f32 %v2025_v2, %v1993_v9 }
 0x20b   : > { %1901 = vrot.lane.b32.xlu0 %v15542_v49, %s15459_s17  ;;  %v2004_v44 = vrot.slane %v15548_v34, 2 }
 0x20c   : > { %1831 = vrot.lane.b32.xlu1 %v15544_v27, %s15488_s27  ;;  %v1762_v22 = vadd.f32 %v1748_v54, %v1692_v47  ;;  %v2085_v54 = vadd.f32 %v2071_v37, %v2039_v12  ;;  %v1910_v47 = vsel %vm15329_vm13, %v10941_v25, %v10936_v4  ;;  %v15552_v37 = vld [vmem:[#allocation35_spill] sm:$0xff]  ;;  %v2211_v25 = vsel %vm15553_vm3, %v10885_v0, %v2198_v50 }
 0x20d   : > { %v11094_v39 = vpop.permute.xlu0 %2245  ;;  %vm15558_vm3 = vcmask 506880   ;;  %vm15560_vm13 = vcmask 252928  }
 0x20e   : > { %v11096_v61 = vpop.permute.xlu1 %2243  ;;  %v1808_v27 = vadd.f32 %v1794_v26, %v1762_v22 }
 0x20f   : > { %2019 = vrot.lane.b32.xlu0 %v2005_v6, %s15504_s9  ;;  %v2141_v6 = vsel %vm15549_vm2, %v10805_v51, %v2128_v56  ;;  %v1980_v51 = vsel %vm15328_vm14, %v10958_v63, %v11005_v28  ;;  %v2257_v63 = vsel %vm2255_vm1, %v10882_v48, %v11096_v61  ;;  %vm15557_vm2 = vcmask 515072  }
 0x210   : > { %1971 = vrot.lane.b32.xlu1 %v15546_v14, %s15497_s24  ;;  %v1854_v3 = vadd.f32 %v1840_v55, %v1808_v27  ;;  %v2155_v2 = vadd.f32 %v2141_v6, %v2085_v54  ;;  %v15554_v55 = vld [vmem:[#allocation77_spill] sm:$0xff]  ;;  %v15555_v6 = vld [vmem:[#allocation78_spill] sm:$0xff]  ;;  %v2026_v0 = vsel %vm15557_vm2, %v10968_v11, %v10984_v30  ;;  %v2072_v54 = vsel %vm15558_vm3, %v11000_v58, %v11044_v57 }
 0x211   : > { %v11107_v49 = vpop.permute.xlu0 %2289  ;;  %v15556_v27 = vld [vmem:[#allocation41_spill] sm:$0xff]  ;;  %vm15559_vm14 = vcmask 498688   ;;  %v1446_v58 = vsel %vm1442_vm5, %v10660_v53, %v10987_v35  ;;  %vm15562_vm2 = vcmask 490496   ;;  %v15565_v53 = vld [vmem:[#allocation16_spill] sm:$0xff]  ;;  %vm15573_vm3 = vcmask 523264  }
 0x212   : > { %v11110_v31 = vpop.permute.xlu1 %1667  ;;  %v1924_v22 = vadd.f32 %v1910_v47, %v1854_v3  ;;  %v2225_v12 = vadd.f32 %v2211_v25, %v2155_v2 }
 0x213   : > { %1973 = vrot.lane.b32.xlu0 %v15550_v13, %s15497_s24  ;;  %v2237_v13 = vrot.slane %v15555_v6, 2 }
 0x214   : > { %2017 = vrot.lane.b32.xlu1 %v2004_v44, %s15504_s9  ;;  %v1994_v44 = vadd.f32 %v1980_v51, %v1924_v22  ;;  %v2271_v48 = vadd.f32 %v2257_v63, %v2225_v12  ;;  %v2142_v51 = vsel %vm15559_vm14, %v2128_v56, %v11059_v60  ;;  %v15561_v22 = vld [vmem:[#allocation47_spill] sm:$0xff]  ;;  %vm15569_vm14 = vcmask 752640  }
 0x215   : > { %v11126_v9 = vpop.permute.xlu0 %1737 }
 0x216   : > { %v11128_v14 = vpop.permute.xlu1 %2199  ;;  %v2040_v3 = vadd.f32 %v2026_v0, %v1994_v44  ;;  %v15563_v44 = vld [vmem:[#allocation42_spill] sm:$0xff] }
 0x217   : > { %2065 = vrot.lane.b32.xlu0 %v15551_v43, %s15500_s13  ;;  %v2303_v43 = vsel %vm15560_vm13, %v10918_v46, %v11107_v49  ;;  %v2236_v56 = vrot.slane %v15563_v44, 2  ;;  %v1517_v46 = vsel %vm1513_vm6, %v10712_v5, %v11027_v40 }
 0x218   : > { %2063 = vrot.lane.b32.xlu1 %v15552_v37, %s15500_s13  ;;  %v2086_v11 = vadd.f32 %v2072_v54, %v2040_v3  ;;  %v2212_v37 = vsel %vm15562_vm2, %v2198_v50, %v11128_v14  ;;  %v2317_v63 = vadd.f32 %v2303_v43, %v2271_v48  ;;  %v1563_v54 = vsel %vm1559_vm7, %v15541_v29, %v11062_v42  ;;  %v15566_v29 = vld [vmem:[#allocation80_spill] sm:$0xff] }
 0x219   : > { %v11139_v34 = vpop.permute.xlu0 %1829  ;;  %v2258_v43 = vsel %vm2255_vm1, %v11096_v61, %v11094_v39  ;;  %v1679_v61 = vsel %vm1675_vm9, %v10785_v15, %v11110_v31  ;;  %vm15574_vm2 = vcmask 515072  }
 0x21a   : > { %v11141_v26 = vpop.permute.xlu1 %2291  ;;  %v2156_v12 = vadd.f32 %v2142_v51, %v2086_v11 }
 0x21b   : > { %2135 = vrot.lane.b32.xlu0 %v15554_v55, %s15473_s16 }
 0x21c   : > { %2133 = vrot.lane.b32.xlu1 %v15556_v27, %s15473_s16  ;;  %v1460_v27 = vadd.f32 %v1446_v58, %v15565_v53  ;;  %v2226_v0 = vadd.f32 %v2212_v37, %v2156_v12  ;;  %v15567_v12 = vld [vmem:[#allocation29_spill] sm:$0xff] }
 0x21d   : > { %v11157_v47 = vpop.permute.xlu0 %2361 }
 0x21e   : > { %v11159_v2 = vpop.permute.xlu1 %1783  ;;  %v1531_v48 = vadd.f32 %v1517_v46, %v1460_v27  ;;  %v2272_v58 = vadd.f32 %v2258_v43, %v2226_v0 }
 0x21f   : > { %2251 = vrot.lane.b32.xlu0 %v2237_v13, %s15483_s2  ;;  %v15564_v13 = vld [vmem:[#allocation79_spill] sm:$0xff]  ;;  %v1795_v15 = vsel %vm1791_vm11, %v10865_v1, %v11159_v2 }
 0x220   : > { %2203 = vrot.lane.b32.xlu1 %v15561_v22, %s15479_s0  ;;  %v1577_v22 = vadd.f32 %v1563_v54, %v1531_v48 }
 0x221   : > { %v2430_v25 = vpop.permute.xlu0 %2429 }
 0x222   : > { %v2360_v55 = vpop.permute.xlu1 %2359  ;;  %v2443_v3 = vsel %vm2441_vm15, %v10466_v8, %v2430_v25  ;;  %v2304_v8 = vsel %vm15560_vm13, %v11107_v49, %v11141_v26  ;;  %vm15577_vm13 = vcmask 506880  }
 0x223   : > { %v2373_v6 = vsel %vm2371_vm0, %v10916_v62, %v2360_v55  ;;  %2205 = vrot.lane.b32.xlu0 %v15564_v13, %s15479_s0  ;;  %v2374_v46 = vsel %vm2371_vm0, %v2360_v55, %v11157_v47  ;;  %v2318_v13 = vadd.f32 %v2304_v8, %v2272_v58 }
 0x224   : > { %v2387_v50 = vadd.f32 %v2373_v6, %v2317_v63  ;;  %2249 = vrot.lane.b32.xlu1 %v2236_v56, %s15483_s2 }
 0x225   : > { %v11189_v5 = vpop.permute.xlu0 %2477  ;;  %v2388_v27 = vadd.f32 %v2374_v46, %v2318_v13 }
 0x226   : > { %v2476_v62 = vpop.permute.xlu1 %2475  ;;  %v2457_v51 = vadd.f32 %v2443_v3, %v2387_v50  ;;  %v1749_v50 = vsel %vm1745_vm10, %v10870_v52, %v11126_v9 }
 0x227   : > { %v2489_v11 = vsel %vm2487_vm4, %v15522_v7, %v2476_v62  ;;  %v1609_v7 = vsel %vm1605_vm8, %v10768_v17, %v11042_v20  ;;  %v2490_v55 = vsel %vm2487_vm4, %v2476_v62, %v11189_v5  ;;  %v15570_v62 = vld [vmem:[#allocation69_spill] sm:$0xff] }
 0x228   : > { %v2503_v37 = vadd.f32 %v2489_v11, %v2457_v51  ;;  %1903 = vrot.lane.b32.xlu1 %v15566_v29, %s15459_s17  ;;  %v1623_v6 = vadd.f32 %v1609_v7, %v1577_v22  ;;  %v15568_v22 = vld [vmem:[#allocation33_spill] sm:$0xff]  ;;  %v15571_v7 = vld [vmem:[#allocation76_spill] sm:$0xff] }
 0x229   : > { %v11201_v44 = vpop.permute.xlu0 %1969 }
 0x22a   : > { %v11203_v56 = vpop.permute.xlu1 %1899  ;;  %v2510_v63 = vadd.f32 %v2503_v37, %v15567_v12  ;;  %v1693_v53 = vadd.f32 %v1679_v61, %v1623_v6  ;;  %v1841_v37 = vsel %vm1837_vm12, %v10903_v41, %v11139_v34 }
 0x22b   : > { %v1911_v1 = vsel %vm15569_vm14, %v10936_v4, %v11203_v56  ;;  %v1981_v4 = vsel %vm15573_vm3, %v11005_v28, %v11201_v44  ;;  %vm15578_vm14 = vcmask 498688   ;;  %vm15579_vm3 = vcmask 490496  }
 0x22c   : > { %v1763_v48 = vadd.f32 %v1749_v50, %v1693_v53 }
 0x22d   : > { %v11214_v49 = vpop.permute.xlu0 %2061 }
 0x22e   : > { %v11216_v0 = vpop.permute.xlu1 %2431  ;;  %v1809_v11 = vadd.f32 %v1795_v15, %v1763_v48  ;;  %v15575_v15 = vld [vmem:[#allocation75_spill] sm:$0xff] }
 0x22f   : > { %v2444_v17 = vsel %vm2441_vm15, %v2430_v25, %v11216_v0 }
 0x230   : > { %v2458_v54 = vadd.f32 %v2444_v17, %v2388_v27  ;;  %v1855_v8 = vadd.f32 %v1841_v37, %v1809_v11  ;;  %v15572_v27 = vld [vmem:[#allocation73_spill] sm:$0xff] }
 0x231   : > { %v11228_v3 = vpop.permute.xlu0 %2560  ;;  %v15576_v37 = vld [vmem:[#allocation57_spill] sm:$0xff] }
 0x232   : > { %v2504_v51 = vadd.f32 %v2490_v55, %v2458_v54  ;;  %v11230_v43 = vpop.permute.xlu1 %2015  ;;  %v1925_v6 = vadd.f32 %v1911_v1, %v1855_v8 }
 0x234   : > { %v11233_v52 = vadd.f32 %v2504_v51, %v15568_v22  ;;  %v1995_v54 = vadd.f32 %v1981_v4, %v1925_v6 }
 0x235   : > { %v2628_v58 = vpop.permute.xlu0 %2627 }
 0x236   : > { %v2559_v25 = vpop.permute.xlu1 %2558  ;;  %v2641_v61 = vsel %vm1513_vm6, %v15571_v7, %v2628_v58 }
 0x237   : > { %v2572_v29 = vsel %vm1442_vm5, %v15570_v62, %v2559_v25  ;;  %v2573_v51 = vsel %vm1442_vm5, %v2559_v25, %v11228_v3 }
 0x238   : > { %v2586_v12 = vadd.f32 %v2572_v29, %v10979_v23  ;;  %v2027_v23 = vsel %vm15574_vm2, %v10984_v30, %v11230_v43  ;;  %v2587_v62 = vadd.f32 %v2573_v51, %v2510_v63  ;;  %v2073_v30 = vsel %vm15577_vm13, %v11044_v57, %v11214_v49 }
 0x239   : > { %v11246_v46 = vpop.permute.xlu0 %2674  ;;  %v2041_v22 = vadd.f32 %v2027_v23, %v1995_v54  ;;  %vm15581_vm2 = vcmask 252928   ;;  %vm15591_vm13 = vcmask 1041408  }
 0x23a   : > { %v2673_v13 = vpop.permute.xlu1 %2672  ;;  %v2655_v53 = vadd.f32 %v2641_v61, %v2586_v12 }
 0x23b   : > { %v2686_v41 = vsel %vm1559_vm7, %v15572_v27, %v2673_v13  ;;  %v2087_v7 = vadd.f32 %v2073_v30, %v2041_v22  ;;  %v2687_v6 = vsel %vm1559_vm7, %v2673_v13, %v11246_v46 }
 0x23c   : > { %v2700_v50 = vadd.f32 %v2686_v41, %v2655_v53 }
 0x23d   : > { %v2718_v17 = vpop.permute.xlu0 %2717 }
 0x23e   : > { %v2731_v55 = vsel %vm1605_vm8, %v15575_v15, %v2718_v17  ;;  %v11258_v48 = vpop.permute.xlu1 %2131 }
 0x23f   : > { %v2745_v11 = vadd.f32 %v2731_v55, %v2700_v50  ;;  %v2143_v12 = vsel %vm15578_vm14, %v11059_v60, %v11258_v48  ;;  %vm15592_vm14 = vcmask 1043456  }
 0x240   : > { %v2157_v57 = vadd.f32 %v2143_v12, %v2087_v7 }
 0x241   : > { %v11263_v1 = vadd.f32 %v15576_v37, %v2745_v11  ;;  %v11265_v28 = vpop.permute.xlu0 %2201 }
 0x242   : > { %v2630_v29 = vpop.permute.xlu1 %2629  ;;  %v2213_v60 = vsel %vm15579_vm3, %v11128_v14, %v11265_v28  ;;  %vm15597_vm3 = vcmask 752640  }
 0x243   : > { %v15332_v8 = vmax.f32 %v11263_v1, 0.0  ;;  %v2642_v25 = vsel %vm1513_vm6, %v2628_v58, %v2630_v29  ;;  %v2227_v4 = vadd.f32 %v2213_v60, %v2157_v57 }
 0x244   : > { %v2656_v61 = vadd.f32 %v2642_v25, %v2587_v62 }
 0x245   : > { %v11277_v53 = vpop.permute.xlu0 %2293  ;;  %2779 = vrot.lane.b32.xlu0 %v15332_v8, %s15486_s23 }
 0x246   : > { %v2701_v63 = vadd.f32 %v2687_v6, %v2656_v61  ;;  %v2720_v27 = vpop.permute.xlu1 %2719  ;;  %v2305_v14 = vsel %vm15581_vm2, %v11141_v26, %v11277_v53  ;;  %v15582_v6 = vld [vmem:[#allocation53_spill] sm:$0xff]  ;;  %vm15598_vm2 = vcmask 523264  }
 0x247   : > { %v2732_v58 = vsel %vm1605_vm8, %v2718_v17, %v2720_v27 }
 0x248   : > { %v2746_v41 = vadd.f32 %v2732_v58, %v2701_v63 }
 0x249   : > { %v11286_v50 = vpop.permute.xlu0 %1438 }
 0x24a   : > { %15580 = vst [vmem:[#allocation65_spill] sm:$0xff] %v11286_v50  ;;  %v11289_v13 = vadd.f32 %v15576_v37, %v2746_v41  ;;  %v11291_v23 = vpop.permute.xlu1 %2247 }
 0x24b   : > { %v2259_v54 = vsel %vm2255_vm1, %v11094_v39, %v11291_v23 }
 0x24c   : > { %v15333_v15 = vmax.f32 %v11289_v13, 0.0  ;;  %v2273_v55 = vadd.f32 %v2259_v54, %v2227_v4 }
 0x24d   : > { %v11300_v17 = vpop.permute.xlu0 %2433 }
 0x24e   : > { %v2319_v51 = vadd.f32 %v2305_v14, %v2273_v55  ;;  %v11302_v11 = vpop.permute.xlu1 %2363  ;;  %2781 = vrot.lane.b32.xlu1 %v15333_v15, %s15486_s23  ;;  %v2445_v62 = vsel %vm2441_vm15, %v11216_v0, %v11300_v17 }
 0x24f   : > { %v2375_v39 = vsel %vm2371_vm0, %v11157_v47, %v11302_v11 }
 0x250   : > { %v2389_v22 = vadd.f32 %v2375_v39, %v2319_v51 }
 0x251   : > { %v11313_v30 = vpop.permute.xlu0 %2564 }
 0x252   : > { %v11315_v26 = vpop.permute.xlu1 %2479  ;;  %v2459_v12 = vadd.f32 %v2445_v62, %v2389_v22 }
 0x253   : > { %v2491_v25 = vsel %vm2487_vm4, %v11189_v5, %v11315_v26 }
 0x254   : > { %v2505_v7 = vadd.f32 %v2491_v25, %v2459_v12 }
 0x255   : > { %v2632_v61 = vpop.permute.xlu0 %2631 }
 0x256   : > { %v2512_v57 = vadd.f32 %v2505_v7, %v15582_v6  ;;  %v2563_v63 = vpop.permute.xlu1 %2562  ;;  %v2643_v0 = vsel %vm1513_vm6, %v2630_v29, %v2632_v61 }
 0x257   : > { %v2574_v47 = vsel %vm1442_vm5, %v11228_v3, %v2563_v63  ;;  %v2575_v54 = vsel %vm1442_vm5, %v2563_v63, %v11313_v30 }
 0x258   : > { %v2588_v60 = vadd.f32 %v2574_v47, %v11233_v52  ;;  %v2589_v51 = vadd.f32 %v2575_v54, %v2512_v57 }
 0x259   : > { %v11325_v58 = vpop.permute.xlu0 %2678 }
 0x25a   : > { %v2677_v41 = vpop.permute.xlu1 %2676  ;;  %v2657_v4 = vadd.f32 %v2643_v0, %v2588_v60 }
 0x25b   : > { %v2688_v5 = vsel %vm1559_vm7, %v11246_v46, %v2677_v41  ;;  %v2689_v12 = vsel %vm1559_vm7, %v2677_v41, %v11325_v58 }
 0x25c   : > { %v2702_v55 = vadd.f32 %v2688_v5, %v2657_v4  ;;  %v1299_v62 = vpop.f32.mrb[64].mxu0 }
 0x25d   : > { %v2722_v14 = vpop.permute.xlu0 %2721  ;;  %v8572_v46 = vpop.f32.mrb[65].mxu0 }
 0x25e   : > { %v2733_v39 = vsel %vm1605_vm8, %v2720_v27, %v2722_v14  ;;  %v11332_v3 = vpop.permute.xlu1 %2633 }
 0x25f   : > { %v2747_v52 = vadd.f32 %v2733_v39, %v2702_v55  ;;  %v2644_v29 = vsel %vm1513_vm6, %v2632_v61, %v11332_v3  ;;  %v15584_v55 = vld [vmem:[#allocation48_spill] sm:$0xff]  ;;  %v15585_v39 = vld [vmem:[#allocation49_spill] sm:$0xff] }
 0x260   : > { %v2658_v22 = vadd.f32 %v2644_v29, %v2589_v51  ;;  %v1303_v47 = vpop.f32.mrb[66].mxu0  ;;  %v2469_v51 = vrot.slane %v10926_v36, 2 }
 0x261   : > { %v11339_v25 = vadd.f32 %v15576_v37, %v2747_v52  ;;  %v8575_v61 = vpop.f32.mrb[67].mxu0 }
 0x262   : > { %v2703_v7 = vadd.f32 %v2689_v12, %v2658_v22  ;;  %v11341_v6 = vpop.permute.xlu1 %2723  ;;  %v15587_v22 = vld [vmem:[#allocation51_spill] sm:$0xff]  ;;  %v11383_v61 = vpop.permute.xlu0 %1509 }
 0x263   : > { %v15331_v27 = vmax.f32 %v11339_v25, 0.0  ;;  %v2734_v57 = vsel %vm1605_vm8, %v2722_v14, %v11341_v6  ;;  %v2468_v62 = vrot.slane %v15587_v22, 2  ;;  %15588 = vst [vmem:[#allocation20_spill] sm:$0xff] %v11383_v61 }
 0x264   : > { %v2748_v63 = vadd.f32 %v2734_v57, %v2703_v7  ;;  %v1307_v41 = vpop.f32.mrb[68].mxu0  ;;  %v2668_v7 = vrot.slane %v11003_v59, 2  ;;  %v2667_v59 = vrot.slane %v10992_v19, 2 }
 0x265   : > { %2783 = vrot.lane.b32.xlu0 %v15331_v27, %s15486_s23  ;;  %v8578_v4 = vpop.f32.mrb[69].mxu0 }
 0x266   : > { %v11350_v60 = vadd.f32 %v15576_v37, %v2748_v63  ;;  %v11373_v46 = vpop.permute.xlu1 %1507 }
 0x268   : > { %15583 = vst [vmem:[#allocation60_spill] sm:$0xff] %v11350_v60  ;;  %v15330_v0 = vmax.f32 %v11350_v60, 0.0  ;;  %v1311_v54 = vpop.f32.mrb[70].mxu0 }
 0x269   : > { %2297 = vrot.lane.b32.xlu0 %v10905_v10, %s15485_s30  ;;  %v8581_v5 = vpop.f32.mrb[71].mxu0 }
 0x26a   : > { %2785 = vrot.lane.b32.xlu1 %v15330_v0, %s15486_s23  ;;  %v11381_v63 = vpop.permute.xlu1 %1553 }
 0x26c   : > { %v1315_v14 = vpop.f32.mrb[72].mxu0 }
 0x26d   : > { %2367 = vrot.lane.b32.xlu0 %v10929_v24, %s15490_s14  ;;  %v8584_v10 = vpop.f32.mrb[73].mxu0  ;;  %v15586_v24 = vld [vmem:[#allocation54_spill] sm:$0xff] }
 0x26e   : > { %2295 = vrot.lane.b32.xlu1 %v15584_v55, %s15485_s30  ;;  %v11391_v4 = vpop.permute.xlu1 %1599 }
 0x270   : > { %v1319_v52 = vpop.f32.mrb[74].mxu0 }
 0x271   : > { %2437 = vrot.lane.b32.xlu0 %v10953_v18, %s15492_s20  ;;  %v8587_v29 = vpop.f32.mrb[75].mxu0 }
 0x272   : > { %2365 = vrot.lane.b32.xlu1 %v15585_v39, %s15490_s14  ;;  %v11398_v55 = vpop.permute.xlu1 %1669 }
 0x274   : > { %v1323_v12 = vpop.f32.mrb[76].mxu0 }
 0x275   : > { %2483 = vrot.lane.b32.xlu0 %v2469_v51, %s15495_s19  ;;  %v8590_v36 = vpop.f32.mrb[77].mxu0 }
 0x276   : > { %2435 = vrot.lane.b32.xlu1 %v15586_v24, %s15492_s20  ;;  %v11402_v10 = vpop.permute.xlu1 %1739 }
 0x278   : > { %v1327_v18 = vpop.f32.mrb[78].mxu0 }
 0x279   : > { %2568 = vrot.lane.b32.xlu0 %v10995_v33, %s15464_s26  ;;  %v8593_v57 = vpop.f32.mrb[79].mxu0 }
 0x27a   : > { %2481 = vrot.lane.b32.xlu1 %v2468_v62, %s15495_s19  ;;  %v11406_v24 = vpop.permute.xlu1 %1785 }
 0x27c   : > { %v1331_v47 = vpop.f32.mrb[80].mxu0 }
 0x27d   : > { %2637 = vrot.lane.b32.xlu0 %v11019_v45, %s15467_s28  ;;  %v8596_v33 = vpop.f32.mrb[81].mxu0 }
 0x27e   : > { %2566 = vrot.lane.b32.xlu1 %v10998_v38, %s15464_s26  ;;  %v11394_v38 = vpop.permute.xlu0 %1555  ;;  %v1832_v18 = vpop.permute.xlu1 %1831 }
 0x27f   : > { %v1565_v27 = vsel %vm1559_vm7, %v11381_v63, %v11394_v38 }
 0x280   : > { %v1335_v41 = vpop.f32.mrb[82].mxu0 }
 0x281   : > { %2682 = vrot.lane.b32.xlu0 %v2668_v7, %s15474_s15  ;;  %v8599_v45 = vpop.f32.mrb[83].mxu0 }
 0x282   : > { %2635 = vrot.lane.b32.xlu1 %v11022_v16, %s15467_s28  ;;  %v11400_v19 = vpop.permute.xlu0 %1601 }
 0x283   : > { %15589 = vst [vmem:[#allocation14_spill] sm:$0xff] %v11400_v19  ;;  %v1611_v15 = vsel %vm1605_vm8, %v11391_v4, %v11400_v19 }
 0x284   : > { %v1339_v54 = vpop.f32.mrb[84].mxu0 }
 0x285   : > { %2727 = vrot.lane.b32.xlu0 %v11072_v21, %s15470_s18  ;;  %v8602_v5 = vpop.f32.mrb[85].mxu0  ;;  %v11415_v54 = vpop.permute.xlu1 %1971 }
 0x286   : > { %2680 = vrot.lane.b32.xlu1 %v2667_v59, %s15474_s15  ;;  %v11404_v39 = vpop.permute.xlu0 %1671 }
 0x287   : > { %15590 = vst [vmem:[#allocation13_spill] sm:$0xff] %v11404_v39 }
 0x288   : > { %v1343_v16 = vpop.f32.mrb[86].mxu0 }
 0x289   : > { %v8605_v14 = vpop.f32.mrb[87].mxu0 }
 0x28a   : > { %2725 = vrot.lane.b32.xlu1 %v11069_v32, %s15470_s18  ;;  %v11408_v62 = vpop.permute.xlu0 %1741 }
 0x28c   : > { %v1347_v51 = vpop.f32.mrb[88].mxu0 }
 0x28d   : > { %v8608_v21 = vpop.f32.mrb[89].mxu0 }
 0x28e   : > { %v11410_v7 = vpop.permute.xlu0 %1787 }
 0x290   : > { %v1351_v52 = vpop.f32.mrb[90].mxu0 }
 0x291   : > { %v8611_v29 = vpop.f32.mrb[91].mxu0 }
 0x292   : > { %v11419_v16 = vpop.permute.xlu0 %1833 }
 0x294   : > { %v1355_v22 = vpop.f32.mrb[92].mxu0 }
 0x295   : > { %v8614_v32 = vpop.f32.mrb[93].mxu0  ;;  %v11427_v22 = vpop.permute.xlu1 %2017 }
 0x296   : > { %v1902_v32 = vpop.permute.xlu0 %1901 }
 0x298   : > { %v1359_v12 = vpop.f32.mrb[94].mxu0 }
 0x299   : > { %v8617_v36 = vpop.f32.mrb[95].mxu0  ;;  %v2553_v57 = vrot.slane %v1359_v12, 6  ;;  %v11429_v12 = vpop.permute.xlu1 %2063 }
 0x29a   : > { %v11431_v36 = vpop.permute.xlu0 %2019 }
 0x29c   : > { %v1364_v47 = vpop.f32.mrb[96].mxu0 }
 0x29d   : > { %v2554_v33 = vrot.slane %v1364_v47, 6  ;;  %v8620_v59 = vpop.f32.mrb[97].mxu0  ;;  %v2622_v41 = vrot.slane %v1364_v47, 4 }
 0x29e   : > { %v11435_v47 = vpop.permute.xlu0 %1973 }
 0x29f   : > { %v11413_v45 = vsel %vm15591_vm13, %v2553_v57, %v2554_v33  ;;  %v11433_v57 = vpop.permute.xlu1 %2133  ;;  %v15594_v33 = vld [vmem:[#allocation63_spill] sm:$0xff]  ;;  %vm15599_vm13 = vcmask 515072  }
 0x2a0   : > { %v11417_v5 = vpop.f32.mrb[98].mxu0  ;;  %v1448_v59 = vsel %vm1442_vm5, %v15594_v33, %v11286_v50 }
 0x2a1   : > { %v2623_v14 = vrot.slane %v11417_v5, 4  ;;  %v8623_v51 = vpop.f32.mrb[99].mxu0 }
 0x2a2   : > { %v11445_v51 = vpop.permute.xlu0 %2065 }
 0x2a3   : > { %v11423_v21 = vsel %vm15592_vm14, %v2622_v41, %v2623_v14  ;;  %v11440_v41 = vpop.permute.xlu1 %2203  ;;  %v1519_v14 = vsel %vm1513_vm6, %v11373_v46, %v11383_v61  ;;  %v1447_v61 = vsel %vm1442_vm5, %v10987_v35, %v15594_v33  ;;  %v1564_v35 = vsel %vm1559_vm7, %v11062_v42, %v11381_v63  ;;  %vm15600_vm14 = vmmov %vm15597_vm3 }
 0x2a4   : > { %v11425_v52 = vpop.f32.mrb[100].mxu0  ;;  %v1797_v33 = vsel %vm1791_vm11, %v11406_v24, %v11410_v7  ;;  %v1680_v42 = vsel %vm1675_vm9, %v11110_v31, %v11398_v55  ;;  %v1842_v31 = vsel %vm1837_vm12, %v11139_v34, %v1832_v18 }
 0x2a5   : > { %15593 = vst [vmem:[#allocation19_spill] sm:$0xff] %v11425_v52  ;;  %v8626_v29 = vpop.f32.mrb[101].mxu0 }
 0x2a6   : > { %v15595_v29 = vld [vmem:[#allocation18_spill] sm:$0xff] }
 0x2a7   : > { %v1462_v0 = vadd.f32 %v1448_v59, %v15595_v29  ;;  %v11454_v50 = vpop.permute.xlu1 %2249  ;;  %v1681_v59 = vsel %vm1675_vm9, %v11398_v55, %v11404_v39  ;;  %v11462_v29 = vpop.permute.xlu0 %2135  ;;  %v1983_v55 = vsel %vm15598_vm2, %v11415_v54, %v11435_v47 }
 0x2a9   : > { %v1533_v8 = vadd.f32 %v1519_v14, %v1462_v0  ;;  %v1518_v0 = vsel %vm1513_vm6, %v11027_v40, %v11373_v46  ;;  %v1610_v40 = vsel %vm1605_vm8, %v11042_v20, %v11391_v4  ;;  %v1843_v46 = vsel %vm1837_vm12, %v1832_v18, %v11419_v16 }
 0x2aa   : > { %v1750_v20 = vsel %vm1745_vm10, %v11126_v9, %v11402_v10 }
 0x2ab   : > { %v1579_v60 = vadd.f32 %v1565_v27, %v1533_v8  ;;  %v1751_v8 = vsel %vm1745_vm10, %v11402_v10, %v11408_v62  ;;  %v15596_v27 = vld [vmem:[#allocation17_spill] sm:$0xff]  ;;  %v11477_v39 = vpop.permute.xlu1 %1903  ;;  %v2029_v10 = vsel %vm15599_vm13, %v11427_v22, %v11431_v36 }
 0x2ac   : > { %v1461_v14 = vadd.f32 %v1447_v61, %v15596_v27  ;;  %v11484_v61 = vpop.permute.xlu0 %2251  ;;  %v1913_v63 = vsel %vm15597_vm3, %v1902_v32, %v11477_v39  ;;  %v1796_v27 = vsel %vm1791_vm11, %v11159_v2, %v11406_v24  ;;  %v1912_v2 = vsel %vm15600_vm14, %v11203_v56, %v1902_v32  ;;  %vm15601_vm3 = vmmov %vm15598_vm2 }
 0x2ad   : > { %v1625_v52 = vadd.f32 %v1611_v15, %v1579_v60  ;;  %v1982_v18 = vsel %vm15601_vm3, %v11201_v44, %v11415_v54  ;;  %vm15602_vm2 = vcmask 506880   ;;  %v2028_v32 = vsel %vm15599_vm13, %v11230_v43, %v11427_v22 }
 0x2ae   : > { %v1532_v15 = vadd.f32 %v1518_v0, %v1461_v14  ;;  %vm15604_vm14 = vmmov %vm15602_vm2  ;;  %vm15605_vm3 = vcmask 498688   ;;  %vm15609_vm13 = vcmask 490496  }
 0x2af   : > { %v1695_v19 = vadd.f32 %v1681_v59, %v1625_v52 }
 0x2b0   : > { %v1578_v52 = vadd.f32 %v1564_v35, %v1532_v15  ;;  %v11497_v14 = vpop.permute.xlu0 %2205 }
 0x2b1   : > { %v1765_v60 = vadd.f32 %v1751_v8, %v1695_v19 }
 0x2b2   : > { %v1624_v19 = vadd.f32 %v1610_v40, %v1578_v52 }
 0x2b3   : > { %v1811_v59 = vadd.f32 %v1797_v33, %v1765_v60 }
 0x2b4   : > { %v1694_v4 = vadd.f32 %v1680_v42, %v1624_v19  ;;  %v15603_v42 = vmax.f32 %v11289_v13, 0.0  ;;  %v2074_v13 = vsel %vm15604_vm14, %v11214_v49, %v11429_v12  ;;  %vm15610_vm14 = vmmov %vm15609_vm13 }
 0x2b5   : > { %v1857_v0 = vadd.f32 %v1843_v46, %v1811_v59  ;;  %v2075_v59 = vsel %vm15602_vm2, %v11429_v12, %v11445_v51  ;;  %vm15608_vm2 = vmmov %vm15605_vm3 }
 0x2b6   : > { %v1764_v35 = vadd.f32 %v1750_v20, %v1694_v4  ;;  %v2145_v20 = vsel %vm15605_vm3, %v11433_v57, %v11462_v29  ;;  %v15606_v4 = vmax.f32 %v11263_v1, 0.0  ;;  %v2144_v49 = vsel %vm15608_vm2, %v11258_v48, %v11433_v57 }
 0x2b7   : > { %v1927_v8 = vadd.f32 %v1913_v63, %v1857_v0  ;;  %v2780_v60 = vpop.permute.xlu0 %2779  ;;  %v2260_v57 = vsel %vm2255_vm1, %v11291_v23, %v11454_v50  ;;  %vm15613_vm3 = vcmask 252928  }
 0x2b8   : > { %v1810_v33 = vadd.f32 %v1796_v27, %v1764_v35  ;;  %v15607_v27 = vmax.f32 %v11339_v25, 0.0  ;;  %v2214_v25 = vsel %vm15609_vm13, %v11265_v28, %v11440_v41  ;;  %vm15614_vm2 = vmmov %vm15613_vm3  ;;  %vm3055_vm13 = vcmask 1045504  }
 0x2b9   : > { %v1997_v15 = vadd.f32 %v1983_v55, %v1927_v8 }
 0x2ba   : > { %v1856_v9 = vadd.f32 %v1842_v31, %v1810_v33  ;;  %v2215_v33 = vsel %vm15610_vm14, %v11440_v41, %v11497_v14  ;;  %v2261_v41 = vsel %vm2255_vm1, %v11454_v50, %v11484_v61  ;;  %v15616_v50 = vld [vmem:[#allocation59_spill] sm:$0xff]  ;;  %vm2904_vm14 = vcmask 48128  }
 0x2bb   : > { %v2043_v40 = vadd.f32 %v2029_v10, %v1997_v15 }
 0x2bc   : > { %v1926_v52 = vadd.f32 %v1912_v2, %v1856_v9  ;;  %v15611_v9 = vld [vmem:[#allocation55_spill] sm:$0xff] }
 0x2bd   : > { %v2089_v19 = vadd.f32 %v2075_v59, %v2043_v40  ;;  %v15612_v40 = vld [vmem:[#allocation50_spill] sm:$0xff] }
 0x2be   : > { %v1996_v44 = vadd.f32 %v1982_v18, %v1926_v52 }
 0x2bf   : > { %v2159_v31 = vadd.f32 %v2145_v20, %v2089_v19 }
 0x2c0   : > { %v2782_v24 = vpop.permute.xlu1 %2781  ;;  %v2042_v22 = vadd.f32 %v2028_v32, %v1996_v44 }
 0x2c1   : > { %v2793_v56 = vsel %vm1675_vm9, %v2780_v60, %v2782_v24  ;;  %v2229_v48 = vadd.f32 %v2215_v33, %v2159_v31  ;;  %v15618_v33 = vld [vmem:[#allocation45_spill] sm:$0xff] }
 0x2c2   : > { %v11538_v8 = vmax.f32 %v15606_v4, %v2793_v56  ;;  %v2088_v1 = vadd.f32 %v2074_v13, %v2042_v22 }
 0x2c4   : > { %v2158_v15 = vadd.f32 %v2144_v49, %v2088_v1 }
 0x2c6   : > { %v2228_v10 = vadd.f32 %v2214_v25, %v2158_v15 }
 0x2c8   : > { %v2274_v52 = vadd.f32 %v2260_v57, %v2228_v10 }
 0x2d7   : > { %v2784_v46 = vpop.permute.xlu0 %2783 }
 0x2d8   : > { %v2794_v34 = vsel %vm1675_vm9, %v2782_v24, %v2784_v46  ;;  %v15615_v24 = vld [vmem:[#allocation52_spill] sm:$0xff] }
 0x2d9   : > { %v11518_v63 = vmax.f32 %v15603_v42, %v2794_v34  ;;  %v2275_v34 = vadd.f32 %v2261_v41, %v2229_v48 }
 0x2db   : > { %v11524_v0 = vpop.permute.xlu0 %2297  ;;  %2822 = vrot.lane.b32.xlu1 %v11518_v63, %s15464_s26 }
 0x2dc   : > { %v11528_v54 = vpop.permute.xlu1 %2785 }
 0x2dd   : > { %v2795_v43 = vsel %vm1675_vm9, %v2784_v46, %v11528_v54  ;;  %v1542_v46 = vrot.slane %v15615_v24, 2 }
 0x2de   : > { %v11544_v35 = vmax.f32 %v15607_v27, %v2795_v43 }
 0x2df   : > { %v11549_v12 = vpop.permute.xlu0 %2367  ;;  %2820 = vrot.lane.b32.xlu1 %v11538_v8, %s15464_s26 }
 0x2e0   : > { %2824 = vrot.lane.b32.xlu0 %v11544_v35, %s15464_s26  ;;  %v2296_v55 = vpop.permute.xlu1 %2295 }
 0x2e1   : > { %v2306_v2 = vsel %vm15613_vm3, %v11277_v53, %v2296_v55  ;;  %v2307_v23 = vsel %vm15614_vm2, %v2296_v55, %v11524_v0  ;;  %vm15646_vm3 = vcmask 506880   ;;  %vm15647_vm2 = vcmask 498688  }
 0x2e2   : > { %v2320_v19 = vadd.f32 %v2306_v2, %v2274_v52  ;;  %v2321_v53 = vadd.f32 %v2307_v23, %v2275_v34 }
 0x2e3   : > { %v11564_v60 = vpop.permute.xlu0 %2437  ;;  %1511 = vrot.lane.b32.xlu1 %v15611_v9, %s15467_s28 }
 0x2e4   : > { %1440 = vrot.lane.b32.xlu0 %v15612_v40, %s15464_s26  ;;  %v2366_v28 = vpop.permute.xlu1 %2365 }
 0x2e5   : > { %v2376_v18 = vsel %vm2371_vm0, %v11302_v11, %v2366_v28  ;;  %v2377_v59 = vsel %vm2371_vm0, %v2366_v28, %v11549_v12 }
 0x2e6   : > { %v2390_v11 = vadd.f32 %v2376_v18, %v2320_v19  ;;  %v2391_v13 = vadd.f32 %v2377_v59, %v2321_v53 }
 0x2e7   : > { %v11582_v42 = vpop.permute.xlu0 %2483  ;;  %1603 = vrot.lane.b32.xlu1 %v15616_v50, %s15470_s18 }
 0x2e8   : > { %1557 = vrot.lane.b32.xlu0 %v1542_v46, %s15474_s15  ;;  %v2436_v56 = vpop.permute.xlu1 %2435 }
 0x2e9   : > { %v2446_v32 = vsel %vm2441_vm15, %v11300_v17, %v2436_v56  ;;  %v2447_v44 = vsel %vm2441_vm15, %v2436_v56, %v11564_v60  ;;  %v15617_v17 = vld [vmem:[#allocation56_spill] sm:$0xff] }
 0x2ea   : > { %v2460_v4 = vadd.f32 %v2446_v32, %v2390_v11  ;;  %v2461_v43 = vadd.f32 %v2447_v44, %v2391_v13  ;;  %v15620_v13 = vld [vmem:[#allocation27_spill] sm:$0xff] }
 0x2eb   : > { %v11591_v20 = vpop.permute.xlu0 %2568 }
 0x2ec   : > { %v2482_v22 = vpop.permute.xlu1 %2481 }
 0x2ed   : > { %v2492_v27 = vsel %vm2487_vm4, %v11315_v26, %v2482_v22  ;;  %v2493_v31 = vsel %vm2487_vm4, %v2482_v22, %v11582_v42  ;;  %v15622_v22 = vld [vmem:[#allocation67_spill] sm:$0xff] }
 0x2ee   : > { %v2506_v49 = vadd.f32 %v2492_v27, %v2460_v4  ;;  %v2507_v1 = vadd.f32 %v2493_v31, %v2461_v43  ;;  %v15621_v4 = vld [vmem:[#allocation66_spill] sm:$0xff]  ;;  %v15623_v27 = vld [vmem:[#allocation28_spill] sm:$0xff] }
 0x2ef   : > { %v11597_v55 = vpop.permute.xlu0 %2637  ;;  %v1774_v43 = vrot.slane %v15621_v4, 2  ;;  %v15624_v31 = vld [vmem:[#allocation30_spill] sm:$0xff] }
 0x2f0   : > { %v2513_v25 = vadd.f32 %v2506_v49, %v15617_v17  ;;  %v2514_v15 = vadd.f32 %v2507_v1, %v15618_v33  ;;  %v2567_v48 = vpop.permute.xlu1 %2566  ;;  %v15625_v49 = vld [vmem:[#allocation71_spill] sm:$0xff]  ;;  %v15626_v17 = vld [vmem:[#allocation74_spill] sm:$0xff]  ;;  %v15628_v33 = vld [vmem:[#allocation12_spill] sm:$0xff] }
 0x2f1   : > { %v2576_v9 = vsel %vm1442_vm5, %v11313_v30, %v2567_v48  ;;  %v2577_v10 = vsel %vm1442_vm5, %v2567_v48, %v11591_v20  ;;  %v2006_v1 = vrot.slane %v15625_v49, 2  ;;  %v15637_v4 = vld [vmem:[#allocation46_spill] sm:$0xff] }
 0x2f2   : > { %v2590_v41 = vadd.f32 %v2576_v9, %v2513_v25  ;;  %v2591_v2 = vadd.f32 %v2577_v10, %v2514_v15  ;;  %v15627_v25 = vld [vmem:[#allocation37_spill] sm:$0xff]  ;;  %v15629_v15 = vld [vmem:[#allocation38_spill] sm:$0xff]  ;;  %v15631_v9 = vld [vmem:[#allocation43_spill] sm:$0xff] }
 0x2f3   : > { %v11605_v26 = vpop.permute.xlu0 %2682  ;;  %v2238_v48 = vrot.slane %v15629_v15, 2  ;;  %v15632_v10 = vld [vmem:[#allocation44_spill] sm:$0xff]  ;;  %v11746_v49 = vld [vmem:[%s15211_s3 + $0x38] sm:$0xff] }
 0x2f4   : > { %v2636_v57 = vpop.permute.xlu1 %2635 }
 0x2f5   : > { %v2645_v40 = vsel %vm1513_vm6, %v11332_v3, %v2636_v57  ;;  %v2646_v28 = vsel %vm1513_vm6, %v2636_v57, %v11597_v55  ;;  %v15630_v57 = vld [vmem:[#allocation36_spill] sm:$0xff] }
 0x2f6   : > { %v2659_v46 = vadd.f32 %v2645_v40, %v2590_v41  ;;  %v2660_v52 = vadd.f32 %v2646_v28, %v2591_v2  ;;  %v15633_v40 = vld [vmem:[#allocation40_spill] sm:$0xff]  ;;  %v2669_v41 = vrot.slane %v11417_v5, 2  ;;  %v15634_v2 = vld [vmem:[#allocation19_spill] sm:$0xff] }
 0x2f7   : > { %v11615_v34 = vpop.permute.xlu0 %2727  ;;  %v2470_v28 = vrot.slane %v15633_v40, 2 }
 0x2f8   : > { %v2681_v23 = vpop.permute.xlu1 %2680 }
 0x2f9   : > { %v2690_v24 = vsel %vm1559_vm7, %v11325_v58, %v2681_v23  ;;  %v2691_v30 = vsel %vm1559_vm7, %v2681_v23, %v11605_v26 }
 0x2fa   : > { %v2704_v18 = vadd.f32 %v2690_v24, %v2659_v46  ;;  %v2705_v59 = vadd.f32 %v2691_v30, %v2660_v52 }
 0x2fc   : > { %v2726_v50 = vpop.permute.xlu1 %2725 }
 0x2fd   : > { %v2735_v3 = vsel %vm1605_vm8, %v11341_v6, %v2726_v50  ;;  %v2736_v19 = vsel %vm1605_vm8, %v2726_v50, %v11615_v34  ;;  %v15619_v6 = vld [vmem:[#allocation81_spill] sm:$0xff]  ;;  %v11717_v50 = vld [vmem:[%s15211_s3 + $0x20] sm:$0xff] }
 0x2fe   : > { %v2749_v53 = vadd.f32 %v2735_v3, %v2704_v18  ;;  %v2750_v56 = vadd.f32 %v2736_v19, %v2705_v59  ;;  %v15635_v18 = vmov 0.0   ;;  %v11709_v59 = vld [vmem:[%s15211_s3 + $0x18] sm:$0xff]  ;;  %v11725_v19 = vld [vmem:[%s15211_s3 + $0x28] sm:$0xff] }
 0x300   : > { %v11622_v58 = vadd.f32 %v15576_v37, %v2749_v53  ;;  %v11625_v32 = vadd.f32 %v15576_v37, %v2750_v56  ;;  %v15636_v53 = vld [vmem:[#allocation65_spill] sm:$0xff] }
 0x302   : > { %v2769_v44 = vmax.f32 %v11622_v58, 0.0  ;;  %v2770_v11 = vmax.f32 %v11625_v32, 0.0  ;;  %v15642_v58 = vld [vmem:[#allocation13_spill] sm:$0xff]  ;;  %v12208_v32 = vld [vmem:[%s15211_s3 + $0x180] sm:$0xff] }
 0x304   : > { %2789 = vrot.lane.b32.xlu1 %v2770_v11, %s15486_s23  ;;  %2787 = vrot.lane.b32.xlu0 %v2769_v44, %s15486_s23 }
 0x308   : > { %1743 = vrot.lane.b32.xlu1 %v15619_v6, %s15440_s29  ;;  %1673 = vrot.lane.b32.xlu0 %v15620_v13, %s15486_s23  ;;  %v11735_v13 = vld [vmem:[%s15211_s3 + $0x30] sm:$0xff] }
 0x30c   : > { %1835 = vrot.lane.b32.xlu1 %v15622_v22, %s15488_s27  ;;  %1789 = vrot.lane.b32.xlu0 %v1774_v43, %s15491_s21  ;;  %s9451_s21 = smov 120   ;;  %s9452_s27 = smov 58  }
 0x310   : > { %1975 = vrot.lane.b32.xlu1 %v15623_v27, %s15497_s24  ;;  %1905 = vrot.lane.b32.xlu0 %v15624_v31, %s15459_s17  ;;  %v15638_v27 = vld [vmem:[#allocation20_spill] sm:$0xff] }
 0x314   : > { %2067 = vrot.lane.b32.xlu1 %v15626_v17, %s15500_s13  ;;  %2021 = vrot.lane.b32.xlu0 %v2006_v1, %s15504_s9  ;;  %s9450_s9 = smov 122  }
 0x318   : > { %2207 = vrot.lane.b32.xlu1 %v15627_v25, %s15479_s0  ;;  %2137 = vrot.lane.b32.xlu0 %v15628_v33, %s15473_s16  ;;  %v11756_v33 = vld [vmem:[%s15211_s3 + $0x40] sm:$0xff]  ;;  %s16040_s16 = sld [smem:[#allocation97_spill]] }
 0x31c   : > { %2299 = vrot.lane.b32.xlu1 %v15630_v57, %s15485_s30  ;;  %2253 = vrot.lane.b32.xlu0 %v2238_v48, %s15483_s2  ;;  %s9453_s30 = smov 56  }
 0x320   : > { %2439 = vrot.lane.b32.xlu1 %v15631_v9, %s15492_s20  ;;  %2369 = vrot.lane.b32.xlu0 %v15632_v10, %s15490_s14  ;;  %v15639_v10 = vld [vmem:[#allocation60_spill] sm:$0xff]  ;;  %s404_s20 = sand.u32 1, %s9418_s22  }
 0x321   : > { %v15640_v40 = vmax.f32 %v15639_v10, 0.0 }
 0x324   : > { %2485 = vrot.lane.b32.xlu0 %v2470_v28, %s15495_s19  ;;  %2570 = vrot.lane.b32.xlu1 %v11413_v45, %s15464_s26 }
 0x328   : > { %2684 = vrot.lane.b32.xlu1 %v2669_v41, %s15474_s15  ;;  %2639 = vrot.lane.b32.xlu0 %v11423_v21, %s15467_s28  ;;  %v11683_v21 = vld [vmem:[%s15211_s3] sm:$0xff] }
 0x32c   : > { %2729 = vrot.lane.b32.xlu0 %v15634_v2, %s15470_s18  ;;  %v15641_v2 = vld [vmem:[#allocation14_spill] sm:$0xff] }
 0x34d   : > { %v2823_v23 = vpop.permute.xlu1 %2822 }
 0x351   : > { %v2821_v24 = vpop.permute.xlu1 %2820 }
 0x352   : > { %v2834_v30 = vsel %vm1442_vm5, %v2821_v24, %v2823_v23  ;;  %v11674_v46 = vpop.permute.xlu0 %2824 }
 0x353   : > { %v2835_v5 = vsel %vm1442_vm5, %v2823_v23, %v11674_v46  ;;  %v2847_v52 = vmax.f32 %v11538_v8, %v2834_v30  ;;  %v11701_v8 = vld [vmem:[%s15211_s3 + $0x10] sm:$0xff] }
 0x354   : > { %v2848_v45 = vmax.f32 %v11518_v63, %v2835_v5  ;;  %v11693_v63 = vld [vmem:[%s15211_s3 + $0x8] sm:$0xff] }
 0x355   : > { %v1512_v6 = vpop.permute.xlu1 %1511 }
 0x356   : > { %8057 = vmatprep.subr.msk.mxu1 %vm3055_vm13, %v2848_v45  ;;  %v1441_v3 = vpop.permute.xlu0 %1440  ;;  %v1520_v31 = vsel %vm1513_vm6, %v15638_v27, %v1512_v6  ;;  %v5797_v45 = vld [vmem:[%s15212_s4] sm:$0xff] }
 0x357   : > { %8058 = vmatpush1.msk.msra.mxu1 %vm3055_vm13, %v2847_v52  ;;  %v1449_v56 = vsel %vm1442_vm5, %v15636_v53, %v1441_v3  ;;  %v11799_v53 = vld [vmem:[%s15211_s3 + $0x50] sm:$0xff] }
 0x358   : > { %8059 = vmatmul.mubr.msk.f32.vlgmr.msra.gmra.mrb[88].mxu1 %vm2904_vm14, %v11683_v21  ;;  %v1463_v43 = vadd.f32 %v1449_v56, %v15637_v4 }
 0x359   : > { %3147 = vmatprep.mubr.f32.mxu1 %v15635_v18  ;;  %v1604_v1 = vpop.permute.xlu1 %1603 }
 0x35a   : > { %v1558_v22 = vpop.permute.xlu0 %1557  ;;  %v1534_v17 = vadd.f32 %v1520_v31, %v1463_v43  ;;  %v1612_v23 = vsel %vm1605_vm8, %v15641_v2, %v1604_v1  ;;  %v11814_v31 = vld [vmem:[%s15211_s3 + $0x58] sm:$0xff]  ;;  %v11838_v2 = vld [vmem:[%s15211_s3 + $0x68] sm:$0xff] }
 0x35b   : > { %v1566_v25 = vsel %vm1559_vm7, %v11394_v38, %v1558_v22  ;;  %v5798_v22 = vld [vmem:[%s15212_s4 + $0x8] sm:$0xff] }
 0x35c   : > { %8060 = vmatmul.mubr.msk.f32.gmra.mrb[90].mxu1 %vm2904_vm14, %v11693_v63  ;;  %v1580_v15 = vadd.f32 %v1566_v25, %v1534_v17 }
 0x35d   : > { %3153 = vmatprep.mubr.f32.mxu1 %v15635_v18 }
 0x35e   : > { %v1626_v30 = vadd.f32 %v1612_v23, %v1580_v15 }
 0x360   : > { %8061 = vmatmul.mubr.msk.f32.gmra.mrb[92].mxu1 %vm2904_vm14, %v11701_v8 }
 0x361   : > { %3159 = vmatprep.mubr.f32.mxu1 %v15635_v18 }
 0x364   : > { %8062 = vmatmul.mubr.msk.f32.gmra.mrb[94].mxu1 %vm2904_vm14, %v11709_v59 }
 0x365   : > { %3165 = vmatprep.mubr.f32.mxu1 %v15635_v18 }
 0x368   : > { %8063 = vmatmul.mubr.msk.f32.gmra.mrb[96].mxu1 %vm2904_vm14, %v11717_v50 }
 0x369   : > { %3171 = vmatprep.mubr.f32.mxu1 %v15635_v18 }
 0x36c   : > { %8064 = vmatmul.mubr.msk.f32.gmra.mrb[98].mxu1 %vm2904_vm14, %v11725_v19 }
 0x36d   : > { %3177 = vmatprep.mubr.f32.mxu1 %v15635_v18 }
 0x370   : > { %8065 = vmatmul.mubr.msk.f32.gmra.mrb[100].mxu1 %vm2904_vm14, %v11735_v13 }
 0x371   : > { %3183 = vmatprep.mubr.f32.mxu1 %v15635_v18 }
 0x374   : > { %8066 = vmatmul.mubr.msk.f32.gmra.mrb[102].mxu1 %vm2904_vm14, %v11746_v49 }
 0x375   : > { %3189 = vmatprep.mubr.f32.mxu1 %v15635_v18 }
 0x376   : > { %v2788_v48 = vpop.permute.xlu0 %2787  ;;  %v11758_v57 = vpop.permute.xlu1 %2789 }
 0x377   : > { %v2796_v9 = vsel %vm1675_vm9, %v11528_v54, %v2788_v48  ;;  %v2797_v38 = vsel %vm1675_vm9, %v2788_v48, %v11758_v57  ;;  %v11780_v54 = vld [vmem:[%s15211_s3 + $0x48] sm:$0xff]  ;;  %v11826_v48 = vld [vmem:[%s15211_s3 + $0x60] sm:$0xff] }
 0x378   : > { %v11766_v28 = vmax.f32 %v15640_v40, %v2796_v9  ;;  %v11770_v41 = vmax.f32 %v2769_v44, %v2797_v38  ;;  %8067 = vmatmul.mubr.msk.f32.gmra.mrb[104].mxu1 %vm2904_vm14, %v11756_v33 }
 0x379   : > { %3195 = vmatprep.mubr.f32.mxu1 %v15635_v18 }
 0x37a   : > { %v1674_v24 = vpop.permute.xlu0 %1673  ;;  %v1744_v5 = vpop.permute.xlu1 %1743  ;;  %2826 = vrot.lane.b32.xlu1 %v11766_v28, %s15464_s26  ;;  %2828 = vrot.lane.b32.xlu0 %v11770_v41, %s15464_s26 }
 0x37b   : > { %v1682_v44 = vsel %vm1675_vm9, %v15642_v58, %v1674_v24  ;;  %v1752_v3 = vsel %vm1745_vm10, %v11408_v62, %v1744_v5  ;;  %vm15643_vm10 = vcmask 752640   ;;  %v11850_v58 = vld [vmem:[%s15211_s3 + $0x70] sm:$0xff] }
 0x37c   : > { %v1696_v52 = vadd.f32 %v1682_v44, %v1626_v30  ;;  %8068 = vmatmul.mubr.msk.f32.gmra.mrb[106].mxu1 %vm2904_vm14, %v11780_v54 }
 0x37d   : > { %3201 = vmatprep.mubr.f32.mxu1 %v15635_v18 }
 0x37e   : > { %v1766_v56 = vadd.f32 %v1752_v3, %v1696_v52  ;;  %v1790_v6 = vpop.permute.xlu0 %1789  ;;  %v1836_v4 = vpop.permute.xlu1 %1835  ;;  %5801 = vperm.xlu0 %9288, %v5797_v45  }
 0x37f   : > { %v1798_v43 = vsel %vm1791_vm11, %v11410_v7, %v1790_v6  ;;  %v1844_v62 = vsel %vm1837_vm12, %v11419_v16, %v1836_v4  ;;  %vm15644_vm11 = vcmask 523264   ;;  %vm15645_vm12 = vcmask 515072  }
 0x380   : > { %v1812_v27 = vadd.f32 %v1798_v43, %v1766_v56  ;;  %8069 = vmatmul.mubr.msk.f32.gmra.mrb[108].mxu1 %vm2904_vm14, %v11799_v53  ;;  %v11862_v56 = vld [vmem:[%s15211_s3 + $0x78] sm:$0xff] }
 0x381   : > { %3207 = vmatprep.mubr.f32.mxu1 %v15635_v18 }
 0x382   : > { %v1858_v1 = vadd.f32 %v1844_v62, %v1812_v27  ;;  %v1906_v7 = vpop.permute.xlu0 %1905  ;;  %v1976_v17 = vpop.permute.xlu1 %1975  ;;  %5806 = vperm.xlu0 %9288, %v5798_v22   ;;  %v11874_v27 = vld [vmem:[%s15211_s3 + $0x80] sm:$0xff] }
 0x383   : > { %v1914_v25 = vsel %vm15643_vm10, %v11477_v39, %v1906_v7  ;;  %v1984_v16 = vsel %vm15644_vm11, %v11435_v47, %v1976_v17  ;;  %vm15648_vm10 = vcmask 490496   ;;  %vm15649_vm11 = vcmask 252928  }
 0x384   : > { %v1928_v15 = vadd.f32 %v1914_v25, %v1858_v1  ;;  %8070 = vmatmul.mubr.msk.f32.gmra.mrb[110].mxu1 %vm2904_vm14, %v11814_v31  ;;  %v15650_v25 = vld [vmem:[#allocation39_spill] sm:$0xff] }
 0x385   : > { %3213 = vmatprep.mubr.f32.mxu1 %v15635_v18 }
 0x386   : > { %v1998_v9 = vadd.f32 %v1984_v16, %v1928_v15  ;;  %v2022_v38 = vpop.permute.xlu0 %2021  ;;  %v2068_v10 = vpop.permute.xlu1 %2067 }
 0x387   : > { %v2030_v39 = vsel %vm15645_vm12, %v11431_v36, %v2022_v38  ;;  %v2076_v47 = vsel %vm15646_vm3, %v11445_v51, %v2068_v10  ;;  %vm15715_vm12 = vmmov %vm15646_vm3 }
 0x388   : > { %v2044_v40 = vadd.f32 %v2030_v39, %v1998_v9  ;;  %8071 = vmatmul.mubr.msk.f32.gmra.mrb[112].mxu1 %vm2904_vm14, %v11826_v48  ;;  %v11897_v39 = vld [vmem:[%s15211_s3 + $0x90] sm:$0xff] }
 0x389   : > { %3219 = vmatprep.mubr.f32.mxu1 %v15635_v18 }
 0x38a   : > { %v2090_v23 = vadd.f32 %v2076_v47, %v2044_v40  ;;  %v2138_v24 = vpop.permute.xlu0 %2137  ;;  %v2208_v30 = vpop.permute.xlu1 %2207 }
 0x38b   : > { %v2146_v36 = vsel %vm15647_vm2, %v11462_v29, %v2138_v24  ;;  %v2216_v51 = vsel %vm15648_vm10, %v11497_v14, %v2208_v30 }
 0x38c   : > { %v2160_v5 = vadd.f32 %v2146_v36, %v2090_v23  ;;  %8072 = vmatmul.mubr.msk.f32.gmra.mrb[114].mxu1 %vm2904_vm14, %v11838_v2 }
 0x38d   : > { %3225 = vmatprep.mubr.f32.mxu1 %v15635_v18 }
 0x38e   : > { %v2230_v44 = vadd.f32 %v2216_v51, %v2160_v5  ;;  %v2254_v45 = vpop.permute.xlu0 %2253  ;;  %v2300_v52 = vpop.permute.xlu1 %2299  ;;  %v11940_v5 = vld [vmem:[%s15211_s3 + $0xb0] sm:$0xff]  ;;  %v11948_v51 = vld [vmem:[%s15211_s3 + $0xb8] sm:$0xff] }
 0x38f   : > { %v2262_v29 = vsel %vm2255_vm1, %v11484_v61, %v2254_v45  ;;  %v2308_v14 = vsel %vm15649_vm11, %v11524_v0, %v2300_v52  ;;  %v11964_v45 = vld [vmem:[%s15211_s3 + $0xc8] sm:$0xff]  ;;  %v11972_v52 = vld [vmem:[%s15211_s3 + $0xd0] sm:$0xff]  ;;  %vm4952_vm1 = vcmask 457728  }
 0x390   : > { %v2276_v3 = vadd.f32 %v2262_v29, %v2230_v44  ;;  %8073 = vmatmul.mubr.msk.f32.gmra.mrb[116].mxu1 %vm2904_vm14, %v11850_v58  ;;  %v11956_v44 = vld [vmem:[%s15211_s3 + $0xc0] sm:$0xff]  ;;  %v11980_v29 = vld [vmem:[%s15211_s3 + $0xd8] sm:$0xff] }
 0x391   : > { %3231 = vmatprep.mubr.f32.mxu1 %v15635_v18 }
 0x392   : > { %v2322_v6 = vadd.f32 %v2308_v14, %v2276_v3  ;;  %v2370_v4 = vpop.permute.xlu0 %2369  ;;  %v2440_v43 = vpop.permute.xlu1 %2439  ;;  %v11988_v3 = vld [vmem:[%s15211_s3 + $0xe0] sm:$0xff]  ;;  %v11996_v14 = vld [vmem:[%s15211_s3 + $0xe8] sm:$0xff] }
 0x393   : > { %v2378_v61 = vsel %vm2371_vm0, %v11549_v12, %v2370_v4  ;;  %v2448_v0 = vsel %vm2441_vm15, %v11564_v60, %v2440_v43  ;;  %v11884_v60 = vld [vmem:[%s15211_s3 + $0x88] sm:$0xff]  ;;  %15651 = vst [vmem:[#allocation58_spill] sm:$0xff] %v11988_v3  ;;  %15652 = vst [vmem:[#allocation61_spill] sm:$0xff] %v11996_v14  ;;  %v12012_v4 = vld [vmem:[%s15211_s3 + $0xf8] sm:$0xff]  ;;  %vm4563_vm0 = vcmask 998400  }
 0x394   : > { %v2392_v22 = vadd.f32 %v2378_v61, %v2322_v6  ;;  %8074 = vmatmul.mubr.msk.f32.gmra.mrb[118].mxu1 %vm2904_vm14, %v11862_v56  ;;  %v12004_v6 = vld [vmem:[%s15211_s3 + $0xf0] sm:$0xff]  ;;  %15654 = vst [vmem:[#allocation62_spill] sm:$0xff] %v12012_v4  ;;  %v12020_v43 = vld [vmem:[%s15211_s3 + $0x100] sm:$0xff]  ;;  %v12028_v61 = vld [vmem:[%s15211_s3 + $0x108] sm:$0xff] }
 0x395   : > { %3237 = vmatprep.mubr.f32.mxu1 %v15635_v18  ;;  %15653 = vst [vmem:[#allocation21_spill] sm:$0xff] %v12004_v6  ;;  %15655 = vst [vmem:[#allocation64_spill] sm:$0xff] %v12020_v43 }
 0x396   : > { %v2462_v62 = vadd.f32 %v2448_v0, %v2392_v22  ;;  %v2486_v1 = vpop.permute.xlu0 %2485  ;;  %v2571_v7 = vpop.permute.xlu1 %2570  ;;  %15656 = vst [vmem:[#allocation22_spill] sm:$0xff] %v12028_v61  ;;  %v12036_v22 = vld [vmem:[%s15211_s3 + $0x110] sm:$0xff]  ;;  %v12044_v0 = vld [vmem:[%s15211_s3 + $0x118] sm:$0xff]  ;;  %vm15710_vm15 = vmmov %vm15648_vm10 }
 0x397   : > { %v2494_v12 = vsel %vm2487_vm4, %v11582_v42, %v2486_v1  ;;  %v2578_v9 = vsel %vm1442_vm5, %v11591_v20, %v2571_v7  ;;  %15657 = vst [vmem:[#allocation15_spill] sm:$0xff] %v12036_v22  ;;  %15658 = vst [vmem:[#allocation24_spill] sm:$0xff] %v12044_v0  ;;  %v12060_v1 = vld [vmem:[%s15211_s3 + $0x128] sm:$0xff]  ;;  %vm4622_vm4 = vcmask 982016  }
 0x398   : > { %v2508_v17 = vadd.f32 %v2494_v12, %v2462_v62  ;;  %8075 = vmatmul.mubr.msk.f32.gmra.mrb[120].mxu1 %vm2904_vm14, %v11874_v27  ;;  %v12052_v62 = vld [vmem:[%s15211_s3 + $0x120] sm:$0xff] }
 0x399   : > { %3243 = vmatprep.mubr.f32.mxu1 %v15635_v18 }
 0x39a   : > { %v2515_v15 = vadd.f32 %v2508_v17, %v15650_v25  ;;  %v2640_v16 = vpop.permute.xlu0 %2639  ;;  %v2685_v10 = vpop.permute.xlu1 %2684 }
 0x39b   : > { %v2647_v42 = vsel %vm1513_vm6, %v11597_v55, %v2640_v16  ;;  %v2692_v20 = vsel %vm1559_vm7, %v11605_v26, %v2685_v10  ;;  %v11909_v55 = vld [vmem:[%s15211_s3 + $0x98] sm:$0xff]  ;;  %v11920_v26 = vld [vmem:[%s15211_s3 + $0xa0] sm:$0xff]  ;;  %vm15709_vm7 = vmmov %vm15646_vm3 }
 0x39c   : > { %v2592_v38 = vadd.f32 %v2578_v9, %v2515_v15  ;;  %8076 = vmatmul.mubr.msk.f32.gmra.mrb[122].mxu1 %vm2904_vm14, %v11884_v60  ;;  %v12074_v15 = vld [vmem:[%s15211_s3 + $0x130] sm:$0xff]  ;;  %v12130_v10 = vld [vmem:[%s15211_s3 + $0x158] sm:$0xff]  ;;  %vm15719_vm3 = vmmov %vm15648_vm10 }
 0x39d   : > { %3249 = vmatprep.mubr.f32.mxu1 %v15635_v18  ;;  %15659 = vst [vmem:[#allocation23_spill] sm:$0xff] %v12074_v15  ;;  %vm15758_vm10 = vmmov %vm15709_vm7 }
 0x39e   : > { %v2661_v40 = vadd.f32 %v2647_v42, %v2592_v38  ;;  %v2730_v47 = vpop.permute.xlu0 %2729  ;;  %v12119_v38 = vld [vmem:[%s15211_s3 + $0x150] sm:$0xff]  ;;  %v12152_v42 = vld [vmem:[%s15211_s3 + $0x160] sm:$0xff]  ;;  %vm15768_vm11 = vmmov %vm15719_vm3 }
 0x39f   : > { %v2737_v24 = vsel %vm1605_vm8, %v11615_v34, %v2730_v47  ;;  %v12172_v47 = vld [vmem:[%s15211_s3 + $0x170] sm:$0xff] }
 0x3a0   : > { %v2706_v23 = vadd.f32 %v2692_v20, %v2661_v40  ;;  %8077 = vmatmul.mubr.msk.f32.gmra.mrb[124].mxu1 %vm2904_vm14, %v11897_v39  ;;  %v12161_v40 = vld [vmem:[%s15211_s3 + $0x168] sm:$0xff] }
 0x3a1   : > { %3255 = vmatprep.mubr.f32.mxu1 %v15635_v18 }
 0x3a2   : > { %v2751_v30 = vadd.f32 %v2737_v24, %v2706_v23 }
 0x3a4   : > { %v11912_v36 = vadd.f32 %v15576_v37, %v2751_v30  ;;  %8078 = vmatmul.mubr.msk.f32.gmra.mrb[126].mxu1 %vm2904_vm14, %v11909_v55  ;;  %v11932_v37 = vld [vmem:[%s15211_s3 + $0xa8] sm:$0xff] }
 0x3a5   : > { %3261 = vmatprep.mubr.f32.mxu1 %v15635_v18 }
 0x3a6   : > { %v2771_v34 = vmax.f32 %v11912_v36, 0.0 }
 0x3a8   : > { %2791 = vrot.lane.b32.xlu1 %v2771_v34, %s15486_s23  ;;  %8079 = vmatmul.mubr.msk.f32.gmra.mrb[128].mxu1 %vm2904_vm14, %v11920_v26 }
 0x3a9   : > { %3266 = vmatprep.mubr.f32.mxu1 %v15635_v18 }
 0x3ac   : > { %8080 = vmatmul.mubr.msk.f32.gmra.mrb[130].mxu1 %vm2904_vm14, %v11932_v37 }
 0x3ad   : > { %3271 = vmatprep.mubr.f32.mxu1 %v15635_v18 }
 0x3b0   : > { %8081 = vmatmul.mubr.msk.f32.gmra.mrb[132].mxu1 %vm2904_vm14, %v11940_v5 }
 0x3b1   : > { %3276 = vmatprep.mubr.f32.mxu1 %v15635_v18 }
 0x3b4   : > { %8082 = vmatmul.mubr.msk.f32.gmra.mrb[134].mxu1 %vm2904_vm14, %v11948_v51 }
 0x3b5   : > { %3281 = vmatprep.mubr.f32.mxu1 %v15635_v18 }
 0x3b8   : > { %8083 = vmatmul.mubr.msk.f32.gmra.mrb[136].mxu1 %vm2904_vm14, %v11956_v44 }
 0x3b9   : > { %3286 = vmatprep.mubr.f32.mxu1 %v15635_v18 }
 0x3bc   : > { %8084 = vmatmul.mubr.msk.f32.gmra.mrb[138].mxu1 %vm2904_vm14, %v11964_v45 }
 0x3bd   : > { %3291 = vmatprep.mubr.f32.mxu1 %v15635_v18 }
 0x3c0   : > { %8085 = vmatmul.mubr.msk.f32.gmra.mrb[140].mxu1 %vm2904_vm14, %v11972_v52 }
 0x3c1   : > { %3296 = vmatprep.mubr.f32.mxu1 %v15635_v18 }
 0x3c4   : > { %8086 = vmatmul.mubr.msk.f32.gmra.mrb[142].mxu1 %vm2904_vm14, %v11980_v29 }
 0x3c5   : > { %3301 = vmatprep.mubr.f32.mxu1 %v15635_v18 }
 0x3c8   : > { %8087 = vmatmul.mubr.msk.f32.gmra.mrb[144].mxu1 %vm2904_vm14, %v11988_v3 }
 0x3c9   : > { %3306 = vmatprep.mubr.f32.mxu1 %v15635_v18 }
 0x3cc   : > { %8088 = vmatmul.mubr.msk.f32.gmra.mrb[146].mxu1 %vm2904_vm14, %v11996_v14 }
 0x3cd   : > { %3311 = vmatprep.mubr.f32.mxu1 %v15635_v18 }
 0x3d0   : > { %8089 = vmatmul.mubr.msk.f32.gmra.mrb[148].mxu1 %vm2904_vm14, %v12004_v6 }
 0x3d1   : > { %3316 = vmatprep.mubr.f32.mxu1 %v15635_v18 }
 0x3d4   : > { %8090 = vmatmul.mubr.msk.f32.gmra.mrb[150].mxu1 %vm2904_vm14, %v12012_v4 }
 0x3d5   : > { %3321 = vmatprep.mubr.f32.mxu1 %v15635_v18 }
 0x3d8   : > { %8091 = vmatmul.mubr.msk.f32.gmra.mrb[152].mxu1 %vm2904_vm14, %v12020_v43 }
 0x3d9   : > { %3326 = vmatprep.mubr.f32.mxu1 %v15635_v18 }
 0x3dc   : > { %8092 = vmatmul.mubr.msk.f32.gmra.mrb[154].mxu1 %vm2904_vm14, %v12028_v61 }
 0x3dd   : > { %3331 = vmatprep.mubr.f32.mxu1 %v15635_v18 }
 0x3e0   : > { %8093 = vmatmul.mubr.msk.f32.gmra.mrb[156].mxu1 %vm2904_vm14, %v12036_v22 }
 0x3e1   : > { %3336 = vmatprep.mubr.f32.mxu1 %v15635_v18 }
 0x3e4   : > { %8094 = vmatmul.mubr.msk.f32.gmra.mrb[158].mxu1 %vm2904_vm14, %v12044_v0 }
 0x3e5   : > { %3341 = vmatprep.mubr.f32.mxu1 %v15635_v18 }
 0x3e8   : > { %8095 = vmatmul.mubr.msk.f32.gmra.mrb[160].mxu1 %vm2904_vm14, %v12052_v62 }
 0x3e9   : > { %3346 = vmatprep.mubr.f32.mxu1 %v15635_v18 }
 0x3ec   : > { %v2827_v7 = vpop.permute.xlu1 %2826  ;;  %v12062_v12 = vpop.permute.xlu0 %2828  ;;  %8096 = vmatmul.mubr.msk.f32.gmra.mrb[162].mxu1 %vm2904_vm14, %v12060_v1 }
 0x3ed   : > { %v2836_v17 = vsel %vm1442_vm5, %v11674_v46, %v2827_v7  ;;  %v2837_v25 = vsel %vm1442_vm5, %v2827_v7, %v12062_v12  ;;  %3351 = vmatprep.mubr.f32.mxu1 %v15635_v18  ;;  %v12086_v46 = vld [vmem:[%s15211_s3 + $0x138] sm:$0xff] }
 0x3ee   : > { %v2849_v16 = vmax.f32 %v11544_v35, %v2836_v17  ;;  %v2850_v9 = vmax.f32 %v11766_v28, %v2837_v25  ;;  %v12097_v35 = vld [vmem:[%s15211_s3 + $0x140] sm:$0xff]  ;;  %v12108_v28 = vld [vmem:[%s15211_s3 + $0x148] sm:$0xff]  ;;  %v12193_v7 = vld [vmem:[%s15211_s3 + $0x178] sm:$0xff] }
 0x3f0   : > { %8109 = vmatprep.subr.msk.mxu0 %vm3055_vm13, %v2850_v9  ;;  %8097 = vmatmul.mubr.msk.f32.gmra.mrb[164].mxu1 %vm2904_vm14, %v12074_v15 }
 0x3f1   : > { %8110 = vmatpush1.msk.msra.mxu0 %vm3055_vm13, %v2849_v16  ;;  %3356 = vmatprep.mubr.f32.mxu1 %v15635_v18 }
 0x3f2   : > { %8111 = vmatmul.mubr.msk.f32.vlgmr.msra.gmra.mrb[102].mxu0 %vm2904_vm14, %v11683_v21 }
 0x3f3   : > { %3472 = vmatprep.mubr.f32.mxu0 %v15635_v18 }
 0x3f4   : > { %8098 = vmatmul.mubr.msk.f32.gmra.mrb[166].mxu1 %vm2904_vm14, %v12086_v46 }
 0x3f5   : > { %3361 = vmatprep.mubr.f32.mxu1 %v15635_v18 }
 0x3f6   : > { %8112 = vmatmul.mubr.msk.f32.gmra.mrb[104].mxu0 %vm2904_vm14, %v11693_v63 }
 0x3f7   : > { %3478 = vmatprep.mubr.f32.mxu0 %v15635_v18 }
 0x3f8   : > { %8099 = vmatmul.mubr.msk.f32.gmra.mrb[168].mxu1 %vm2904_vm14, %v12097_v35 }
 0x3f9   : > { %3365 = vmatprep.mubr.f32.mxu1 %v15635_v18 }
 0x3fa   : > { %8113 = vmatmul.mubr.msk.f32.gmra.mrb[106].mxu0 %vm2904_vm14, %v11701_v8 }
 0x3fb   : > { %3484 = vmatprep.mubr.f32.mxu0 %v15635_v18 }
 0x3fc   : > { %8100 = vmatmul.mubr.msk.f32.gmra.mrb[170].mxu1 %vm2904_vm14, %v12108_v28 }
 0x3fd   : > { %3369 = vmatprep.mubr.f32.mxu1 %v15635_v18 }
 0x3fe   : > { %8114 = vmatmul.mubr.msk.f32.gmra.mrb[108].mxu0 %vm2904_vm14, %v11709_v59 }
 0x3ff   : > { %3490 = vmatprep.mubr.f32.mxu0 %v15635_v18 }
 0x400   : > { %8101 = vmatmul.mubr.msk.f32.gmra.mrb[172].mxu1 %vm2904_vm14, %v12119_v38 }
 0x401   : > { %3373 = vmatprep.mubr.f32.mxu1 %v15635_v18 }
 0x402   : > { %8115 = vmatmul.mubr.msk.f32.gmra.mrb[110].mxu0 %vm2904_vm14, %v11717_v50 }
 0x403   : > { %3496 = vmatprep.mubr.f32.mxu0 %v15635_v18 }
 0x404   : > { %8102 = vmatmul.mubr.msk.f32.gmra.mrb[174].mxu1 %vm2904_vm14, %v12130_v10 }
 0x405   : > { %3377 = vmatprep.mubr.f32.mxu1 %v15635_v18 }
 0x406   : > { %8116 = vmatmul.mubr.msk.f32.gmra.mrb[112].mxu0 %vm2904_vm14, %v11725_v19 }
 0x407   : > { %3502 = vmatprep.mubr.f32.mxu0 %v15635_v18 }
 0x408   : > { %8103 = vmatmul.mubr.msk.f32.gmra.mrb[176].mxu1 %vm2904_vm14, %v12152_v42 }
 0x409   : > { %3381 = vmatprep.mubr.f32.mxu1 %v15635_v18 }
 0x40a   : > { %8117 = vmatmul.mubr.msk.f32.gmra.mrb[114].mxu0 %vm2904_vm14, %v11735_v13 }
 0x40b   : > { %3508 = vmatprep.mubr.f32.mxu0 %v15635_v18 }
 0x40c   : > { %8104 = vmatmul.mubr.msk.f32.gmra.mrb[178].mxu1 %vm2904_vm14, %v12161_v40 }
 0x40d   : > { %3385 = vmatprep.mubr.f32.mxu1 %v15635_v18 }
 0x40e   : > { %8118 = vmatmul.mubr.msk.f32.gmra.mrb[116].mxu0 %vm2904_vm14, %v11746_v49 }
 0x40f   : > { %3514 = vmatprep.mubr.f32.mxu0 %v15635_v18 }
 0x410   : > { %8105 = vmatmul.mubr.msk.f32.gmra.mrb[180].mxu1 %vm2904_vm14, %v12172_v47 }
 0x411   : > { %3389 = vmatprep.mubr.f32.mxu1 %v15635_v18 }
 0x412   : > { %8119 = vmatmul.mubr.msk.f32.gmra.mrb[118].mxu0 %vm2904_vm14, %v11756_v33 }
 0x413   : > { %3520 = vmatprep.mubr.f32.mxu0 %v15635_v18 }
 0x414   : > { %8106 = vmatmul.mubr.msk.f32.gmra.mrb[182].mxu1 %vm2904_vm14, %v12193_v7 }
 0x415   : > { %3393 = vmatprep.mubr.f32.mxu1 %v15635_v18 }
 0x416   : > { %8120 = vmatmul.mubr.msk.f32.gmra.mrb[120].mxu0 %vm2904_vm14, %v11780_v54 }
 0x417   : > { %3526 = vmatprep.mubr.f32.mxu0 %v15635_v18 }
 0x418   : > { %8107 = vmatmul.mubr.msk.f32.gmra.mrb[184].mxu1 %vm2904_vm14, %v12208_v32 }
 0x419   : > { %3397 = vmatprep.mubr.f32.mxu1 %v15635_v18 }
 0x41a   : > { %v2792_v20 = vpop.permute.xlu1 %2791  ;;  %8121 = vmatmul.mubr.msk.f32.gmra.mrb[122].mxu0 %vm2904_vm14, %v11799_v53 }
 0x41b   : > { %v2798_v23 = vsel %vm1675_vm9, %v11758_v57, %v2792_v20  ;;  %v12180_v24 = vmax.f32 %v2771_v34, %v2792_v20  ;;  %3532 = vmatprep.mubr.f32.mxu0 %v15635_v18  ;;  %vm4885_vm9 = vcmask 474112  }
 0x41c   : > { %v12187_v30 = vmax.f32 %v2770_v11, %v2798_v23  ;;  %v12219_v11 = vld [vmem:[%s15211_s3 + $0x188] sm:$0xff] }
 0x41d   : > { %2832 = vrot.lane.b32.xlu1 %v12180_v24, %s15464_s26  ;;  %8108 = vmatmul.mubr.msk.f32.gmra.mrb[186].mxu1 %vm2904_vm14, %v12219_v11 }
 0x41e   : > { %2830 = vrot.lane.b32.xlu0 %v12187_v30, %s15464_s26  ;;  %8122 = vmatmul.mubr.msk.f32.gmra.mrb[124].mxu0 %vm2904_vm14, %v11814_v31  ;;  %s7881_s26 = scalar_lea.sflag [#allocation3], %s404_s20 }
 0x41f   : > { %3538 = vmatprep.mubr.f32.mxu0 %v15635_v18  ;;  %3831 = vmatprep.mubr.f32.mxu1 %v15635_v18 }
 0x422   : > { %8123 = vmatmul.mubr.msk.f32.gmra.mrb[126].mxu0 %vm2904_vm14, %v11826_v48 }
 0x423   : > { %3544 = vmatprep.mubr.f32.mxu0 %v15635_v18 }
 0x426   : > { %8124 = vmatmul.mubr.msk.f32.gmra.mrb[128].mxu0 %vm2904_vm14, %v11838_v2 }
 0x427   : > { %3550 = vmatprep.mubr.f32.mxu0 %v15635_v18 }
 0x42a   : > { %8125 = vmatmul.mubr.msk.f32.gmra.mrb[130].mxu0 %vm2904_vm14, %v11850_v58 }
 0x42b   : > { %3556 = vmatprep.mubr.f32.mxu0 %v15635_v18  ;;  %v12230_v57 = vpop.f32.mrb[88].mxu1 }
 0x42c   : > { %15660 = vst [vmem:[#allocation26_spill] sm:$0xff] %v12230_v57  ;;  %v12232_v36 = vpop.f32.mrb[89].mxu1 }
 0x42d   : > { %15661 = vst [vmem:[#allocation31_spill] sm:$0xff] %v12232_v36 }
 0x42e   : > { %8126 = vmatmul.mubr.msk.f32.gmra.mrb[132].mxu0 %vm2904_vm14, %v11862_v56 }
 0x42f   : > { %3562 = vmatprep.mubr.f32.mxu0 %v15635_v18  ;;  %v12237_v34 = vpop.f32.mrb[90].mxu1 }
 0x430   : > { %15662 = vst [vmem:[#allocation68_spill] sm:$0xff] %v12237_v34  ;;  %v12239_v17 = vpop.f32.mrb[91].mxu1 }
 0x431   : > { %15663 = vst [vmem:[#allocation25_spill] sm:$0xff] %v12239_v17 }
 0x432   : > { %8127 = vmatmul.mubr.msk.f32.gmra.mrb[134].mxu0 %vm2904_vm14, %v11874_v27 }
 0x433   : > { %3568 = vmatprep.mubr.f32.mxu0 %v15635_v18  ;;  %v3155_v25 = vpop.f32.mrb[92].mxu1 }
 0x434   : > { %4427 = vrot.lane.b32.xlu0 %v3155_v25, %s15467_s28  ;;  %v3157_v16 = vpop.f32.mrb[93].mxu1 }
 0x436   : > { %8128 = vmatmul.mubr.msk.f32.gmra.mrb[136].mxu0 %vm2904_vm14, %v11884_v60 }
 0x437   : > { %3574 = vmatprep.mubr.f32.mxu0 %v15635_v18  ;;  %v3161_v9 = vpop.f32.mrb[94].mxu1 }
 0x438   : > { %4429 = vrot.lane.b32.xlu0 %v3157_v16, %s15467_s28  ;;  %v3163_v20 = vpop.f32.mrb[95].mxu1 }
 0x43a   : > { %8129 = vmatmul.mubr.msk.f32.gmra.mrb[138].mxu0 %vm2904_vm14, %v11897_v39 }
 0x43b   : > { %3580 = vmatprep.mubr.f32.mxu0 %v15635_v18  ;;  %v3167_v23 = vpop.f32.mrb[96].mxu1 }
 0x43c   : > { %4437 = vrot.lane.b32.xlu0 %v3161_v9, %s15467_s28  ;;  %v3169_v17 = vpop.f32.mrb[97].mxu1  ;;  %4485 = vrot.lane.b32.xlu1 %v3167_v23, %s15470_s18 }
 0x43e   : > { %8130 = vmatmul.mubr.msk.f32.gmra.mrb[140].mxu0 %vm2904_vm14, %v11909_v55 }
 0x43f   : > { %3586 = vmatprep.mubr.f32.mxu0 %v15635_v18  ;;  %v3173_v25 = vpop.f32.mrb[98].mxu1 }
 0x440   : > { %4439 = vrot.lane.b32.xlu0 %v3163_v20, %s15467_s28  ;;  %v3175_v16 = vpop.f32.mrb[99].mxu1  ;;  %4487 = vrot.lane.b32.xlu1 %v3169_v17, %s15470_s18 }
 0x442   : > { %8131 = vmatmul.mubr.msk.f32.gmra.mrb[142].mxu0 %vm2904_vm14, %v11920_v26 }
 0x443   : > { %3592 = vmatprep.mubr.f32.mxu0 %v15635_v18  ;;  %v3179_v9 = vpop.f32.mrb[100].mxu1 }
 0x444   : > { %4495 = vrot.lane.b32.xlu0 %v3173_v25, %s15470_s18  ;;  %v3181_v23 = vpop.f32.mrb[101].mxu1  ;;  %4543 = vrot.lane.b32.xlu1 %v3179_v9, %s9450_s9 }
 0x446   : > { %8132 = vmatmul.mubr.msk.f32.gmra.mrb[144].mxu0 %vm2904_vm14, %v11932_v37 }
 0x447   : > { %3598 = vmatprep.mubr.f32.mxu0 %v15635_v18  ;;  %v3185_v20 = vpop.f32.mrb[102].mxu1 }
 0x448   : > { %4497 = vrot.lane.b32.xlu0 %v3175_v16, %s15470_s18  ;;  %v3187_v17 = vpop.f32.mrb[103].mxu1 }
 0x44a   : > { %8133 = vmatmul.mubr.msk.f32.gmra.mrb[146].mxu0 %vm2904_vm14, %v11940_v5 }
 0x44b   : > { %3604 = vmatprep.mubr.f32.mxu0 %v15635_v18  ;;  %v3191_v36 = vpop.f32.mrb[104].mxu1 }
 0x44c   : > { %4545 = vrot.lane.b32.xlu0 %v3181_v23, %s9450_s9  ;;  %v3193_v25 = vpop.f32.mrb[105].mxu1  ;;  %4602 = vrot.lane.b32.xlu1 %v3191_v36, %s9451_s21 }
 0x44e   : > { %8134 = vmatmul.mubr.msk.f32.gmra.mrb[148].mxu0 %vm2904_vm14, %v11948_v51 }
 0x44f   : > { %3610 = vmatprep.mubr.f32.mxu0 %v15635_v18  ;;  %v3197_v9 = vpop.f32.mrb[106].mxu1 }
 0x450   : > { %4553 = vrot.lane.b32.xlu0 %v3185_v20, %s9450_s9  ;;  %v3199_v16 = vpop.f32.mrb[107].mxu1 }
 0x452   : > { %8135 = vmatmul.mubr.msk.f32.gmra.mrb[150].mxu0 %vm2904_vm14, %v11956_v44 }
 0x453   : > { %3616 = vmatprep.mubr.f32.mxu0 %v15635_v18  ;;  %v3203_v34 = vpop.f32.mrb[108].mxu1 }
 0x454   : > { %4555 = vrot.lane.b32.xlu0 %v3187_v17, %s9450_s9  ;;  %4663 = vrot.lane.b32.xlu1 %v3203_v34, %s15497_s24  ;;  %v3205_v36 = vpop.f32.mrb[109].mxu1 }
 0x456   : > { %8136 = vmatmul.mubr.msk.f32.gmra.mrb[152].mxu0 %vm2904_vm14, %v11964_v45 }
 0x457   : > { %3622 = vmatprep.mubr.f32.mxu0 %v15635_v18  ;;  %v3209_v23 = vpop.f32.mrb[110].mxu1 }
 0x458   : > { %4604 = vrot.lane.b32.xlu0 %v3193_v25, %s9451_s21  ;;  %4675 = vrot.lane.b32.xlu1 %v3209_v23, %s15497_s24  ;;  %v3211_v20 = vpop.f32.mrb[111].mxu1 }
 0x45a   : > { %8137 = vmatmul.mubr.msk.f32.gmra.mrb[154].mxu0 %vm2904_vm14, %v11972_v52 }
 0x45b   : > { %3628 = vmatprep.mubr.f32.mxu0 %v15635_v18  ;;  %v3215_v17 = vpop.f32.mrb[112].mxu1 }
 0x45c   : > { %4612 = vrot.lane.b32.xlu0 %v3197_v9, %s9451_s21  ;;  %v3217_v34 = vpop.f32.mrb[113].mxu1  ;;  %4677 = vrot.lane.b32.xlu1 %v3211_v20, %s15497_s24 }
 0x45e   : > { %8138 = vmatmul.mubr.msk.f32.gmra.mrb[156].mxu0 %vm2904_vm14, %v11980_v29 }
 0x45f   : > { %3634 = vmatprep.mubr.f32.mxu0 %v15635_v18  ;;  %v3221_v25 = vpop.f32.mrb[114].mxu1 }
 0x460   : > { %4614 = vrot.lane.b32.xlu0 %v3199_v16, %s9451_s21  ;;  %4729 = vrot.lane.b32.xlu1 %v3215_v17, %s15500_s13  ;;  %v3223_v23 = vpop.f32.mrb[115].mxu1 }
 0x462   : > { %8139 = vmatmul.mubr.msk.f32.gmra.mrb[158].mxu0 %vm2904_vm14, %v11988_v3 }
 0x463   : > { %3640 = vmatprep.mubr.f32.mxu0 %v15635_v18  ;;  %v3227_v9 = vpop.f32.mrb[116].mxu1 }
 0x464   : > { %4665 = vrot.lane.b32.xlu0 %v3205_v36, %s15497_s24  ;;  %v12301_v20 = vpop.f32.mrb[117].mxu1 }
 0x466   : > { %8140 = vmatmul.mubr.msk.f32.gmra.mrb[160].mxu0 %vm2904_vm14, %v11996_v14 }
 0x467   : > { %3646 = vmatprep.mubr.f32.mxu0 %v15635_v18  ;;  %v12306_v57 = vpop.f32.mrb[118].mxu1 }
 0x468   : > { %4731 = vrot.lane.b32.xlu0 %v3217_v34, %s15500_s13  ;;  %v12309_v16 = vpop.f32.mrb[119].mxu1 }
 0x46a   : > { %8141 = vmatmul.mubr.msk.f32.gmra.mrb[162].mxu0 %vm2904_vm14, %v12004_v6 }
 0x46b   : > { %3652 = vmatprep.mubr.f32.mxu0 %v15635_v18  ;;  %v12314_v17 = vpop.f32.mrb[120].mxu1 }
 0x46c   : > { %4741 = vrot.lane.b32.xlu0 %v3221_v25, %s15500_s13  ;;  %v12317_v36 = vpop.f32.mrb[121].mxu1 }
 0x46e   : > { %8142 = vmatmul.mubr.msk.f32.gmra.mrb[164].mxu0 %vm2904_vm14, %v12012_v4 }
 0x46f   : > { %3658 = vmatprep.mubr.f32.mxu0 %v15635_v18  ;;  %v12322_v14 = vpop.f32.mrb[122].mxu1 }
 0x470   : > { %4743 = vrot.lane.b32.xlu0 %v3223_v23, %s15500_s13  ;;  %v12325_v34 = vpop.f32.mrb[123].mxu1 }
 0x472   : > { %8143 = vmatmul.mubr.msk.f32.gmra.mrb[166].mxu0 %vm2904_vm14, %v12020_v43 }
 0x473   : > { %3664 = vmatprep.mubr.f32.mxu0 %v15635_v18  ;;  %v12330_v6 = vpop.f32.mrb[124].mxu1 }
 0x474   : > { %4795 = vrot.lane.b32.xlu0 %v3227_v9, %s15479_s0  ;;  %v12333_v25 = vpop.f32.mrb[125].mxu1 }
 0x475   : > { %15664 = vst [vmem:[#allocation34_spill] sm:$0xff] %v12333_v25 }
 0x476   : > { %8144 = vmatmul.mubr.msk.f32.gmra.mrb[168].mxu0 %vm2904_vm14, %v12028_v61 }
 0x477   : > { %3670 = vmatprep.mubr.f32.mxu0 %v15635_v18  ;;  %v12338_v4 = vpop.f32.mrb[126].mxu1 }
 0x478   : > { %v12343_v23 = vpop.f32.mrb[127].mxu1 }
 0x479   : > { %15665 = vst [vmem:[#allocation32_spill] sm:$0xff] %v12343_v23 }
 0x47a   : > { %8145 = vmatmul.mubr.msk.f32.gmra.mrb[170].mxu0 %vm2904_vm14, %v12036_v22  ;;  %v12355_v22 = vpop.permute.xlu0 %5801 }
 0x47b   : > { %3676 = vmatprep.mubr.f32.mxu0 %v15635_v18  ;;  %v3263_v43 = vpop.f32.mrb[128].mxu1  ;;  %15668 = vst [vmem:[#allocation35_spill] sm:$0xff] %v12355_v22 }
 0x47c   : > { %v12351_v9 = vpop.f32.mrb[129].mxu1 }
 0x47d   : > { %15666 = vst [vmem:[#allocation70_spill] sm:$0xff] %v12351_v9 }
 0x47e   : > { %8146 = vmatmul.mubr.msk.f32.gmra.mrb[172].mxu0 %vm2904_vm14, %v12044_v0 }
 0x47f   : > { %3682 = vmatprep.mubr.f32.mxu0 %v15635_v18  ;;  %v3268_v61 = vpop.f32.mrb[130].mxu1 }
 0x480   : > { %v12353_v25 = vpop.f32.mrb[131].mxu1 }
 0x481   : > { %15667 = vst [vmem:[#allocation72_spill] sm:$0xff] %v12353_v25  ;;  %v12367_v25 = vpop.permute.xlu0 %5806 }
 0x482   : > { %8147 = vmatmul.mubr.msk.f32.gmra.mrb[174].mxu0 %vm2904_vm14, %v12052_v62  ;;  %15671 = vst [vmem:[#allocation41_spill] sm:$0xff] %v12367_v25 }
 0x483   : > { %3688 = vmatprep.mubr.f32.mxu0 %v15635_v18  ;;  %v3273_v43 = vpop.f32.mrb[132].mxu1 }
 0x484   : > { %v12360_v0 = vpop.f32.mrb[133].mxu1 }
 0x485   : > { %15669 = vst [vmem:[#allocation77_spill] sm:$0xff] %v12360_v0 }
 0x486   : > { %8148 = vmatmul.mubr.msk.f32.gmra.mrb[176].mxu0 %vm2904_vm14, %v12060_v1 }
 0x487   : > { %3694 = vmatprep.mubr.f32.mxu0 %v15635_v18  ;;  %v3278_v23 = vpop.f32.mrb[134].mxu1 }
 0x488   : > { %v12362_v3 = vpop.f32.mrb[135].mxu1 }
 0x489   : > { %15670 = vst [vmem:[#allocation78_spill] sm:$0xff] %v12362_v3 }
 0x48a   : > { %8149 = vmatmul.mubr.msk.f32.gmra.mrb[178].mxu0 %vm2904_vm14, %v12074_v15 }
 0x48b   : > { %3700 = vmatprep.mubr.f32.mxu0 %v15635_v18  ;;  %v3283_v61 = vpop.f32.mrb[136].mxu1 }
 0x48c   : > { %v12369_v22 = vpop.f32.mrb[137].mxu1 }
 0x48d   : > { %15672 = vst [vmem:[#allocation47_spill] sm:$0xff] %v12369_v22 }
 0x48e   : > { %8150 = vmatmul.mubr.msk.f32.gmra.mrb[180].mxu0 %vm2904_vm14, %v12086_v46 }
 0x48f   : > { %v2833_v43 = vpop.permute.xlu1 %2832  ;;  %3706 = vmatprep.mubr.f32.mxu0 %v15635_v18  ;;  %v3288_v9 = vpop.f32.mrb[138].mxu1 }
 0x490   : > { %v2853_v23 = vmax.f32 %v12180_v24, %v2833_v43  ;;  %v2831_v3 = vpop.permute.xlu0 %2830  ;;  %v12375_v0 = vpop.f32.mrb[139].mxu1 }
 0x491   : > { %v2838_v15 = vsel %vm1442_vm5, %v12062_v12, %v2831_v3  ;;  %v2839_v61 = vsel %vm1442_vm5, %v2831_v3, %v2833_v43  ;;  %vm15707_vm5 = vcmask 523264  }
 0x492   : > { %v2851_v25 = vmax.f32 %v11770_v41, %v2838_v15  ;;  %v2852_v22 = vmax.f32 %v12187_v30, %v2839_v61  ;;  %8627 = vmatprep.subr.msk.mxu0 %vm3055_vm13, %v2853_v23  ;;  %8151 = vmatmul.mubr.msk.f32.gmra.mrb[182].mxu0 %vm2904_vm14, %v12097_v35  ;;  %vm15755_vm2 = vmmov %vm15707_vm5 }
 0x493   : > { %8628 = vmatpush3.msk.msra.mxu0 %vm3055_vm13, %v2853_v23  ;;  %3712 = vmatprep.mubr.f32.mxu0 %v15635_v18  ;;  %v3293_v24 = vpop.f32.mrb[140].mxu1 }
 0x494   : > { %8161 = vmatprep.subr.msk.mxu1 %vm3055_vm13, %v2852_v22  ;;  %v12388_v9 = vpop.f32.mrb[141].mxu1 }
 0x495   : > { %8162 = vmatpush1.msk.msra.mxu1 %vm3055_vm13, %v2851_v25 }
 0x496   : > { %8163 = vmatmul.mubr.msk.f32.vlgmr.msra.gmra.mrb[188].mxu1 %vm2904_vm14, %v11683_v21  ;;  %8152 = vmatmul.mubr.msk.f32.gmra.mrb[184].mxu0 %vm2904_vm14, %v12108_v28 }
 0x497   : > { %3836 = vmatprep.mubr.f32.mxu1 %v15635_v18  ;;  %3718 = vmatprep.mubr.f32.mxu0 %v15635_v18  ;;  %v3298_v41 = vpop.f32.mrb[142].mxu1 }
 0x498   : > { %v12403_v3 = vpop.f32.mrb[143].mxu1 }
 0x49a   : > { %8164 = vmatmul.mubr.msk.f32.gmra.mrb[190].mxu1 %vm2904_vm14, %v11693_v63  ;;  %8153 = vmatmul.mubr.msk.f32.gmra.mrb[186].mxu0 %vm2904_vm14, %v12119_v38 }
 0x49b   : > { %3841 = vmatprep.mubr.f32.mxu1 %v15635_v18  ;;  %3724 = vmatprep.mubr.f32.mxu0 %v15635_v18  ;;  %v3303_v22 = vpop.f32.mrb[144].mxu1 }
 0x49c   : > { %v12423_v12 = vpop.f32.mrb[145].mxu1 }
 0x49e   : > { %8165 = vmatmul.mubr.msk.f32.gmra.mrb[192].mxu1 %vm2904_vm14, %v11701_v8  ;;  %8154 = vmatmul.mubr.msk.f32.gmra.mrb[188].mxu0 %vm2904_vm14, %v12130_v10 }
 0x49f   : > { %3846 = vmatprep.mubr.f32.mxu1 %v15635_v18  ;;  %3730 = vmatprep.mubr.f32.mxu0 %v15635_v18  ;;  %v3308_v15 = vpop.f32.mrb[146].mxu1 }
 0x4a0   : > { %v12425_v30 = vpop.f32.mrb[147].mxu1 }
 0x4a2   : > { %8166 = vmatmul.mubr.msk.f32.gmra.mrb[194].mxu1 %vm2904_vm14, %v11709_v59  ;;  %8155 = vmatmul.mubr.msk.f32.gmra.mrb[190].mxu0 %vm2904_vm14, %v12152_v42 }
 0x4a3   : > { %3851 = vmatprep.mubr.f32.mxu1 %v15635_v18  ;;  %3736 = vmatprep.mubr.f32.mxu0 %v15635_v18  ;;  %v3313_v25 = vpop.f32.mrb[148].mxu1 }
 0x4a4   : > { %v12439_v43 = vpop.f32.mrb[149].mxu1 }
 0x4a6   : > { %8167 = vmatmul.mubr.msk.f32.gmra.mrb[196].mxu1 %vm2904_vm14, %v11717_v50  ;;  %8156 = vmatmul.mubr.msk.f32.gmra.mrb[192].mxu0 %vm2904_vm14, %v12161_v40 }
 0x4a7   : > { %3856 = vmatprep.mubr.f32.mxu1 %v15635_v18  ;;  %3742 = vmatprep.mubr.f32.mxu0 %v15635_v18  ;;  %v3318_v23 = vpop.f32.mrb[150].mxu1 }
 0x4a8   : > { %v12441_v61 = vpop.f32.mrb[151].mxu1 }
 0x4aa   : > { %8168 = vmatmul.mubr.msk.f32.gmra.mrb[198].mxu1 %vm2904_vm14, %v11725_v19  ;;  %8157 = vmatmul.mubr.msk.f32.gmra.mrb[194].mxu0 %vm2904_vm14, %v12172_v47 }
 0x4ab   : > { %3861 = vmatprep.mubr.f32.mxu1 %v15635_v18  ;;  %3748 = vmatprep.mubr.f32.mxu0 %v15635_v18  ;;  %v3323_v24 = vpop.f32.mrb[152].mxu1 }
 0x4ac   : > { %v12449_v41 = vpop.f32.mrb[153].mxu1 }
 0x4ae   : > { %8169 = vmatmul.mubr.msk.f32.gmra.mrb[200].mxu1 %vm2904_vm14, %v11735_v13  ;;  %8158 = vmatmul.mubr.msk.f32.gmra.mrb[196].mxu0 %vm2904_vm14, %v12193_v7 }
 0x4af   : > { %3866 = vmatprep.mubr.f32.mxu1 %v15635_v18  ;;  %3754 = vmatprep.mubr.f32.mxu0 %v15635_v18  ;;  %v3328_v22 = vpop.f32.mrb[154].mxu1 }
 0x4b0   : > { %v12458_v15 = vpop.f32.mrb[155].mxu1 }
 0x4b2   : > { %8170 = vmatmul.mubr.msk.f32.gmra.mrb[202].mxu1 %vm2904_vm14, %v11746_v49  ;;  %8159 = vmatmul.mubr.msk.f32.gmra.mrb[198].mxu0 %vm2904_vm14, %v12208_v32 }
 0x4b3   : > { %3871 = vmatprep.mubr.f32.mxu1 %v15635_v18  ;;  %3760 = vmatprep.mubr.f32.mxu0 %v15635_v18  ;;  %v3333_v25 = vpop.f32.mrb[156].mxu1 }
 0x4b4   : > { %v12467_v23 = vpop.f32.mrb[157].mxu1 }
 0x4b6   : > { %8171 = vmatmul.mubr.msk.f32.gmra.mrb[204].mxu1 %vm2904_vm14, %v11756_v33  ;;  %8160 = vmatmul.mubr.msk.f32.gmra.mrb[200].mxu0 %vm2904_vm14, %v12219_v11 }
 0x4b7   : > { %3876 = vmatprep.mubr.f32.mxu1 %v15635_v18  ;;  %8629 = vmatprep.mubr.msk.f32.mxu0 %vm2904_vm14, %v11683_v21  ;;  %v3338_v24 = vpop.f32.mrb[158].mxu1 }
 0x4ba   : > { %8172 = vmatmul.mubr.msk.f32.gmra.mrb[206].mxu1 %vm2904_vm14, %v11780_v54  ;;  %8630 = vmatmul.mubr.msk.f32.vlgmr.msra.gmra.mrb[202].mxu0 %vm2904_vm14, %v11693_v63 }
 0x4bb   : > { %3881 = vmatprep.mubr.f32.mxu1 %v15635_v18  ;;  %8632 = vmatprep.mubr.msk.f32.mxu0 %vm2904_vm14, %v11701_v8 }
 0x4be   : > { %8173 = vmatmul.mubr.msk.f32.gmra.mrb[208].mxu1 %vm2904_vm14, %v11799_v53  ;;  %8633 = vmatmul.mubr.msk.f32.gmra.mrb[204].mxu0 %vm2904_vm14, %v11709_v59 }
 0x4bf   : > { %3887 = vmatprep.mubr.f32.mxu1 %v15635_v18  ;;  %8635 = vmatprep.mubr.msk.f32.mxu0 %vm2904_vm14, %v11717_v50  ;;  %v12505_v50 = vpop.f32.mrb[159].mxu1 }
 0x4c2   : > { %8174 = vmatmul.mubr.msk.f32.gmra.mrb[210].mxu1 %vm2904_vm14, %v11814_v31  ;;  %8636 = vmatmul.mubr.msk.f32.gmra.mrb[206].mxu0 %vm2904_vm14, %v11725_v19  ;;  %v3343_v19 = vpop.f32.mrb[160].mxu1 }
 0x4c3   : > { %3893 = vmatprep.mubr.f32.mxu1 %v15635_v18  ;;  %8638 = vmatprep.mubr.msk.f32.mxu0 %vm2904_vm14, %v11735_v13 }
 0x4c5   : > { %v12483_v21 = vpop.f32.mrb[102].mxu0 }
 0x4c6   : > { %15673 = vst [vmem:[#allocation42_spill] sm:$0xff] %v12483_v21  ;;  %v12485_v63 = vpop.f32.mrb[103].mxu0  ;;  %8175 = vmatmul.mubr.msk.f32.gmra.mrb[212].mxu1 %vm2904_vm14, %v11826_v48  ;;  %8639 = vmatmul.mubr.msk.f32.gmra.mrb[208].mxu0 %vm2904_vm14, %v11746_v49  ;;  %v12507_v49 = vpop.f32.mrb[161].mxu1 }
 0x4c7   : > { %15674 = vst [vmem:[#allocation79_spill] sm:$0xff] %v12485_v63  ;;  %3899 = vmatprep.mubr.f32.mxu1 %v15635_v18  ;;  %8641 = vmatprep.mubr.msk.f32.mxu0 %vm2904_vm14, %v11756_v33 }
 0x4c9   : > { %v12494_v8 = vpop.f32.mrb[104].mxu0 }
 0x4ca   : > { %15675 = vst [vmem:[#allocation16_spill] sm:$0xff] %v12494_v8  ;;  %v12496_v59 = vpop.f32.mrb[105].mxu0  ;;  %8176 = vmatmul.mubr.msk.f32.gmra.mrb[214].mxu1 %vm2904_vm14, %v11838_v2  ;;  %8642 = vmatmul.mubr.msk.f32.gmra.mrb[210].mxu0 %vm2904_vm14, %v11780_v54  ;;  %v3348_v54 = vpop.f32.mrb[162].mxu1 }
 0x4cb   : > { %15676 = vst [vmem:[#allocation80_spill] sm:$0xff] %v12496_v59  ;;  %3905 = vmatprep.mubr.f32.mxu1 %v15635_v18  ;;  %8644 = vmatprep.mubr.msk.f32.mxu0 %vm2904_vm14, %v11799_v53  ;;  %v12516_v53 = vpop.f32.mrb[163].mxu1 }
 0x4cc   : > { %v3353_v25 = vpop.f32.mrb[164].mxu1 }
 0x4cd   : > { %v3480_v13 = vpop.f32.mrb[106].mxu0  ;;  %v12526_v19 = vpop.f32.mrb[165].mxu1 }
 0x4ce   : > { %4431 = vrot.lane.b32.xlu1 %v3480_v13, %s15467_s28  ;;  %v3482_v33 = vpop.f32.mrb[107].mxu0  ;;  %8177 = vmatmul.mubr.msk.f32.gmra.mrb[216].mxu1 %vm2904_vm14, %v11850_v58 }
 0x4cf   : > { %4433 = vrot.lane.b32.xlu0 %v3482_v33, %s15467_s28  ;;  %3911 = vmatprep.mubr.f32.mxu1 %v15635_v18 }
 0x4d0   : > { %8645 = vmatmul.mubr.msk.f32.gmra.mrb[212].mxu0 %vm2904_vm14, %v11814_v31  ;;  %v3358_v31 = vpop.f32.mrb[166].mxu1 }
 0x4d1   : > { %v3486_v22 = vpop.f32.mrb[108].mxu0  ;;  %8647 = vmatprep.mubr.msk.f32.mxu0 %vm2904_vm14, %v11826_v48 }
 0x4d2   : > { %4797 = vrot.lane.b32.xlu1 %v12301_v20, %s15479_s0  ;;  %v3488_v24 = vpop.f32.mrb[109].mxu0  ;;  %8178 = vmatmul.mubr.msk.f32.gmra.mrb[218].mxu1 %vm2904_vm14, %v11862_v56 }
 0x4d3   : > { %4443 = vrot.lane.b32.xlu0 %v3488_v24, %s15467_s28  ;;  %3917 = vmatprep.mubr.f32.mxu1 %v15635_v18 }
 0x4d4   : > { %8648 = vmatmul.mubr.msk.f32.gmra.mrb[214].mxu0 %vm2904_vm14, %v11838_v2 }
 0x4d5   : > { %v3492_v13 = vpop.f32.mrb[110].mxu0  ;;  %8650 = vmatprep.mubr.msk.f32.mxu0 %vm2904_vm14, %v11850_v58  ;;  %v12548_v58 = vpop.f32.mrb[167].mxu1 }
 0x4d6   : > { %4441 = vrot.lane.b32.xlu1 %v3486_v22, %s15467_s28  ;;  %v3494_v48 = vpop.f32.mrb[111].mxu0  ;;  %8179 = vmatmul.mubr.msk.f32.gmra.mrb[220].mxu1 %vm2904_vm14, %v11874_v27 }
 0x4d7   : > { %4489 = vrot.lane.b32.xlu0 %v3492_v13, %s15470_s18  ;;  %3923 = vmatprep.mubr.f32.mxu1 %v15635_v18 }
 0x4d8   : > { %8651 = vmatmul.mubr.msk.f32.gmra.mrb[216].mxu0 %vm2904_vm14, %v11862_v56  ;;  %v12550_v56 = vpop.permute.xlu0 %4427 }
 0x4d9   : > { %v3498_v20 = vpop.f32.mrb[112].mxu0  ;;  %8653 = vmatprep.mubr.msk.f32.mxu0 %vm2904_vm14, %v11874_v27  ;;  %v3363_v27 = vpop.f32.mrb[168].mxu1 }
 0x4da   : > { %4807 = vrot.lane.b32.xlu1 %v12306_v57, %s15479_s0  ;;  %v3500_v2 = vpop.f32.mrb[113].mxu0  ;;  %8180 = vmatmul.mubr.msk.f32.gmra.mrb[222].mxu1 %vm2904_vm14, %v11884_v60  ;;  %v3364_v57 = vpop.f32.mrb[169].mxu1 }
 0x4db   : > { %4863 = vrot.lane.b32.xlu0 %v12317_v36, %s9452_s27  ;;  %3929 = vmatprep.mubr.f32.mxu1 %v15635_v18  ;;  %v3367_v36 = vpop.f32.mrb[170].mxu1 }
 0x4dc   : > { %8654 = vmatmul.mubr.msk.f32.gmra.mrb[218].mxu0 %vm2904_vm14, %v11884_v60  ;;  %v3368_v60 = vpop.f32.mrb[171].mxu1 }
 0x4dd   : > { %v3504_v33 = vpop.f32.mrb[114].mxu0  ;;  %8656 = vmatprep.mubr.msk.f32.mxu0 %vm2904_vm14, %v11897_v39  ;;  %v3371_v25 = vpop.f32.mrb[172].mxu1 }
 0x4de   : > { %4809 = vrot.lane.b32.xlu1 %v12309_v16, %s15479_s0  ;;  %v3506_v54 = vpop.f32.mrb[115].mxu0  ;;  %8181 = vmatmul.mubr.msk.f32.gmra.mrb[224].mxu1 %vm2904_vm14, %v11897_v39  ;;  %v12575_v39 = vpop.permute.xlu0 %4429 }
 0x4df   : > { %4501 = vrot.lane.b32.xlu0 %v3500_v2, %s15470_s18  ;;  %3935 = vmatprep.mubr.f32.mxu1 %v15635_v18  ;;  %v3372_v24 = vpop.f32.mrb[173].mxu1 }
 0x4e0   : > { %8657 = vmatmul.mubr.msk.f32.gmra.mrb[220].mxu0 %vm2904_vm14, %v11909_v55  ;;  %v3375_v31 = vpop.f32.mrb[174].mxu1  ;;  %v15677_v24 = vld [vmem:[#allocation58_spill] sm:$0xff] }
 0x4e1   : > { %v12564_v22 = vpop.f32.mrb[116].mxu0  ;;  %8659 = vmatprep.mubr.msk.f32.mxu0 %vm2904_vm14, %v11920_v26  ;;  %v15678_v31 = vld [vmem:[#allocation61_spill] sm:$0xff] }
 0x4e2   : > { %4861 = vrot.lane.b32.xlu1 %v12314_v17, %s9452_s27  ;;  %v3512_v16 = vpop.f32.mrb[117].mxu0  ;;  %8182 = vmatmul.mubr.msk.f32.gmra.mrb[226].mxu1 %vm2904_vm14, %v11909_v55  ;;  %v3376_v17 = vpop.f32.mrb[175].mxu1 }
 0x4e3   : > { %4875 = vrot.lane.b32.xlu0 %v12325_v34, %s9452_s27  ;;  %3941 = vmatprep.mubr.f32.mxu1 %v15635_v18  ;;  %v3379_v34 = vpop.f32.mrb[176].mxu1  ;;  %v12593_v57 = vpop.permute.xlu0 %4437 }
 0x4e4   : > { %8660 = vmatmul.mubr.msk.f32.gmra.mrb[222].mxu0 %vm2904_vm14, %v11932_v37  ;;  %v3380_v2 = vpop.f32.mrb[177].mxu1 }
 0x4e5   : > { %v12579_v13 = vpop.f32.mrb[118].mxu0  ;;  %8662 = vmatprep.mubr.msk.f32.mxu0 %vm2904_vm14, %v11940_v5  ;;  %v15679_v2 = vld [vmem:[#allocation21_spill] sm:$0xff] }
 0x4e6   : > { %4491 = vrot.lane.b32.xlu1 %v3494_v48, %s15470_s18  ;;  %v3518_v55 = vpop.f32.mrb[119].mxu0  ;;  %8183 = vmatmul.mubr.msk.f32.gmra.mrb[228].mxu1 %vm2904_vm14, %v11920_v26 }
 0x4e7   : > { %4928 = vrot.lane.b32.xlu0 %v12330_v6, %s9453_s30  ;;  %3947 = vmatprep.mubr.f32.mxu1 %v15635_v18  ;;  %v3383_v6 = vpop.f32.mrb[178].mxu1 }
 0x4e8   : > { %8663 = vmatmul.mubr.msk.f32.gmra.mrb[224].mxu0 %vm2904_vm14, %v11948_v51  ;;  %v3384_v48 = vpop.f32.mrb[179].mxu1 }
 0x4e9   : > { %v12591_v27 = vpop.f32.mrb[120].mxu0  ;;  %8665 = vmatprep.mubr.msk.f32.mxu0 %vm2904_vm14, %v11956_v44  ;;  %v15681_v48 = vld [vmem:[#allocation62_spill] sm:$0xff] }
 0x4ea   : > { %4499 = vrot.lane.b32.xlu1 %v3498_v20, %s15470_s18  ;;  %v3524_v26 = vpop.f32.mrb[121].mxu0  ;;  %8184 = vmatmul.mubr.msk.f32.gmra.mrb[230].mxu1 %vm2904_vm14, %v11932_v37  ;;  %v3387_v37 = vpop.f32.mrb[180].mxu1 }
 0x4eb   : > { %4549 = vrot.lane.b32.xlu0 %v3506_v54, %s9450_s9  ;;  %3953 = vmatprep.mubr.f32.mxu1 %v15635_v18  ;;  %v12614_v54 = vpop.permute.xlu0 %4439  ;;  %v3388_v60 = vpop.f32.mrb[181].mxu1 }
 0x4ec   : > { %8666 = vmatmul.mubr.msk.f32.gmra.mrb[226].mxu0 %vm2904_vm14, %v11964_v45  ;;  %v15682_v60 = vld [vmem:[#allocation64_spill] sm:$0xff] }
 0x4ed   : > { %v12604_v36 = vpop.f32.mrb[122].mxu0  ;;  %8668 = vmatprep.mubr.msk.f32.mxu0 %vm2904_vm14, %v11972_v52 }
 0x4ee   : > { %4873 = vrot.lane.b32.xlu1 %v12322_v14, %s9452_s27  ;;  %v3530_v20 = vpop.f32.mrb[123].mxu0  ;;  %8185 = vmatmul.mubr.msk.f32.gmra.mrb[232].mxu1 %vm2904_vm14, %v11940_v5  ;;  %v3391_v5 = vpop.f32.mrb[182].mxu1 }
 0x4ef   : > { %4940 = vrot.lane.b32.xlu0 %v12338_v4, %s9453_s30  ;;  %3959 = vmatprep.mubr.f32.mxu1 %v15635_v18  ;;  %v3392_v4 = vpop.f32.mrb[183].mxu1  ;;  %v12632_v34 = vpop.permute.xlu0 %4495 }
 0x4f0   : > { %8669 = vmatmul.mubr.msk.f32.gmra.mrb[228].mxu0 %vm2904_vm14, %v11980_v29 }
 0x4f1   : > { %v3534_v25 = vpop.f32.mrb[124].mxu0  ;;  %8671 = vmatprep.mubr.msk.f32.mxu0 %vm2904_vm14, %v15677_v24 }
 0x4f2   : > { %4547 = vrot.lane.b32.xlu1 %v3504_v33, %s9450_s9  ;;  %v12622_v14 = vpop.f32.mrb[125].mxu0  ;;  %8186 = vmatmul.mubr.msk.f32.gmra.mrb[234].mxu1 %vm2904_vm14, %v11948_v51  ;;  %v15680_v33 = vld [vmem:[#allocation34_spill] sm:$0xff] }
 0x4f3   : > { %4559 = vrot.lane.b32.xlu0 %v3512_v16, %s9450_s9  ;;  %3965 = vmatprep.mubr.f32.mxu1 %v15635_v18  ;;  %v3395_v16 = vpop.f32.mrb[184].mxu1 }
 0x4f4   : > { %8672 = vmatmul.mubr.msk.f32.gmra.mrb[230].mxu0 %vm2904_vm14, %v15678_v31  ;;  %v3396_v6 = vpop.f32.mrb[185].mxu1 }
 0x4f5   : > { %v12630_v17 = vpop.f32.mrb[126].mxu0  ;;  %8674 = vmatprep.mubr.msk.f32.mxu0 %vm2904_vm14, %v15679_v2  ;;  %v15684_v6 = vld [vmem:[#allocation15_spill] sm:$0xff] }
 0x4f6   : > { %4930 = vrot.lane.b32.xlu1 %v15680_v33, %s9453_s30  ;;  %v3542_v51 = vpop.f32.mrb[127].mxu0  ;;  %8187 = vmatmul.mubr.msk.f32.gmra.mrb[236].mxu1 %vm2904_vm14, %v11956_v44  ;;  %v3399_v44 = vpop.f32.mrb[186].mxu1  ;;  %v15683_v33 = vld [vmem:[#allocation22_spill] sm:$0xff] }
 0x4f7   : > { %4608 = vrot.lane.b32.xlu0 %v3518_v55, %s9451_s21  ;;  %3971 = vmatprep.mubr.f32.mxu1 %v15635_v18  ;;  %v12653_v55 = vpop.permute.xlu0 %4497  ;;  %v3400_v4 = vpop.f32.mrb[187].mxu1 }
 0x4f8   : > { %8675 = vmatmul.mubr.msk.f32.gmra.mrb[232].mxu0 %vm2904_vm14, %v15681_v48  ;;  %v15687_v4 = vld [vmem:[#allocation23_spill] sm:$0xff] }
 0x4f9   : > { %v12644_v37 = vpop.f32.mrb[128].mxu0  ;;  %8677 = vmatprep.mubr.msk.f32.mxu0 %vm2904_vm14, %v15682_v60 }
 0x4fa   : > { %4557 = vrot.lane.b32.xlu1 %v12564_v22, %s9450_s9  ;;  %v3548_v5 = vpop.f32.mrb[129].mxu0  ;;  %8188 = vmatmul.mubr.msk.f32.gmra.mrb[238].mxu1 %vm2904_vm14, %v11964_v45  ;;  %v15685_v22 = vld [vmem:[#allocation32_spill] sm:$0xff] }
 0x4fb   : > { %4618 = vrot.lane.b32.xlu0 %v3524_v26, %s9451_s21  ;;  %3977 = vmatprep.mubr.f32.mxu1 %v15635_v18  ;;  %v15686_v45 = vld [vmem:[#allocation24_spill] sm:$0xff]  ;;  %v12670_v26 = vpop.permute.xlu0 %4545 }
 0x4fc   : > { %8678 = vmatmul.mubr.msk.f32.gmra.mrb[234].mxu0 %vm2904_vm14, %v15683_v33 }
 0x4fd   : > { %v3552_v16 = vpop.f32.mrb[130].mxu0  ;;  %8680 = vmatprep.mubr.msk.f32.mxu0 %vm2904_vm14, %v15684_v6  ;;  %v9350_v6 = vld [vmem:[%s15211_s3 + $0x120] sm:$0xff] }
 0x4fe   : > { %4942 = vrot.lane.b32.xlu1 %v15685_v22, %s9453_s30  ;;  %v12662_v59 = vpop.f32.mrb[131].mxu0  ;;  %8189 = vmatmul.mubr.msk.f32.gmra.mrb[240].mxu1 %vm2904_vm14, %v11972_v52 }
 0x4ff   : > { %4669 = vrot.lane.b32.xlu0 %v3530_v20, %s15497_s24  ;;  %3983 = vmatprep.mubr.f32.mxu1 %v15635_v18 }
 0x500   : > { %8681 = vmatmul.mubr.msk.f32.gmra.mrb[236].mxu0 %vm2904_vm14, %v15686_v45 }
 0x501   : > { %v3558_v44 = vpop.f32.mrb[132].mxu0  ;;  %8683 = vmatprep.mubr.msk.f32.mxu0 %vm2904_vm14, %v12052_v62 }
 0x502   : > { %4606 = vrot.lane.b32.xlu1 %v12579_v13, %s9451_s21  ;;  %8190 = vmatmul.mubr.msk.f32.gmra.mrb[242].mxu1 %vm2904_vm14, %v11980_v29  ;;  %v12678_v52 = vpop.f32.mrb[133].mxu0  ;;  %v12695_v29 = vpop.permute.xlu0 %4553 }
 0x503   : > { %4679 = vrot.lane.b32.xlu0 %v3534_v25, %s15497_s24  ;;  %3989 = vmatprep.mubr.f32.mxu1 %v15635_v18 }
 0x504   : > { %8684 = vmatmul.mubr.msk.f32.gmra.mrb[238].mxu0 %vm2904_vm14, %v12060_v1 }
 0x505   : > { %v12684_v20 = vpop.f32.mrb[134].mxu0  ;;  %8686 = vmatprep.mubr.msk.f32.mxu0 %vm2904_vm14, %v15687_v4 }
 0x506   : > { %4616 = vrot.lane.b32.xlu1 %v12591_v27, %s9451_s21  ;;  %v12690_v62 = vpop.f32.mrb[135].mxu0  ;;  %8191 = vmatmul.mubr.msk.f32.gmra.mrb[244].mxu1 %vm2904_vm14, %v15677_v24  ;;  %v12760_v24 = vpop.permute.xlu1 %4485 }
 0x507   : > { %4735 = vrot.lane.b32.xlu0 %v3542_v51, %s15500_s13  ;;  %3995 = vmatprep.mubr.f32.mxu1 %v15635_v18 }
 0x508   : > { %8687 = vmatmul.mubr.msk.f32.gmra.mrb[240].mxu0 %vm2904_vm14, %v12086_v46  ;;  %v12714_v46 = vpop.permute.xlu0 %4555 }
 0x509   : > { %v12700_v1 = vpop.f32.mrb[136].mxu0  ;;  %8689 = vmatprep.mubr.msk.f32.mxu0 %vm2904_vm14, %v12097_v35  ;;  %v15688_v35 = vld [vmem:[#allocation77_spill] sm:$0xff] }
 0x50a   : > { %4667 = vrot.lane.b32.xlu1 %v12604_v36, %s15497_s24  ;;  %v12706_v13 = vpop.f32.mrb[137].mxu0  ;;  %8192 = vmatmul.mubr.msk.f32.gmra.mrb[246].mxu1 %vm2904_vm14, %v15678_v31  ;;  %v15694_v31 = vld [vmem:[#allocation47_spill] sm:$0xff] }
 0x50b   : > { %4747 = vrot.lane.b32.xlu0 %v3548_v5, %s15500_s13  ;;  %4001 = vmatprep.mubr.f32.mxu1 %v15635_v18  ;;  %v9349_v5 = vld [vmem:[%s15211_s3 + $0x118] sm:$0xff] }
 0x50c   : > { %8690 = vmatmul.mubr.msk.f32.gmra.mrb[242].mxu0 %vm2904_vm14, %v12108_v28 }
 0x50d   : > { %v12716_v27 = vpop.f32.mrb[138].mxu0  ;;  %8692 = vmatprep.mubr.msk.f32.mxu0 %vm2904_vm14, %v12119_v38 }
 0x50e   : > { %5003 = vrot.lane.b32.xlu1 %v15688_v35, %s15467_s28  ;;  %v12722_v36 = vpop.f32.mrb[139].mxu0  ;;  %8193 = vmatmul.mubr.msk.f32.gmra.mrb[248].mxu1 %vm2904_vm14, %v15679_v2  ;;  %v9348_v2 = vld [vmem:[%s15211_s3 + $0x110] sm:$0xff] }
 0x50f   : > { %5071 = vrot.lane.b32.xlu0 %v12375_v0, %s15470_s18  ;;  %4007 = vmatprep.mubr.f32.mxu1 %v15635_v18  ;;  %v12742_v0 = vpop.permute.xlu0 %4604 }
 0x510   : > { %8693 = vmatmul.mubr.msk.f32.gmra.mrb[244].mxu0 %vm2904_vm14, %v12130_v10 }
 0x511   : > { %v12731_v28 = vpop.f32.mrb[140].mxu0  ;;  %8695 = vmatprep.mubr.msk.f32.mxu0 %vm2904_vm14, %v12152_v42  ;;  %v15690_v42 = vld [vmem:[#allocation78_spill] sm:$0xff] }
 0x512   : > { %4681 = vrot.lane.b32.xlu1 %v12622_v14, %s15497_s24  ;;  %v12737_v38 = vpop.f32.mrb[141].mxu0  ;;  %8194 = vmatmul.mubr.msk.f32.gmra.mrb[250].mxu1 %vm2904_vm14, %v15681_v48 }
 0x513   : > { %4799 = vrot.lane.b32.xlu0 %v3552_v16, %s15479_s0  ;;  %4013 = vmatprep.mubr.f32.mxu1 %v15635_v18 }
 0x514   : > { %8696 = vmatmul.mubr.msk.f32.gmra.mrb[246].mxu0 %vm2904_vm14, %v12161_v40  ;;  %v12764_v40 = vpop.permute.xlu0 %4612 }
 0x515   : > { %v12747_v10 = vpop.f32.mrb[142].mxu0  ;;  %8698 = vmatprep.mubr.msk.f32.mxu0 %vm2904_vm14, %v12172_v47 }
 0x516   : > { %15689 = vst [vmem:[#allocation29_spill] sm:$0xff] %v12747_v10  ;;  %5013 = vrot.lane.b32.xlu1 %v15690_v42, %s15467_s28  ;;  %v12753_v25 = vpop.f32.mrb[143].mxu0  ;;  %8195 = vmatmul.mubr.msk.f32.gmra.mrb[252].mxu1 %vm2904_vm14, %v15682_v60 }
 0x517   : > { %15691 = vst [vmem:[#allocation33_spill] sm:$0xff] %v12753_v25  ;;  %5119 = vrot.lane.b32.xlu0 %v12388_v9, %s9450_s9  ;;  %4019 = vmatprep.mubr.f32.mxu1 %v15635_v18  ;;  %v9347_v9 = vld [vmem:[%s15211_s3 + $0x108] sm:$0xff] }
 0x518   : > { %8699 = vmatmul.mubr.msk.f32.gmra.mrb[248].mxu0 %vm2904_vm14, %v12193_v7  ;;  %v12794_v51 = vpop.permute.xlu0 %4614 }
 0x519   : > { %v12766_v47 = vpop.f32.mrb[144].mxu0  ;;  %8701 = vmatprep.mubr.msk.f32.mxu0 %vm2904_vm14, %v12208_v32  ;;  %v12784_v32 = vpop.permute.xlu1 %4487 }
 0x51a   : > { %15692 = vst [vmem:[#allocation69_spill] sm:$0xff] %v12766_v47  ;;  %4733 = vrot.lane.b32.xlu1 %v12630_v17, %s15500_s13  ;;  %v12772_v14 = vpop.f32.mrb[145].mxu0  ;;  %8196 = vmatmul.mubr.msk.f32.gmra.mrb[254].mxu1 %vm2904_vm14, %v9347_v9  ;;  %v9353_v9 = vld [vmem:[%s15211_s3 + $0x138] sm:$0xff] }
 0x51b   : > { %15693 = vst [vmem:[#allocation76_spill] sm:$0xff] %v12772_v14  ;;  %4811 = vrot.lane.b32.xlu0 %v3558_v44, %s15479_s0  ;;  %4025 = vmatprep.mubr.f32.mxu1 %v15635_v18 }
 0x51c   : > { %8702 = vmatmul.mubr.msk.f32.gmra.mrb[250].mxu0 %vm2904_vm14, %v12219_v11 }
 0x51d   : > { %v12782_v7 = vpop.f32.mrb[146].mxu0  ;;  %v12799_v48 = vpop.permute.xlu1 %4543 }
 0x51e   : > { %5061 = vrot.lane.b32.xlu1 %v15694_v31, %s15470_s18  ;;  %v3602_v17 = vpop.f32.mrb[147].mxu0  ;;  %8197 = vmatmul.mubr.msk.f32.gmra.mrb[0].mxu1 %vm2904_vm14, %v9348_v2 }
 0x51f   : > { %5129 = vrot.lane.b32.xlu0 %v12403_v3, %s9450_s9  ;;  %4031 = vmatprep.mubr.f32.mxu1 %v15635_v18  ;;  %v12812_v3 = vpop.permute.xlu0 %4665 }
 0x521   : > { %v12797_v11 = vpop.f32.mrb[148].mxu0  ;;  %v12816_v16 = vpop.permute.xlu1 %4602 }
 0x522   : > { %4745 = vrot.lane.b32.xlu1 %v12644_v37, %s15500_s13  ;;  %v12803_v60 = vpop.f32.mrb[149].mxu0  ;;  %8198 = vmatmul.mubr.msk.f32.gmra.mrb[2].mxu1 %vm2904_vm14, %v9349_v5 }
 0x523   : > { %4867 = vrot.lane.b32.xlu0 %v12690_v62, %s9452_s27  ;;  %4037 = vmatprep.mubr.f32.mxu1 %v15635_v18  ;;  %v12841_v44 = vpop.permute.xlu0 %4731 }
 0x525   : > { %v12814_v33 = vpop.f32.mrb[150].mxu0  ;;  %v12844_v4 = vpop.permute.xlu1 %4663 }
 0x526   : > { %4801 = vrot.lane.b32.xlu1 %v12662_v59, %s15479_s0  ;;  %v12820_v37 = vpop.f32.mrb[151].mxu0  ;;  %8199 = vmatmul.mubr.msk.f32.gmra.mrb[4].mxu1 %vm2904_vm14, %v9350_v6  ;;  %v9351_v59 = vld [vmem:[%s15211_s3 + $0x128] sm:$0xff] }
 0x527   : > { %4879 = vrot.lane.b32.xlu0 %v12706_v13, %s9452_s27  ;;  %4043 = vmatprep.mubr.f32.mxu1 %v15635_v18  ;;  %v9352_v13 = vld [vmem:[%s15211_s3 + $0x130] sm:$0xff]  ;;  %v9355_v6 = vld [vmem:[%s15211_s3 + $0x148] sm:$0xff] }
 0x529   : > { %v12829_v22 = vpop.f32.mrb[152].mxu0  ;;  %v12863_v42 = vpop.permute.xlu1 %4675 }
 0x52a   : > { %4813 = vrot.lane.b32.xlu1 %v12678_v52, %s15479_s0  ;;  %v12833_v45 = vpop.f32.mrb[153].mxu0  ;;  %8200 = vmatmul.mubr.msk.f32.gmra.mrb[6].mxu1 %vm2904_vm14, %v9351_v59 }
 0x52b   : > { %5187 = vrot.lane.b32.xlu0 %v12425_v30, %s9451_s21  ;;  %4049 = vmatprep.mubr.f32.mxu1 %v15635_v18  ;;  %v12859_v30 = vpop.permute.xlu0 %4741 }
 0x52d   : > { %v12846_v62 = vpop.f32.mrb[154].mxu0 }
 0x52e   : > { %4865 = vrot.lane.b32.xlu1 %v12684_v20, %s9452_s27  ;;  %v12850_v52 = vpop.f32.mrb[155].mxu0  ;;  %8201 = vmatmul.mubr.msk.f32.gmra.mrb[8].mxu1 %vm2904_vm14, %v9352_v13 }
 0x52f   : > { %4932 = vrot.lane.b32.xlu0 %v12716_v27, %s9453_s30  ;;  %4055 = vmatprep.mubr.f32.mxu1 %v15635_v18  ;;  %v12888_v2 = vpop.permute.xlu0 %4743 }
 0x531   : > { %v12861_v35 = vpop.f32.mrb[156].mxu0 }
 0x532   : > { %5177 = vrot.lane.b32.xlu1 %v12423_v12, %s9451_s21  ;;  %v12867_v20 = vpop.f32.mrb[157].mxu0  ;;  %8202 = vmatmul.mubr.msk.f32.gmra.mrb[10].mxu1 %vm2904_vm14, %v9353_v9  ;;  %v9354_v12 = vld [vmem:[%s15211_s3 + $0x140] sm:$0xff]  ;;  %v9356_v9 = vld [vmem:[%s15211_s3 + $0x150] sm:$0xff] }
 0x533   : > { %4944 = vrot.lane.b32.xlu0 %v12731_v28, %s9453_s30  ;;  %4061 = vmatprep.mubr.f32.mxu1 %v15635_v18  ;;  %v12891_v28 = vpop.permute.xlu1 %4677 }
 0x535   : > { %v12876_v27 = vpop.f32.mrb[158].mxu0 }
 0x536   : > { %4877 = vrot.lane.b32.xlu1 %v12700_v1, %s9452_s27  ;;  %v12880_v31 = vpop.f32.mrb[159].mxu0  ;;  %8203 = vmatmul.mubr.msk.f32.gmra.mrb[12].mxu1 %vm2904_vm14, %v9354_v12 }
 0x537   : > { %5315 = vrot.lane.b32.xlu0 %v12458_v15, %s15500_s13  ;;  %4067 = vmatprep.mubr.f32.mxu1 %v15635_v18  ;;  %v12904_v15 = vpop.permute.xlu0 %4795  ;;  %v12907_v59 = vpop.permute.xlu1 %4729 }
 0x539   : > { %v12893_v5 = vpop.f32.mrb[160].mxu0 }
 0x53a   : > { %4934 = vrot.lane.b32.xlu1 %v12722_v36, %s9453_s30  ;;  %v12897_v1 = vpop.f32.mrb[161].mxu0  ;;  %8204 = vmatmul.mubr.msk.f32.gmra.mrb[14].mxu1 %vm2904_vm14, %v9355_v6 }
 0x53b   : > { %5007 = vrot.lane.b32.xlu0 %v3602_v17, %s15467_s28  ;;  %4073 = vmatprep.mubr.f32.mxu1 %v15635_v18 }
 0x53d   : > { %v12909_v13 = vpop.f32.mrb[162].mxu0 }
 0x53e   : > { %5237 = vrot.lane.b32.xlu1 %v12439_v43, %s15497_s24  ;;  %v12913_v36 = vpop.f32.mrb[163].mxu0  ;;  %8205 = vmatmul.mubr.msk.f32.gmra.mrb[16].mxu1 %vm2904_vm14, %v9356_v9  ;;  %v9357_v9 = vld [vmem:[%s15211_s3 + $0x158] sm:$0xff] }
 0x53f   : > { %5369 = vrot.lane.b32.xlu0 %v12467_v23, %s15479_s0  ;;  %4079 = vmatprep.mubr.f32.mxu1 %v15635_v18 }
 0x540   : > { %v12922_v17 = vpop.permute.xlu1 %4431 }
 0x541   : > { %15695 = vst [vmem:[#allocation73_spill] sm:$0xff] %v12922_v17  ;;  %v12924_v12 = vpop.permute.xlu0 %4433  ;;  %v12926_v6 = vpop.f32.mrb[164].mxu0 }
 0x542   : > { %15696 = vst [vmem:[#allocation75_spill] sm:$0xff] %v12924_v12  ;;  %4946 = vrot.lane.b32.xlu1 %v12737_v38, %s9453_s30  ;;  %v12930_v43 = vpop.f32.mrb[165].mxu0  ;;  %8206 = vmatmul.mubr.msk.f32.gmra.mrb[18].mxu1 %vm2904_vm14, %v9357_v9  ;;  %v9358_v9 = vld [vmem:[%s15211_s3 + $0x160] sm:$0xff] }
 0x543   : > { %5015 = vrot.lane.b32.xlu0 %v12797_v11, %s15467_s28  ;;  %4085 = vmatprep.mubr.f32.mxu1 %v15635_v18 }
 0x544   : > { %v12939_v23 = vpop.permute.xlu1 %4797 }
 0x545   : > { %v12941_v63 = vpop.permute.xlu0 %4443  ;;  %v12943_v14 = vpop.f32.mrb[166].mxu0 }
 0x546   : > { %15697 = vst [vmem:[#allocation57_spill] sm:$0xff] %v12941_v63  ;;  %5249 = vrot.lane.b32.xlu1 %v12441_v61, %s15497_s24  ;;  %v12947_v38 = vpop.f32.mrb[167].mxu0  ;;  %8207 = vmatmul.mubr.msk.f32.gmra.mrb[20].mxu1 %vm2904_vm14, %v9358_v9  ;;  %v9359_v9 = vld [vmem:[%s15211_s3 + $0x168] sm:$0xff] }
 0x547   : > { %5063 = vrot.lane.b32.xlu0 %v12814_v33, %s15470_s18  ;;  %4091 = vmatprep.mubr.f32.mxu1 %v15635_v18 }
 0x548   : > { %v12956_v11 = vpop.permute.xlu1 %4441 }
 0x549   : > { %15698 = vst [vmem:[#allocation53_spill] sm:$0xff] %v12956_v11  ;;  %v12958_v25 = vpop.permute.xlu0 %4489  ;;  %v12960_v47 = vpop.f32.mrb[168].mxu0  ;;  %v9362_v11 = vld [vmem:[%s15211_s3 + $0x180] sm:$0xff] }
 0x54a   : > { %15699 = vst [vmem:[#allocation48_spill] sm:$0xff] %v12958_v25  ;;  %5303 = vrot.lane.b32.xlu1 %v12449_v41, %s15500_s13  ;;  %v12964_v61 = vpop.f32.mrb[169].mxu0  ;;  %8208 = vmatmul.mubr.msk.f32.gmra.mrb[22].mxu1 %vm2904_vm14, %v9359_v9  ;;  %v9360_v9 = vld [vmem:[%s15211_s3 + $0x170] sm:$0xff] }
 0x54b   : > { %5075 = vrot.lane.b32.xlu0 %v12833_v45, %s15470_s18  ;;  %4097 = vmatprep.mubr.f32.mxu1 %v15635_v18 }
 0x54c   : > { %v12973_v33 = vpop.permute.xlu1 %4807 }
 0x54d   : > { %v12975_v10 = vpop.permute.xlu0 %4863  ;;  %v12977_v8 = vpop.f32.mrb[170].mxu0 }
 0x54e   : > { %5005 = vrot.lane.b32.xlu1 %v12782_v7, %s15467_s28  ;;  %v12981_v41 = vpop.f32.mrb[171].mxu0  ;;  %8209 = vmatmul.mubr.msk.f32.gmra.mrb[24].mxu1 %vm2904_vm14, %v9360_v9  ;;  %v9361_v9 = vld [vmem:[%s15211_s3 + $0x178] sm:$0xff] }
 0x54f   : > { %5121 = vrot.lane.b32.xlu0 %v12846_v62, %s9450_s9  ;;  %4103 = vmatprep.mubr.f32.mxu1 %v15635_v18 }
 0x550   : > { %v12990_v45 = vpop.permute.xlu1 %4809 }
 0x551   : > { %v12992_v63 = vpop.permute.xlu0 %4501  ;;  %v12994_v21 = vpop.f32.mrb[172].mxu0 }
 0x552   : > { %15700 = vst [vmem:[#allocation49_spill] sm:$0xff] %v12992_v63  ;;  %5017 = vrot.lane.b32.xlu1 %v12803_v60, %s15467_s28  ;;  %v12998_v7 = vpop.f32.mrb[173].mxu0  ;;  %8210 = vmatmul.mubr.msk.f32.gmra.mrb[26].mxu1 %vm2904_vm14, %v9361_v9 }
 0x553   : > { %5501 = vrot.lane.b32.xlu0 %v12526_v19, %s9453_s30  ;;  %4109 = vmatprep.mubr.f32.mxu1 %v15635_v18  ;;  %v4447_v19 = vsel %vm1513_vm6, %v12550_v56, %v12575_v39 }
 0x554   : > { %v4862_v62 = vpop.permute.xlu1 %4861 }
 0x555   : > { %v13007_v63 = vpop.permute.xlu0 %4875  ;;  %v13009_v12 = vpop.f32.mrb[174].mxu0 }
 0x556   : > { %5381 = vrot.lane.b32.xlu1 %v12505_v50, %s15479_s0  ;;  %v13013_v60 = vpop.f32.mrb[175].mxu0  ;;  %8211 = vmatmul.mubr.msk.f32.gmra.mrb[28].mxu1 %vm2904_vm14, %v9362_v11  ;;  %v4505_v50 = vsel %vm1605_vm8, %v12760_v24, %v12784_v32  ;;  %v15703_v11 = vld [vmem:[#allocation26_spill] sm:$0xff]  ;;  %v4564_v24 = vsel %vm4563_vm0, %v12799_v48, %v12670_v26  ;;  %v4509_v48 = vsel %vm1605_vm8, %v12632_v34, %v12653_v55 }
 0x557   : > { %15701 = vst [vmem:[#allocation54_spill] sm:$0xff] %v13013_v60  ;;  %5131 = vrot.lane.b32.xlu0 %v12861_v35, %s9450_s9  ;;  %4115 = vmatprep.mubr.f32.mxu1 %v15635_v18  ;;  %v4465_v17 = vadd.f32 %v4447_v19, %v15703_v11  ;;  %v9363_v35 = vld [vmem:[%s15211_s3 + $0x188] sm:$0xff]  ;;  %v4623_v18 = vsel %vm4622_vm4, %v12816_v16, %v12742_v0 }
 0x558   : > { %v13025_v9 = vpop.permute.xlu1 %4491  ;;  %v15708_v16 = vld [vmem:[#allocation68_spill] sm:$0xff] }
 0x559   : > { %15702 = vst [vmem:[#allocation51_spill] sm:$0xff] %v13025_v9  ;;  %v4929_v60 = vpop.permute.xlu0 %4928  ;;  %v13030_v25 = vpop.f32.mrb[176].mxu0  ;;  %v4523_v19 = vadd.f32 %v4505_v50, %v4465_v17 }
 0x55a   : > { %5065 = vrot.lane.b32.xlu1 %v12820_v37, %s15470_s18  ;;  %v13035_v56 = vpop.f32.mrb[177].mxu0  ;;  %8212 = vmatmul.mubr.msk.f32.gmra.mrb[30].mxu1 %vm2904_vm14, %v9363_v35  ;;  %v4451_v37 = vsel %vm1513_vm6, %v12593_v57, %v12614_v54  ;;  %v4687_v57 = vsel %vm15707_vm5, %v12844_v4, %v12812_v3  ;;  %vm15714_vm14 = vmmov %vm15707_vm5 }
 0x55b   : > { %15704 = vst [vmem:[#allocation63_spill] sm:$0xff] %v13035_v56  ;;  %5513 = vrot.lane.b32.xlu0 %v12548_v58, %s9453_s30  ;;  %v4582_v56 = vadd.f32 %v4564_v24, %v4523_v19  ;;  %v4470_v17 = vadd.f32 %v4451_v37, %v15708_v16  ;;  %v4753_v19 = vsel %vm15709_vm7, %v12907_v59, %v12841_v44  ;;  %vm15769_vm5 = vmmov %vm15755_vm2 }
 0x55c   : > { %v13046_v11 = vpop.permute.xlu1 %4499 }
 0x55d   : > { %v13054_v9 = vpop.permute.xlu0 %4549  ;;  %v13056_v35 = vpop.f32.mrb[178].mxu0  ;;  %v4641_v50 = vadd.f32 %v4623_v18, %v4582_v56  ;;  %v4627_v18 = vsel %vm4622_vm4, %v12764_v40, %v12794_v51 }
 0x55e   : > { %15705 = vst [vmem:[#allocation18_spill] sm:$0xff] %v13054_v9  ;;  %15706 = vst [vmem:[#allocation17_spill] sm:$0xff] %v13056_v35  ;;  %5435 = vrot.lane.b32.xlu1 %v12507_v49, %s9452_s27  ;;  %v13060_v58 = vpop.f32.mrb[179].mxu0  ;;  %v4568_v49 = vsel %vm4563_vm0, %v12695_v29, %v12714_v46  ;;  %v4528_v35 = vadd.f32 %v4509_v48, %v4470_v17  ;;  %v4819_v29 = vsel %vm15710_vm15, %v12904_v15, %v12939_v23 }
 0x55f   : > { %5181 = vrot.lane.b32.xlu0 %v12880_v31, %s9451_s21  ;;  %v4707_v4 = vadd.f32 %v4687_v57, %v4641_v50  ;;  %v4758_v17 = vsel %vm15715_vm12, %v12859_v30, %v12888_v2  ;;  %vm15771_vm15 = vmmov %vm15755_vm2 }
 0x560   : > { %v4874_v24 = vpop.permute.xlu1 %4873  ;;  %v4587_v59 = vadd.f32 %v4568_v49, %v4528_v35  ;;  %vm15776_vm12 = vmmov %vm15719_vm3 }
 0x561   : > { %v4941_v34 = vpop.permute.xlu0 %4940  ;;  %v13077_v9 = vpop.f32.mrb[180].mxu0  ;;  %v4773_v56 = vadd.f32 %v4753_v19, %v4707_v4 }
 0x562   : > { %5073 = vrot.lane.b32.xlu1 %v12829_v22, %s15470_s18  ;;  %v13081_v31 = vpop.f32.mrb[181].mxu0  ;;  %v4886_v22 = vsel %vm4885_vm9, %v4862_v62, %v12975_v10  ;;  %v4646_v16 = vadd.f32 %v4627_v18, %v4587_v59  ;;  %v4824_v18 = vsel %vm15719_vm3, %v12973_v33, %v12990_v45  ;;  %v15721_v59 = vld [vmem:[#allocation70_spill] sm:$0xff] }
 0x563   : > { %5189 = vrot.lane.b32.xlu0 %v12893_v5, %s9451_s21  ;;  %v4839_v40 = vadd.f32 %v4819_v29, %v4773_v56  ;;  %v4692_v5 = vsel %vm15714_vm14, %v12863_v42, %v12891_v28  ;;  %vm15773_vm14 = vmmov %vm15709_vm7 }
 0x564   : > { %v13091_v37 = vpop.permute.xlu1 %4547  ;;  %v4712_v19 = vadd.f32 %v4692_v5, %v4646_v16 }
 0x565   : > { %v13095_v48 = vpop.permute.xlu0 %4559  ;;  %v13097_v57 = vpop.f32.mrb[182].mxu0  ;;  %v4906_v62 = vadd.f32 %v4886_v22, %v4839_v40 }
 0x566   : > { %15711 = vst [vmem:[#allocation55_spill] sm:$0xff] %v13095_v48  ;;  %15712 = vst [vmem:[#allocation50_spill] sm:$0xff] %v13097_v57  ;;  %5447 = vrot.lane.b32.xlu1 %v12516_v53, %s9452_s27  ;;  %v13101_v15 = vpop.f32.mrb[183].mxu0 }
 0x567   : > { %15713 = vst [vmem:[#allocation52_spill] sm:$0xff] %v13101_v15  ;;  %5239 = vrot.lane.b32.xlu0 %v12909_v13, %s15497_s24 }
 0x568   : > { %v13108_v35 = vpop.permute.xlu1 %4930 }
 0x569   : > { %v4953_v53 = vsel %vm4952_vm1, %v4929_v60, %v13108_v35  ;;  %v13115_v50 = vpop.permute.xlu0 %4608  ;;  %v13117_v49 = vpop.f32.mrb[188].mxu1  ;;  %v4778_v60 = vadd.f32 %v4758_v17, %v4712_v19 }
 0x56a   : > { %15716 = vst [vmem:[#allocation59_spill] sm:$0xff] %v13115_v50  ;;  %15717 = vst [vmem:[#allocation56_spill] sm:$0xff] %v13117_v49  ;;  %v4973_v4 = vadd.f32 %v4953_v53, %v4906_v62  ;;  %5123 = vrot.lane.b32.xlu1 %v12850_v52, %s9450_s9  ;;  %v3835_v42 = vpop.f32.mrb[189].mxu1  ;;  %v13121_v13 = vpop.f32.mrb[184].mxu0  ;;  %v4891_v52 = vsel %vm4885_vm9, %v4874_v24, %v13007_v63 }
 0x56b   : > { %15718 = vst [vmem:[#allocation45_spill] sm:$0xff] %v13121_v13  ;;  %5253 = vrot.lane.b32.xlu0 %v12930_v43, %s15497_s24  ;;  %v13128_v30 = vpop.f32.mrb[185].mxu0  ;;  %v4844_v40 = vadd.f32 %v4824_v18, %v4778_v60  ;;  %v15726_v60 = vld [vmem:[#allocation72_spill] sm:$0xff] }
 0x56c   : > { %15720 = vst [vmem:[#allocation81_spill] sm:$0xff] %v13128_v30  ;;  %v13130_v29 = vpop.permute.xlu1 %4557  ;;  %v13133_v56 = vadd.f32 %v4973_v4, %v15721_v59 }
 0x56d   : > { %v13137_v22 = vpop.permute.xlu0 %4618  ;;  %v13139_v16 = vpop.f32.mrb[190].mxu1  ;;  %v4911_v62 = vadd.f32 %v4891_v52, %v4844_v40 }
 0x56e   : > { %15722 = vst [vmem:[#allocation27_spill] sm:$0xff] %v13133_v56  ;;  %15723 = vst [vmem:[#allocation66_spill] sm:$0xff] %v13137_v22  ;;  %5133 = vrot.lane.b32.xlu1 %v12867_v20, %s9450_s9  ;;  %v3840_v43 = vpop.f32.mrb[191].mxu1  ;;  %v13143_v33 = vpop.f32.mrb[186].mxu0 }
 0x56f   : > { %15724 = vst [vmem:[#allocation67_spill] sm:$0xff] %v13139_v16  ;;  %5305 = vrot.lane.b32.xlu0 %v12943_v14, %s15500_s13  ;;  %v13147_v5 = vpop.f32.mrb[187].mxu0 }
 0x570   : > { %v13149_v17 = vpop.permute.xlu1 %4942 }
 0x571   : > { %v4958_v24 = vsel %vm4952_vm1, %v4941_v34, %v13149_v17  ;;  %v13153_v53 = vpop.permute.xlu0 %4669  ;;  %v13155_v19 = vpop.f32.mrb[192].mxu1 }
 0x572   : > { %15725 = vst [vmem:[#allocation28_spill] sm:$0xff] %v13153_v53  ;;  %v4978_v4 = vadd.f32 %v4958_v24, %v4911_v62  ;;  %5179 = vrot.lane.b32.xlu1 %v12876_v27, %s9451_s21  ;;  %v3845_v20 = vpop.f32.mrb[193].mxu1  ;;  %v13159_v42 = vpop.f32.mrb[188].mxu0 }
 0x573   : > { %5317 = vrot.lane.b32.xlu0 %v12960_v47, %s15500_s13  ;;  %v13163_v14 = vpop.f32.mrb[189].mxu0 }
 0x574   : > { %v13165_v18 = vpop.permute.xlu1 %4606  ;;  %v13168_v34 = vadd.f32 %v4978_v4, %v15726_v60 }
 0x575   : > { %v13170_v59 = vpop.permute.xlu0 %4679  ;;  %v13172_v52 = vpop.f32.mrb[194].mxu1 }
 0x576   : > { %15727 = vst [vmem:[#allocation30_spill] sm:$0xff] %v13168_v34  ;;  %5191 = vrot.lane.b32.xlu1 %v12897_v1, %s9451_s21  ;;  %v3850_v27 = vpop.f32.mrb[195].mxu1  ;;  %v13176_v40 = vpop.f32.mrb[190].mxu0 }
 0x577   : > { %5373 = vrot.lane.b32.xlu0 %v12981_v41, %s15479_s0  ;;  %v13180_v47 = vpop.f32.mrb[191].mxu0 }
 0x578   : > { %v13182_v43 = vpop.permute.xlu1 %4616 }
 0x579   : > { %v13184_v62 = vpop.permute.xlu0 %4735  ;;  %v3853_v24 = vpop.f32.mrb[196].mxu1 }
 0x57a   : > { %15728 = vst [vmem:[#allocation71_spill] sm:$0xff] %v13184_v62  ;;  %5241 = vrot.lane.b32.xlu1 %v12913_v36, %s15497_s24  ;;  %v13188_v4 = vpop.f32.mrb[192].mxu0  ;;  %v3855_v20 = vpop.f32.mrb[197].mxu1 }
 0x57b   : > { %5385 = vrot.lane.b32.xlu0 %v12998_v7, %s15479_s0  ;;  %v13192_v1 = vpop.f32.mrb[193].mxu0 }
 0x57c   : > { %v13194_v60 = vpop.permute.xlu1 %4667 }
 0x57d   : > { %v13196_v41 = vpop.permute.xlu0 %4747  ;;  %v13198_v27 = vpop.f32.mrb[198].mxu1 }
 0x57e   : > { %15729 = vst [vmem:[#allocation74_spill] sm:$0xff] %v13196_v41  ;;  %5251 = vrot.lane.b32.xlu1 %v12926_v6, %s15497_s24  ;;  %v3860_v16 = vpop.f32.mrb[199].mxu1  ;;  %v13202_v49 = vpop.f32.mrb[194].mxu0 }
 0x57f   : > { %15730 = vst [vmem:[#allocation37_spill] sm:$0xff] %v13202_v49  ;;  %5437 = vrot.lane.b32.xlu0 %v13009_v12, %s9452_s27  ;;  %v13206_v36 = vpop.f32.mrb[195].mxu0 }
 0x580   : > { %15731 = vst [vmem:[#allocation12_spill] sm:$0xff] %v13206_v36  ;;  %v13208_v7 = vpop.permute.xlu1 %5003 }
 0x581   : > { %15732 = vst [vmem:[#allocation38_spill] sm:$0xff] %v13208_v7  ;;  %v13210_v20 = vpop.permute.xlu0 %5071  ;;  %v13212_v30 = vpop.f32.mrb[200].mxu1 }
 0x582   : > { %15733 = vst [vmem:[#allocation36_spill] sm:$0xff] %v13210_v20  ;;  %15734 = vst [vmem:[#allocation43_spill] sm:$0xff] %v13212_v30  ;;  %5307 = vrot.lane.b32.xlu1 %v12947_v38, %s15500_s13  ;;  %v3865_v13 = vpop.f32.mrb[201].mxu1  ;;  %v13216_v15 = vpop.f32.mrb[196].mxu0 }
 0x583   : > { %5449 = vrot.lane.b32.xlu0 %v13030_v25, %s9452_s27  ;;  %v13220_v6 = vpop.f32.mrb[197].mxu0 }
 0x584   : > { %v13222_v12 = vpop.permute.xlu1 %4681 }
 0x585   : > { %15735 = vst [vmem:[#allocation44_spill] sm:$0xff] %v13222_v12  ;;  %v13224_v16 = vpop.permute.xlu0 %4799  ;;  %v13226_v57 = vpop.f32.mrb[202].mxu1 }
 0x586   : > { %15736 = vst [vmem:[#allocation40_spill] sm:$0xff] %v13226_v57  ;;  %5319 = vrot.lane.b32.xlu1 %v12964_v61, %s15500_s13  ;;  %v3870_v34 = vpop.f32.mrb[203].mxu1  ;;  %v13230_v20 = vpop.f32.mrb[198].mxu0 }
 0x587   : > { %15737 = vst [vmem:[#allocation19_spill] sm:$0xff] %v13230_v20  ;;  %5505 = vrot.lane.b32.xlu0 %v13060_v58, %s9453_s30  ;;  %v13234_v38 = vpop.f32.mrb[199].mxu0 }
 0x588   : > { %v13236_v25 = vpop.permute.xlu1 %5013 }
 0x589   : > { %15738 = vst [vmem:[#allocation65_spill] sm:$0xff] %v13236_v25  ;;  %v13238_v13 = vpop.permute.xlu0 %5119  ;;  %v13240_v56 = vpop.f32.mrb[204].mxu1 }
 0x58a   : > { %15739 = vst [vmem:[#allocation46_spill] sm:$0xff] %v13238_v13  ;;  %15740 = vst [vmem:[#allocation20_spill] sm:$0xff] %v13240_v56  ;;  %5371 = vrot.lane.b32.xlu1 %v12977_v8, %s15479_s0  ;;  %v3875_v7 = vpop.f32.mrb[205].mxu1  ;;  %v13244_v36 = vpop.f32.mrb[200].mxu0  ;;  %v15744_v8 = vld [vmem:[#allocation73_spill] sm:$0xff] }
 0x58b   : > { %15741 = vst [vmem:[#allocation60_spill] sm:$0xff] %v13244_v36  ;;  %5517 = vrot.lane.b32.xlu0 %v13081_v31, %s9453_s30  ;;  %v13248_v61 = vpop.f32.mrb[201].mxu0  ;;  %v4448_v7 = vsel %vm1513_vm6, %v12575_v39, %v15744_v8 }
 0x58c   : > { %15742 = vst [vmem:[#allocation14_spill] sm:$0xff] %v13248_v61  ;;  %v13250_v58 = vpop.permute.xlu1 %4733  ;;  %v15746_v61 = vld [vmem:[#allocation48_spill] sm:$0xff] }
 0x58d   : > { %v13252_v34 = vpop.permute.xlu0 %4811  ;;  %v13254_v25 = vpop.f32.mrb[206].mxu1  ;;  %v4506_v49 = vsel %vm1605_vm8, %v12784_v32, %v15746_v61 }
 0x58e   : > { %15743 = vst [vmem:[#allocation13_spill] sm:$0xff] %v13254_v25  ;;  %5383 = vrot.lane.b32.xlu1 %v12994_v21, %s15479_s0  ;;  %v3880_v13 = vpop.f32.mrb[207].mxu1  ;;  %v8631_v20 = vpop.f32.mrb[202].mxu0  ;;  %v15749_v21 = vld [vmem:[#allocation31_spill] sm:$0xff] }
 0x58f   : > { %4493 = vrot.lane.b32.xlu0 %v3853_v24, %s15470_s18  ;;  %v4188_v31 = vpop.f32.mrb[203].mxu0  ;;  %v4466_v13 = vadd.f32 %v4448_v7, %v15749_v21  ;;  %v15750_v20 = vld [vmem:[#allocation54_spill] sm:$0xff]  ;;  %v4565_v24 = vsel %vm4563_vm0, %v12670_v26, %v13091_v37  ;;  %v4624_v21 = vsel %vm4622_vm4, %v12742_v0, %v13165_v18 }
 0x590   : > { %v13262_v36 = vpop.permute.xlu1 %5061 }
 0x591   : > { %15745 = vst [vmem:[#allocation39_spill] sm:$0xff] %v13262_v36  ;;  %v13267_v56 = vpop.permute.xlu0 %5129  ;;  %v13269_v25 = vpop.f32.mrb[208].mxu1  ;;  %v4524_v31 = vadd.f32 %v4506_v49, %v4466_v13  ;;  %v15751_v36 = vld [vmem:[#allocation53_spill] sm:$0xff]  ;;  %v4510_v13 = vsel %vm1605_vm8, %v12653_v55, %v13046_v11  ;;  %v4754_v55 = vsel %vm15758_vm10, %v12841_v44, %v13250_v58  ;;  %v4628_v44 = vsel %vm4622_vm4, %v12794_v51, %v13182_v43  ;;  %vm15778_vm10 = vmmov %vm15709_vm7 }
 0x592   : > { %15747 = vst [vmem:[#allocation58_spill] sm:$0xff] %v13267_v56  ;;  %15748 = vst [vmem:[#allocation61_spill] sm:$0xff] %v13269_v25  ;;  %5439 = vrot.lane.b32.xlu1 %v15750_v20, %s9452_s27  ;;  %v13274_v57 = vpop.f32.mrb[209].mxu1  ;;  %v8634_v39 = vpop.f32.mrb[204].mxu0  ;;  %v4452_v7 = vsel %vm1513_vm6, %v12614_v54, %v15751_v36  ;;  %v15753_v25 = vld [vmem:[#allocation63_spill] sm:$0xff]  ;;  %v4688_v54 = vsel %vm15755_vm2, %v12812_v3, %v13194_v60 }
 0x593   : > { %5585 = vrot.lane.b32.xlu0 %v13159_v42, %s15467_s28  ;;  %v4196_v32 = vpop.f32.mrb[205].mxu0  ;;  %v4583_v26 = vadd.f32 %v4565_v24, %v4524_v31 }
 0x594   : > { %v13281_v56 = vpop.permute.xlu1 %4745  ;;  %v15756_v32 = vld [vmem:[#allocation25_spill] sm:$0xff] }
 0x595   : > { %v13289_v20 = vpop.permute.xlu0 %4867  ;;  %v13291_v39 = vpop.f32.mrb[210].mxu1  ;;  %v4471_v24 = vadd.f32 %v4452_v7, %v15756_v32  ;;  %v4642_v31 = vadd.f32 %v4624_v21, %v4583_v26  ;;  %v15763_v26 = vld [vmem:[#allocation75_spill] sm:$0xff] }
 0x596   : > { %15752 = vst [vmem:[#allocation21_spill] sm:$0xff] %v13289_v20  ;;  %5451 = vrot.lane.b32.xlu1 %v15753_v25, %s9452_s27  ;;  %v13295_v42 = vpop.f32.mrb[211].mxu1  ;;  %v8637_v49 = vpop.f32.mrb[206].mxu0  ;;  %v4569_v25 = vsel %vm4563_vm0, %v12714_v46, %v13130_v29  ;;  %v4449_v46 = vsel %vm1513_vm6, %v15744_v8, %v15763_v26  ;;  %v15766_v8 = vld [vmem:[#allocation42_spill] sm:$0xff] }
 0x597   : > { %15754 = vst [vmem:[#allocation34_spill] sm:$0xff] %v13295_v42  ;;  %5633 = vrot.lane.b32.xlu0 %v13176_v40, %s15470_s18  ;;  %v4204_v0 = vpop.f32.mrb[207].mxu0  ;;  %v4529_v42 = vadd.f32 %v4510_v13, %v4471_v24  ;;  %v4708_v40 = vadd.f32 %v4688_v54, %v4642_v31  ;;  %v15765_v31 = vld [vmem:[#allocation51_spill] sm:$0xff]  ;;  %v4467_v26 = vadd.f32 %v4449_v46, %v15766_v8  ;;  %v15770_v8 = vld [vmem:[#allocation57_spill] sm:$0xff] }
 0x598   : > { %v13306_v30 = vpop.permute.xlu1 %4801  ;;  %v15761_v0 = vld [vmem:[#allocation17_spill] sm:$0xff] }
 0x599   : > { %15757 = vst [vmem:[#allocation62_spill] sm:$0xff] %v13306_v30  ;;  %v13314_v49 = vpop.permute.xlu0 %4879  ;;  %v13316_v3 = vpop.f32.mrb[212].mxu1  ;;  %v4588_v13 = vadd.f32 %v4569_v25, %v4529_v42  ;;  %v4774_v54 = vadd.f32 %v4754_v55, %v4708_v40  ;;  %v15767_v42 = vld [vmem:[#allocation18_spill] sm:$0xff] }
 0x59a   : > { %15759 = vst [vmem:[#allocation64_spill] sm:$0xff] %v13314_v49  ;;  %15760 = vst [vmem:[#allocation22_spill] sm:$0xff] %v13316_v3  ;;  %5503 = vrot.lane.b32.xlu1 %v15761_v0, %s9453_s30  ;;  %v13320_v7 = vpop.f32.mrb[213].mxu1  ;;  %v8640_v21 = vpop.f32.mrb[208].mxu0  ;;  %v4507_v0 = vsel %vm1605_vm8, %v15746_v61, %v15765_v31  ;;  %v4566_v25 = vsel %vm4563_vm0, %v13091_v37, %v15767_v42  ;;  %v4820_v61 = vsel %vm15768_vm11, %v12939_v23, %v13224_v16 }
 0x59b   : > { %15762 = vst [vmem:[#allocation15_spill] sm:$0xff] %v13320_v7  ;;  %5635 = vrot.lane.b32.xlu0 %v13180_v47, %s15470_s18  ;;  %v4212_v32 = vpop.f32.mrb[209].mxu0  ;;  %v4647_v3 = vadd.f32 %v4628_v44, %v4588_v13  ;;  %v4525_v40 = vadd.f32 %v4507_v0, %v4467_v26  ;;  %v4840_v46 = vadd.f32 %v4820_v61, %v4774_v54  ;;  %vm15781_vm11 = vmmov %vm15719_vm3 }
 0x59c   : > { %v13330_v24 = vpop.permute.xlu1 %4813  ;;  %v4693_v32 = vsel %vm15769_vm5, %v12891_v28, %v13170_v59  ;;  %v4759_v37 = vsel %vm15709_vm7, %v12888_v2, %v13281_v56  ;;  %v4453_v2 = vsel %vm1513_vm6, %v15751_v36, %v15770_v8  ;;  %v4755_v36 = vsel %vm15773_vm14, %v13250_v58, %v13184_v62  ;;  %vm15849_vm5 = vmmov %vm15755_vm2 }
 0x59d   : > { %15764 = vst [vmem:[#allocation32_spill] sm:$0xff] %v13330_v24  ;;  %v13335_v21 = vpop.permute.xlu0 %5187  ;;  %v13337_v7 = vpop.f32.mrb[214].mxu1  ;;  %v4584_v26 = vadd.f32 %v4566_v25, %v4525_v40  ;;  %v4713_v54 = vadd.f32 %v4693_v32, %v4647_v3  ;;  %v4825_v58 = vsel %vm15776_vm12, %v12990_v45, %v13252_v34  ;;  %vm15850_vm7 = vmmov %vm15755_vm2 }
 0x59e   : > { %5515 = vrot.lane.b32.xlu1 %v13077_v9, %s9453_s30  ;;  %v13342_v51 = vpop.f32.mrb[215].mxu1  ;;  %v8643_v47 = vpop.f32.mrb[210].mxu0  ;;  %v4625_v9 = vsel %vm4622_vm4, %v13165_v18, %v13115_v50  ;;  %vm15853_vm14 = vmmov %vm15778_vm10 }
 0x59f   : > { %5643 = vrot.lane.b32.xlu0 %v13188_v4, %s15470_s18  ;;  %v4220_v55 = vpop.f32.mrb[211].mxu0  ;;  %v4643_v47 = vadd.f32 %v4625_v9, %v4584_v26  ;;  %v4779_v25 = vadd.f32 %v4759_v37, %v4713_v54  ;;  %v15775_v37 = vld [vmem:[#allocation29_spill] sm:$0xff]  ;;  %v4821_v54 = vsel %vm15719_vm3, %v13224_v16, %v13306_v30  ;;  %vm15854_vm12 = vmmov %vm15778_vm10 }
 0x5a0   : > { %v4866_v44 = vpop.permute.xlu1 %4865  ;;  %v15772_v55 = vld [vmem:[#allocation49_spill] sm:$0xff] }
 0x5a1   : > { %v4887_v23 = vsel %vm4885_vm9, %v12975_v10, %v4866_v44  ;;  %v4933_v4 = vpop.permute.xlu0 %4932  ;;  %v13363_v13 = vpop.f32.mrb[216].mxu1  ;;  %v4689_v10 = vsel %vm15771_vm15, %v13194_v60, %v13153_v53  ;;  %v4511_v40 = vsel %vm1605_vm8, %v13046_v11, %v15772_v55  ;;  %v4570_v11 = vsel %vm4563_vm0, %v13130_v29, %v13095_v48  ;;  %v15808_v48 = vld [vmem:[#allocation14_spill] sm:$0xff]  ;;  %vm15851_vm15 = vmmov %vm15755_vm2 }
 0x5a2   : > { %v4907_v0 = vadd.f32 %v4887_v23, %v4840_v46  ;;  %v4954_v18 = vsel %vm4952_vm1, %v13108_v35, %v4933_v4  ;;  %4435 = vrot.lane.b32.xlu1 %v13155_v19, %s15467_s28  ;;  %v13369_v28 = vpop.f32.mrb[217].mxu1  ;;  %v4709_v9 = vadd.f32 %v4689_v10, %v4643_v47  ;;  %v4629_v29 = vsel %vm4622_vm4, %v13182_v43, %v13137_v22  ;;  %v15811_v42 = vld [vmem:[#allocation22_spill] sm:$0xff] }
 0x5a3   : > { %5645 = vrot.lane.b32.xlu0 %v13192_v1, %s15470_s18  ;;  %v8646_v3 = vpop.f32.mrb[212].mxu0  ;;  %v15774_v1 = vld [vmem:[#allocation16_spill] sm:$0xff]  ;;  %v4888_v45 = vsel %vm4885_vm9, %v4866_v44, %v13289_v20  ;;  %v4694_v43 = vsel %vm15755_vm2, %v13170_v59, %v13222_v12 }
 0x5a4   : > { %v4974_v35 = vadd.f32 %v4954_v18, %v4907_v0  ;;  %v13379_v61 = vpop.permute.xlu1 %5177  ;;  %v4228_v19 = vpop.f32.mrb[213].mxu0  ;;  %v4472_v32 = vadd.f32 %v4453_v2, %v15774_v1  ;;  %v4775_v18 = vadd.f32 %v4755_v36, %v4709_v9  ;;  %v4845_v2 = vadd.f32 %v4825_v58, %v4779_v25 }
 0x5a5   : > { %v13387_v46 = vpop.permute.xlu0 %4944  ;;  %v13389_v60 = vpop.f32.mrb[218].mxu1 }
 0x5a6   : > { %4445 = vrot.lane.b32.xlu1 %v13172_v52, %s15467_s28  ;;  %v13395_v23 = vadd.f32 %v4974_v35, %v15775_v37  ;;  %v13397_v26 = vpop.f32.mrb[219].mxu1  ;;  %v4530_v0 = vadd.f32 %v4511_v40, %v4472_v32  ;;  %v4841_v19 = vadd.f32 %v4821_v54, %v4775_v18  ;;  %v4760_v37 = vsel %vm15778_vm10, %v13281_v56, %v13196_v41  ;;  %v15780_v54 = vld [vmem:[#allocation69_spill] sm:$0xff]  ;;  %vm15856_vm10 = vmmov %vm15719_vm3 }
 0x5a7   : > { %5701 = vrot.lane.b32.xlu0 %v13216_v15, %s9450_s9  ;;  %v8649_v52 = vpop.f32.mrb[214].mxu0  ;;  %v4826_v56 = vsel %vm15781_vm11, %v13252_v34, %v13330_v24  ;;  %vm15858_vm11 = vmmov %vm15854_vm12 }
 0x5a8   : > { %v4878_v10 = vpop.permute.xlu1 %4877  ;;  %v4236_v3 = vpop.f32.mrb[215].mxu0  ;;  %v4589_v15 = vadd.f32 %v4570_v11, %v4530_v0  ;;  %v4908_v1 = vadd.f32 %v4888_v45, %v4841_v19 }
 0x5a9   : > { %v4892_v47 = vsel %vm4885_vm9, %v13007_v63, %v4878_v10  ;;  %v13417_v16 = vpop.permute.xlu0 %5315  ;;  %v13419_v35 = vpop.f32.mrb[220].mxu1  ;;  %v4959_v63 = vsel %vm4952_vm1, %v13149_v17, %v13387_v46 }
 0x5aa   : > { %v4912_v40 = vadd.f32 %v4892_v47, %v4845_v2  ;;  %5575 = vrot.lane.b32.xlu1 %v13143_v33, %s15467_s28  ;;  %v13423_v25 = vpop.f32.mrb[221].mxu1  ;;  %v4648_v36 = vadd.f32 %v4629_v29, %v4589_v15  ;;  %v15782_v29 = vld [vmem:[#allocation33_spill] sm:$0xff] }
 0x5ab   : > { %5703 = vrot.lane.b32.xlu0 %v13220_v6, %s9450_s9  ;;  %v8652_v44 = vpop.f32.mrb[216].mxu0 }
 0x5ac   : > { %v4979_v32 = vadd.f32 %v4959_v63, %v4912_v40  ;;  %v13433_v9 = vpop.permute.xlu1 %4934  ;;  %v4244_v33 = vpop.f32.mrb[217].mxu0  ;;  %v4714_v58 = vadd.f32 %v4694_v43, %v4648_v36 }
 0x5ad   : > { %15777 = vst [vmem:[#allocation24_spill] sm:$0xff] %v13433_v9  ;;  %v4955_v59 = vsel %vm4952_vm1, %v4933_v4, %v13433_v9  ;;  %v13440_v11 = vpop.permute.xlu0 %5007  ;;  %v13442_v17 = vpop.f32.mrb[222].mxu1 }
 0x5ae   : > { %15779 = vst [vmem:[#allocation23_spill] sm:$0xff] %v13440_v11  ;;  %v4975_v6 = vadd.f32 %v4955_v59, %v4908_v1  ;;  %5577 = vrot.lane.b32.xlu1 %v13147_v5, %s15467_s28  ;;  %v13447_v52 = vadd.f32 %v4979_v32, %v15780_v54  ;;  %v13449_v0 = vpop.f32.mrb[223].mxu1  ;;  %v4780_v18 = vadd.f32 %v4760_v37, %v4714_v58  ;;  %v15785_v37 = vld [vmem:[#allocation76_spill] sm:$0xff]  ;;  %v15790_v54 = vld [vmem:[#allocation34_spill] sm:$0xff] }
 0x5af   : > { %4673 = vrot.lane.b32.xlu0 %v13274_v57, %s15497_s24  ;;  %v8655_v4 = vpop.f32.mrb[218].mxu0  ;;  %v4893_v5 = vsel %vm4885_vm9, %v4878_v10, %v13314_v49 }
 0x5b0   : > { %v13456_v2 = vpop.permute.xlu1 %5237  ;;  %v4252_v3 = vpop.f32.mrb[219].mxu0  ;;  %v13459_v45 = vadd.f32 %v4975_v6, %v15782_v29  ;;  %v4846_v19 = vadd.f32 %v4826_v56, %v4780_v18  ;;  %v15788_v6 = vld [vmem:[#allocation43_spill] sm:$0xff]  ;;  %v15792_v29 = vld [vmem:[#allocation40_spill] sm:$0xff] }
 0x5b1   : > { %v13463_v47 = vpop.permute.xlu0 %5369  ;;  %v13465_v15 = vpop.f32.mrb[224].mxu1 }
 0x5b2   : > { %15783 = vst [vmem:[#allocation77_spill] sm:$0xff] %v13459_v45  ;;  %4503 = vrot.lane.b32.xlu1 %v13198_v27, %s15470_s18  ;;  %v13469_v57 = vpop.f32.mrb[225].mxu1  ;;  %v4913_v40 = vadd.f32 %v4893_v5, %v4846_v19 }
 0x5b3   : > { %5751 = vrot.lane.b32.xlu0 %v13234_v38, %s9451_s21  ;;  %v8658_v34 = vpop.f32.mrb[220].mxu0 }
 0x5b4   : > { %v13473_v43 = vpop.permute.xlu1 %4946  ;;  %v4260_v63 = vpop.f32.mrb[221].mxu0 }
 0x5b5   : > { %15784 = vst [vmem:[#allocation78_spill] sm:$0xff] %v13473_v43  ;;  %v4960_v10 = vsel %vm4952_vm1, %v13387_v46, %v13473_v43  ;;  %v13478_v44 = vpop.permute.xlu0 %5015  ;;  %v13480_v36 = vpop.f32.mrb[226].mxu1 }
 0x5b6   : > { %v4980_v1 = vadd.f32 %v4960_v10, %v4913_v40  ;;  %5587 = vrot.lane.b32.xlu1 %v13163_v14, %s15467_s28  ;;  %v13484_v27 = vpop.f32.mrb[227].mxu1 }
 0x5b7   : > { %4683 = vrot.lane.b32.xlu0 %v13291_v39, %s15497_s24  ;;  %v8661_v38 = vpop.f32.mrb[222].mxu0 }
 0x5b8   : > { %v13488_v32 = vpop.permute.xlu1 %5249  ;;  %v4268_v33 = vpop.f32.mrb[223].mxu0  ;;  %v13491_v59 = vadd.f32 %v4980_v1, %v15785_v37  ;;  %v15794_v1 = vld [vmem:[#allocation20_spill] sm:$0xff] }
 0x5b9   : > { %v13493_v46 = vpop.permute.xlu0 %5063  ;;  %v13495_v58 = vpop.f32.mrb[228].mxu1 }
 0x5ba   : > { %15786 = vst [vmem:[#allocation47_spill] sm:$0xff] %v13491_v59  ;;  %15787 = vst [vmem:[#allocation26_spill] sm:$0xff] %v13495_v58  ;;  %4551 = vrot.lane.b32.xlu1 %v15788_v6, %s9450_s9  ;;  %v13499_v14 = vpop.f32.mrb[229].mxu1  ;;  %v15801_v58 = vld [vmem:[#allocation61_spill] sm:$0xff]  ;;  %v15803_v59 = vld [vmem:[#allocation19_spill] sm:$0xff] }
 0x5bb   : > { %15789 = vst [vmem:[#allocation68_spill] sm:$0xff] %v13499_v14  ;;  %4685 = vrot.lane.b32.xlu0 %v15790_v54, %s15497_s24  ;;  %v8664_v39 = vpop.f32.mrb[224].mxu0 }
 0x5bc   : > { %v13503_v56 = vpop.permute.xlu1 %5303  ;;  %v4276_v4 = vpop.f32.mrb[225].mxu0  ;;  %v15795_v39 = vld [vmem:[#allocation37_spill] sm:$0xff] }
 0x5bd   : > { %v13505_v18 = vpop.permute.xlu0 %5075  ;;  %v13507_v3 = vpop.f32.mrb[230].mxu1 }
 0x5be   : > { %15791 = vst [vmem:[#allocation70_spill] sm:$0xff] %v13507_v3  ;;  %4561 = vrot.lane.b32.xlu1 %v15792_v29, %s9450_s9  ;;  %v13511_v5 = vpop.f32.mrb[231].mxu1 }
 0x5bf   : > { %15793 = vst [vmem:[#allocation72_spill] sm:$0xff] %v13511_v5  ;;  %4803 = vrot.lane.b32.xlu0 %v13363_v13, %s15479_s0  ;;  %v8667_v19 = vpop.f32.mrb[226].mxu0  ;;  %v15798_v5 = vld [vmem:[#allocation13_spill] sm:$0xff] }
 0x5c0   : > { %v13515_v34 = vpop.permute.xlu1 %5005  ;;  %v4284_v40 = vpop.f32.mrb[227].mxu0 }
 0x5c1   : > { %v13517_v63 = vpop.permute.xlu0 %5121  ;;  %v13519_v10 = vpop.f32.mrb[232].mxu1 }
 0x5c2   : > { %4610 = vrot.lane.b32.xlu1 %v15794_v1, %s9451_s21  ;;  %v3957_v38 = vpop.f32.mrb[233].mxu1 }
 0x5c3   : > { %4805 = vrot.lane.b32.xlu0 %v13369_v28, %s15479_s0  ;;  %v8670_v33 = vpop.f32.mrb[228].mxu0 }
 0x5c4   : > { %v13525_v37 = vpop.permute.xlu1 %5017  ;;  %v4292_v6 = vpop.f32.mrb[229].mxu0  ;;  %v15796_v33 = vld [vmem:[#allocation12_spill] sm:$0xff] }
 0x5c5   : > { %v13527_v13 = vpop.permute.xlu0 %5501  ;;  %v3961_v54 = vpop.f32.mrb[234].mxu1 }
 0x5c6   : > { %5691 = vrot.lane.b32.xlu1 %v15795_v39, %s9450_s9  ;;  %v13531_v4 = vpop.f32.mrb[235].mxu1 }
 0x5c7   : > { %4815 = vrot.lane.b32.xlu0 %v13389_v60, %s15479_s0  ;;  %v8673_v29 = vpop.f32.mrb[230].mxu0 }
 0x5c8   : > { %v13535_v19 = vpop.permute.xlu1 %5381  ;;  %v4300_v40 = vpop.f32.mrb[231].mxu0 }
 0x5c9   : > { %v13537_v28 = vpop.permute.xlu0 %5131  ;;  %v3967_v1 = vpop.f32.mrb[236].mxu1 }
 0x5ca   : > { %5693 = vrot.lane.b32.xlu1 %v15796_v33, %s9450_s9  ;;  %v13541_v6 = vpop.f32.mrb[237].mxu1 }
 0x5cb   : > { %4817 = vrot.lane.b32.xlu0 %v13397_v26, %s15479_s0  ;;  %v13545_v39 = vpop.f32.mrb[232].mxu0 }
 0x5cc   : > { %v13547_v45 = vpop.permute.xlu1 %5065  ;;  %v13549_v60 = vpop.f32.mrb[233].mxu0 }
 0x5cd   : > { %v13551_v29 = vpop.permute.xlu0 %5513  ;;  %v13553_v40 = vpop.f32.mrb[238].mxu1 }
 0x5ce   : > { %15797 = vst [vmem:[#allocation73_spill] sm:$0xff] %v13551_v29  ;;  %4620 = vrot.lane.b32.xlu1 %v15798_v5, %s9451_s21  ;;  %v3975_v3 = vpop.f32.mrb[239].mxu1 }
 0x5cf   : > { %4883 = vrot.lane.b32.xlu0 %v13449_v0, %s9452_s27  ;;  %v13559_v33 = vpop.f32.mrb[234].mxu0 }
 0x5d0   : > { %15799 = vst [vmem:[#allocation48_spill] sm:$0xff] %v13559_v33  ;;  %v13561_v26 = vpop.permute.xlu1 %5435  ;;  %v13563_v43 = vpop.f32.mrb[235].mxu0 }
 0x5d1   : > { %15800 = vst [vmem:[#allocation31_spill] sm:$0xff] %v13563_v43  ;;  %v13565_v14 = vpop.permute.xlu0 %5181  ;;  %v3979_v49 = vpop.f32.mrb[240].mxu1 }
 0x5d2   : > { %4671 = vrot.lane.b32.xlu1 %v15801_v58, %s15497_s24  ;;  %v13569_v9 = vpop.f32.mrb[241].mxu1 }
 0x5d3   : > { %4936 = vrot.lane.b32.xlu0 %v13465_v15, %s9453_s30  ;;  %v13573_v5 = vpop.f32.mrb[236].mxu0 }
 0x5d4   : > { %15802 = vst [vmem:[#allocation54_spill] sm:$0xff] %v13573_v5  ;;  %v13575_v0 = vpop.permute.xlu1 %5073  ;;  %v13577_v20 = vpop.f32.mrb[237].mxu0  ;;  %v15815_v5 = vld [vmem:[#allocation15_spill] sm:$0xff] }
 0x5d5   : > { %v13579_v24 = vpop.permute.xlu0 %5189  ;;  %v3985_v41 = vpop.f32.mrb[242].mxu1 }
 0x5d6   : > { %5749 = vrot.lane.b32.xlu1 %v15803_v59, %s9451_s21  ;;  %v13583_v12 = vpop.f32.mrb[243].mxu1 }
 0x5d7   : > { %15804 = vst [vmem:[#allocation53_spill] sm:$0xff] %v13583_v12  ;;  %4938 = vrot.lane.b32.xlu0 %v13469_v57, %s9453_s30  ;;  %v13587_v58 = vpop.f32.mrb[238].mxu0 }
 0x5d8   : > { %15805 = vst [vmem:[#allocation63_spill] sm:$0xff] %v13587_v58  ;;  %v13589_v15 = vpop.permute.xlu1 %5447  ;;  %v13591_v30 = vpop.f32.mrb[239].mxu0 }
 0x5d9   : > { %15806 = vst [vmem:[#allocation25_spill] sm:$0xff] %v13591_v30  ;;  %v13593_v62 = vpop.permute.xlu0 %5239  ;;  %v13595_v22 = vpop.f32.mrb[244].mxu1 }
 0x5da   : > { %15807 = vst [vmem:[#allocation17_spill] sm:$0xff] %v13595_v22  ;;  %5761 = vrot.lane.b32.xlu1 %v15808_v48, %s9451_s21  ;;  %v13599_v53 = vpop.f32.mrb[245].mxu1 }
 0x5db   : > { %4948 = vrot.lane.b32.xlu0 %v13480_v36, %s9453_s30  ;;  %v13603_v59 = vpop.f32.mrb[240].mxu0 }
 0x5dc   : > { %15809 = vst [vmem:[#allocation42_spill] sm:$0xff] %v13603_v59  ;;  %v13605_v57 = vpop.permute.xlu1 %5123  ;;  %v13607_v55 = vpop.f32.mrb[241].mxu0 }
 0x5dd   : > { %15810 = vst [vmem:[#allocation16_spill] sm:$0xff] %v13607_v55  ;;  %v13609_v50 = vpop.permute.xlu0 %5253  ;;  %v13611_v8 = vpop.f32.mrb[246].mxu1 }
 0x5de   : > { %4737 = vrot.lane.b32.xlu1 %v15811_v42, %s15500_s13  ;;  %v13615_v31 = vpop.f32.mrb[247].mxu1 }
 0x5df   : > { %15812 = vst [vmem:[#allocation29_spill] sm:$0xff] %v13615_v31  ;;  %5011 = vrot.lane.b32.xlu0 %v3957_v38, %s15467_s28  ;;  %v13618_v48 = vpop.f32.mrb[242].mxu0 }
 0x5e0   : > { %15813 = vst [vmem:[#allocation69_spill] sm:$0xff] %v13618_v48  ;;  %v13620_v36 = vpop.permute.xlu1 %5133  ;;  %v13622_v59 = vpop.f32.mrb[243].mxu0 }
 0x5e1   : > { %15814 = vst [vmem:[#allocation33_spill] sm:$0xff] %v13622_v59  ;;  %v13624_v30 = vpop.permute.xlu0 %5305  ;;  %v13626_v58 = vpop.f32.mrb[248].mxu1 }
 0x5e2   : > { %4739 = vrot.lane.b32.xlu1 %v15815_v5, %s15500_s13  ;;  %v13630_v43 = vpop.f32.mrb[249].mxu1 }
 0x5e3   : > { %15816 = vst [vmem:[#allocation76_spill] sm:$0xff] %v13630_v43  ;;  %5019 = vrot.lane.b32.xlu0 %v3961_v54, %s15467_s28  ;;  %v13633_v42 = vpop.f32.mrb[244].mxu0 }
 0x5e4   : > { %15817 = vst [vmem:[#allocation43_spill] sm:$0xff] %v13633_v42  ;;  %v13635_v38 = vpop.permute.xlu1 %5179  ;;  %v13637_v48 = vpop.f32.mrb[245].mxu0 }
 0x5e5   : > { %15818 = vst [vmem:[#allocation34_spill] sm:$0xff] %v13637_v48  ;;  %v13639_v31 = vpop.permute.xlu0 %5317  ;;  %v13641_v59 = vpop.f32.mrb[250].mxu1 }
 0x5e6   : > { %15819 = vst [vmem:[#allocation40_spill] sm:$0xff] %v13641_v59  ;;  %4749 = vrot.lane.b32.xlu1 %v13337_v7, %s15500_s13  ;;  %v13645_v33 = vpop.f32.mrb[251].mxu1 }
 0x5e7   : > { %15820 = vst [vmem:[#allocation20_spill] sm:$0xff] %v13645_v33  ;;  %5067 = vrot.lane.b32.xlu0 %v3967_v1, %s15470_s18  ;;  %v13648_v5 = vpop.f32.mrb[246].mxu0  ;;  %v15844_v33 = vld [vmem:[#allocation30_spill] sm:$0xff] }
 0x5e8   : > { %15821 = vst [vmem:[#allocation37_spill] sm:$0xff] %v13648_v5  ;;  %v13650_v54 = vpop.permute.xlu1 %5191  ;;  %v13652_v43 = vpop.f32.mrb[247].mxu0 }
 0x5e9   : > { %15822 = vst [vmem:[#allocation12_spill] sm:$0xff] %v13652_v43  ;;  %v13654_v42 = vpop.permute.xlu0 %5373  ;;  %v13656_v48 = vpop.f32.mrb[252].mxu1 }
 0x5ea   : > { %15823 = vst [vmem:[#allocation13_spill] sm:$0xff] %v13656_v48  ;;  %4751 = vrot.lane.b32.xlu1 %v13342_v51, %s15500_s13  ;;  %v13660_v59 = vpop.f32.mrb[253].mxu1 }
 0x5eb   : > { %15824 = vst [vmem:[#allocation61_spill] sm:$0xff] %v13660_v59  ;;  %5079 = vrot.lane.b32.xlu0 %v3975_v3, %s15470_s18  ;;  %v13663_v7 = vpop.f32.mrb[248].mxu0  ;;  %v15832_v59 = vld [vmem:[#allocation38_spill] sm:$0xff] }
 0x5ec   : > { %15825 = vst [vmem:[#allocation19_spill] sm:$0xff] %v13663_v7  ;;  %v13665_v1 = vpop.permute.xlu1 %5241  ;;  %v13667_v5 = vpop.f32.mrb[249].mxu0 }
 0x5ed   : > { %15826 = vst [vmem:[#allocation14_spill] sm:$0xff] %v13667_v5  ;;  %v13669_v22 = vpop.permute.xlu0 %5385  ;;  %v13671_v43 = vpop.f32.mrb[254].mxu1  ;;  %v5023_v5 = vsel %vm1513_vm6, %v15832_v59, %v13515_v34 }
 0x5ee   : > { %15827 = vst [vmem:[#allocation22_spill] sm:$0xff] %v13669_v22  ;;  %15828 = vst [vmem:[#allocation15_spill] sm:$0xff] %v13671_v43  ;;  %4869 = vrot.lane.b32.xlu1 %v13419_v35, %s9452_s27  ;;  %v13675_v48 = vpop.f32.mrb[255].mxu1 }
 0x5ef   : > { %15829 = vst [vmem:[#allocation82_spill] sm:$0xff] %v13675_v48  ;;  %5125 = vrot.lane.b32.xlu0 %v3979_v49, %s9450_s9  ;;  %v13678_v51 = vpop.f32.mrb[250].mxu0  ;;  %v15835_v49 = vld [vmem:[#allocation27_spill] sm:$0xff] }
 0x5f0   : > { %15830 = vst [vmem:[#allocation83_spill] sm:$0xff] %v13678_v51  ;;  %v13680_v3 = vpop.permute.xlu1 %5251  ;;  %v13682_v7 = vpop.f32.mrb[251].mxu0  ;;  %v5041_v51 = vadd.f32 %v5023_v5, %v15835_v49 }
 0x5f1   : > { %15831 = vst [vmem:[#allocation84_spill] sm:$0xff] %v13682_v7  ;;  %v13687_v55 = vpop.permute.xlu0 %5437  ;;  %v13689_v43 = vpop.f32.mrb[0].mxu1 }
 0x5f2   : > { %15833 = vst [vmem:[#allocation38_spill] sm:$0xff] %v13689_v43  ;;  %4871 = vrot.lane.b32.xlu1 %v13423_v25, %s9452_s27  ;;  %v13693_v35 = vpop.f32.mrb[1].mxu1  ;;  %v15838_v43 = vld [vmem:[#allocation65_spill] sm:$0xff] }
 0x5f3   : > { %15834 = vst [vmem:[#allocation85_spill] sm:$0xff] %v13693_v35  ;;  %5135 = vrot.lane.b32.xlu0 %v3985_v41, %s9450_s9  ;;  %v5027_v25 = vsel %vm1513_vm6, %v15838_v43, %v13478_v44  ;;  %v15839_v35 = vld [vmem:[#allocation39_spill] sm:$0xff] }
 0x5f4   : > { %v13697_v48 = vpop.permute.xlu1 %5307  ;;  %v5081_v41 = vsel %vm1605_vm8, %v15839_v35, %v13493_v46  ;;  %v5046_v43 = vadd.f32 %v5027_v25, %v15844_v33 }
 0x5f5   : > { %v13699_v7 = vpop.permute.xlu0 %5449  ;;  %v13701_v12 = vpop.f32.mrb[2].mxu1  ;;  %v5099_v5 = vadd.f32 %v5081_v41, %v5041_v51  ;;  %v15846_v51 = vld [vmem:[#allocation46_spill] sm:$0xff] }
 0x5f6   : > { %15836 = vst [vmem:[#allocation27_spill] sm:$0xff] %v13701_v12  ;;  %4881 = vrot.lane.b32.xlu1 %v13442_v17, %s9452_s27  ;;  %v13705_v59 = vpop.f32.mrb[3].mxu1  ;;  %v15841_v12 = vld [vmem:[#allocation36_spill] sm:$0xff]  ;;  %v5139_v41 = vsel %vm4563_vm0, %v15846_v51, %v13517_v63 }
 0x5f7   : > { %15837 = vst [vmem:[#allocation86_spill] sm:$0xff] %v13705_v59  ;;  %5259 = vrot.lane.b32.xlu0 %v13545_v39, %s15497_s24  ;;  %v5085_v17 = vsel %vm1605_vm8, %v15841_v12, %v13575_v0  ;;  %v5024_v39 = vsel %vm1513_vm6, %v13515_v34, %v13440_v11  ;;  %v5197_v12 = vsel %vm4622_vm4, %v13379_v61, %v13635_v38 }
 0x5f8   : > { %v13715_v49 = vpop.permute.xlu1 %5319  ;;  %v5157_v33 = vadd.f32 %v5139_v41, %v5099_v5  ;;  %v5104_v25 = vadd.f32 %v5085_v17, %v5046_v43  ;;  %v5042_v51 = vadd.f32 %v5024_v39, %v13395_v23  ;;  %v15848_v5 = vld [vmem:[#allocation58_spill] sm:$0xff]  ;;  %v5140_v17 = vsel %vm4563_vm0, %v13517_v63, %v13605_v57 }
 0x5f9   : > { %15840 = vst [vmem:[#allocation65_spill] sm:$0xff] %v13715_v49  ;;  %v13720_v29 = vpop.permute.xlu0 %5505  ;;  %v13722_v59 = vpop.f32.mrb[4].mxu1  ;;  %v5086_v39 = vsel %vm1605_vm8, %v13575_v0, %v13505_v18  ;;  %v5198_v41 = vsel %vm4622_vm4, %v13635_v38, %v13565_v14  ;;  %v5144_v38 = vsel %vm4563_vm0, %v13537_v28, %v13620_v36 }
 0x5fa   : > { %15842 = vst [vmem:[#allocation39_spill] sm:$0xff] %v13720_v29  ;;  %15843 = vst [vmem:[#allocation36_spill] sm:$0xff] %v13722_v59  ;;  %4950 = vrot.lane.b32.xlu1 %v13484_v27, %s9453_s30  ;;  %v13727_v35 = vpop.f32.mrb[5].mxu1  ;;  %v5215_v11 = vadd.f32 %v5197_v12, %v5157_v33 }
 0x5fb   : > { %15845 = vst [vmem:[#allocation30_spill] sm:$0xff] %v13727_v35  ;;  %5247 = vrot.lane.b32.xlu0 %v13549_v60, %s15497_s24  ;;  %v5082_v35 = vsel %vm1605_vm8, %v13493_v46, %v13547_v45  ;;  %v5028_v60 = vsel %vm1513_vm6, %v13478_v44, %v13525_v37  ;;  %v5143_v46 = vsel %vm4563_vm0, %v15848_v5, %v13537_v28 }
 0x5fc   : > { %v5372_v27 = vpop.permute.xlu1 %5371  ;;  %v5100_v23 = vadd.f32 %v5082_v35, %v5042_v51  ;;  %v5162_v43 = vadd.f32 %v5143_v46, %v5104_v25  ;;  %v5261_v44 = vsel %vm15849_vm5, %v13456_v2, %v13593_v62  ;;  %v5201_v2 = vsel %vm4622_vm4, %v13335_v21, %v13579_v24  ;;  %vm15859_vm5 = vmmov %vm15858_vm11 }
 0x5fd   : > { %v13743_v59 = vpop.permute.xlu0 %5517  ;;  %v13745_v34 = vpop.f32.mrb[6].mxu1  ;;  %v5281_v33 = vadd.f32 %v5261_v44, %v5215_v11  ;;  %v5262_v25 = vsel %vm15850_vm7, %v13593_v62, %v13665_v1  ;;  %v5266_v11 = vsel %vm15851_vm15, %v13488_v32, %v13680_v3  ;;  %v5327_v21 = vsel %vm15853_vm14, %v13503_v56, %v13624_v30  ;;  %vm15860_vm7 = vmmov %vm15719_vm3 }
 0x5fe   : > { %15847 = vst [vmem:[#allocation46_spill] sm:$0xff] %v13743_v59  ;;  %5009 = vrot.lane.b32.xlu1 %v13519_v10, %s15467_s28  ;;  %v13750_v61 = vpop.f32.mrb[7].mxu1  ;;  %v5158_v35 = vadd.f32 %v5140_v17, %v5100_v23  ;;  %v5202_v62 = vsel %vm4622_vm4, %v13579_v24, %v13650_v54  ;;  %v5328_v32 = vsel %vm15854_vm12, %v13624_v30, %v13697_v48  ;;  %vm15864_vm15 = vmmov %vm15719_vm3 }
 0x5ff   : > { %5185 = vrot.lane.b32.xlu0 %v13599_v53, %s9451_s21  ;;  %v5047_v53 = vadd.f32 %v5028_v60, %v13447_v52  ;;  %v5267_v30 = vsel %vm15755_vm2, %v13680_v3, %v13609_v50  ;;  %v5394_v24 = vsel %vm15856_vm10, %v5372_v27, %v13654_v42  ;;  %vm15904_vm14 = vmmov %vm15719_vm3 }
 0x600   : > { %v5384_v10 = vpop.permute.xlu1 %5383  ;;  %v5216_v51 = vadd.f32 %v5198_v41, %v5158_v35  ;;  %vm15909_vm12 = vmmov %vm15719_vm3 }
 0x601   : > { %v13772_v12 = vpop.permute.xlu0 %4493  ;;  %v13774_v63 = vpop.f32.mrb[8].mxu1  ;;  %v5105_v52 = vadd.f32 %v5086_v39, %v5047_v53  ;;  %v5333_v53 = vsel %vm15859_vm5, %v13639_v31, %v13715_v49  ;;  %v5398_v3 = vsel %vm15860_vm7, %v13535_v19, %v5384_v10  ;;  %v5399_v19 = vsel %vm15864_vm15, %v5384_v10, %v13669_v22  ;;  %v15927_v22 = vld [vmem:[#allocation12_spill] sm:$0xff]  ;;  %v15929_v49 = vld [vmem:[#allocation66_spill] sm:$0xff]  ;;  %vm15931_vm10 = vmmov %vm15859_vm5 }
 0x602   : > { %5021 = vrot.lane.b32.xlu1 %v13531_v4, %s15467_s28  ;;  %v13779_v0 = vpop.f32.mrb[9].mxu1  ;;  %v5220_v4 = vadd.f32 %v5201_v2, %v5162_v43  ;;  %v5282_v17 = vadd.f32 %v5262_v25, %v5216_v51  ;;  %v5347_v43 = vadd.f32 %v5327_v21, %v5281_v33  ;;  %vm15940_vm15 = vmmov %vm15755_vm2 }
 0x603   : > { %5193 = vrot.lane.b32.xlu0 %v13611_v8, %s9451_s21  ;;  %v5393_v8 = vsel %vm15719_vm3, %v13463_v47, %v5372_v27  ;;  %v5163_v46 = vadd.f32 %v5144_v38, %v5105_v52  ;;  %vm15925_vm3 = vmmov %vm15755_vm2 }
 0x604   : > { %v13795_v60 = vpop.permute.xlu1 %5439  ;;  %v5286_v23 = vadd.f32 %v5266_v11, %v5220_v4  ;;  %v5348_v39 = vadd.f32 %v5328_v32, %v5282_v17  ;;  %v5413_v44 = vadd.f32 %v5393_v8, %v5347_v43 }
 0x605   : > { %15852 = vst [vmem:[#allocation58_spill] sm:$0xff] %v13795_v60  ;;  %v13808_v28 = vpop.permute.xlu0 %5585  ;;  %v13810_v5 = vpop.f32.mrb[10].mxu1  ;;  %v5221_v47 = vadd.f32 %v5202_v62, %v5163_v46  ;;  %v5464_v46 = vsel %vm4885_vm9, %v13589_v15, %v13699_v7 }
 0x606   : > { %15855 = vst [vmem:[#allocation87_spill] sm:$0xff] %v13808_v28  ;;  %5069 = vrot.lane.b32.xlu1 %v13541_v6, %s15470_s18  ;;  %v13814_v56 = vpop.f32.mrb[11].mxu1  ;;  %v5332_v6 = vsel %vm15858_vm11, %v13417_v16, %v13639_v31  ;;  %v5414_v2 = vadd.f32 %v5394_v24, %v5348_v39  ;;  %v5459_v31 = vsel %vm4885_vm9, %v13561_v26, %v13687_v55  ;;  %vm15935_vm11 = vmmov %vm15860_vm7 }
 0x607   : > { %5379 = vrot.lane.b32.xlu0 %v13577_v20, %s15479_s0  ;;  %v5460_v20 = vsel %vm4885_vm9, %v13687_v55, %v13795_v60  ;;  %v5287_v33 = vadd.f32 %v5267_v30, %v5221_v47  ;;  %v5352_v38 = vadd.f32 %v5332_v6, %v5286_v23  ;;  %v5479_v4 = vadd.f32 %v5459_v31, %v5413_v44  ;;  %v15869_v30 = vld [vmem:[#allocation50_spill] sm:$0xff]  ;;  %v15871_v47 = vld [vmem:[#allocation52_spill] sm:$0xff]  ;;  %v15873_v44 = vld [vmem:[#allocation73_spill] sm:$0xff] }
 0x608   : > { %v13823_v41 = vpop.permute.xlu1 %5451  ;;  %v5480_v52 = vadd.f32 %v5460_v20, %v5414_v2  ;;  %v15875_v20 = vld [vmem:[#allocation53_spill] sm:$0xff]  ;;  %v15876_v2 = vld [vmem:[#allocation16_spill] sm:$0xff]  ;;  %vm15938_vm7 = vmmov %vm15755_vm2 }
 0x609   : > { %15857 = vst [vmem:[#allocation88_spill] sm:$0xff] %v13823_v41  ;;  %v13836_v27 = vpop.permute.xlu0 %5633  ;;  %v13838_v35 = vpop.f32.mrb[12].mxu1  ;;  %v5353_v25 = vadd.f32 %v5333_v53, %v5287_v33  ;;  %v5418_v11 = vadd.f32 %v5398_v3, %v5352_v38  ;;  %v15877_v31 = vld [vmem:[#allocation45_spill] sm:$0xff] }
 0x60a   : > { %15861 = vst [vmem:[#allocation89_spill] sm:$0xff] %v13836_v27  ;;  %15862 = vst [vmem:[#allocation90_spill] sm:$0xff] %v13838_v35  ;;  %5077 = vrot.lane.b32.xlu1 %v13553_v40, %s15470_s18  ;;  %v13842_v16 = vpop.f32.mrb[13].mxu1  ;;  %v5465_v40 = vsel %vm4885_vm9, %v13699_v7, %v13823_v41  ;;  %v15905_v27 = vld [vmem:[#allocation40_spill] sm:$0xff] }
 0x60b   : > { %15863 = vst [vmem:[#allocation91_spill] sm:$0xff] %v13842_v16  ;;  %5243 = vrot.lane.b32.xlu0 %v13626_v58, %s15497_s24  ;;  %v5419_v58 = vadd.f32 %v5399_v19, %v5353_v25  ;;  %v5484_v23 = vadd.f32 %v5464_v46, %v5418_v11  ;;  %v15879_v25 = vld [vmem:[#allocation81_spill] sm:$0xff]  ;;  %v15918_v16 = vld [vmem:[#allocation56_spill] sm:$0xff] }
 0x60c   : > { %v5504_v51 = vpop.permute.xlu1 %5503  ;;  %v15926_v41 = vld [vmem:[#allocation80_spill] sm:$0xff] }
 0x60d   : > { %v5525_v21 = vsel %vm4952_vm1, %v13527_v13, %v5504_v51  ;;  %v5526_v55 = vsel %vm4952_vm1, %v5504_v51, %v13720_v29  ;;  %v13858_v26 = vpop.permute.xlu0 %5635  ;;  %v13860_v10 = vpop.f32.mrb[14].mxu1  ;;  %v15868_v13 = vld [vmem:[#allocation20_spill] sm:$0xff]  ;;  %v5485_v17 = vadd.f32 %v5465_v40, %v5419_v58  ;;  %v15882_v51 = vld [vmem:[#allocation17_spill] sm:$0xff] }
 0x60e   : > { %15865 = vst [vmem:[#allocation92_spill] sm:$0xff] %v13858_v26  ;;  %15866 = vst [vmem:[#allocation93_spill] sm:$0xff] %v13860_v10  ;;  %v5545_v62 = vadd.f32 %v5525_v21, %v5479_v4  ;;  %v5546_v32 = vadd.f32 %v5526_v55, %v5480_v52  ;;  %5127 = vrot.lane.b32.xlu1 %v13569_v9, %s9450_s9  ;;  %v13864_v8 = vpop.f32.mrb[15].mxu1  ;;  %v15883_v21 = vld [vmem:[#allocation13_spill] sm:$0xff]  ;;  %v15917_v10 = vld [vmem:[#allocation18_spill] sm:$0xff] }
 0x60f   : > { %15867 = vst [vmem:[#allocation94_spill] sm:$0xff] %v13864_v8  ;;  %5257 = vrot.lane.b32.xlu0 %v15868_v13, %s15497_s24  ;;  %v15886_v13 = vld [vmem:[#allocation15_spill] sm:$0xff] }
 0x610   : > { %v5516_v43 = vpop.permute.xlu1 %5515  ;;  %v13872_v24 = vadd.f32 %v5545_v62, %v15869_v30  ;;  %v13875_v39 = vadd.f32 %v5546_v32, %v15871_v47  ;;  %v15885_v32 = vld [vmem:[#allocation48_spill] sm:$0xff]  ;;  %v15889_v30 = vld [vmem:[#allocation31_spill] sm:$0xff] }
 0x611   : > { %v5530_v9 = vsel %vm4952_vm1, %v15873_v44, %v5516_v43  ;;  %v5531_v6 = vsel %vm4952_vm1, %v5516_v43, %v13743_v59  ;;  %v13881_v53 = vpop.permute.xlu0 %5643  ;;  %v13883_v15 = vpop.f32.mrb[16].mxu1  ;;  %v15890_v44 = vld [vmem:[#allocation43_spill] sm:$0xff] }
 0x612   : > { %15870 = vst [vmem:[#allocation20_spill] sm:$0xff] %v13872_v24  ;;  %15872 = vst [vmem:[#allocation50_spill] sm:$0xff] %v13875_v39  ;;  %v5550_v7 = vadd.f32 %v5530_v9, %v5484_v23  ;;  %v5551_v3 = vadd.f32 %v5531_v6, %v5485_v17  ;;  %5137 = vrot.lane.b32.xlu1 %v15875_v20, %s9450_s9  ;;  %v13887_v33 = vpop.f32.mrb[17].mxu1 }
 0x613   : > { %15874 = vst [vmem:[#allocation52_spill] sm:$0xff] %v13881_v53  ;;  %5511 = vrot.lane.b32.xlu0 %v15876_v2, %s9453_s30  ;;  %v15893_v2 = vld [vmem:[#allocation34_spill] sm:$0xff] }
 0x614   : > { %v13891_v38 = vpop.permute.xlu1 %4435  ;;  %v13894_v19 = vadd.f32 %v5550_v7, %v15877_v31  ;;  %v13897_v11 = vadd.f32 %v5551_v3, %v15879_v25  ;;  %v15892_v3 = vld [vmem:[#allocation54_spill] sm:$0xff] }
 0x615   : > { %v13899_v52 = vpop.permute.xlu0 %5645  ;;  %v13901_v4 = vpop.f32.mrb[18].mxu1  ;;  %v4469_v35 = vadd.f32 %v13891_v38, %v15918_v16 }
 0x616   : > { %15878 = vst [vmem:[#allocation73_spill] sm:$0xff] %v13894_v19  ;;  %15880 = vst [vmem:[#allocation53_spill] sm:$0xff] %v13897_v11  ;;  %5183 = vrot.lane.b32.xlu1 %v15882_v51, %s9451_s21  ;;  %v13905_v40 = vpop.f32.mrb[19].mxu1  ;;  %v15899_v19 = vld [vmem:[#allocation86_spill] sm:$0xff] }
 0x617   : > { %15881 = vst [vmem:[#allocation16_spill] sm:$0xff] %v13899_v52  ;;  %5309 = vrot.lane.b32.xlu0 %v15883_v21, %s15500_s13  ;;  %v15895_v21 = vld [vmem:[#allocation29_spill] sm:$0xff]  ;;  %v15901_v11 = vld [vmem:[#allocation14_spill] sm:$0xff]  ;;  %v4527_v60 = vadd.f32 %v13772_v12, %v4469_v35 }
 0x618   : > { %v13909_v55 = vpop.permute.xlu1 %4445  ;;  %v15902_v52 = vld [vmem:[#allocation25_spill] sm:$0xff] }
 0x619   : > { %v13911_v58 = vpop.permute.xlu0 %5701  ;;  %v13913_v62 = vpop.f32.mrb[20].mxu1 }
 0x61a   : > { %15884 = vst [vmem:[#allocation45_spill] sm:$0xff] %v13911_v58  ;;  %5325 = vrot.lane.b32.xlu1 %v15885_v32, %s15500_s13  ;;  %v13917_v46 = vpop.f32.mrb[21].mxu1 }
 0x61b   : > { %5321 = vrot.lane.b32.xlu0 %v15886_v13, %s15500_s13  ;;  %v15896_v13 = vld [vmem:[#allocation85_spill] sm:$0xff] }
 0x61c   : > { %v13921_v17 = vpop.permute.xlu1 %5575 }
 0x61d   : > { %15887 = vst [vmem:[#allocation81_spill] sm:$0xff] %v13921_v17  ;;  %v13923_v23 = vpop.permute.xlu0 %5703  ;;  %v13925_v43 = vpop.f32.mrb[22].mxu1 }
 0x61e   : > { %15888 = vst [vmem:[#allocation17_spill] sm:$0xff] %v13923_v23  ;;  %5313 = vrot.lane.b32.xlu1 %v15889_v30, %s15500_s13  ;;  %v13929_v47 = vpop.f32.mrb[23].mxu1 }
 0x61f   : > { %5593 = vrot.lane.b32.xlu0 %v15890_v44, %s15467_s28 }
 0x620   : > { %v13933_v9 = vpop.permute.xlu1 %5577 }
 0x621   : > { %15891 = vst [vmem:[#allocation13_spill] sm:$0xff] %v13933_v9  ;;  %v13935_v6 = vpop.permute.xlu0 %4673  ;;  %v13937_v7 = vpop.f32.mrb[24].mxu1 }
 0x622   : > { %5391 = vrot.lane.b32.xlu1 %v15892_v3, %s15479_s0  ;;  %v13941_v20 = vpop.f32.mrb[25].mxu1 }
 0x623   : > { %5583 = vrot.lane.b32.xlu0 %v15893_v2, %s15467_s28  ;;  %v15898_v2 = vld [vmem:[#allocation63_spill] sm:$0xff] }
 0x624   : > { %v13945_v31 = vpop.permute.xlu1 %4503 }
 0x625   : > { %v13947_v25 = vpop.permute.xlu0 %5751  ;;  %v13949_v51 = vpop.f32.mrb[26].mxu1 }
 0x626   : > { %15894 = vst [vmem:[#allocation48_spill] sm:$0xff] %v13947_v25  ;;  %5195 = vrot.lane.b32.xlu1 %v15895_v21, %s9451_s21  ;;  %v13953_v32 = vpop.f32.mrb[27].mxu1 }
 0x627   : > { %5377 = vrot.lane.b32.xlu0 %v15896_v13, %s15479_s0  ;;  %v15900_v13 = vld [vmem:[#allocation76_spill] sm:$0xff] }
 0x628   : > { %v13957_v30 = vpop.permute.xlu1 %5587 }
 0x629   : > { %15897 = vst [vmem:[#allocation15_spill] sm:$0xff] %v13957_v30  ;;  %v13959_v44 = vpop.permute.xlu0 %4683  ;;  %v13961_v3 = vpop.f32.mrb[28].mxu1 }
 0x62a   : > { %5457 = vrot.lane.b32.xlu1 %v15898_v2, %s9452_s27  ;;  %v13965_v58 = vpop.f32.mrb[29].mxu1 }
 0x62b   : > { %5389 = vrot.lane.b32.xlu0 %v15899_v19, %s15479_s0  ;;  %v15903_v19 = vld [vmem:[#allocation36_spill] sm:$0xff] }
 0x62c   : > { %v4552_v21 = vpop.permute.xlu1 %4551 }
 0x62d   : > { %v13969_v23 = vpop.permute.xlu0 %4685  ;;  %v13971_v53 = vpop.f32.mrb[30].mxu1 }
 0x62e   : > { %5245 = vrot.lane.b32.xlu1 %v15900_v13, %s15497_s24  ;;  %v13975_v28 = vpop.f32.mrb[31].mxu1 }
 0x62f   : > { %5699 = vrot.lane.b32.xlu0 %v15901_v11, %s9450_s9 }
 0x630   : > { %v13979_v39 = vpop.permute.xlu1 %4561 }
 0x631   : > { %v13981_v2 = vpop.permute.xlu0 %4803 }
 0x632   : > { %5445 = vrot.lane.b32.xlu1 %v15902_v52, %s9452_s27  ;;  %v15907_v52 = vld [vmem:[#allocation42_spill] sm:$0xff] }
 0x633   : > { %5441 = vrot.lane.b32.xlu0 %v15903_v19, %s9452_s27 }
 0x634   : > { %v4611_v30 = vpop.permute.xlu1 %4610 }
 0x635   : > { %v4806_v25 = vpop.permute.xlu0 %4805 }
 0x636   : > { %v13989_v13 = vsel %vm15904_vm14, %v13981_v2, %v4806_v25  ;;  %5255 = vrot.lane.b32.xlu1 %v15905_v27, %s15497_s24  ;;  %v15910_v27 = vld [vmem:[#allocation61_spill] sm:$0xff]  ;;  %vm15942_vm14 = vmmov %vm15859_vm5 }
 0x637   : > { %5453 = vrot.lane.b32.xlu0 %v13745_v34, %s9452_s27 }
 0x638   : > { %v13995_v11 = vpop.permute.xlu1 %5691 }
 0x639   : > { %15906 = vst [vmem:[#allocation31_spill] sm:$0xff] %v13995_v11  ;;  %v13997_v26 = vpop.permute.xlu0 %4815 }
 0x63a   : > { %5523 = vrot.lane.b32.xlu1 %v15907_v52, %s9453_s30  ;;  %v15911_v52 = vld [vmem:[#allocation82_spill] sm:$0xff] }
 0x63b   : > { %5509 = vrot.lane.b32.xlu0 %v13779_v0, %s9453_s30  ;;  %v15912_v0 = vld [vmem:[#allocation75_spill] sm:$0xff] }
 0x63c   : > { %v14003_v19 = vpop.permute.xlu1 %5693 }
 0x63d   : > { %15908 = vst [vmem:[#allocation43_spill] sm:$0xff] %v14003_v19  ;;  %v4818_v25 = vpop.permute.xlu0 %4817  ;;  %v4450_v19 = vsel %vm1513_vm6, %v15912_v0, %v13891_v38  ;;  %v15923_v38 = vld [vmem:[#allocation49_spill] sm:$0xff] }
 0x63e   : > { %v14007_v24 = vsel %vm15909_vm12, %v13997_v26, %v4818_v25  ;;  %5311 = vrot.lane.b32.xlu1 %v15910_v27, %s15500_s13  ;;  %v15913_v27 = vld [vmem:[#allocation79_spill] sm:$0xff]  ;;  %vm15945_vm12 = vmmov %vm15935_vm11 }
 0x63f   : > { %5521 = vrot.lane.b32.xlu0 %v13814_v56, %s9453_s30  ;;  %v4468_v9 = vadd.f32 %v4450_v19, %v15913_v27  ;;  %v15914_v56 = vld [vmem:[#allocation38_spill] sm:$0xff] }
 0x640   : > { %v4621_v34 = vpop.permute.xlu1 %4620 }
 0x641   : > { %v14013_v11 = vpop.permute.xlu0 %4883 }
 0x642   : > { %5323 = vrot.lane.b32.xlu1 %v15911_v52, %s15500_s13  ;;  %v15916_v52 = vld [vmem:[#allocation51_spill] sm:$0xff] }
 0x643   : > { %5579 = vrot.lane.b32.xlu0 %v13883_v15, %s15467_s28  ;;  %v4508_v0 = vsel %vm1605_vm8, %v15916_v52, %v13772_v12  ;;  %v4567_v15 = vsel %vm4563_vm0, %v15917_v10, %v4552_v21  ;;  %v15921_v52 = vld [vmem:[#allocation59_spill] sm:$0xff] }
 0x644   : > { %v4672_v25 = vpop.permute.xlu1 %4671  ;;  %v4526_v19 = vadd.f32 %v4508_v0, %v4468_v9  ;;  %v4626_v29 = vsel %vm4622_vm4, %v15921_v52, %v4611_v30  ;;  %v15924_v9 = vld [vmem:[#allocation28_spill] sm:$0xff]  ;;  %v15930_v12 = vld [vmem:[#allocation71_spill] sm:$0xff] }
 0x645   : > { %v14022_v17 = vpop.permute.xlu0 %4936  ;;  %v4690_v0 = vsel %vm15925_vm3, %v15924_v9, %v4672_v25  ;;  %vm15946_vm3 = vmmov %vm15859_vm5 }
 0x646   : > { %5375 = vrot.lane.b32.xlu1 %v15914_v56, %s15479_s0  ;;  %v15920_v56 = vld [vmem:[#allocation57_spill] sm:$0xff]  ;;  %v4585_v10 = vadd.f32 %v4567_v15, %v4526_v19 }
 0x647   : > { %5589 = vrot.lane.b32.xlu0 %v13901_v4, %s15467_s28  ;;  %v15919_v4 = vld [vmem:[#allocation37_spill] sm:$0xff] }
 0x648   : > { %v14029_v8 = vpop.permute.xlu1 %5749  ;;  %v4644_v52 = vadd.f32 %v4626_v29, %v4585_v10  ;;  %v4691_v29 = vsel %vm15755_vm2, %v4672_v25, %v13935_v6 }
 0x649   : > { %15915 = vst [vmem:[#allocation54_spill] sm:$0xff] %v14029_v8  ;;  %v4939_v59 = vpop.permute.xlu0 %4938  ;;  %v4454_v8 = vsel %vm1513_vm6, %v15920_v56, %v13909_v55 }
 0x64a   : > { %v14040_v27 = vsel %vm4952_vm1, %v14022_v17, %v4939_v59  ;;  %5651 = vrot.lane.b32.xlu1 %v15919_v4, %s15470_s18  ;;  %v4512_v59 = vsel %vm1605_vm8, %v15923_v38, %v13945_v31  ;;  %v4473_v56 = vadd.f32 %v4454_v8, %v15926_v41  ;;  %v4586_v38 = vadd.f32 %v4552_v21, %v4527_v60  ;;  %v15932_v8 = vld [vmem:[#allocation67_spill] sm:$0xff]  ;;  %v15934_v21 = vld [vmem:[#allocation62_spill] sm:$0xff] }
 0x64b   : > { %5639 = vrot.lane.b32.xlu0 %v13917_v46, %s15470_s18  ;;  %v15928_v46 = vld [vmem:[#allocation55_spill] sm:$0xff]  ;;  %v4710_v9 = vadd.f32 %v4690_v0, %v4644_v52  ;;  %v4630_v41 = vsel %vm4622_vm4, %v15929_v49, %v4621_v34  ;;  %v4474_v10 = vadd.f32 %v13909_v55, %v15932_v8  ;;  %v4822_v49 = vsel %vm15935_vm11, %v15934_v21, %v13981_v2  ;;  %vm15961_vm11 = vmmov %vm15755_vm2 }
 0x64c   : > { %v14051_v16 = vpop.permute.xlu1 %5761  ;;  %v4571_v15 = vsel %vm4563_vm0, %v15928_v46, %v13979_v39  ;;  %v4531_v19 = vadd.f32 %v4512_v59, %v4473_v56  ;;  %v15933_v60 = vld [vmem:[#allocation27_spill] sm:$0xff] }
 0x64d   : > { %15922 = vst [vmem:[#allocation34_spill] sm:$0xff] %v14051_v16  ;;  %v14058_v4 = vpop.permute.xlu0 %4948  ;;  %v4532_v6 = vadd.f32 %v13945_v31, %v4474_v10 }
 0x64e   : > { %5641 = vrot.lane.b32.xlu1 %v15927_v22, %s15470_s18  ;;  %v4590_v46 = vadd.f32 %v4571_v15, %v4531_v19 }
 0x64f   : > { %5649 = vrot.lane.b32.xlu0 %v13929_v47, %s15470_s18  ;;  %v4645_v47 = vadd.f32 %v4611_v30, %v4586_v38  ;;  %v4591_v15 = vadd.f32 %v13979_v39, %v4532_v6  ;;  %v15936_v38 = vld [vmem:[#allocation19_spill] sm:$0xff] }
 0x650   : > { %v4738_v16 = vpop.permute.xlu1 %4737  ;;  %v4649_v25 = vadd.f32 %v4630_v41, %v4590_v46 }
 0x651   : > { %v4756_v22 = vsel %vm15931_vm10, %v15930_v12, %v4738_v16  ;;  %v14075_v35 = vpop.permute.xlu0 %5011  ;;  %v4711_v0 = vadd.f32 %v4691_v29, %v4645_v47  ;;  %v15943_v47 = vld [vmem:[#allocation30_spill] sm:$0xff]  ;;  %vm15959_vm10 = vmmov %vm15755_vm2 }
 0x652   : > { %v4776_v59 = vadd.f32 %v4756_v22, %v4710_v9  ;;  %5387 = vrot.lane.b32.xlu1 %v15933_v60, %s15479_s0  ;;  %v15939_v9 = vld [vmem:[#allocation47_spill] sm:$0xff]  ;;  %v15941_v22 = vld [vmem:[#allocation74_spill] sm:$0xff]  ;;  %s8299_s0 = sshll.u32 %s9543_s25, 4  ;;  %s9456_s25 = smov [#allocation2]  }
 0x653   : > { %5695 = vrot.lane.b32.xlu0 %v13937_v7, %s9450_s9  ;;  %v15937_v7 = vld [vmem:[#allocation44_spill] sm:$0xff]  ;;  %s9368_s14 = sshll.u32 %s9456_s25, 4  ;;  %s9369_s14 = int_to_ptr.vmem [resolvable:$false] %s9368_s14 }
 0x654   : > { %v4740_v56 = vpop.permute.xlu1 %4739  ;;  %v4842_v52 = vadd.f32 %v4822_v49, %v4776_v59  ;;  %v4695_v31 = vsel %vm15938_vm7, %v15937_v7, %v13959_v44  ;;  %v15947_v49 = vld [vmem:[#allocation84_spill] sm:$0xff]  ;;  %vm15963_vm7 = vmmov %vm15755_vm2  ;;  %s9370_s29 = scalar_lea.vmem %s9369_s14, 32 }
 0x655   : > { %v4757_v55 = vsel %vm15859_vm5, %v4738_v16, %v4740_v56  ;;  %v14088_v30 = vpop.permute.xlu0 %5019  ;;  %v4650_v16 = vadd.f32 %v4621_v34, %v4591_v15  ;;  %v4715_v39 = vadd.f32 %v4695_v31, %v4649_v25  ;;  %v15948_v25 = vld [vmem:[#allocation21_spill] sm:$0xff]  ;;  %vm15962_vm5 = vmmov %vm15755_vm2 }
 0x656   : > { %v4777_v19 = vadd.f32 %v4757_v55, %v4711_v0  ;;  %v5029_v2 = vsel %vm1513_vm6, %v13525_v37, %v14088_v30  ;;  %5709 = vrot.lane.b32.xlu1 %v15936_v38, %s9450_s9  ;;  %v4696_v37 = vsel %vm15940_vm15, %v13959_v44, %v13969_v23  ;;  %v15949_v55 = vld [vmem:[#allocation24_spill] sm:$0xff]  ;;  %vm15964_vm15 = vmmov %vm15946_vm3 }
 0x657   : > { %v14100_v41 = vadd.f32 %v5029_v2, %v15939_v9  ;;  %5707 = vrot.lane.b32.xlu0 %v13953_v32, %s9450_s9  ;;  %v15944_v32 = vld [vmem:[#allocation32_spill] sm:$0xff]  ;;  %v4956_v15 = vsel %vm4952_vm1, %v15949_v55, %v14022_v17 }
 0x658   : > { %v4750_v29 = vpop.permute.xlu1 %4749  ;;  %v4843_v12 = vadd.f32 %v13989_v13, %v4777_v19  ;;  %v4827_v34 = vsel %vm15945_vm12, %v15944_v32, %v13997_v26  ;;  %v4716_v13 = vadd.f32 %v4696_v37, %v4650_v16  ;;  %v15950_v19 = vld [vmem:[#allocation83_spill] sm:$0xff]  ;;  %v15952_v16 = vld [vmem:[#allocation64_spill] sm:$0xff] }
 0x659   : > { %v4761_v8 = vsel %vm15942_vm14, %v15941_v22, %v4750_v29  ;;  %v14110_v10 = vpop.permute.xlu0 %5067  ;;  %vm15965_vm14 = vmmov %vm15946_vm3 }
 0x65a   : > { %v4781_v46 = vadd.f32 %v4761_v8, %v4715_v39  ;;  %5443 = vrot.lane.b32.xlu1 %v15943_v47, %s9452_s27 }
 0x65b   : > { %5755 = vrot.lane.b32.xlu0 %v13965_v58, %s9451_s21 }
 0x65c   : > { %v4752_v59 = vpop.permute.xlu1 %4751  ;;  %v4847_v60 = vadd.f32 %v4827_v34, %v4781_v46 }
 0x65d   : > { %v4762_v23 = vsel %vm15946_vm3, %v4750_v29, %v4752_v59  ;;  %v14120_v44 = vpop.permute.xlu0 %5079  ;;  %vm15966_vm3 = vmmov %vm15755_vm2 }
 0x65e   : > { %v4782_v21 = vadd.f32 %v4762_v23, %v4716_v13  ;;  %5757 = vrot.lane.b32.xlu1 %v15947_v49, %s9451_s21  ;;  %v15956_v23 = vld [vmem:[#allocation72_spill] sm:$0xff]  ;;  %v15957_v49 = vld [vmem:[#allocation23_spill] sm:$0xff] }
 0x65f   : > { %5763 = vrot.lane.b32.xlu0 %v13971_v53, %s9451_s21 }
 0x660   : > { %v4870_v6 = vpop.permute.xlu1 %4869  ;;  %v4848_v26 = vadd.f32 %v14007_v24, %v4782_v21 }
 0x661   : > { %v4889_v58 = vsel %vm4885_vm9, %v15948_v25, %v4870_v6  ;;  %v14129_v0 = vpop.permute.xlu0 %5125 }
 0x662   : > { %v4909_v56 = vadd.f32 %v4889_v58, %v4842_v52  ;;  %5455 = vrot.lane.b32.xlu1 %v13750_v61, %s9452_s27  ;;  %v15951_v52 = vld [vmem:[#allocation26_spill] sm:$0xff] }
 0x663   : > { %5767 = vrot.lane.b32.xlu0 %v15950_v19, %s9451_s21  ;;  %v5141_v19 = vsel %vm4563_vm0, %v13605_v57, %v14129_v0 }
 0x664   : > { %v4976_v53 = vadd.f32 %v4956_v15, %v4909_v56  ;;  %v4872_v2 = vpop.permute.xlu1 %4871 }
 0x665   : > { %v4890_v24 = vsel %vm4885_vm9, %v4870_v6, %v4872_v2  ;;  %v14139_v38 = vpop.permute.xlu0 %5135 }
 0x666   : > { %v4910_v7 = vadd.f32 %v4890_v24, %v4843_v12  ;;  %5507 = vrot.lane.b32.xlu1 %v13774_v63, %s9453_s30  ;;  %v4986_v31 = vadd.f32 %v4976_v53, %v15951_v52  ;;  %v15953_v12 = vld [vmem:[#allocation68_spill] sm:$0xff]  ;;  %v15954_v63 = vld [vmem:[#allocation78_spill] sm:$0xff] }
 0x667   : > { %v4961_v46 = vsel %vm4952_vm1, %v15954_v63, %v14058_v4 }
 0x668   : > { %v4977_v61 = vadd.f32 %v14040_v27, %v4910_v7  ;;  %v4882_v9 = vpop.permute.xlu1 %4881 }
 0x669   : > { %v4894_v17 = vsel %vm4885_vm9, %v15952_v16, %v4882_v9  ;;  %v4895_v39 = vsel %vm4885_vm9, %v4882_v9, %v14013_v11  ;;  %v5260_v29 = vpop.permute.xlu0 %5259 }
 0x66a   : > { %v4914_v37 = vadd.f32 %v4894_v17, %v4847_v60  ;;  %v4915_v22 = vadd.f32 %v4895_v39, %v4848_v26  ;;  %5519 = vrot.lane.b32.xlu1 %v13810_v5, %s9453_s30  ;;  %v4987_v8 = vadd.f32 %v4977_v61, %v15953_v12  ;;  %v15955_v5 = vld [vmem:[#allocation70_spill] sm:$0xff] }
 0x66c   : > { %v4981_v27 = vadd.f32 %v4961_v46, %v4914_v37  ;;  %v4951_v47 = vpop.permute.xlu1 %4950  ;;  %v5045_v32 = vadd.f32 %v14075_v35, %v4987_v8 }
 0x66d   : > { %v4962_v34 = vsel %vm4952_vm1, %v14058_v4, %v4951_v47  ;;  %v14158_v11 = vpop.permute.xlu0 %5247  ;;  %v15958_v4 = vld [vmem:[#allocation77_spill] sm:$0xff] }
 0x66e   : > { %v4982_v13 = vadd.f32 %v4962_v34, %v4915_v22  ;;  %5581 = vrot.lane.b32.xlu1 %v13887_v33, %s15467_s28  ;;  %v4991_v59 = vadd.f32 %v4981_v27, %v15955_v5  ;;  %v5083_v33 = vsel %vm1605_vm8, %v13547_v45, %v14110_v10 }
 0x670   : > { %v5010_v60 = vpop.permute.xlu1 %5009  ;;  %v4992_v21 = vadd.f32 %v4982_v13, %v15956_v23 }
 0x671   : > { %v5025_v6 = vsel %vm1513_vm6, %v15957_v49, %v5010_v60  ;;  %v5026_v26 = vsel %vm1513_vm6, %v5010_v60, %v14075_v35  ;;  %v14168_v25 = vpop.permute.xlu0 %5185 }
 0x672   : > { %v5043_v58 = vadd.f32 %v5025_v6, %v15958_v4  ;;  %v5044_v56 = vadd.f32 %v5026_v26, %v4986_v31  ;;  %5591 = vrot.lane.b32.xlu1 %v13905_v40, %s15467_s28 }
 0x674   : > { %v5101_v55 = vadd.f32 %v5083_v33, %v5043_v58  ;;  %v5022_v15 = vpop.permute.xlu1 %5021 }
 0x675   : > { %v5030_v35 = vsel %vm1513_vm6, %v14088_v30, %v5022_v15  ;;  %v5050_v53 = vadd.f32 %v5022_v15, %v4992_v21  ;;  %v5194_v2 = vpop.permute.xlu0 %5193 }
 0x676   : > { %v5049_v24 = vadd.f32 %v5030_v35, %v4991_v59  ;;  %5637 = vrot.lane.b32.xlu1 %v13913_v62, %s15470_s18  ;;  %v5159_v40 = vadd.f32 %v5141_v19, %v5101_v55  ;;  %v5203_v22 = vsel %vm4622_vm4, %v13650_v54, %v5194_v2  ;;  %v15960_v59 = vld [vmem:[#allocation60_spill] sm:$0xff] }
 0x677   : > { %v5108_v7 = vadd.f32 %v14120_v44, %v5050_v53 }
 0x678   : > { %v5070_v52 = vpop.permute.xlu1 %5069 }
 0x679   : > { %v5084_v45 = vsel %vm1605_vm8, %v14110_v10, %v5070_v52  ;;  %v5103_v31 = vadd.f32 %v5070_v52, %v5045_v32  ;;  %v14186_v61 = vpop.permute.xlu0 %5379  ;;  %v5145_v10 = vsel %vm4563_vm0, %v13620_v36, %v14139_v38 }
 0x67a   : > { %v5102_v57 = vadd.f32 %v5084_v45, %v5044_v56  ;;  %5647 = vrot.lane.b32.xlu1 %v13925_v43, %s15470_s18 }
 0x67c   : > { %v5078_v30 = vpop.permute.xlu1 %5077 }
 0x67d   : > { %v5087_v9 = vsel %vm1605_vm8, %v13505_v18, %v5078_v30  ;;  %v5088_v62 = vsel %vm1605_vm8, %v5078_v30, %v14120_v44  ;;  %v5244_v16 = vpop.permute.xlu0 %5243 }
 0x67e   : > { %v5106_v17 = vadd.f32 %v5087_v9, %v14100_v41  ;;  %v5107_v39 = vadd.f32 %v5088_v62, %v5049_v24  ;;  %5697 = vrot.lane.b32.xlu1 %v13941_v20, %s9450_s9 }
 0x680   : > { %v5164_v37 = vadd.f32 %v5145_v10, %v5106_v17  ;;  %v5128_v43 = vpop.permute.xlu1 %5127 }
 0x681   : > { %v5142_v18 = vsel %vm4563_vm0, %v14129_v0, %v5128_v43  ;;  %v14204_v44 = vadd.f32 %v5128_v43, %v5103_v31  ;;  %v5258_v12 = vpop.permute.xlu0 %5257 }
 0x682   : > { %v5160_v41 = vadd.f32 %v5142_v18, %v5102_v57  ;;  %v5270_v8 = vsel %vm15755_vm2, %v5258_v12, %v5260_v29  ;;  %5705 = vrot.lane.b32.xlu1 %v13949_v51, %s9450_s9  ;;  %v5222_v20 = vadd.f32 %v5203_v22, %v5164_v37  ;;  %vm15967_vm2 = vmmov %vm15965_vm14 }
 0x684   : > { %v5138_v63 = vpop.permute.xlu1 %5137 }
 0x685   : > { %v5146_v36 = vsel %vm4563_vm0, %v14139_v38, %v5138_v63  ;;  %v5166_v46 = vadd.f32 %v5138_v63, %v5108_v7  ;;  %v14211_v27 = vpop.permute.xlu0 %5511  ;;  %v5263_v38 = vsel %vm15959_vm10, %v13665_v1, %v5244_v16  ;;  %vm15968_vm10 = vmmov %vm15945_vm12 }
 0x686   : > { %v5165_v54 = vadd.f32 %v5146_v36, %v5107_v39  ;;  %5753 = vrot.lane.b32.xlu1 %v13961_v3, %s9451_s21 }
 0x688   : > { %v5184_v0 = vpop.permute.xlu1 %5183 }
 0x689   : > { %v5199_v47 = vsel %vm4622_vm4, %v13565_v14, %v5184_v0  ;;  %v5200_v29 = vsel %vm4622_vm4, %v5184_v0, %v14168_v25  ;;  %v14219_v51 = vpop.permute.xlu0 %5309 }
 0x68a   : > { %v5217_v32 = vadd.f32 %v5199_v47, %v5159_v40  ;;  %v5218_v34 = vadd.f32 %v5200_v29, %v5160_v41  ;;  %5765 = vrot.lane.b32.xlu1 %v13975_v28, %s9451_s21 }
 0x68c   : > { %v5283_v13 = vadd.f32 %v5263_v38, %v5217_v32  ;;  %v5326_v5 = vpop.permute.xlu1 %5325 }
 0x68d   : > { %v14225_v3 = vpop.permute.xlu0 %5321 }
 0x68e   : > { %5759 = vrot.lane.b32.xlu1 %v15960_v59, %s9451_s21  ;;  %s16043_s21 = sld [smem:[#allocation99_spill]] }
 0x690   : > { %v5314_v14 = vpop.permute.xlu1 %5313 }
 0x691   : > { %v14229_v60 = vpop.permute.xlu0 %5593 }
 0x694   : > { %v5392_v23 = vpop.permute.xlu1 %5391  ;;  %s16044_s27 = smov %s16043_s21  ;;  %s15166_s30 = scalar_lea.hbm %s16043_s21, %s8299_s0 }
 0x695   : > { %v14232_v26 = vpop.permute.xlu0 %5583 }
 0x698   : > { %v5196_v21 = vpop.permute.xlu1 %5195 }
 0x699   : > { %v5204_v49 = vsel %vm4622_vm4, %v5194_v2, %v5196_v21  ;;  %v5224_v6 = vadd.f32 %v5196_v21, %v5166_v46  ;;  %v5378_v58 = vpop.permute.xlu0 %5377 }
 0x69a   : > { %v5223_v28 = vadd.f32 %v5204_v49, %v5165_v54  ;;  %v5397_v0 = vsel %vm15968_vm10, %v5378_v58, %v14186_v61 }
 0x69b   : > { %v5290_v4 = vadd.f32 %v5270_v8, %v5224_v6  ;;  %v15974_v6 = vld [vmem:[#allocation65_spill] sm:$0xff] }
 0x69c   : > { %v5458_v1 = vpop.permute.xlu1 %5457 }
 0x69d   : > { %v5390_v19 = vpop.permute.xlu0 %5389 }
 0x69e   : > { %v5402_v17 = vsel %vm15945_vm12, %v5390_v19, %v5392_v23  ;;  %v15972_v23 = vld [vmem:[#allocation33_spill] sm:$0xff] }
 0x6a0   : > { %v5246_v56 = vpop.permute.xlu1 %5245 }
 0x6a1   : > { %v5264_v33 = vsel %vm15961_vm11, %v5244_v16, %v5246_v56  ;;  %v14238_v7 = vpop.permute.xlu0 %5699  ;;  %v5265_v18 = vsel %vm15966_vm3, %v5246_v56, %v14158_v11  ;;  %vm15969_vm11 = vmmov %vm15967_vm2 }
 0x6a2   : > { %v5284_v55 = vadd.f32 %v5264_v33, %v5218_v34 }
 0x6a4   : > { %v5446_v15 = vpop.permute.xlu1 %5445 }
 0x6a5   : > { %v5442_v31 = vpop.permute.xlu0 %5441 }
 0x6a8   : > { %v5256_v35 = vpop.permute.xlu1 %5255 }
 0x6a9   : > { %v5268_v53 = vsel %vm15962_vm5, %v13609_v50, %v5256_v35  ;;  %v5269_v24 = vsel %vm15963_vm7, %v5256_v35, %v5258_v12  ;;  %v5454_v50 = vpop.permute.xlu0 %5453  ;;  %v5219_v12 = vadd.f32 %v14168_v25, %v14204_v44  ;;  %v5329_v44 = vsel %vm15969_vm11, %v13697_v48, %v14219_v51  ;;  %vm15970_vm5 = vmmov %vm15968_vm10 }
 0x6aa   : > { %v5288_v2 = vadd.f32 %v5268_v53, %v5222_v20  ;;  %v5289_v40 = vadd.f32 %v5269_v24, %v5223_v28  ;;  %v5349_v61 = vadd.f32 %v5329_v44, %v5283_v13  ;;  %vm15971_vm7 = vmmov %vm15967_vm2  ;;  %v15978_v13 = vld [vmem:[#allocation58_spill] sm:$0xff]  ;;  %v15985_v44 = vld [vmem:[#allocation91_spill] sm:$0xff] }
 0x6ab   : > { %v5285_v63 = vadd.f32 %v5265_v18, %v5219_v12  ;;  %vm15977_vm12 = vmmov %vm15970_vm5  ;;  %v15981_v18 = vld [vmem:[#allocation39_spill] sm:$0xff] }
 0x6ac   : > { %v5524_v52 = vpop.permute.xlu1 %5523  ;;  %vm15979_vm3 = vmmov %vm15970_vm5 }
 0x6ad   : > { %v5510_v43 = vpop.permute.xlu0 %5509 }
 0x6ae   : > { %v5529_v25 = vsel %vm4952_vm1, %v5510_v43, %v14211_v27 }
 0x6b0   : > { %v5312_v45 = vpop.permute.xlu1 %5311 }
 0x6b1   : > { %v14252_v41 = vpop.permute.xlu0 %5521  ;;  %v5331_v20 = vsel %vm15967_vm2, %v5312_v45, %v5314_v14  ;;  %v5330_v14 = vsel %vm15971_vm7, %v14219_v51, %v5312_v45 }
 0x6b2   : > { %v5351_v36 = vadd.f32 %v5331_v20, %v5285_v63  ;;  %v5350_v28 = vadd.f32 %v5330_v14, %v5284_v55  ;;  %v5534_v45 = vsel %vm4952_vm1, %v14252_v41, %v5524_v52 }
 0x6b4   : > { %v5324_v57 = vpop.permute.xlu1 %5323  ;;  %v5417_v47 = vadd.f32 %v5397_v0, %v5351_v36 }
 0x6b5   : > { %v5335_v30 = vsel %vm15964_vm15, %v14225_v3, %v5324_v57  ;;  %v5336_v9 = vsel %vm15965_vm14, %v5324_v57, %v5326_v5  ;;  %v14257_v54 = vpop.permute.xlu0 %5579  ;;  %vm15973_vm15 = vmmov %vm15970_vm5 }
 0x6b6   : > { %v5355_v62 = vadd.f32 %v5335_v30, %v5289_v40  ;;  %v5356_v16 = vadd.f32 %v5336_v9, %v5290_v4  ;;  %vm15975_vm14 = vmmov %vm15967_vm2 }
 0x6b7   : > { %v5334_v48 = vsel %vm15975_vm14, %v15974_v6, %v14225_v3  ;;  %vm16020_vm14 = vmmov 0  }
 0x6b8   : > { %v5376_v39 = vpop.permute.xlu1 %5375  ;;  %v5422_v10 = vadd.f32 %v5402_v17, %v5356_v16  ;;  %v5354_v51 = vadd.f32 %v5334_v48, %v5288_v2  ;;  %v15980_v17 = vld [vmem:[#allocation88_spill] sm:$0xff]  ;;  %v15987_v48 = vld [vmem:[#allocation93_spill] sm:$0xff] }
 0x6b9   : > { %v5395_v34 = vsel %vm15970_vm5, %v13654_v42, %v5376_v39  ;;  %v14269_v38 = vpop.permute.xlu0 %5589  ;;  %v5396_v27 = vsel %vm15973_vm15, %v5376_v39, %v5378_v58  ;;  %v15976_v42 = vld [vmem:[#allocation22_spill] sm:$0xff]  ;;  %vm16017_vm5 = vcmask 1041408   ;;  %vm6012_vm15 = vcmask 146432  }
 0x6ba   : > { %v5415_v49 = vadd.f32 %v5395_v34, %v5349_v61  ;;  %v5416_v53 = vadd.f32 %v5396_v27, %v5350_v28  ;;  %vm16018_vm7 = vmmov %vm16017_vm5 }
 0x6bc   : > { %v14244_v37 = vpop.permute.xlu1 %5651 }
 0x6bd   : > { %v14288_v40 = vpop.permute.xlu0 %5639 }
 0x6c0   : > { %v14246_v22 = vpop.permute.xlu1 %5641 }
 0x6c4   : > { %v5388_v8 = vpop.permute.xlu1 %5387 }
 0x6c5   : > { %v5400_v4 = vsel %vm15977_vm12, %v15976_v42, %v5388_v8  ;;  %v5401_v24 = vsel %vm15979_vm3, %v5388_v8, %v5390_v19  ;;  %v5466_v19 = vsel %vm4885_vm9, %v15980_v17, %v5454_v50  ;;  %v15982_v8 = vld [vmem:[#allocation69_spill] sm:$0xff]  ;;  %v15988_v42 = vld [vmem:[#allocation94_spill] sm:$0xff]  ;;  %v15996_v17 = vld [vmem:[#allocation48_spill] sm:$0xff]  ;;  %vm9455_vm12 = vmmov 1  }
 0x6c6   : > { %v5420_v57 = vadd.f32 %v5400_v4, %v5354_v51  ;;  %v5421_v39 = vadd.f32 %v5401_v24, %v5355_v62  ;;  %v15984_v62 = vld [vmem:[#allocation90_spill] sm:$0xff] }
 0x6c8   : > { %v14255_v46 = vpop.permute.xlu1 %5709 }
 0x6cc   : > { %v5444_v29 = vpop.permute.xlu1 %5443 }
 0x6cd   : > { %v5463_v11 = vsel %vm4885_vm9, %v5444_v29, %v5446_v15  ;;  %v5461_v15 = vsel %vm4885_vm9, %v15978_v13, %v5442_v31  ;;  %v5462_v35 = vsel %vm4885_vm9, %v5442_v31, %v5444_v29  ;;  %v14302_v29 = vpop.permute.xlu0 %5649  ;;  %v15990_v13 = vld [vmem:[#allocation81_spill] sm:$0xff] }
 0x6ce   : > { %v5483_v32 = vadd.f32 %v5463_v11, %v5417_v47  ;;  %v5481_v30 = vadd.f32 %v5461_v15, %v5415_v49  ;;  %v5482_v9 = vadd.f32 %v5462_v35, %v5416_v53  ;;  %v5486_v47 = vadd.f32 %v5466_v19, %v5420_v57  ;;  %v15983_v11 = vld [vmem:[#allocation35_spill] sm:$0xff]  ;;  %v15997_v19 = vld [vmem:[#allocation54_spill] sm:$0xff] }
 0x6cf   : > { %v5660_v24 = vsel %vm1605_vm8, %v14302_v29, %v14244_v37 }
 0x6d0   : > { %v5549_v5 = vadd.f32 %v5529_v25, %v5483_v32  ;;  %v14271_v59 = vpop.permute.xlu1 %5757 }
 0x6d2   : > { %v5559_v21 = vadd.f32 %v5549_v5, %v15972_v23  ;;  %v15986_v5 = vld [vmem:[#allocation46_spill] sm:$0xff] }
 0x6d4   : > { %v5617_v56 = vadd.f32 %v14232_v26, %v5559_v21  ;;  %v5456_v33 = vpop.permute.xlu1 %5455 }
 0x6d5   : > { %v5468_v58 = vsel %vm4885_vm9, %v5456_v33, %v5458_v1  ;;  %v5467_v31 = vsel %vm4885_vm9, %v5454_v50, %v5456_v33  ;;  %v15989_v33 = vld [vmem:[#allocation13_spill] sm:$0xff] }
 0x6d6   : > { %v5675_v3 = vadd.f32 %v14246_v22, %v5617_v56  ;;  %v5488_v55 = vadd.f32 %v5468_v58, %v5422_v10  ;;  %v5487_v0 = vadd.f32 %v5467_v31, %v5421_v39  ;;  %v5696_v56 = vpop.permute.xlu0 %5695  ;;  %v15991_v58 = vld [vmem:[#allocation20_spill] sm:$0xff]  ;;  %v15994_v31 = vld [vmem:[#allocation43_spill] sm:$0xff] }
 0x6d8   : > { %v5733_v2 = vadd.f32 %v14238_v7, %v5675_v3  ;;  %v5554_v16 = vadd.f32 %v5534_v45, %v5488_v55  ;;  %v5508_v1 = vpop.permute.xlu1 %5507  ;;  %v15992_v3 = vld [vmem:[#allocation92_spill] sm:$0xff]  ;;  %v15993_v55 = vld [vmem:[#allocation89_spill] sm:$0xff] }
 0x6d9   : > { %v5527_v12 = vsel %vm4952_vm1, %v15981_v18, %v5508_v1  ;;  %v5528_v10 = vsel %vm4952_vm1, %v5508_v1, %v5510_v43  ;;  %v5653_v45 = vsel %vm1605_vm8, %v15993_v55, %v15992_v3 }
 0x6da   : > { %v5791_v52 = vadd.f32 %v14271_v59, %v5733_v2  ;;  %v5564_v20 = vadd.f32 %v15982_v8, %v5554_v16  ;;  %v5547_v63 = vadd.f32 %v5527_v12, %v5481_v30  ;;  %v5548_v36 = vadd.f32 %v5528_v10, %v5482_v9  ;;  %v5708_v57 = vpop.permute.xlu0 %5707 }
 0x6db   : > { %v5596_v8 = vsel %vm1513_vm6, %v15989_v33, %v14257_v54 }
 0x6dc   : > { %v14305_v32 = vadd.f32 %v15983_v11, %v5791_v52  ;;  %v5520_v50 = vpop.permute.xlu1 %5519  ;;  %v5557_v25 = vadd.f32 %v5547_v63, %v15984_v62  ;;  %v5558_v34 = vadd.f32 %v5548_v36, %v15985_v44  ;;  %v5622_v43 = vadd.f32 %v14229_v60, %v5564_v20  ;;  %v15999_v62 = vld [vmem:[#allocation16_spill] sm:$0xff] }
 0x6dd   : > { %v5532_v61 = vsel %vm4952_vm1, %v15986_v5, %v5520_v50  ;;  %v5533_v14 = vsel %vm4952_vm1, %v5520_v50, %v14252_v41  ;;  %v5595_v41 = vsel %vm1513_vm6, %v15990_v13, %v15989_v33  ;;  %v5656_v63 = vsel %vm1605_vm8, %v14288_v40, %v14246_v22  ;;  %v16002_v22 = vld [vmem:[#allocation87_spill] sm:$0xff] }
 0x6de   : > { %v5823_v23 = vmax.f32 %v14305_v32, 0.0  ;;  %v5552_v21 = vadd.f32 %v5532_v61, %v5486_v47  ;;  %v5553_v27 = vadd.f32 %v5533_v14, %v5487_v0  ;;  %v14316_v49 = vadd.f32 %v14244_v37, %v5622_v43  ;;  %v5756_v10 = vpop.permute.xlu0 %5755  ;;  %v16000_v43 = vld [vmem:[#allocation50_spill] sm:$0xff]  ;;  %v16001_v61 = vld [vmem:[#allocation53_spill] sm:$0xff] }
 0x6df   : > { %v5613_v53 = vadd.f32 %v5595_v41, %v15991_v58  ;;  %v5769_v37 = vsel %vm4622_vm4, %v15997_v19, %v15996_v17  ;;  %v5614_v5 = vadd.f32 %v5596_v8, %v16000_v43 }
 0x6e0   : > { %5847 = vrot.lane.b32.xlu0 %v5823_v23, %s15497_s24  ;;  %v5582_v6 = vpop.permute.xlu1 %5581  ;;  %v5562_v28 = vadd.f32 %v5552_v21, %v15987_v48  ;;  %v5563_v4 = vadd.f32 %v5553_v27, %v15988_v42 }
 0x6e1   : > { %v5598_v2 = vsel %vm1513_vm6, %v5582_v6, %v14232_v26  ;;  %v5671_v1 = vadd.f32 %v5653_v45, %v5613_v53  ;;  %v15998_v26 = vld [vmem:[#allocation15_spill] sm:$0xff]  ;;  %v5597_v47 = vsel %vm1513_vm6, %v14257_v54, %v5582_v6  ;;  %v5772_v6 = vsel %vm4622_vm4, %v5756_v10, %v14271_v59 }
 0x6e2   : > { %v5616_v39 = vadd.f32 %v5598_v2, %v5558_v34  ;;  %v5600_v20 = vsel %vm1513_vm6, %v15998_v26, %v14269_v38  ;;  %v5599_v27 = vsel %vm1513_vm6, %v16002_v22, %v15998_v26  ;;  %v5764_v42 = vpop.permute.xlu0 %5763  ;;  %v5712_v2 = vsel %vm4563_vm0, %v15994_v31, %v5696_v56 }
 0x6e3   : > { %v5619_v14 = vadd.f32 %v5600_v20, %v16001_v61 }
 0x6e4   : > { %v5592_v15 = vpop.permute.xlu1 %5591  ;;  %v5674_v36 = vadd.f32 %v5656_v63, %v5616_v39  ;;  %v5738_v63 = vadd.f32 %v14255_v46, %v14316_v49 }
 0x6e5   : > { %v5602_v51 = vsel %vm1513_vm6, %v5592_v15, %v14229_v60  ;;  %v15995_v60 = vld [vmem:[#allocation31_spill] sm:$0xff]  ;;  %v5601_v58 = vsel %vm1513_vm6, %v14269_v38, %v5592_v15 }
 0x6e6   : > { %v5621_v35 = vadd.f32 %v5602_v51, %v5563_v4  ;;  %v5711_v16 = vsel %vm4563_vm0, %v15995_v60, %v15994_v31  ;;  %v16003_v51 = vld [vmem:[#allocation52_spill] sm:$0xff]  ;;  %v16006_v60 = vld [vmem:[#allocation34_spill] sm:$0xff] }
 0x6e7   : > { %v5729_v12 = vadd.f32 %v5711_v16, %v5671_v1  ;;  %v5774_v38 = vsel %vm4622_vm4, %v16006_v60, %v5764_v42  ;;  %v5620_v16 = vadd.f32 %v5601_v58, %v5562_v28 }
 0x6e8   : > { %v14335_v30 = vadd.f32 %v5660_v24, %v5621_v35  ;;  %v5638_v9 = vpop.permute.xlu1 %5637  ;;  %v5657_v35 = vsel %vm1605_vm8, %v16003_v51, %v15999_v62  ;;  %v16004_v24 = vld [vmem:[#allocation17_spill] sm:$0xff] }
 0x6e9   : > { %v5787_v52 = vadd.f32 %v5769_v37, %v5729_v12  ;;  %v5654_v50 = vsel %vm1605_vm8, %v15992_v3, %v5638_v9  ;;  %v5655_v48 = vsel %vm1605_vm8, %v5638_v9, %v14288_v40  ;;  %v16005_v3 = vld [vmem:[#allocation73_spill] sm:$0xff] }
 0x6ea   : > { %v5672_v4 = vadd.f32 %v5654_v50, %v5614_v5  ;;  %v5618_v40 = vadd.f32 %v5599_v27, %v16005_v3  ;;  %v5977_v3 = vld [vmem:[%s15213_s5 + $0x100] sm:$0xff] }
 0x6eb   : > { %v14368_v54 = vadd.f32 %v15983_v11, %v5787_v52 }
 0x6ec   : > { %v5648_v18 = vpop.permute.xlu1 %5647  ;;  %v5730_v37 = vadd.f32 %v5712_v2, %v5672_v4  ;;  %v5676_v28 = vadd.f32 %v5657_v35, %v5618_v40  ;;  %v5962_v2 = vld [vmem:[%s15213_s5 + $0x88] sm:$0xff] }
 0x6ed   : > { %v5658_v44 = vsel %vm1605_vm8, %v15999_v62, %v5648_v18  ;;  %v5819_v9 = vmax.f32 %v14368_v54, 0.0  ;;  %v5659_v15 = vsel %vm1605_vm8, %v5648_v18, %v14302_v29  ;;  %v5718_v18 = vsel %vm4563_vm0, %v5708_v57, %v14255_v46  ;;  %v16007_v62 = vld [vmem:[#allocation45_spill] sm:$0xff] }
 0x6ee   : > { %v5677_v33 = vadd.f32 %v5658_v44, %v5619_v14  ;;  %v5678_v31 = vadd.f32 %v5659_v15, %v5620_v16  ;;  %v16008_v44 = vld [vmem:[#allocation41_spill] sm:$0xff]  ;;  %v5945_v15 = vld [vmem:[%s15213_s5] sm:$0xff]  ;;  %vm16009_vm8 = vcmask 523264  }
 0x6ef   : > { %v5946_v16 = vld [vmem:[%s15213_s5 + $0x8] sm:$0xff] }
 0x6f0   : > { %v5698_v0 = vpop.permute.xlu1 %5697 }
 0x6f1   : > { %v5714_v34 = vsel %vm4563_vm0, %v5698_v0, %v14238_v7  ;;  %v5615_v7 = vadd.f32 %v5597_v47, %v5557_v25  ;;  %v5713_v53 = vsel %vm4563_vm0, %v5696_v56, %v5698_v0  ;;  %v5737_v47 = vadd.f32 %v5718_v18, %v14335_v30  ;;  %v5965_v18 = vld [vmem:[%s15213_s5 + $0xa0] sm:$0xff] }
 0x6f2   : > { %v5732_v21 = vadd.f32 %v5714_v34, %v5674_v36  ;;  %v5768_v36 = vpop.permute.xlu0 %5767 }
 0x6f3   : > { %v5673_v55 = vadd.f32 %v5655_v48, %v5615_v7  ;;  %v5796_v14 = vadd.f32 %v5768_v36, %v5738_v63 }
 0x6f4   : > { %v5790_v13 = vadd.f32 %v5772_v6, %v5732_v21  ;;  %v5706_v41 = vpop.permute.xlu1 %5705 }
 0x6f5   : > { %v5716_v59 = vsel %vm4563_vm0, %v16004_v24, %v5706_v41  ;;  %v5731_v1 = vadd.f32 %v5713_v53, %v5673_v55  ;;  %v5717_v12 = vsel %vm4563_vm0, %v5706_v41, %v5708_v57  ;;  %v5715_v57 = vsel %vm4563_vm0, %v16007_v62, %v16004_v24  ;;  %v5993_v24 = vld [vmem:[%s15213_s5 + $0x180] sm:$0xff]  ;;  %v5978_v55 = vld [vmem:[%s15213_s5 + $0x108] sm:$0xff]  ;;  %vm16010_vm0 = vmmov %vm16009_vm8 }
 0x6f6   : > { %v14384_v25 = vadd.f32 %v15983_v11, %v5790_v13  ;;  %v5735_v45 = vadd.f32 %v5716_v59, %v5677_v33  ;;  %v5736_v0 = vadd.f32 %v5717_v12, %v5678_v31  ;;  %v5734_v22 = vadd.f32 %v5715_v57, %v5676_v28  ;;  %v5994_v59 = vld [vmem:[%s15213_s5 + $0x188] sm:$0xff]  ;;  %v5947_v12 = vld [vmem:[%s15213_s5 + $0x10] sm:$0xff]  ;;  %v5996_v31 = vld [vmem:[%s15213_s5 + $0x198] sm:$0xff] }
 0x6f7   : > { %v14440_v33 = vadd.f32 %v16008_v44, %v5796_v14  ;;  %v8991_v40 = vpack.c.bf16 %v5994_v59, %v5993_v24  ;;  %v5980_v28 = vld [vmem:[%s15213_s5 + $0x118] sm:$0xff]  ;;  %v5997_v62 = vld [vmem:[%s15213_s5 + $0x1a0] sm:$0xff]  ;;  %v5998_v57 = vld [vmem:[%s15213_s5 + $0x1a8] sm:$0xff] }
 0x6f8   : > { %v5822_v19 = vmax.f32 %v14384_v25, 0.0  ;;  %v5754_v39 = vpop.permute.xlu1 %5753  ;;  %v5793_v52 = vadd.f32 %v5774_v38, %v5735_v45  ;;  %v5961_v45 = vld [vmem:[%s15213_s5 + $0x80] sm:$0xff]  ;;  %v5984_v24 = vld [vmem:[%s15213_s5 + $0x138] sm:$0xff]  ;;  %vm16012_vm9 = vmmov %vm16010_vm0 }
 0x6f9   : > { %v5770_v8 = vsel %vm4622_vm4, %v15996_v17, %v5754_v39  ;;  %v5771_v56 = vsel %vm4622_vm4, %v5754_v39, %v5756_v10  ;;  %v5828_v58 = vmax.f32 %v14440_v33, 0.0  ;;  %v8959_v38 = vpack.c.bf16 %v5962_v2, %v5961_v45  ;;  %8992 = vmatprep.subr.bf16.mxu1 %v8991_v40  ;;  %v5964_v39 = vld [vmem:[%s15213_s5 + $0x98] sm:$0xff]  ;;  %v5970_v40 = vld [vmem:[%s15213_s5 + $0xc8] sm:$0xff]  ;;  %v6001_v45 = vld [vmem:[%s15213_s5 + $0x1c0] sm:$0xff] }
 0x6fa   : > { %v5788_v26 = vadd.f32 %v5770_v8, %v5730_v37  ;;  %v5789_v20 = vadd.f32 %v5771_v56, %v5731_v1  ;;  %v9294_v29 = vpack.i.bf16 %v5819_v9, %v5822_v19  ;;  %v14418_v34 = vadd.f32 %v16008_v44, %v5793_v52  ;;  %v5963_v37 = vld [vmem:[%s15213_s5 + $0x90] sm:$0xff]  ;;  %v5948_v8 = vld [vmem:[%s15213_s5 + $0x18] sm:$0xff]  ;;  %v6002_v2 = vld [vmem:[%s15213_s5 + $0x1c8] sm:$0xff] }
 0x6fb   : > { %v8961_v1 = vpack.c.bf16 %v5946_v16, %v5945_v15  ;;  %8960 = vmatprep.subr.bf16.mxu0 %v8959_v38  ;;  %v8963_v52 = vpack.c.bf16 %v5964_v39, %v5963_v37  ;;  %v5995_v56 = vld [vmem:[%s15213_s5 + $0x190] sm:$0xff]  ;;  %v9007_v38 = vpack.c.bf16 %v6002_v2, %v6001_v45  ;;  %v5985_v15 = vld [vmem:[%s15213_s5 + $0x140] sm:$0xff]  ;;  %v5986_v16 = vld [vmem:[%s15213_s5 + $0x148] sm:$0xff] }
 0x6fc   : > { %v14407_v17 = vadd.f32 %v15983_v11, %v5788_v26  ;;  %v14410_v10 = vadd.f32 %v15983_v11, %v5789_v20  ;;  %9295 = vrot.lane.b32.xlu1 %v9294_v29, %s15497_s24  ;;  %v5766_v50 = vpop.permute.xlu1 %5765  ;;  %v5825_v48 = vmax.f32 %v14418_v34, 0.0  ;;  %v8965_v26 = vpack.c.bf16 %v5948_v8, %v5947_v12  ;;  %v5979_v29 = vld [vmem:[%s15213_s5 + $0x110] sm:$0xff]  ;;  %v5953_v37 = vld [vmem:[%s15213_s5 + $0x40] sm:$0xff]  ;;  %v5954_v39 = vld [vmem:[%s15213_s5 + $0x48] sm:$0xff] }
 0x6fd   : > { %v5775_v46 = vsel %vm4622_vm4, %v5764_v42, %v5766_v50  ;;  %v5776_v49 = vsel %vm4622_vm4, %v5766_v50, %v5768_v36  ;;  %8962 = vmatpush3.bf16.msra.mxu0 %v8961_v1  ;;  %v8995_v20 = vpack.c.bf16 %v5996_v31, %v5995_v56  ;;  %v8997_v63 = vpack.c.bf16 %v5980_v28, %v5979_v29  ;;  %v5966_v36 = vld [vmem:[%s15213_s5 + $0xa8] sm:$0xff]  ;;  %v5971_v12 = vld [vmem:[%s15213_s5 + $0xd0] sm:$0xff]  ;;  %v6004_v56 = vld [vmem:[%s15213_s5 + $0x1d8] sm:$0xff] }
 0x6fe   : > { %v5820_v43 = vmax.f32 %v14407_v17, 0.0  ;;  %v5821_v11 = vmax.f32 %v14410_v10, 0.0  ;;  %v5794_v5 = vadd.f32 %v5775_v46, %v5736_v0  ;;  %v5795_v61 = vadd.f32 %v5776_v49, %v5737_v47  ;;  %8964 = vmatprep.subr.bf16.mxu0 %v8963_v52  ;;  %v5949_v0 = vld [vmem:[%s15213_s5 + $0x20] sm:$0xff]  ;;  %v5950_v47 = vld [vmem:[%s15213_s5 + $0x28] sm:$0xff]  ;;  %v5972_v52 = vld [vmem:[%s15213_s5 + $0xd8] sm:$0xff] }
 0x6ff   : > { %v8967_v50 = vpack.c.bf16 %v5966_v36, %v5965_v18  ;;  %v8999_v46 = vpack.c.bf16 %v5998_v57, %v5997_v62  ;;  %v5982_v49 = vld [vmem:[%s15213_s5 + $0x128] sm:$0xff]  ;;  %v8969_v14 = vpack.c.bf16 %v5950_v47, %v5949_v0  ;;  %v6003_v8 = vld [vmem:[%s15213_s5 + $0x1d0] sm:$0xff]  ;;  %v9009_v31 = vpack.c.bf16 %v5986_v16, %v5985_v15  ;;  %v5988_v28 = vld [vmem:[%s15213_s5 + $0x158] sm:$0xff] }
 0x700   : > { %v9289_v30 = vpack.i.bf16 %v5821_v11, %v5820_v43  ;;  %v14429_v21 = vadd.f32 %v16008_v44, %v5794_v5  ;;  %v5760_v27 = vpop.permute.xlu1 %5759  ;;  %v14435_v42 = vadd.f32 %v16008_v44, %v5795_v61  ;;  %v5967_v5 = vld [vmem:[%s15213_s5 + $0xb0] sm:$0xff]  ;;  %v5968_v61 = vld [vmem:[%s15213_s5 + $0xb8] sm:$0xff]  ;;  %v8979_v18 = vpack.c.bf16 %v5972_v52, %v5971_v12  ;;  %v5973_v0 = vld [vmem:[%s15213_s5 + $0xe0] sm:$0xff] }
 0x701   : > { %v5773_v6 = vsel %vm4622_vm4, %v5760_v27, %v16006_v60  ;;  %v8993_v60 = vpack.c.bf16 %v5978_v55, %v5977_v3  ;;  %8966 = vmatpush3.bf16.msra.mxu0 %v8965_v26  ;;  %v5952_v27 = vld [vmem:[%s15213_s5 + $0x38] sm:$0xff]  ;;  %v5969_v3 = vld [vmem:[%s15213_s5 + $0xc0] sm:$0xff]  ;;  %v8977_v26 = vpack.c.bf16 %v5954_v39, %v5953_v37  ;;  %v5987_v29 = vld [vmem:[%s15213_s5 + $0x150] sm:$0xff] }
 0x702   : > { %v5826_v7 = vmax.f32 %v14429_v21, 0.0  ;;  %v5792_v4 = vadd.f32 %v5773_v6, %v5734_v22  ;;  %9290 = vrot.lane.b32.xlu0 %v9289_v30, %s15497_s24  ;;  %v5827_v51 = vmax.f32 %v14435_v42, 0.0  ;;  %v5951_v22 = vld [vmem:[%s15213_s5 + $0x30] sm:$0xff]  ;;  %8968 = vmatprep.subr.bf16.mxu0 %v8967_v50  ;;  %v8975_v1 = vpack.c.bf16 %v5970_v40, %v5969_v3  ;;  %v5956_v36 = vld [vmem:[%s15213_s5 + $0x58] sm:$0xff]  ;;  %v5974_v47 = vld [vmem:[%s15213_s5 + $0xe8] sm:$0xff] }
 0x703   : > { %8994 = vmatpush3.bf16.msra.mxu1 %v8993_v60  ;;  %v5999_v6 = vld [vmem:[%s15213_s5 + $0x1b0] sm:$0xff]  ;;  %v8973_v60 = vpack.c.bf16 %v5952_v27, %v5951_v22  ;;  %v9013_v50 = vpack.c.bf16 %v5988_v28, %v5987_v29  ;;  %v8983_v57 = vpack.c.bf16 %v5974_v47, %v5973_v0  ;;  %v5990_v22 = vld [vmem:[%s15213_s5 + $0x168] sm:$0xff]  ;;  %v6008_v45 = vld [vmem:[%s15213_s5 + $0x1f8] sm:$0xff] }
 0x704   : > { %v9299_v13 = vpack.i.bf16 %v5826_v7, %v5825_v48  ;;  %v14447_v41 = vadd.f32 %v16008_v44, %v5792_v4  ;;  %8996 = vmatprep.subr.bf16.mxu1 %v8995_v20  ;;  %v5981_v44 = vld [vmem:[%s15213_s5 + $0x120] sm:$0xff]  ;;  %v8971_v4 = vpack.c.bf16 %v5968_v61, %v5967_v5  ;;  %v9011_v20 = vpack.c.bf16 %v6004_v56, %v6003_v8  ;;  %v6006_v61 = vld [vmem:[%s15213_s5 + $0x1e8] sm:$0xff]  ;;  %v5992_v15 = vld [vmem:[%s15213_s5 + $0x178] sm:$0xff] }
 0x705   : > { %v9001_v30 = vpack.c.bf16 %v5982_v49, %v5981_v44  ;;  %8970 = vmatpush3.bf16.msra.mxu0 %v8969_v14  ;;  %v5957_v44 = vld [vmem:[%s15213_s5 + $0x60] sm:$0xff]  ;;  %vm16011_vm4 = vmmov %vm16010_vm0 }
 0x706   : > { %v5824_v35 = vmax.f32 %v14447_v41, 0.0  ;;  %9300 = vrot.lane.b32.xlu1 %v9299_v13, %s15497_s24  ;;  %v6000_v13 = vld [vmem:[%s15213_s5 + $0x1b8] sm:$0xff]  ;;  %8972 = vmatprep.subr.bf16.mxu0 %v8971_v4  ;;  %v6005_v5 = vld [vmem:[%s15213_s5 + $0x1e0] sm:$0xff]  ;;  %v5975_v4 = vld [vmem:[%s15213_s5 + $0xf0] sm:$0xff] }
 0x707   : > { %8998 = vmatpush3.bf16.msra.mxu1 %v8997_v63  ;;  %v9003_v59 = vpack.c.bf16 %v6000_v13, %v5999_v6  ;;  %v5955_v63 = vld [vmem:[%s15213_s5 + $0x50] sm:$0xff]  ;;  %v9015_v14 = vpack.c.bf16 %v6006_v61, %v6005_v5  ;;  %v5976_v13 = vld [vmem:[%s15213_s5 + $0xf8] sm:$0xff]  ;;  %vm16013_vm1 = vmmov %vm16010_vm0 }
 0x708   : > { %v9304_v53 = vpack.i.bf16 %v5824_v35, %v5827_v51  ;;  %9000 = vmatprep.subr.bf16.mxu1 %v8999_v46  ;;  %v8981_v62 = vpack.c.bf16 %v5956_v36, %v5955_v63  ;;  %v5958_v46 = vld [vmem:[%s15213_s5 + $0x68] sm:$0xff]  ;;  %v6009_v63 = vld [vmem:[%s15213_s5 + $0x200] sm:$0xff]  ;;  %vm16014_vm2 = vmmov %vm16010_vm0 }
 0x709   : > { %8974 = vmatpush3.bf16.msra.mxu0 %v8973_v60  ;;  %v8985_v49 = vpack.c.bf16 %v5958_v46, %v5957_v44  ;;  %v6010_v36 = vld [vmem:[%s15213_s5 + $0x208] sm:$0xff]  ;;  %vm16015_vm10 = vmmov %vm16010_vm0 }
 0x70a   : > { %5857 = vrot.lane.b32.xlu1 %v5828_v58, %s15497_s24  ;;  %9305 = vrot.lane.b32.xlu0 %v9304_v53, %s15497_s24  ;;  %v5983_v53 = vld [vmem:[%s15213_s5 + $0x130] sm:$0xff]  ;;  %v9023_v0 = vpack.c.bf16 %v6010_v36, %v6009_v63  ;;  %vm16016_vm11 = vmmov %vm16010_vm0  ;;  %s405_s24 = scalar_lea.vmem [#allocation2], %s404_s20 }
 0x70b   : > { %9002 = vmatpush3.bf16.msra.mxu1 %v9001_v30  ;;  %v9005_v55 = vpack.c.bf16 %v5984_v24, %v5983_v53  ;;  %8976 = vmatprep.subr.bf16.mxu0 %v8975_v1  ;;  %v5989_v30 = vld [vmem:[%s15213_s5 + $0x160] sm:$0xff]  ;;  %v8987_v53 = vpack.c.bf16 %v5976_v13, %v5975_v4  ;;  %v5959_v24 = vld [vmem:[%s15213_s5 + $0x70] sm:$0xff]  ;;  %s7893_s13 = sshll.u32 %s405_s24, 4  ;;  %s15168_s13 = int_to_ptr.vmem [resolvable:$true] %s7893_s13 }
 0x70c   : > { %9004 = vmatprep.subr.bf16.mxu1 %v9003_v59  ;;  %v9017_v6 = vpack.c.bf16 %v5990_v22, %v5989_v30  ;;  %v5960_v59 = vld [vmem:[%s15213_s5 + $0x78] sm:$0xff]  ;;  %s9364_s2 = scalar_lea.vmem %s15168_s13, 16  ;;  %p9371_p0 = scmp.lt.s32.totalorder %s15168_s13, %s9369_s14 }
 0x70d   : > { %8978 = vmatpush3.bf16.msra.mxu0 %v8977_v26  ;;  %v8989_v40 = vpack.c.bf16 %v5960_v59, %v5959_v24  ;;  %p9365_p11 = scmp.ne.s32.totalorder %s15168_s13, %s9364_s2  ;;  %p9372_p1 = scmp.lt.s32.totalorder %s9370_s29, %s9364_s2 }
 0x70e   : > { %8980 = vmatprep.subr.bf16.mxu0 %v8979_v18 }
 0x70f   : > { %9006 = vmatpush3.bf16.msra.mxu1 %v9005_v55  ;;  %v6007_v55 = vld [vmem:[%s15213_s5 + $0x1f0] sm:$0xff]  ;;  %p9366_p12 = pnand %p9365_p11, %p9560_p5  ;;  %p9373_p2 = por %p9372_p1, %p9371_p0 }
 0x710   : > { %9008 = vmatprep.subr.bf16.mxu1 %v9007_v38  ;;  %v9019_v60 = vpack.c.bf16 %v6008_v45, %v6007_v55  ;;  %v5991_v38 = vld [vmem:[%s15213_s5 + $0x170] sm:$0xff] }
 0x711   : > { %8982 = vmatpush3.bf16.msra.mxu0 %v8981_v62  ;;  %v9021_v16 = vpack.c.bf16 %v5992_v15, %v5991_v38  ;;  %p9367_p13 = pneg %p9366_p12 }
 0x712   : > { %8984 = vmatprep.subr.bf16.mxu0 %v8983_v57 }
 0x713   : > { %9010 = vmatpush3.bf16.msra.mxu1 %v9009_v31  ;;  %p9374_p3 = pnand %p9373_p2, %p9367_p13 }
 0x714   : > { %9012 = vmatprep.subr.bf16.mxu1 %v9011_v20 }
 0x715   : > { %8986 = vmatpush3.bf16.msra.mxu0 %v8985_v49 }
 0x716   : > { %8988 = vmatprep.subr.bf16.mxu0 %v8987_v53 }
 0x717   : > { %9014 = vmatpush3.bf16.msra.mxu1 %v9013_v50 }
 0x718   : > { %9016 = vmatprep.subr.bf16.mxu1 %v9015_v14 }
 0x719   : > { %8990 = vmatpush3.bf16.msra.mxu0 %v8989_v40 }
 0x71a   : > { %9024 = vmatprep.subr.bf16.mxu0 %v9023_v0 }
 0x71b   : > { %9018 = vmatpush3.bf16.msra.mxu1 %v9017_v6  ;;  %v6011_v6 = vld [vmem:[%s15213_s5 + $0x210] sm:$0x3] }
 0x71c   : > { %9020 = vmatprep.subr.bf16.mxu1 %v9019_v60 }
 0x71f   : > { %9022 = vmatpush3.bf16.msra.mxu1 %v9021_v16 }
 0x752   : > { %v5848_v3 = vpop.permute.xlu0 %5847 }
 0x753   : > { %v5881_v47 = vmax.f32 %v5823_v23, %v5848_v3 }
 0x76e   : > { %v9296_v27 = vpop.permute.xlu1 %9295 }
 0x76f   : > { %v9297_v2 = vunpack.i.l.bf16 %v9296_v27  ;;  %v9298_v37 = vunpack.i.h.bf16 %v9296_v27 }
 0x771   : > { %v5862_v39 = vsel %vm16009_vm8, %v9297_v2, %v5848_v3  ;;  %vm6381_vm8 = vcmask 1046528  }
 0x772   : > { %v5880_v26 = vmax.f32 %v5822_v19, %v5862_v39 }
 0x774   : > { %v9291_v1 = vpop.permute.xlu0 %9290 }
 0x775   : > { %v9293_v12 = vunpack.i.h.bf16 %v9291_v1  ;;  %v9292_v52 = vunpack.i.l.bf16 %v9291_v1 }
 0x777   : > { %v5859_v8 = vsel %vm16010_vm0, %v9298_v37, %v9292_v52  ;;  %v5860_v56 = vsel %vm16011_vm4, %v9292_v52, %v9293_v12  ;;  %v5861_v31 = vsel %vm16012_vm9, %v9293_v12, %v9297_v2  ;;  %v16019_v12 = vmov 0.0   ;;  %v6247_v52 = vld [vmem:[%s15214_s6] sm:$0xff] }
 0x778   : > { %v5877_v20 = vmax.f32 %v5819_v9, %v5859_v8  ;;  %v5878_v29 = vmax.f32 %v5820_v43, %v5860_v56  ;;  %v5879_v28 = vmax.f32 %v5821_v11, %v5861_v31  ;;  %v9301_v18 = vpop.permute.xlu1 %9300  ;;  %v6248_v8 = vld [vmem:[%s15214_s6 + $0x8] sm:$0xff]  ;;  %v9454_v31 = vmov 0.0|0.0  }
 0x779   : > { %v9303_v25 = vunpack.i.h.bf16 %v9301_v18  ;;  %v9302_v19 = vunpack.i.l.bf16 %v9301_v18  ;;  %v9028_v56 = vpack.c.bf16 %v6248_v8, %v6247_v52  ;;  %9139 = vmatprep.subr.bf16.mxu1 %v9454_v31  ;;  %vm6298_vm0 = vcmask 203776  }
 0x77a   : > { %v9314_v54 = vpack.i.bf16 %v5880_v26, %v5877_v20  ;;  %v9309_v9 = vpack.i.bf16 %v5879_v28, %v5878_v29  ;;  %vm6560_vm4 = vcmask 1044480   ;;  %vm16023_vm9 = vcmask 1043456  }
 0x77b   : > { %v5864_v10 = vsel %vm16013_vm1, %v9302_v19, %v9303_v25  ;;  %vm16024_vm1 = vmmov %vm16023_vm9 }
 0x77c   : > { %v9306_v17 = vpop.permute.xlu0 %9305  ;;  %9315 = vrot.lane.b32.xlu1 %v9314_v54, %s15467_s28  ;;  %9310 = vrot.lane.b32.xlu0 %v9309_v9, %s15467_s28  ;;  %v5883_v57 = vmax.f32 %v5825_v48, %v5864_v10  ;;  %v5858_v49 = vpop.permute.xlu1 %5857  ;;  %v6252_v54 = vld [vmem:[%s15214_s6 + $0x28] sm:$0xff] }
 0x77d   : > { %v9308_v43 = vunpack.i.h.bf16 %v9306_v17  ;;  %v9307_v11 = vunpack.i.l.bf16 %v9306_v17  ;;  %v5886_v34 = vmax.f32 %v5828_v58, %v5858_v49 }
 0x77f   : > { %v5863_v50 = vsel %vm16014_vm2, %v9308_v43, %v9302_v19  ;;  %v5865_v62 = vsel %vm16015_vm10, %v9303_v25, %v9307_v11  ;;  %v5866_v32 = vsel %vm16016_vm11, %v9307_v11, %v5858_v49  ;;  %v6385_v11 = vrot.slane %v6252_v54, 1  ;;  %vm16025_vm2 = vmmov %vm16024_vm1 }
 0x780   : > { %v5884_v44 = vmax.f32 %v5826_v7, %v5865_v62  ;;  %5905 = vrot.lane.b32.xlu0 %v5881_v47, %s15467_s28  ;;  %v5882_v46 = vmax.f32 %v5824_v35, %v5863_v50  ;;  %v5885_v23 = vmax.f32 %v5827_v51, %v5866_v32  ;;  %v7703_v62 = vld [vmem:[%s15216_s8] sm:$0xff]  ;;  %v7706_v32 = vld [vmem:[%s15216_s8 + $0x18] sm:$0xff]  ;;  %vm16026_vm10 = vcmask 1042432  }
 0x781   : > { %vm16027_vm11 = vmmov %vm16026_vm10 }
 0x782   : > { %v9319_v5 = vpack.i.bf16 %v5884_v44, %v5883_v57 }
 0x784   : > { %9320 = vrot.lane.b32.xlu1 %v9319_v5, %s15467_s28  ;;  %5907 = vrot.lane.b32.xlu0 %v5882_v46, %s15467_s28 }
 0x788   : > { %5915 = vrot.lane.b32.xlu1 %v5886_v34, %s15467_s28  ;;  %5913 = vrot.lane.b32.xlu0 %v5885_v23, %s15467_s28 }
 0x7ee   : > { %v9316_v21 = vpop.permute.xlu1 %9315  ;;  %v9311_v48 = vpop.permute.xlu0 %9310 }
 0x7ef   : > { %v9318_v7 = vunpack.i.h.bf16 %v9316_v21  ;;  %v9317_v41 = vunpack.i.l.bf16 %v9316_v21  ;;  %v9313_v35 = vunpack.i.h.bf16 %v9311_v48  ;;  %v9312_v61 = vunpack.i.l.bf16 %v9311_v48 }
 0x7f1   : > { %v5917_v14 = vsel %vm1513_vm6, %v9317_v41, %v9312_v61  ;;  %v5918_v30 = vsel %vm1513_vm6, %v9312_v61, %v9313_v35  ;;  %v5919_v42 = vsel %vm1513_vm6, %v9313_v35, %v9318_v7  ;;  %v6254_v41 = vld [vmem:[%s15214_s6 + $0x38] sm:$0xff]  ;;  %v6255_v35 = vld [vmem:[%s15214_s6 + $0x40] sm:$0xff] }
 0x7f2   : > { %v5935_v51 = vmax.f32 %v5877_v20, %v5917_v14  ;;  %v5906_v22 = vpop.permute.xlu0 %5905  ;;  %v5936_v33 = vmax.f32 %v5878_v29, %v5918_v30  ;;  %v5937_v4 = vmax.f32 %v5879_v28, %v5919_v42  ;;  %v6250_v20 = vld [vmem:[%s15214_s6 + $0x18] sm:$0xff]  ;;  %v7707_v42 = vld [vmem:[%s15216_s8 + $0x20] sm:$0xff] }
 0x7f3   : > { %v5920_v58 = vsel %vm1513_vm6, %v9318_v7, %v5906_v22  ;;  %v5939_v16 = vmax.f32 %v5881_v47, %v5906_v22  ;;  %v6382_v10 = vrot.slane %v6250_v20, 1  ;;  %v6253_v47 = vld [vmem:[%s15214_s6 + $0x30] sm:$0xff]  ;;  %v6297_v28 = vld [vmem:[%s15215_s7] sm:$0x1] }
 0x7f4   : > { %v5938_v27 = vmax.f32 %v5880_v26, %v5920_v58  ;;  %6086 = vmatprep.mubr.f32.mxu0 %v5936_v33  ;;  %v6249_v26 = vld [vmem:[%s15214_s6 + $0x10] sm:$0xff]  ;;  %v6387_v49 = vrot.slane %v6253_v47, 1 }
 0x7f5   : > { %6087 = vmatmul.mubr.f32.vlgmr.msra.gmra.mrb[252].mxu0 %v5935_v51  ;;  %v9031_v29 = vpack.c.bf16 %v6250_v20, %v6249_v26  ;;  %v7708_v51 = vld [vmem:[%s15216_s8 + $0x28] sm:$0xff] }
 0x7f6   : > { %v9321_v13 = vpop.permute.xlu1 %9320  ;;  %6161 = vmatprep.mubr.f32.mxu1 %v5938_v27  ;;  %v5908_v53 = vpop.permute.xlu0 %5907  ;;  %9026 = vmatpush3.bf16.msra.mxu0 %v9023_v0  ;;  %v6251_v0 = vld [vmem:[%s15214_s6 + $0x20] sm:$0xff]  ;;  %v6388_v58 = vsel %vm6381_vm8, %v6385_v11, %v6387_v49  ;;  %v6471_v27 = vrot.slane %v6253_v47, 2  ;;  %v7716_v47 = vld [vmem:[%s15216_s8 + $0x68] sm:$0xff] }
 0x7f7   : > { %v9323_v24 = vunpack.i.h.bf16 %v9321_v13  ;;  %v9322_v59 = vunpack.i.l.bf16 %v9321_v13  ;;  %6162 = vmatmul.mubr.f32.vlgmr.msra.gmra.mrb[32].mxu1 %v5937_v4  ;;  %8708 = vmatprep.subr.msk.mxu0 %vm16017_vm5, %v6011_v6  ;;  %v6383_v43 = vrot.slane %v6251_v0, 1  ;;  %v6472_v13 = vrot.slane %v6254_v41, 2  ;;  %v6264_v41 = vld [vmem:[%s15214_s6 + $0x88] sm:$0xff]  ;;  %vm16028_vm5 = vmmov %vm16026_vm10 }
 0x7f9   : > { %v5921_v3 = vsel %vm1513_vm6, %v5908_v53, %v9322_v59  ;;  %v5922_v40 = vsel %vm1513_vm6, %v9322_v59, %v9323_v24  ;;  %v6384_v21 = vsel %vm6381_vm8, %v6382_v10, %v6383_v43  ;;  %v6386_v48 = vsel %vm6381_vm8, %v6383_v43, %v6385_v11  ;;  %v6261_v10 = vld [vmem:[%s15214_s6 + $0x70] sm:$0xff]  ;;  %v7715_v11 = vld [vmem:[%s15216_s8 + $0x60] sm:$0xff] }
 0x7fa   : > { %v5940_v55 = vmax.f32 %v5882_v46, %v5921_v3  ;;  %v5916_v45 = vpop.permute.xlu1 %5915  ;;  %v5914_v2 = vpop.permute.xlu0 %5913  ;;  %v5941_v60 = vmax.f32 %v5883_v57, %v5922_v40  ;;  %8709 = vmatpush3.msk.msra.mxu0 %vm16018_vm7, %v6011_v6  ;;  %v7704_v57 = vld [vmem:[%s15216_s8 + $0x8] sm:$0xff]  ;;  %v9035_v33 = vpack.c.bf16 %v6386_v48, %v6384_v21  ;;  %v6474_v53 = vrot.slane %v6255_v35, 2  ;;  %v7709_v40 = vld [vmem:[%s15216_s8 + $0x30] sm:$0xff] }
 0x7fb   : > { %v5923_v38 = vsel %vm1513_vm6, %v9323_v24, %v5914_v2  ;;  %v5924_v15 = vsel %vm1513_vm6, %v5914_v2, %v5916_v45  ;;  %v5944_v39 = vmax.f32 %v5886_v34, %v5916_v45  ;;  %9027 = vmatprep.subr.bf16.mxu0 %v9454_v31  ;;  %vm6302_vm6 = vcmask 1040384   ;;  %v6256_v24 = vld [vmem:[%s15214_s6 + $0x48] sm:$0xff] }
 0x7fc   : > { %v5942_v1 = vmax.f32 %v5884_v44, %v5923_v38  ;;  %v5943_v37 = vmax.f32 %v5885_v23, %v5924_v15  ;;  %6091 = vmatprep.mubr.f32.mxu0 %v5941_v60  ;;  %vm14727_vm3 = vmpackc.low %vm6302_vm6, %vm9455_vm12  ;;  %v7705_v44 = vld [vmem:[%s15216_s8 + $0x10] sm:$0xff]  ;;  %v9140_v5 = vpack.c.bf16 %v7704_v57, %v7703_v62  ;;  %v9146_v59 = vpack.c.bf16 %v7708_v51, %v7707_v42 }
 0x7fd   : > { %6092 = vmatmul.mubr.f32.gmra.mrb[254].mxu0 %v5940_v55  ;;  %v9143_v61 = vpack.c.bf16 %v7706_v32, %v7705_v44  ;;  %v7710_v55 = vld [vmem:[%s15216_s8 + $0x38] sm:$0xff]  ;;  %v9038_v45 = vpack.c.bf16 %v6387_v49, %v6388_v58  ;;  %v6476_v2 = vrot.slane %v6256_v24, 2  ;;  %v6473_v60 = vsel %vm3055_vm13, %v6471_v27, %v6472_v13  ;;  %v6257_v15 = vld [vmem:[%s15214_s6 + $0x50] sm:$0xff]  ;;  %vm16030_vm12 = vmmov %vm16018_vm7 }
 0x7fe   : > { %6166 = vmatprep.mubr.f32.mxu1 %v5943_v37  ;;  %8710 = vmatprep.mubr.msk.f32.mxu0 %vm6012_vm15, %v5939_v16  ;;  %v6475_v38 = vsel %vm3055_vm13, %v6472_v13, %v6474_v53  ;;  %v6258_v16 = vld [vmem:[%s15214_s6 + $0x58] sm:$0xff]  ;;  %v7711_v37 = vld [vmem:[%s15216_s8 + $0x40] sm:$0xff]  ;;  %v6561_v26 = vrot.slane %v6256_v24, 3  ;;  %v6562_v20 = vrot.slane %v6257_v15, 3  ;;  %v6653_v49 = vrot.slane %v6261_v10, 4  ;;  %v6272_v10 = vld [vmem:[%s15214_s6 + $0xc8] sm:$0xff] }
 0x7ff   : > { %6167 = vmatmul.mubr.f32.gmra.mrb[34].mxu1 %v5942_v1  ;;  %v9149_v1 = vpack.c.bf16 %v7710_v55, %v7709_v40  ;;  %v9042_v52 = vpack.c.bf16 %v6475_v38, %v6473_v60  ;;  %v6477_v8 = vsel %vm3055_vm13, %v6474_v53, %v6476_v2  ;;  %v9158_v32 = vpack.c.bf16 %v7716_v47, %v7715_v11  ;;  %v6266_v13 = vld [vmem:[%s15214_s6 + $0x98] sm:$0xff]  ;;  %v6267_v53 = vld [vmem:[%s15214_s6 + $0xa0] sm:$0xff]  ;;  %v6268_v60 = vld [vmem:[%s15214_s6 + $0xa8] sm:$0xff] }
 0x800   : > { %8921 = vmatprep.mubr.msk.f32.mxu1 %vm16020_vm14, %v16019_v12  ;;  %9141 = vmatpush3.bf16.msra.mxu1 %v9140_v5  ;;  %v6563_v54 = vsel %vm6560_vm4, %v6561_v26, %v6562_v20  ;;  %v6262_v5 = vld [vmem:[%s15214_s6 + $0x78] sm:$0xff]  ;;  %v6742_v51 = vrot.slane %v6264_v41, 5  ;;  %v6833_v15 = vrot.slane %v6268_v60, 6  ;;  %v6917_v26 = vrot.slane %v6268_v60, 7  ;;  %v6275_v11 = vld [vmem:[%s15214_s6 + $0xe0] sm:$0xff]  ;;  %v6276_v47 = vld [vmem:[%s15214_s6 + $0xe8] sm:$0xff] }
 0x801   : > { %8711 = vmatmul.mubr.msk.f32.vlgmr.msra.gmra.mrb[0].mxu0 %vm6012_vm15, %v5944_v39  ;;  %9142 = vmatprep.subr.bf16.mxu1 %v9454_v31  ;;  %v7712_v39 = vld [vmem:[%s15216_s8 + $0x48] sm:$0xff]  ;;  %vm16029_vm15 = vmmov %vm16018_vm7 }
 0x802   : > { %8721 = vmatprep.mubr.msk.f32.mxu0 %vm16020_vm14, %v16019_v12  ;;  %9029 = vmatpush3.bf16.msra.mxu0 %v9028_v56 }
 0x803   : > { %9030 = vmatprep.subr.bf16.mxu0 %v9454_v31 }
 0x804   : > { %9144 = vmatpush3.bf16.msra.mxu1 %v9143_v61 }
 0x805   : > { %9145 = vmatprep.subr.bf16.mxu1 %v9454_v31 }
 0x806   : > { %9033 = vmatpush3.bf16.msk.msra.mxu0 %vm14727_vm3, %v9031_v29  ;;  %v6564_v29 = vrot.slane %v6258_v16, 3 }
 0x807   : > { %9034 = vmatprep.subr.bf16.mxu0 %v9454_v31 }
 0x808   : > { %9147 = vmatpush3.bf16.msra.mxu1 %v9146_v59 }
 0x809   : > { %9148 = vmatprep.subr.bf16.mxu1 %v9454_v31 }
 0x80c   : > { %9150 = vmatpush3.bf16.msra.mxu1 %v9149_v1 }
 0x80d   : > { %9151 = vmatprep.subr.bf16.mxu1 %v9454_v31 }
 0x8c8   : > { %v8405_v18 = vpop.f32.mrb[252].mxu0 }
 0x8c9   : > { %v8406_v63 = vpop.f32.mrb[253].mxu0 }
 0x8ca   : > { %v8407_v36 = vadd.f32 %v8406_v63, %v8405_v18  ;;  %v8443_v25 = vpop.f32.mrb[32].mxu1  ;;  %v6259_v18 = vld [vmem:[%s15214_s6 + $0x60] sm:$0xff]  ;;  %v9152_v63 = vpack.c.bf16 %v7712_v39, %v7711_v37  ;;  %v6269_v37 = vld [vmem:[%s15214_s6 + $0xb0] sm:$0xff]  ;;  %v6270_v39 = vld [vmem:[%s15214_s6 + $0xb8] sm:$0xff] }
 0x8cb   : > { %v8444_v19 = vpop.f32.mrb[33].mxu1  ;;  %v6566_v0 = vrot.slane %v6259_v18, 3  ;;  %v6650_v44 = vrot.slane %v6259_v18, 4  ;;  %v6271_v18 = vld [vmem:[%s15214_s6 + $0xc0] sm:$0xff] }
 0x8cc   : > { %v8445_v9 = vadd.f32 %v8444_v19, %v8443_v25  ;;  %v7714_v25 = vld [vmem:[%s15216_s8 + $0x58] sm:$0xff]  ;;  %v9045_v19 = vpack.c.bf16 %v6476_v2, %v6477_v8  ;;  %9153 = vmatpush3.bf16.msra.mxu1 %v9152_v63  ;;  %v6831_v2 = vrot.slane %v6267_v53, 6 }
 0x8cd   : > { %9154 = vmatprep.subr.bf16.mxu1 %v9454_v31  ;;  %v6567_v62 = vsel %vm6560_vm4, %v6564_v29, %v6566_v0 }
 0x8ce   : > { %v6164_v17 = vadd.f32 %v8445_v9, %v8407_v36  ;;  %v7713_v36 = vld [vmem:[%s15216_s8 + $0x50] sm:$0xff]  ;;  %v6565_v9 = vsel %vm6560_vm4, %v6562_v20, %v6564_v29  ;;  %v6834_v8 = vsel %vm16030_vm12, %v6831_v2, %v6833_v15  ;;  %v6918_v20 = vrot.slane %v6269_v37, 7 }
 0x8cf   : > { %v9155_v43 = vpack.c.bf16 %v7714_v25, %v7713_v36  ;;  %v6920_v29 = vrot.slane %v6270_v39, 7  ;;  %v9073_v63 = vpack.c.bf16 %v6833_v15, %v6834_v8 }
 0x8d0   : > { %v8408_v50 = vpop.f32.mrb[254].mxu0  ;;  %v6919_v36 = vsel %vm6302_vm6, %v6917_v26, %v6918_v20 }
 0x8d1   : > { %v8409_v46 = vpop.f32.mrb[255].mxu0  ;;  %9156 = vmatpush3.bf16.msra.mxu1 %v9155_v43  ;;  %v6921_v25 = vsel %vm6302_vm6, %v6918_v20, %v6920_v29  ;;  %v6273_v43 = vld [vmem:[%s15214_s6 + $0xd0] sm:$0xff]  ;;  %v6287_v20 = vld [vmem:[%s15214_s6 + $0x140] sm:$0xff] }
 0x8d2   : > { %v8410_v23 = vadd.f32 %v8409_v46, %v8408_v50  ;;  %v8446_v34 = vpop.f32.mrb[34].mxu1  ;;  %v9049_v50 = vpack.c.bf16 %v6565_v9, %v6563_v54  ;;  %9157 = vmatprep.subr.bf16.mxu1 %v9454_v31 }
 0x8d3   : > { %v8447_v7 = vpop.f32.mrb[35].mxu1 }
 0x8d4   : > { %v8448_v14 = vadd.f32 %v8447_v7, %v8446_v34  ;;  %v8712_v30 = vpop.f32.mrb[0].mxu0  ;;  %v6655_v34 = vrot.slane %v6262_v5, 4  ;;  %v6263_v7 = vld [vmem:[%s15214_s6 + $0x80] sm:$0xff] }
 0x8d5   : > { %v6238_v22 = vpop.f32.mrb[1].mxu0  ;;  %9159 = vmatpush3.bf16.msra.mxu1 %v9158_v32  ;;  %v6740_v42 = vrot.slane %v6263_v7, 5  ;;  %v6278_v32 = vld [vmem:[%s15214_s6 + $0xf8] sm:$0xff]  ;;  %v6280_v7 = vld [vmem:[%s15214_s6 + $0x108] sm:$0xff] }
 0x8d6   : > { %v6169_v6 = vadd.f32 %v8448_v14, %v8410_v23  ;;  %v14771_v4 = vadd.f32 %v6238_v22, %v6164_v17  ;;  %v6260_v17 = vld [vmem:[%s15214_s6 + $0x68] sm:$0xff]  ;;  %v9052_v23 = vpack.c.bf16 %v6566_v0, %v6567_v62  ;;  %9160 = vmatprep.subr.bf16.mxu1 %v9454_v31  ;;  %v6656_v61 = vsel %vm16025_vm2, %v6653_v49, %v6655_v34  ;;  %v6265_v22 = vld [vmem:[%s15214_s6 + $0x90] sm:$0xff] }
 0x8d7   : > { %v6651_v46 = vrot.slane %v6260_v17, 4  ;;  %v6744_v58 = vrot.slane %v6265_v22, 5  ;;  %v6828_v55 = vrot.slane %v6265_v22, 6  ;;  %v9077_v0 = vpack.c.bf16 %v6921_v25, %v6919_v36  ;;  %v6288_v25 = vld [vmem:[%s15214_s6 + $0x148] sm:$0xff] }
 0x8d8   : > { %v14776_v3 = vadd.f32 %v8712_v30, %v6169_v6  ;;  %8722 = vmatmul.mubr.msk.f32.vlgmr.msra.gmra.mrb[2].mxu0 %vm6298_vm0, %v14771_v4  ;;  %v6377_v56 = vrot.slane %v14771_v4, 1  ;;  %v6467_v57 = vrot.slane %v14771_v4, 2  ;;  %v6556_v14 = vrot.slane %v14771_v4, 3 }
 0x8d9   : > { %9036 = vmatpush3.bf16.msra.mxu0 %v9035_v33  ;;  %8732 = vmatprep.mubr.msk.f32.mxu0 %vm16020_vm14, %v16019_v12  ;;  %v6652_v21 = vsel %vm16023_vm9, %v6650_v44, %v6651_v46  ;;  %v6654_v48 = vsel %vm16024_vm1, %v6651_v46, %v6653_v49  ;;  %v6739_v30 = vrot.slane %v6262_v5, 5  ;;  %v9059_v33 = vpack.c.bf16 %v6655_v34, %v6656_v61  ;;  %v6274_v44 = vld [vmem:[%s15214_s6 + $0xd8] sm:$0xff]  ;;  %vm16034_vm9 = vmmov %vm16028_vm5 }
 0x8da   : > { %9037 = vmatprep.subr.bf16.mxu0 %v9454_v31  ;;  %v9056_v35 = vpack.c.bf16 %v6654_v48, %v6652_v21  ;;  %v6743_v6 = vsel %vm16027_vm11, %v6740_v42, %v6742_v51  ;;  %v6745_v59 = vsel %vm16028_vm5, %v6742_v51, %v6744_v58  ;;  %v6646_v40 = vrot.slane %v14771_v4, 4  ;;  %v6279_v48 = vld [vmem:[%s15214_s6 + $0x100] sm:$0xff]  ;;  %vm16038_vm11 = vmmov %vm16018_vm7 }
 0x8db   : > { %v6741_v27 = vsel %vm16026_vm10, %v6739_v30, %v6740_v42  ;;  %v9066_v38 = vpack.c.bf16 %v6744_v58, %v6745_v59  ;;  %v6824_v54 = vrot.slane %v14771_v4, 6  ;;  %v9084_v62 = vpack.c.bf16 %v6273_v43, %v6272_v10  ;;  %v6281_v42 = vld [vmem:[%s15214_s6 + $0x110] sm:$0xff]  ;;  %vm16037_vm10 = vmmov %vm16018_vm7 }
 0x8dc   : > { %v9063_v24 = vpack.c.bf16 %v6743_v6, %v6741_v27  ;;  %v7083_v46 = vrot.slane %v6275_v11, 1  ;;  %v7084_v49 = vrot.slane %v6276_v47, 1  ;;  %v7088_v21 = vrot.slane %v6278_v32, 1  ;;  %v6282_v27 = vld [vmem:[%s15214_s6 + $0x118] sm:$0xff]  ;;  %v6283_v6 = vld [vmem:[%s15214_s6 + $0x120] sm:$0xff] }
 0x8dd   : > { %9040 = vmatpush3.bf16.msk.msra.mxu0 %vm14727_vm3, %v9038_v45  ;;  %v6829_v45 = vrot.slane %v6266_v13, 6  ;;  %v7172_v61 = vrot.slane %v6278_v32, 2  ;;  %v7175_v30 = vrot.slane %v6280_v7, 2  ;;  %v7177_v22 = vrot.slane %v6281_v42, 2 }
 0x8de   : > { %9041 = vmatprep.subr.bf16.mxu0 %v9454_v31  ;;  %v7261_v59 = vrot.slane %v6281_v42, 3  ;;  %v7440_v10 = vrot.slane %v6288_v25, 5  ;;  %v7346_v32 = vrot.slane %v14776_v3, 4 }
 0x8df   : > { %v6830_v16 = vsel %vm16018_vm7, %v6828_v55, %v6829_v45  ;;  %v6832_v1 = vsel %vm16029_vm15, %v6829_v45, %v6831_v2  ;;  %v7178_v53 = vsel %vm3055_vm13, %v7175_v30, %v7177_v22  ;;  %v7264_v55 = vrot.slane %v6283_v6, 3  ;;  %v6284_v45 = vld [vmem:[%s15214_s6 + $0x128] sm:$0xff] }
 0x8e0   : > { %8733 = vmatmul.mubr.msk.f32.vlgmr.msra.gmra.mrb[2].mxu0 %vm6298_vm0, %v6377_v56  ;;  %v6735_v56 = vrot.slane %v14771_v4, 5  ;;  %v9101_v2 = vpack.c.bf16 %v7177_v22, %v7178_v53  ;;  %v7266_v60 = vrot.slane %v6284_v45, 3  ;;  %v7350_v8 = vrot.slane %v6284_v45, 4 }
 0x8e1   : > { %9043 = vmatpush3.bf16.msra.mxu0 %v9042_v52  ;;  %8743 = vmatprep.mubr.msk.f32.mxu0 %vm16020_vm14, %v16019_v12  ;;  %v9070_v52 = vpack.c.bf16 %v6832_v1, %v6830_v16  ;;  %v6285_v16 = vld [vmem:[%s15214_s6 + $0x130] sm:$0xff]  ;;  %v6286_v1 = vld [vmem:[%s15214_s6 + $0x138] sm:$0xff] }
 0x8e2   : > { %9044 = vmatprep.subr.bf16.mxu0 %v9454_v31  ;;  %v7267_v39 = vsel %vm6560_vm4, %v7264_v55, %v7266_v60  ;;  %v7353_v26 = vrot.slane %v6286_v1, 4 }
 0x8e5   : > { %9047 = vmatpush3.bf16.msk.msra.mxu0 %vm14727_vm3, %v9045_v19  ;;  %v6922_v19 = vrot.slane %v6271_v18, 7  ;;  %v7355_v18 = vrot.slane %v6287_v20, 4 }
 0x8e6   : > { %9048 = vmatprep.subr.bf16.mxu0 %v9454_v31 }
 0x8e7   : > { %v6923_v9 = vsel %vm6302_vm6, %v6920_v29, %v6922_v19  ;;  %v9108_v29 = vpack.c.bf16 %v7266_v60, %v7267_v39  ;;  %v7717_v60 = vld [vmem:[%s15216_s8 + $0x70] sm:$0xff] }
 0x8e8   : > { %8744 = vmatmul.mubr.msk.f32.vlgmr.msra.gmra.mrb[2].mxu0 %vm6298_vm0, %v6467_v57  ;;  %v9080_v17 = vpack.c.bf16 %v6922_v19, %v6923_v9  ;;  %v6913_v57 = vrot.slane %v14771_v4, 7  ;;  %v7085_v4 = vsel %vm6381_vm8, %v7083_v46, %v7084_v49  ;;  %v6289_v19 = vld [vmem:[%s15214_s6 + $0x150] sm:$0xff]  ;;  %v7257_v9 = vrot.slane %v14776_v3, 3  ;;  %v6292_v46 = vld [vmem:[%s15214_s6 + $0x168] sm:$0xff] }
 0x8e9   : > { %9050 = vmatpush3.bf16.msra.mxu0 %v9049_v50  ;;  %8754 = vmatprep.mubr.msk.f32.mxu0 %vm16020_vm14, %v16019_v12  ;;  %v6277_v50 = vld [vmem:[%s15214_s6 + $0xf0] sm:$0xff]  ;;  %v7442_v43 = vrot.slane %v6289_v19, 5  ;;  %v7799_v19 = vld [vmem:[%s15218_s10 + $0x40] sm:$0xff] }
 0x8ea   : > { %9051 = vmatprep.subr.bf16.mxu0 %v9454_v31  ;;  %v7086_v5 = vrot.slane %v6277_v50, 1 }
 0x8ec   : > { %v7087_v34 = vsel %vm6381_vm8, %v7084_v49, %v7086_v5 }
 0x8ed   : > { %9054 = vmatpush3.bf16.msk.msra.mxu0 %vm14727_vm3, %v9052_v23  ;;  %v9087_v23 = vpack.c.bf16 %v6275_v11, %v6274_v44  ;;  %v9091_v41 = vpack.c.bf16 %v7087_v34, %v7085_v4  ;;  %v6290_v11 = vld [vmem:[%s15214_s6 + $0x158] sm:$0xff]  ;;  %v6291_v44 = vld [vmem:[%s15214_s6 + $0x160] sm:$0xff]  ;;  %v7531_v34 = vrot.slane %v6292_v46, 6 }
 0x8ee   : > { %9055 = vmatprep.subr.bf16.mxu0 %v9454_v31  ;;  %v7444_v50 = vrot.slane %v6290_v11, 5  ;;  %v7529_v4 = vrot.slane %v6291_v44, 6  ;;  %v7719_v44 = vld [vmem:[%s16040_s16] sm:$0x1] }
 0x8f0   : > { %8755 = vmatmul.mubr.msk.f32.vlgmr.msra.gmra.mrb[2].mxu0 %vm6298_vm0, %v6556_v14  ;;  %v7173_v14 = vrot.slane %v6279_v48, 2 }
 0x8f1   : > { %9057 = vmatpush3.bf16.msra.mxu0 %v9056_v35  ;;  %8765 = vmatprep.mubr.msk.f32.mxu0 %vm16020_vm14, %v16019_v12  ;;  %v7089_v35 = vsel %vm6381_vm8, %v7086_v5, %v7088_v21  ;;  %vm16032_vm8 = vmmov %vm16024_vm1 }
 0x8f2   : > { %9058 = vmatprep.subr.bf16.mxu0 %v9454_v31  ;;  %v9094_v51 = vpack.c.bf16 %v7088_v21, %v7089_v35  ;;  %v7176_v58 = vsel %vm3055_vm13, %v7173_v14, %v7175_v30  ;;  %v6293_v21 = vld [vmem:[%s15214_s6 + $0x170] sm:$0xff]  ;;  %v7532_v35 = vsel %vm16038_vm11, %v7529_v4, %v7531_v34 }
 0x8f3   : > { %v7533_v7 = vrot.slane %v6293_v21, 6  ;;  %v7617_v22 = vrot.slane %v6293_v21, 7 }
 0x8f5   : > { %9061 = vmatpush3.bf16.msk.msra.mxu0 %vm14727_vm3, %v9059_v33  ;;  %v7174_v33 = vsel %vm3055_vm13, %v7172_v61, %v7173_v14  ;;  %vm16031_vm13 = vmmov %vm16024_vm1  ;;  %v6294_v61 = vld [vmem:[%s15214_s6 + $0x178] sm:$0xff]  ;;  %v6295_v14 = vld [vmem:[%s15214_s6 + $0x180] sm:$0xff] }
 0x8f6   : > { %9062 = vmatprep.subr.bf16.mxu0 %v9454_v31  ;;  %v9098_v13 = vpack.c.bf16 %v7176_v58, %v7174_v33  ;;  %v7618_v33 = vrot.slane %v6294_v61, 7  ;;  %v7620_v58 = vrot.slane %v6295_v14, 7 }
 0x8f8   : > { %8766 = vmatmul.mubr.msk.f32.vlgmr.msra.gmra.mrb[2].mxu0 %vm6298_vm0, %v6646_v40  ;;  %v7262_v40 = vrot.slane %v6282_v27, 3  ;;  %v6296_v27 = vld [vmem:[%s15214_s6 + $0x188] sm:$0xff]  ;;  %v7621_v53 = vsel %vm6302_vm6, %v7618_v33, %v7620_v58 }
 0x8f9   : > { %9064 = vmatpush3.bf16.msra.mxu0 %v9063_v24  ;;  %8776 = vmatprep.mubr.msk.f32.mxu0 %vm16020_vm14, %v16019_v12  ;;  %v7079_v24 = vrot.slane %v14776_v3, 1 }
 0x8fa   : > { %9065 = vmatprep.subr.bf16.mxu0 %v9454_v31  ;;  %v7265_v15 = vsel %vm6560_vm4, %v7262_v40, %v7264_v55 }
 0x8fd   : > { %9068 = vmatpush3.bf16.msk.msra.mxu0 %vm14727_vm3, %v9066_v38  ;;  %v7263_v38 = vsel %vm6560_vm4, %v7261_v59, %v7262_v40  ;;  %vm16033_vm4 = vmmov %vm16024_vm1  ;;  %v7524_v40 = vrot.slane %v14776_v3, 6 }
 0x8fe   : > { %9069 = vmatprep.subr.bf16.mxu0 %v9454_v31  ;;  %v9105_v37 = vpack.c.bf16 %v7265_v15, %v7263_v38  ;;  %vm16035_vm1 = vmmov %vm16028_vm5  ;;  %v7718_v38 = vld [vmem:[%s15216_s8 + $0x78] sm:$0xff] }
 0x8ff   : > { %vm16036_vm2 = vmmov %vm16035_vm1  ;;  %v9161_v15 = vpack.c.bf16 %v7718_v38, %v7717_v60 }
 0x900   : > { %8777 = vmatmul.mubr.msk.f32.vlgmr.msra.gmra.mrb[2].mxu0 %vm6298_vm0, %v6735_v56  ;;  %v7351_v56 = vrot.slane %v6285_v16, 4  ;;  %v7445_v5 = vsel %vm16036_vm2, %v7442_v43, %v7444_v50  ;;  %vm16039_vm5 = vmmov %vm16018_vm7  ;;  %v7792_v16 = vld [vmem:[%s15218_s10 + $0x8] sm:$0xff] }
 0x901   : > { %9071 = vmatpush3.bf16.msra.mxu0 %v9070_v52  ;;  %8787 = vmatprep.mubr.msk.f32.mxu0 %vm16020_vm14, %v16019_v12  ;;  %v7168_v52 = vrot.slane %v14776_v3, 2  ;;  %v9122_v48 = vpack.c.bf16 %v7444_v50, %v7445_v5  ;;  %v7534_v42 = vsel %vm16039_vm5, %v7531_v34, %v7533_v7  ;;  %v7805_v50 = vld [vmem:[%s15218_s10 + $0x70] sm:$0xff] }
 0x902   : > { %9072 = vmatprep.subr.bf16.mxu0 %v9454_v31  ;;  %v7354_v36 = vsel %vm16032_vm8, %v7351_v56, %v7353_v26  ;;  %v9129_v6 = vpack.c.bf16 %v7533_v7, %v7534_v42  ;;  %9162 = vmatpush3.bf16.msra.mxu1 %v9161_v15 }
 0x903   : > { %9163 = vmatprep.subr.bf16.mxu1 %v9454_v31 }
 0x905   : > { %9075 = vmatpush3.bf16.msk.msra.mxu0 %vm14727_vm3, %v9073_v63  ;;  %v7352_v63 = vsel %vm16031_vm13, %v7350_v8, %v7351_v56  ;;  %v7793_v56 = vld [vmem:[%s15218_s10 + $0x10] sm:$0xff] }
 0x906   : > { %9076 = vmatprep.subr.bf16.mxu0 %v9454_v31 }
 0x908   : > { %8788 = vmatmul.mubr.msk.f32.vlgmr.msra.gmra.mrb[2].mxu0 %vm6298_vm0, %v6824_v54  ;;  %v7356_v54 = vsel %vm16033_vm4, %v7353_v26, %v7355_v18  ;;  %v7794_v26 = vld [vmem:[%s15218_s10 + $0x18] sm:$0xff] }
 0x909   : > { %9078 = vmatpush3.bf16.msra.mxu0 %v9077_v0  ;;  %8798 = vmatprep.mubr.msk.f32.mxu0 %vm16020_vm14, %v16019_v12  ;;  %v9112_v0 = vpack.c.bf16 %v7354_v36, %v7352_v63  ;;  %v9115_v47 = vpack.c.bf16 %v7355_v18, %v7356_v54  ;;  %v7796_v18 = vld [vmem:[%s15218_s10 + $0x28] sm:$0xff]  ;;  %v7797_v36 = vld [vmem:[%s15218_s10 + $0x30] sm:$0xff] }
 0x90a   : > { %9079 = vmatprep.subr.bf16.mxu0 %v9454_v31 }
 0x90d   : > { %9082 = vmatpush3.bf16.msk.msra.mxu0 %vm14727_vm3, %v9080_v17  ;;  %v7439_v17 = vrot.slane %v6287_v20, 5  ;;  %v9167_v20 = vpack.c.bf16 %v7794_v26, %v7793_v56 }
 0x90e   : > { %9083 = vmatprep.subr.bf16.mxu0 %v9454_v31 }
 0x910   : > { %8799 = vmatmul.mubr.msk.f32.vlgmr.msra.gmra.mrb[2].mxu0 %vm6298_vm0, %v6913_v57  ;;  %v7443_v57 = vsel %vm16035_vm1, %v7440_v10, %v7442_v43  ;;  %v7803_v43 = vld [vmem:[%s15218_s10 + $0x60] sm:$0xff] }
 0x911   : > { %9085 = vmatpush3.bf16.msra.mxu0 %v9084_v62  ;;  %8809 = vmatprep.mubr.msk.f32.mxu0 %vm16020_vm14, %v16019_v12  ;;  %v7441_v62 = vsel %vm16034_vm9, %v7439_v17, %v7440_v10  ;;  %v7802_v17 = vld [vmem:[%s15218_s10 + $0x58] sm:$0xff] }
 0x912   : > { %9086 = vmatprep.subr.bf16.mxu0 %v9454_v31  ;;  %v9119_v49 = vpack.c.bf16 %v7443_v57, %v7441_v62  ;;  %v7806_v62 = vld [vmem:[%s15218_s10 + $0x78] sm:$0xff] }
 0x913   : > { %v9185_v57 = vpack.c.bf16 %v7806_v62, %v7805_v50 }
 0x915   : > { %9089 = vmatpush3.bf16.msk.msra.mxu0 %vm14727_vm3, %v9087_v23  ;;  %v7528_v23 = vrot.slane %v6290_v11, 6  ;;  %v7804_v11 = vld [vmem:[%s15218_s10 + $0x68] sm:$0xff] }
 0x916   : > { %9090 = vmatprep.subr.bf16.mxu0 %v9454_v31 }
 0x918   : > { %8810 = vmatmul.mubr.msk.f32.vlgmr.msra.gmra.mrb[2].mxu0 %vm6298_vm0, %v14776_v3 }
 0x919   : > { %9092 = vmatpush3.bf16.msra.mxu0 %v9091_v41  ;;  %8820 = vmatprep.mubr.msk.f32.mxu0 %vm16020_vm14, %v16019_v12  ;;  %v7530_v41 = vsel %vm16037_vm10, %v7528_v23, %v7529_v4 }
 0x91a   : > { %9093 = vmatprep.subr.bf16.mxu0 %v9454_v31  ;;  %v9126_v30 = vpack.c.bf16 %v7532_v35, %v7530_v41 }
 0x91d   : > { %9096 = vmatpush3.bf16.msk.msra.mxu0 %vm14727_vm3, %v9094_v51  ;;  %v7435_v51 = vrot.slane %v14776_v3, 5 }
 0x91e   : > { %9097 = vmatprep.subr.bf16.mxu0 %v9454_v31 }
 0x920   : > { %8821 = vmatmul.mubr.msk.f32.vlgmr.msra.gmra.mrb[2].mxu0 %vm6298_vm0, %v7079_v24  ;;  %v7622_v24 = vrot.slane %v6296_v27, 7 }
 0x921   : > { %9099 = vmatpush3.bf16.msra.mxu0 %v9098_v13  ;;  %8831 = vmatprep.mubr.msk.f32.mxu0 %vm16020_vm14, %v16019_v12  ;;  %v7619_v13 = vsel %vm6302_vm6, %v7617_v22, %v7618_v33 }
 0x922   : > { %9100 = vmatprep.subr.bf16.mxu0 %v9454_v31  ;;  %v9133_v59 = vpack.c.bf16 %v7621_v53, %v7619_v13  ;;  %v7623_v55 = vsel %vm6302_vm6, %v7620_v58, %v7622_v24 }
 0x923   : > { %v9136_v45 = vpack.c.bf16 %v7622_v24, %v7623_v55 }
 0x925   : > { %9103 = vmatpush3.bf16.msk.msra.mxu0 %vm14727_vm3, %v9101_v2  ;;  %v7613_v2 = vrot.slane %v14776_v3, 7  ;;  %v7791_v3 = vld [vmem:[%s15218_s10] sm:$0xff] }
 0x926   : > { %9104 = vmatprep.subr.bf16.mxu0 %v9454_v31 }
 0x928   : > { %8832 = vmatmul.mubr.msk.f32.vlgmr.msra.gmra.mrb[2].mxu0 %vm6298_vm0, %v7168_v52  ;;  %v9164_v52 = vpack.c.bf16 %v7792_v16, %v7791_v3 }
 0x929   : > { %9106 = vmatpush3.bf16.msra.mxu0 %v9105_v37  ;;  %8842 = vmatprep.mubr.msk.f32.mxu0 %vm16020_vm14, %v16019_v12 }
 0x92a   : > { %9107 = vmatprep.subr.bf16.mxu0 %v9454_v31 }
 0x92d   : > { %9110 = vmatpush3.bf16.msk.msra.mxu0 %vm14727_vm3, %v9108_v29  ;;  %v7795_v29 = vld [vmem:[%s15218_s10 + $0x20] sm:$0xff] }
 0x92e   : > { %9111 = vmatprep.subr.bf16.mxu0 %v9454_v31  ;;  %v9170_v63 = vpack.c.bf16 %v7796_v18, %v7795_v29 }
 0x930   : > { %8843 = vmatmul.mubr.msk.f32.vlgmr.msra.gmra.mrb[2].mxu0 %vm6298_vm0, %v7257_v9  ;;  %v7801_v9 = vld [vmem:[%s15218_s10 + $0x50] sm:$0xff] }
 0x931   : > { %9113 = vmatpush3.bf16.msra.mxu0 %v9112_v0  ;;  %8853 = vmatprep.mubr.msk.f32.mxu0 %vm16020_vm14, %v16019_v12  ;;  %v7800_v0 = vld [vmem:[%s15218_s10 + $0x48] sm:$0xff]  ;;  %v9179_v10 = vpack.c.bf16 %v7802_v17, %v7801_v9 }
 0x932   : > { %9114 = vmatprep.subr.bf16.mxu0 %v9454_v31  ;;  %v9176_v54 = vpack.c.bf16 %v7800_v0, %v7799_v19 }
 0x935   : > { %9117 = vmatpush3.bf16.msk.msra.mxu0 %vm14727_vm3, %v9115_v47  ;;  %v9182_v47 = vpack.c.bf16 %v7804_v11, %v7803_v43 }
 0x936   : > { %9118 = vmatprep.subr.bf16.mxu0 %v9454_v31 }
 0x938   : > { %8854 = vmatmul.mubr.msk.f32.vlgmr.msra.gmra.mrb[2].mxu0 %vm6298_vm0, %v7346_v32 }
 0x939   : > { %9120 = vmatpush3.bf16.msra.mxu0 %v9119_v49  ;;  %8864 = vmatprep.mubr.msk.f32.mxu0 %vm16020_vm14, %v16019_v12 }
 0x93a   : > { %9121 = vmatprep.subr.bf16.mxu0 %v9454_v31 }
 0x93d   : > { %9124 = vmatpush3.bf16.msk.msra.mxu0 %vm14727_vm3, %v9122_v48 }
 0x93e   : > { %9125 = vmatprep.subr.bf16.mxu0 %v9454_v31 }
 0x940   : > { %8865 = vmatmul.mubr.msk.f32.vlgmr.msra.gmra.mrb[2].mxu0 %vm6298_vm0, %v7435_v51 }
 0x941   : > { %9127 = vmatpush3.bf16.msra.mxu0 %v9126_v30  ;;  %8875 = vmatprep.mubr.msk.f32.mxu0 %vm16020_vm14, %v16019_v12 }
 0x942   : > { %9128 = vmatprep.subr.bf16.mxu0 %v9454_v31 }
 0x945   : > { %9131 = vmatpush3.bf16.msk.msra.mxu0 %vm14727_vm3, %v9129_v6 }
 0x946   : > { %9132 = vmatprep.subr.bf16.mxu0 %v9454_v31 }
 0x948   : > { %8876 = vmatmul.mubr.msk.f32.vlgmr.msra.gmra.mrb[2].mxu0 %vm6298_vm0, %v7524_v40 }
 0x949   : > { %9134 = vmatpush3.bf16.msra.mxu0 %v9133_v59  ;;  %8886 = vmatprep.mubr.msk.f32.mxu0 %vm16020_vm14, %v16019_v12 }
 0x94a   : > { %9135 = vmatprep.subr.bf16.mxu0 %v9454_v31 }
 0x94d   : > { %9138 = vmatpush3.bf16.msk.msra.mxu0 %vm14727_vm3, %v9136_v45 }
 0x950   : > { %8887 = vmatmul.mubr.msk.f32.vlgmr.msra.gmra.mrb[2].mxu0 %vm6298_vm0, %v7613_v2 }
 0xa23   : > { %v7697_v1 = vpop.f32.mrb[2].mxu0 }
 0xa24   : > { %v9189_v37 = vadd.f32 %v7697_v1, %v6297_v28  ;;  %v8888_v39 = vpop.f32.mrb[3].mxu0 }
 0xa26   : > { %v7702_v8 = vmax.f32 %v9189_v37, 0.0 }
 0xa28   : > { %8922 = vmatmul.mubr.f32.vlgmr.msra.gmra.mrb[36].mxu1 %v7702_v8 }
 0xa29   : > { %9165 = vmatpush3.bf16.msra.mxu1 %v9164_v52  ;;  %8956 = vmatprep.mubr.msk.f32.mxu1 %vm16020_vm14, %v16019_v12  ;;  %v7798_v12 = vld [vmem:[%s15218_s10 + $0x38] sm:$0xff]  ;;  %vm7878_vm14 = vcmask 73728  }
 0xa2a   : > { %9166 = vmatprep.subr.bf16.mxu1 %v9454_v31  ;;  %v9173_v25 = vpack.c.bf16 %v7798_v12, %v7797_v36 }
 0xa2d   : > { %9168 = vmatpush3.bf16.msra.mxu1 %v9167_v20 }
 0xa2e   : > { %9169 = vmatprep.subr.bf16.mxu1 %v9454_v31 }
 0xa31   : > { %9171 = vmatpush3.bf16.msra.mxu1 %v9170_v63 }
 0xa32   : > { %9172 = vmatprep.subr.bf16.mxu1 %v9454_v31 }
 0xa35   : > { %9174 = vmatpush3.bf16.msra.mxu1 %v9173_v25 }
 0xa36   : > { %9175 = vmatprep.subr.bf16.mxu1 %v9454_v31 }
 0xa39   : > { %9177 = vmatpush3.bf16.msra.mxu1 %v9176_v54 }
 0xa3a   : > { %9178 = vmatprep.subr.bf16.mxu1 %v9454_v31 }
 0xa3d   : > { %9180 = vmatpush3.bf16.msra.mxu1 %v9179_v10 }
 0xa3e   : > { %9181 = vmatprep.subr.bf16.mxu1 %v9454_v31 }
 0xa41   : > { %9183 = vmatpush3.bf16.msra.mxu1 %v9182_v47 }
 0xa42   : > { %9184 = vmatprep.subr.bf16.mxu1 %v9454_v31  ;;  %v7807_v31 = vld [vmem:[%s16042_s12] sm:$0x1] }
 0xa45   : > { %9186 = vmatpush3.bf16.msra.mxu1 %v9185_v57 }
 0xafb   : > { %v7786_v46 = vpop.f32.mrb[36].mxu1 }
 0xafc   : > { %v7787_v49 = vadd.f32 %v7786_v46, %v7719_v44  ;;  %v8923_v5 = vpop.f32.mrb[37].mxu1 }
 0xafe   : > { %v7790_v32 = vmax.f32 %v7787_v49, 0.0 }
 0xb00   : > { %8957 = vmatmul.mubr.f32.vlgmr.msra.gmra.mrb[38].mxu1 %v7790_v32 }
 0xbd3   : > { %v7874_v23 = vpop.f32.mrb[38].mxu1 }
 0xbd4   : > { %v7875_v4 = vadd.f32 %v7874_v23, %v7807_v31  ;;  %v8958_v34 = vpop.f32.mrb[39].mxu1 }
 0xbd6   : > { %7879 = vst.msk [vmem:[%s405_s24] sm:$0x1] %vm7878_vm14, %v7875_v4 }
 0xbd7   : > { %9377 = shalt.err (!%p9374_p3)
}
 0xbd8   : > { %s9378_s15 = scalar_lea.hbm %s15166_s30, 16  ;;  %s9382_s16 = scalar_lea.hbm %s16044_s27, 32 }
 0xbd9   : > { %p9379_p4 = scmp.ne.s32.totalorder %s15166_s30, %s9378_s15  ;;  %p9383_p9 = scmp.lt.u32.totalorder %s15166_s30, %s16044_s27 }
 0xbda   : > { %p9384_p10 = scmp.lt.u32.totalorder %s9382_s16, %s9378_s15  ;;  %p9386_p12 = scmp.lt.u32.totalorder %s9378_s15, %s15166_s30 }
 0xbdb   : > { %p9380_p7 = pnand %p9379_p4, %p9560_p5 }
 0xbdc   : > { %p9385_p11 = por %p9384_p10, %p9383_p9 }
 0xbdd   : > { %p9381_p8 = pneg %p9380_p7 }
 0xbde   : > { %p9387_p13 = por %p9386_p12, %p9385_p11 }
 0xbe0   : > { %p9388_p0 = pnand %p9387_p13, %p9381_p8 }
 0xbe2   : > { %9391 = shalt.err (!%p9388_p0)
}
 0xbe3   : > { %9221 = dma.vmem_to_hbm [thread:$0]  (%p9560_p5), %s15168_s13, 16, %s15166_s30, %s7881_s26  }
 0xbe4 PF: > { %s16045_s11 = sld [smem:[#allocation7_spill]]  ;;  %s16046_s12 = sld [smem:[#allocation5_spill]] }
 0xbea   : > { %p9227_p1 = scmp.ge.s32.totalorder %s16045_s11, 2  ;;  %s7905_s24 = sand.u32 1, %s16046_s12  }
 0xbeb   : > { %s7906_s18 = scalar_lea.sflag [#allocation3], %s7905_s24 }
 0xbec   : > { %p9224_p2 = pnand %p9227_p1, %p9564_p6 }
 0xbee   : > { %9409 = dma.done.wait (!%p9224_p2), %s7906_s18, 16  }
 0xbef   : > { %9411 = vsyncadd (!%p9224_p2), %s7906_s18, 4294967280  ;;  %s16048_s24 = sld [smem:[#allocation8_spill]]  ;;  %s16049_s9 = sld [smem:[#allocation6_spill]] }
 0xbf0   : > { %s16050_s23 = sld [smem:[#allocation9_spill]]  ;;  %s16051_s21 = smov %s9418_s22 }
 0xbf5   : > { %p22_p3 = scmp.ge.s32.totalorder %s16048_s24, 4   ;;  %s16052_s22 = smov %s16049_s9 }
 0xbf7   :  { %24 = sbr.rel (!%p22_p3) target bundleno = 9 (0x9), region = 103 }
 0xbfe   :  { %7910 = vsyncpa [#allocation3], 1 }
 0xbff   :  { %7912 = vsyncpa [#allocation3 + $0x1], 1 }

</bundles_post_ra>
